<compile_context>
chip_gen: v7x
topology: tpu7x:2x2x1
jax: 0.10.0
libtpu: 0.0.40
codegen_flags: <defaults>
</compile_context>

<pallas_src>
import functools

import jax
import jax.numpy as jnp
import numpy as np
from jax.experimental import pallas as pl
from jax.experimental.pallas import tpu as pltpu


NEGATIVE_SLOPE = 1.0  # literal nn.LeakyReLU(True) semantics (see note above)


def _im2col_3x3(img4, oh, ow):
    """img4: (1, oh+2, ow+2, C) -> (oh*ow, 9*C), tap-major (ky,kx), chan-minor.

    Row/col ordering matches a HWIO weight reshaped to (9*C, Cout)."""
    taps = [img4[:, ky:ky + oh, kx:kx + ow, :]
            for ky in range(3) for kx in range(3)]
    cols = jnp.concatenate(taps, axis=-1)           # (1, oh, ow, 9*C)
    return cols.reshape(oh * ow, 9 * img4.shape[-1])


def _trans_high_kernel(xpad_ref, gpad_ref, w1_ref, b1_ref, w2_ref, b2_ref,
                       o_ref, feat_ref, *, H, W, in_ch, inter_ch, out_ch,
                       neg_slope):
    """Fused Trans_high forward for one image (one grid step).

    xpad_ref: (1, H+2, W+2, in_ch)   x, padded by 1 (VMEM)
    gpad_ref: (1, H+2, W+2, in_ch)   guide, padded by 1 (VMEM)
    w1_ref:   (18*in_ch, 3*inter_ch) block-diag packed enc|scale|shift weights
    b1_ref:   (1, 3*inter_ch)        packed biases
    w2_ref:   (9*inter_ch, out_ch)   decoder weights (HWIO flattened)
    b2_ref:   (1, out_ch)            decoder bias
    o_ref:    (1, H, W, out_ch)      output (VMEM)
    feat_ref: (1, H+2, W+2, inter_ch) VMEM scratch for the intermediate
    """
    xp = xpad_ref[...]                              # (1, H+2, W+2, in_ch)
    gp = gpad_ref[...]

    # ---- stage 1: encoder(x) || scale_conv(guide) || shift_conv(guide) ----
    # One MXU matmul: (H*W, 18*in_ch) @ (18*in_ch, 3*inter_ch); the weight is
    # block-diagonal so the x-taps only feed the encoder columns and the
    # guide-taps only feed the scale/shift columns.
    p1 = jnp.concatenate(
        [_im2col_3x3(xp, H, W), _im2col_3x3(gp, H, W)], axis=-1)
    y1 = jnp.dot(p1, w1_ref[...], preferred_element_type=jnp.float32)
    y1 = y1 + b1_ref[...]

    enc = y1[:, :inter_ch]
    scale = y1[:, inter_ch:2 * inter_ch]
    shift = y1[:, 2 * inter_ch:]

    act = jnp.where(enc >= 0, enc, neg_slope * enc)   # LeakyReLU(neg_slope)
    feat = act + act * scale + shift                  # (H*W, inter_ch)

    # ---- stage 2: decoder conv on the VMEM-resident intermediate ----------
    # The decoder uses padding=1 on the H x W intermediate -> zero ring.
    feat_ref[...] = jnp.zeros_like(feat_ref)
    feat_ref[:, 1:1 + H, 1:1 + W, :] = feat.reshape(1, H, W, inter_ch)

    p2 = _im2col_3x3(feat_ref[...], H, W)             # (H*W, 9*inter_ch)
    y2 = jnp.dot(p2, w2_ref[...], preferred_element_type=jnp.float32)
    y2 = y2 + b2_ref[...]

    # residual: out = x + decoder(...); interior of the zero-padded x == x
    x_center = xp[:, 1:1 + H, 1:1 + W, :].reshape(H * W, in_ch)
    out = x_center.astype(jnp.float32) + y2
    o_ref[...] = out.reshape(1, H, W, out_ch).astype(o_ref.dtype)


def trans_high_forward(x_nchw, guide_nchw, params, *,
                       negative_slope=NEGATIVE_SLOPE):
    """Trans_high forward. Inputs/outputs NCHW (PyTorch convention)."""
    (w_enc, b_enc, w_scale, b_scale, w_shift, b_shift, w_dec, b_dec) = params
    N, C, H, W = x_nchw.shape
    in_ch, inter_ch = w_enc.shape[2], w_enc.shape[3]
    out_ch = w_dec.shape[3]
    assert C == in_ch and in_ch == out_ch  # residual x + decoder(...) needs it

    x = jnp.transpose(x_nchw, (0, 2, 3, 1))           # NCHW -> NHWC
    g = jnp.transpose(guide_nchw, (0, 2, 3, 1))
    # Pad ONCE (3x3, padding=1); every conv inside the fused kernel reuses it.
    xp = jnp.pad(x, ((0, 0), (1, 1), (1, 1), (0, 0)))
    gp = jnp.pad(g, ((0, 0), (1, 1), (1, 1), (0, 0)))

    # Pack stage-1 weights block-diagonally: rows [0:9*in_ch] are x-taps
    # (encoder), rows [9*in_ch:18*in_ch] are guide-taps (scale | shift).
    K1 = 9 * in_ch
    w1 = jnp.zeros((2 * K1, 3 * inter_ch), jnp.float32)
    w1 = w1.at[:K1, :inter_ch].set(w_enc.reshape(K1, inter_ch))
    w1 = w1.at[K1:, inter_ch:2 * inter_ch].set(w_scale.reshape(K1, inter_ch))
    w1 = w1.at[K1:, 2 * inter_ch:].set(w_shift.reshape(K1, inter_ch))
    b1 = jnp.concatenate([b_enc, b_scale, b_shift]).reshape(1, 3 * inter_ch)
    w2 = w_dec.reshape(9 * inter_ch, out_ch)
    b2 = b_dec.reshape(1, out_ch)

    kernel = functools.partial(
        _trans_high_kernel, H=H, W=W, in_ch=in_ch, inter_ch=inter_ch,
        out_ch=out_ch, neg_slope=float(negative_slope))

    out_nhwc = pl.pallas_call(
        kernel,
        out_shape=jax.ShapeDtypeStruct((N, H, W, out_ch), x.dtype),
        grid_spec=pltpu.PrefetchScalarGridSpec(
            num_scalar_prefetch=0,
            grid=(N,),
            in_specs=[
                pl.BlockSpec((1, H + 2, W + 2, in_ch), lambda n: (n, 0, 0, 0)),
                pl.BlockSpec((1, H + 2, W + 2, in_ch), lambda n: (n, 0, 0, 0)),
                pl.BlockSpec((2 * K1, 3 * inter_ch), lambda n: (0, 0)),
                pl.BlockSpec((1, 3 * inter_ch), lambda n: (0, 0)),
                pl.BlockSpec((9 * inter_ch, out_ch), lambda n: (0, 0)),
                pl.BlockSpec((1, out_ch), lambda n: (0, 0)),
            ],
            out_specs=pl.BlockSpec((1, H, W, out_ch), lambda n: (n, 0, 0, 0)),
            scratch_shapes=[
                pltpu.VMEM((1, H + 2, W + 2, inter_ch), jnp.float32)],
        ),
        compiler_params=pltpu.CompilerParams(
            dimension_semantics=("parallel",),
            vmem_limit_bytes=48 * 1024 * 1024,
        ),
    )(xp, gp, w1, b1, w2, b2)

    return jnp.transpose(out_nhwc, (0, 3, 1, 2))      # NHWC -> NCHW


def init_trans_high_params(in_ch, inter_ch, out_ch, key):
    """Deterministic synthetic parameters matching Trans_high.__init__ shapes.

    Weights are stored HWIO (3, 3, Cin, Cout); PyTorch is OIHW but the math is
    identical after transposition."""
    conv_dims = [
        (in_ch, inter_ch),    # encoder
        (in_ch, inter_ch),    # scale_conv
        (in_ch, inter_ch),    # shift_conv
        (inter_ch, out_ch),   # decoder
    ]
    params = []
    for i, (cin, cout) in enumerate(conv_dims):
        kw, kb = jax.random.split(jax.random.fold_in(key, i))
        fan_in = cin * 9
        w = jax.random.normal(kw, (3, 3, cin, cout), jnp.float32) / np.sqrt(fan_in)
        b = 0.01 * jax.random.normal(kb, (cout,), jnp.float32)
        params += [w, b]
    return tuple(params)


# ---------------- pure-JAX reference (for correctness check) ----------------
def _conv3x3_ref(x_nhwc, w_hwio, bias):
    y = jax.lax.conv_general_dilated(
        x_nhwc, w_hwio, window_strides=(1, 1), padding=((1, 1), (1, 1)),
        dimension_numbers=("NHWC", "HWIO", "NHWC"))
    return y + bias


def trans_high_ref(x_nchw, guide_nchw, params, *,
                   negative_slope=NEGATIVE_SLOPE):
    (w_enc, b_enc, w_scale, b_scale, w_shift, b_shift, w_dec, b_dec) = params
    x = jnp.transpose(x_nchw, (0, 2, 3, 1))
    g = jnp.transpose(guide_nchw, (0, 2, 3, 1))
    e = _conv3x3_ref(x, w_enc, b_enc)
    e = jnp.where(e >= 0, e, negative_slope * e)       # LeakyReLU
    scale = _conv3x3_ref(g, w_scale, b_scale)
    shift = _conv3x3_ref(g, w_shift, b_shift)
    f = e + e * scale + shift
    d = _conv3x3_ref(f, w_dec, b_dec)
    out = x + d
    return jnp.transpose(out, (0, 3, 1, 2))


if __name__ == "__main__":
    key = jax.random.PRNGKey(0)
    in_ch, inter_ch, out_ch = 3, 32, 3                 # module defaults
    N, H, W = 2, 16, 16

    kx, kg, kp = jax.random.split(key, 3)
    x = jax.random.normal(kx, (N, in_ch, H, W), jnp.float32)      # NCHW
    guide = jax.random.normal(kg, (N, in_ch, H, W), jnp.float32)  # NCHW
    params = init_trans_high_params(in_ch, inter_ch, out_ch, kp)

    out = jax.block_until_ready(trans_high_forward(x, guide, params))
    ref = jax.block_until_ready(trans_high_ref(x, guide, params))

    assert out.shape == (N, out_ch, H, W), out.shape
    np.testing.assert_allclose(np.asarray(out), np.asarray(ref),
                               rtol=1e-4, atol=1e-4)
    print("KERNEL_OK")
</pallas_src>

<mosaic_0001>
module attributes {stable_mosaic.version = 11 : i64} {
  func.func @_trans_high_kernel(%arg0: i32, %arg1: memref<1x18x18x3xf32, #tpu.memory_space<vmem>>, %arg2: memref<1x18x18x3xf32, #tpu.memory_space<vmem>>, %arg3: memref<54x96xf32, #tpu.memory_space<vmem>>, %arg4: memref<1x96xf32, #tpu.memory_space<vmem>>, %arg5: memref<288x3xf32, #tpu.memory_space<vmem>>, %arg6: memref<1x3xf32, #tpu.memory_space<vmem>>, %arg7: memref<1x16x16x3xf32, #tpu.memory_space<vmem>>, %arg8: memref<1x18x18x32xf32, #tpu.memory_space<vmem>>) attributes {dimension_semantics = [#tpu.dimension_semantics<parallel>], iteration_bounds = array<i64: 2>, scalar_prefetch = 0 : i64, scratch_operands = 1 : i64, tpu.core_type = #tpu.core_type<tc>, window_params = [{transform_indices = @transform_0, window_bounds = array<i64: 1, 18, 18, 3>}, {transform_indices = @transform_1, window_bounds = array<i64: 1, 18, 18, 3>}, {pipeline_mode = #tpu.pipeline_mode<synchronous>, transform_indices = @transform_2, window_bounds = array<i64: 54, 96>}, {pipeline_mode = #tpu.pipeline_mode<synchronous>, transform_indices = @transform_3, window_bounds = array<i64: 1, 96>}, {pipeline_mode = #tpu.pipeline_mode<synchronous>, transform_indices = @transform_4, window_bounds = array<i64: 288, 3>}, {pipeline_mode = #tpu.pipeline_mode<synchronous>, transform_indices = @transform_5, window_bounds = array<i64: 1, 3>}, {transform_indices = @transform_6, window_bounds = array<i64: 1, 16, 16, 3>}]} {
    %c0 = arith.constant 0 : index
    %c0_0 = arith.constant 0 : index
    %c0_1 = arith.constant 0 : index
    %c0_2 = arith.constant 0 : index
    %0 = vector.load %arg1[%c0, %c0_0, %c0_1, %c0_2] : memref<1x18x18x3xf32, #tpu.memory_space<vmem>>, vector<1x18x18x3xf32>
    %c0_3 = arith.constant 0 : index
    %c0_4 = arith.constant 0 : index
    %c0_5 = arith.constant 0 : index
    %c0_6 = arith.constant 0 : index
    %1 = vector.load %arg2[%c0_3, %c0_4, %c0_5, %c0_6] : memref<1x18x18x3xf32, #tpu.memory_space<vmem>>, vector<1x18x18x3xf32>
    %2 = vector.extract_strided_slice %0 {offsets = [0, 0, 0, 0], sizes = [1, 16, 16, 3], strides = [1, 1, 1, 1]} : vector<1x18x18x3xf32> to vector<1x16x16x3xf32>
    %3 = vector.extract_strided_slice %0 {offsets = [0, 0, 1, 0], sizes = [1, 16, 16, 3], strides = [1, 1, 1, 1]} : vector<1x18x18x3xf32> to vector<1x16x16x3xf32>
    %4 = vector.extract_strided_slice %0 {offsets = [0, 0, 2, 0], sizes = [1, 16, 16, 3], strides = [1, 1, 1, 1]} : vector<1x18x18x3xf32> to vector<1x16x16x3xf32>
    %5 = vector.extract_strided_slice %0 {offsets = [0, 1, 0, 0], sizes = [1, 16, 16, 3], strides = [1, 1, 1, 1]} : vector<1x18x18x3xf32> to vector<1x16x16x3xf32>
    %6 = vector.extract_strided_slice %0 {offsets = [0, 1, 1, 0], sizes = [1, 16, 16, 3], strides = [1, 1, 1, 1]} : vector<1x18x18x3xf32> to vector<1x16x16x3xf32>
    %7 = vector.extract_strided_slice %0 {offsets = [0, 1, 2, 0], sizes = [1, 16, 16, 3], strides = [1, 1, 1, 1]} : vector<1x18x18x3xf32> to vector<1x16x16x3xf32>
    %8 = vector.extract_strided_slice %0 {offsets = [0, 2, 0, 0], sizes = [1, 16, 16, 3], strides = [1, 1, 1, 1]} : vector<1x18x18x3xf32> to vector<1x16x16x3xf32>
    %9 = vector.extract_strided_slice %0 {offsets = [0, 2, 1, 0], sizes = [1, 16, 16, 3], strides = [1, 1, 1, 1]} : vector<1x18x18x3xf32> to vector<1x16x16x3xf32>
    %10 = vector.extract_strided_slice %0 {offsets = [0, 2, 2, 0], sizes = [1, 16, 16, 3], strides = [1, 1, 1, 1]} : vector<1x18x18x3xf32> to vector<1x16x16x3xf32>
    %11 = tpu.concatenate %2, %3, %4, %5, %6, %7, %8, %9, %10 in 3 : vector<1x16x16x3xf32>, vector<1x16x16x3xf32>, vector<1x16x16x3xf32>, vector<1x16x16x3xf32>, vector<1x16x16x3xf32>, vector<1x16x16x3xf32>, vector<1x16x16x3xf32>, vector<1x16x16x3xf32>, vector<1x16x16x3xf32> -> vector<1x16x16x27xf32>
    %12 = vector.shape_cast %11 : vector<1x16x16x27xf32> to vector<256x27xf32>
    %13 = vector.extract_strided_slice %1 {offsets = [0, 0, 0, 0], sizes = [1, 16, 16, 3], strides = [1, 1, 1, 1]} : vector<1x18x18x3xf32> to vector<1x16x16x3xf32>
    %14 = vector.extract_strided_slice %1 {offsets = [0, 0, 1, 0], sizes = [1, 16, 16, 3], strides = [1, 1, 1, 1]} : vector<1x18x18x3xf32> to vector<1x16x16x3xf32>
    %15 = vector.extract_strided_slice %1 {offsets = [0, 0, 2, 0], sizes = [1, 16, 16, 3], strides = [1, 1, 1, 1]} : vector<1x18x18x3xf32> to vector<1x16x16x3xf32>
    %16 = vector.extract_strided_slice %1 {offsets = [0, 1, 0, 0], sizes = [1, 16, 16, 3], strides = [1, 1, 1, 1]} : vector<1x18x18x3xf32> to vector<1x16x16x3xf32>
    %17 = vector.extract_strided_slice %1 {offsets = [0, 1, 1, 0], sizes = [1, 16, 16, 3], strides = [1, 1, 1, 1]} : vector<1x18x18x3xf32> to vector<1x16x16x3xf32>
    %18 = vector.extract_strided_slice %1 {offsets = [0, 1, 2, 0], sizes = [1, 16, 16, 3], strides = [1, 1, 1, 1]} : vector<1x18x18x3xf32> to vector<1x16x16x3xf32>
    %19 = vector.extract_strided_slice %1 {offsets = [0, 2, 0, 0], sizes = [1, 16, 16, 3], strides = [1, 1, 1, 1]} : vector<1x18x18x3xf32> to vector<1x16x16x3xf32>
    %20 = vector.extract_strided_slice %1 {offsets = [0, 2, 1, 0], sizes = [1, 16, 16, 3], strides = [1, 1, 1, 1]} : vector<1x18x18x3xf32> to vector<1x16x16x3xf32>
    %21 = vector.extract_strided_slice %1 {offsets = [0, 2, 2, 0], sizes = [1, 16, 16, 3], strides = [1, 1, 1, 1]} : vector<1x18x18x3xf32> to vector<1x16x16x3xf32>
    %22 = tpu.concatenate %13, %14, %15, %16, %17, %18, %19, %20, %21 in 3 : vector<1x16x16x3xf32>, vector<1x16x16x3xf32>, vector<1x16x16x3xf32>, vector<1x16x16x3xf32>, vector<1x16x16x3xf32>, vector<1x16x16x3xf32>, vector<1x16x16x3xf32>, vector<1x16x16x3xf32>, vector<1x16x16x3xf32> -> vector<1x16x16x27xf32>
    %23 = vector.shape_cast %22 : vector<1x16x16x27xf32> to vector<256x27xf32>
    %24 = tpu.concatenate %12, %23 in 1 : vector<256x27xf32>, vector<256x27xf32> -> vector<256x54xf32>
    %c0_7 = arith.constant 0 : index
    %c0_8 = arith.constant 0 : index
    %25 = vector.load %arg3[%c0_7, %c0_8] : memref<54x96xf32, #tpu.memory_space<vmem>>, vector<54x96xf32>
    %cst = arith.constant dense<0.000000e+00> : vector<256x96xf32>
    %26 = tpu.matmul %24, %25, %cst {dimension_numbers = #tpu.dot_dimension_numbers<[1], [0], [0], [1], [0, 0, 1, 1], [], []>} : vector<256x54xf32>, vector<54x96xf32>, vector<256x96xf32> -> vector<256x96xf32>
    %c0_9 = arith.constant 0 : index
    %c0_10 = arith.constant 0 : index
    %27 = vector.load %arg4[%c0_9, %c0_10] : memref<1x96xf32, #tpu.memory_space<vmem>>, vector<1x96xf32>
    %28 = vector.broadcast %27 : vector<1x96xf32> to vector<256x96xf32>
    %29 = arith.addf %26, %28 : vector<256x96xf32>
    %30 = vector.extract_strided_slice %29 {offsets = [0, 0], sizes = [256, 32], strides = [1, 1]} : vector<256x96xf32> to vector<256x32xf32>
    %31 = vector.extract_strided_slice %29 {offsets = [0, 32], sizes = [256, 32], strides = [1, 1]} : vector<256x96xf32> to vector<256x32xf32>
    %32 = vector.extract_strided_slice %29 {offsets = [0, 64], sizes = [256, 32], strides = [1, 1]} : vector<256x96xf32> to vector<256x32xf32>
    %cst_11 = arith.constant 0.000000e+00 : f32
    %33 = vector.broadcast %cst_11 : f32 to vector<256x32xf32>
    %34 = arith.cmpf oge, %30, %33 : vector<256x32xf32>
    %cst_12 = arith.constant 1.000000e+00 : f32
    %35 = vector.broadcast %cst_12 : f32 to vector<256x32xf32>
    %36 = arith.mulf %35, %30 : vector<256x32xf32>
    %37 = arith.select %34, %30, %36 : vector<256x32xi1>, vector<256x32xf32>
    %38 = arith.mulf %37, %31 : vector<256x32xf32>
    %39 = arith.addf %37, %38 : vector<256x32xf32>
    %40 = arith.addf %39, %32 : vector<256x32xf32>
    %cst_13 = arith.constant 0.000000e+00 : f32
    %41 = vector.broadcast %cst_13 : f32 to vector<1x18x18x32xf32>
    %c0_14 = arith.constant 0 : index
    %c0_15 = arith.constant 0 : index
    %c0_16 = arith.constant 0 : index
    %c0_17 = arith.constant 0 : index
    %42 = vector.load %arg8[%c0_14, %c0_15, %c0_16, %c0_17] : memref<1x18x18x32xf32, #tpu.memory_space<vmem>>, vector<1x18x18x32xf32>
    tpu.vector_store %arg8[%c0_14, %c0_15, %c0_16, %c0_17], %41 {strides = array<i32>} : memref<1x18x18x32xf32, #tpu.memory_space<vmem>>, vector<1x18x18x32xf32>,
    %43 = vector.shape_cast %40 : vector<256x32xf32> to vector<1x16x16x32xf32>
    %c0_18 = arith.constant 0 : index
    %c1 = arith.constant 1 : index
    %c1_19 = arith.constant 1 : index
    %c0_20 = arith.constant 0 : index
    %44 = vector.load %arg8[%c0_18, %c1, %c1_19, %c0_20] : memref<1x18x18x32xf32, #tpu.memory_space<vmem>>, vector<1x16x16x32xf32>
    tpu.vector_store %arg8[%c0_18, %c1, %c1_19, %c0_20], %43 {strides = array<i32>} : memref<1x18x18x32xf32, #tpu.memory_space<vmem>>, vector<1x16x16x32xf32>,
    %c0_21 = arith.constant 0 : index
    %c0_22 = arith.constant 0 : index
    %c0_23 = arith.constant 0 : index
    %c0_24 = arith.constant 0 : index
    %45 = vector.load %arg8[%c0_21, %c0_22, %c0_23, %c0_24] : memref<1x18x18x32xf32, #tpu.memory_space<vmem>>, vector<1x18x18x32xf32>
    %46 = vector.extract_strided_slice %45 {offsets = [0, 0, 0, 0], sizes = [1, 16, 16, 32], strides = [1, 1, 1, 1]} : vector<1x18x18x32xf32> to vector<1x16x16x32xf32>
    %47 = vector.extract_strided_slice %45 {offsets = [0, 0, 1, 0], sizes = [1, 16, 16, 32], strides = [1, 1, 1, 1]} : vector<1x18x18x32xf32> to vector<1x16x16x32xf32>
    %48 = vector.extract_strided_slice %45 {offsets = [0, 0, 2, 0], sizes = [1, 16, 16, 32], strides = [1, 1, 1, 1]} : vector<1x18x18x32xf32> to vector<1x16x16x32xf32>
    %49 = vector.extract_strided_slice %45 {offsets = [0, 1, 0, 0], sizes = [1, 16, 16, 32], strides = [1, 1, 1, 1]} : vector<1x18x18x32xf32> to vector<1x16x16x32xf32>
    %50 = vector.extract_strided_slice %45 {offsets = [0, 1, 1, 0], sizes = [1, 16, 16, 32], strides = [1, 1, 1, 1]} : vector<1x18x18x32xf32> to vector<1x16x16x32xf32>
    %51 = vector.extract_strided_slice %45 {offsets = [0, 1, 2, 0], sizes = [1, 16, 16, 32], strides = [1, 1, 1, 1]} : vector<1x18x18x32xf32> to vector<1x16x16x32xf32>
    %52 = vector.extract_strided_slice %45 {offsets = [0, 2, 0, 0], sizes = [1, 16, 16, 32], strides = [1, 1, 1, 1]} : vector<1x18x18x32xf32> to vector<1x16x16x32xf32>
    %53 = vector.extract_strided_slice %45 {offsets = [0, 2, 1, 0], sizes = [1, 16, 16, 32], strides = [1, 1, 1, 1]} : vector<1x18x18x32xf32> to vector<1x16x16x32xf32>
    %54 = vector.extract_strided_slice %45 {offsets = [0, 2, 2, 0], sizes = [1, 16, 16, 32], strides = [1, 1, 1, 1]} : vector<1x18x18x32xf32> to vector<1x16x16x32xf32>
    %55 = tpu.concatenate %46, %47, %48, %49, %50, %51, %52, %53, %54 in 3 : vector<1x16x16x32xf32>, vector<1x16x16x32xf32>, vector<1x16x16x32xf32>, vector<1x16x16x32xf32>, vector<1x16x16x32xf32>, vector<1x16x16x32xf32>, vector<1x16x16x32xf32>, vector<1x16x16x32xf32>, vector<1x16x16x32xf32> -> vector<1x16x16x288xf32>
    %56 = vector.shape_cast %55 : vector<1x16x16x288xf32> to vector<256x288xf32>
    %c0_25 = arith.constant 0 : index
    %c0_26 = arith.constant 0 : index
    %57 = vector.load %arg5[%c0_25, %c0_26] : memref<288x3xf32, #tpu.memory_space<vmem>>, vector<288x3xf32>
    %cst_27 = arith.constant dense<0.000000e+00> : vector<256x3xf32>
    %58 = tpu.matmul %56, %57, %cst_27 {dimension_numbers = #tpu.dot_dimension_numbers<[1], [0], [0], [1], [0, 0, 1, 1], [], []>} : vector<256x288xf32>, vector<288x3xf32>, vector<256x3xf32> -> vector<256x3xf32>
    %c0_28 = arith.constant 0 : index
    %c0_29 = arith.constant 0 : index
    %59 = vector.load %arg6[%c0_28, %c0_29] : memref<1x3xf32, #tpu.memory_space<vmem>>, vector<1x3xf32>
    %60 = vector.broadcast %59 : vector<1x3xf32> to vector<256x3xf32>
    %61 = arith.addf %58, %60 : vector<256x3xf32>
    %62 = vector.extract_strided_slice %0 {offsets = [0, 1, 1, 0], sizes = [1, 16, 16, 3], strides = [1, 1, 1, 1]} : vector<1x18x18x3xf32> to vector<1x16x16x3xf32>
    %63 = vector.shape_cast %62 : vector<1x16x16x3xf32> to vector<256x3xf32>
    %64 = arith.addf %63, %61 : vector<256x3xf32>
    %65 = vector.shape_cast %64 : vector<256x3xf32> to vector<1x16x16x3xf32>
    %c0_30 = arith.constant 0 : index
    %c0_31 = arith.constant 0 : index
    %c0_32 = arith.constant 0 : index
    %c0_33 = arith.constant 0 : index
    %66 = vector.load %arg7[%c0_30, %c0_31, %c0_32, %c0_33] : memref<1x16x16x3xf32, #tpu.memory_space<vmem>>, vector<1x16x16x3xf32>
    tpu.vector_store %arg7[%c0_30, %c0_31, %c0_32, %c0_33], %65 {strides = array<i32>} : memref<1x16x16x3xf32, #tpu.memory_space<vmem>>, vector<1x16x16x3xf32>,
    return
  }
  func.func @transform_0(%arg0: i32) -> (i32, i32, i32, i32) {
    %c0_i32 = arith.constant 0 : i32
    %c0_i32_0 = arith.constant 0 : i32
    %c0_i32_1 = arith.constant 0 : i32
    %c0_i32_2 = arith.constant 0 : i32
    return %arg0, %c0_i32, %c0_i32_0, %c0_i32_1 : i32, i32, i32, i32
  }
  func.func @transform_1(%arg0: i32) -> (i32, i32, i32, i32) {
    %c0_i32 = arith.constant 0 : i32
    %c0_i32_0 = arith.constant 0 : i32
    %c0_i32_1 = arith.constant 0 : i32
    %c0_i32_2 = arith.constant 0 : i32
    return %arg0, %c0_i32, %c0_i32_0, %c0_i32_1 : i32, i32, i32, i32
  }
  func.func @transform_2(%arg0: i32) -> (i32, i32) {
    %c0_i32 = arith.constant 0 : i32
    %c0_i32_0 = arith.constant 0 : i32
    %c0_i32_1 = arith.constant 0 : i32
    return %c0_i32, %c0_i32_0 : i32, i32
  }
  func.func @transform_3(%arg0: i32) -> (i32, i32) {
    %c0_i32 = arith.constant 0 : i32
    %c0_i32_0 = arith.constant 0 : i32
    %c0_i32_1 = arith.constant 0 : i32
    return %c0_i32, %c0_i32_0 : i32, i32
  }
  func.func @transform_4(%arg0: i32) -> (i32, i32) {
    %c0_i32 = arith.constant 0 : i32
    %c0_i32_0 = arith.constant 0 : i32
    %c0_i32_1 = arith.constant 0 : i32
    return %c0_i32, %c0_i32_0 : i32, i32
  }
  func.func @transform_5(%arg0: i32) -> (i32, i32) {
    %c0_i32 = arith.constant 0 : i32
    %c0_i32_0 = arith.constant 0 : i32
    %c0_i32_1 = arith.constant 0 : i32
    return %c0_i32, %c0_i32_0 : i32, i32
  }
  func.func @transform_6(%arg0: i32) -> (i32, i32, i32, i32) {
    %c0_i32 = arith.constant 0 : i32
    %c0_i32_0 = arith.constant 0 : i32
    %c0_i32_1 = arith.constant 0 : i32
    %c0_i32_2 = arith.constant 0 : i32
    return %arg0, %c0_i32, %c0_i32_0, %c0_i32_1 : i32, i32, i32, i32
  }
}

</mosaic_0001>

<bundles_post_ra>
// kernel: tpu_custom_call.1
= control target key start
LH: loop header
LB: loop body
LE: loop exit
PB: predicated region body
PF: predicated region fallthrough
CT: control target
= control target key end

     0   :  { %s6649_s21 = smov 0   ;;  %s12463_s0 = inlined_call_operand.vmem [shape: f32[2,18,18,3], index: 0, kind: input, shape index: {}]   ;;  %s12464_s1 = inlined_call_operand.vmem [shape: f32[2,18,18,3], index: 1, kind: input, shape index: {}]   ;;  %s12465_s2 = inlined_call_operand.vmem [shape: f32[54,96], index: 2, kind: input, shape index: {}]   ;;  %s12466_s3 = inlined_call_operand.vmem [shape: f32[1,96], index: 3, kind: input, shape index: {}]   ;;  %s12467_s4 = inlined_call_operand.vmem [shape: f32[288,3], index: 4, kind: input, shape index: {}]   ;;  %s12468_s5 = inlined_call_operand.vmem [shape: f32[1,3], index: 5, kind: input, shape index: {}]   ;;  %s12469_s6 = inlined_call_operand.vmem [shape: f32[2,16,16,3], index: 6, kind: output, shape index: {}]  }
   0x1 LB: > { %s5625_s22 = sadd.s32 4294967295, %s6598_s21   ;;  %p5629_p0 = scmp.ge.s32.totalorder %s6598_s21, 1  ;;  %s6598_s21 = sphi %s6649_s21, %s16_s21  }
   0x2   : > { %p222_p1 = scmp.lt.s32.totalorder %s6598_s21, 3 }
   0x4   : > { %p223_p2 = pnand %p5629_p0, %p222_p1 }
   0x6   : > { %226 = sbr.rel (%p223_p2) target bundleno = 2188 (0x88c), region = 44 }
   0xd   : > { %p257_p3 = scmp.lt.s32.totalorder %s5625_s22, 1  ;;  %vm428_vm0 = vcmask 1046528   ;;  %s6600_s27 = smov 3   ;;  %vm605_vm1 = vcmask 1045504   ;;  %vm1384_vm2 = vcmask 23552   ;;  %vm1417_vm3 = vcmask 48128  }
   0xe   : > { %s6601_s28 = smov 6   ;;  %s6602_s29 = smov 9   ;;  %vm1450_vm4 = vcmask 72704   ;;  %vm1483_vm5 = vcmask 97280   ;;  %vm1516_vm6 = vcmask 121856   ;;  %vm1549_vm7 = vcmask 146432  }
   0xf   : > { %s13688_s22 = smov (!%p257_p3, %s5625_s22), 1  ;;  %s6603_s30 = smov 12   ;;  %vm1582_vm8 = vcmask 171008   ;;  %vm1615_vm9 = vcmask 195584   ;;  %vm3034_vm10 = vcmask 220160   ;;  %vm3081_vm11 = vcmask 441344  }
  0x10   : > { %s5997_s23 = smul.u32 432, %s13688_s22  ;;  %s6604_s7 = smov 15   ;;  %vm3726_vm12 = vcmask 261120   ;;  %vm3729_vm13 = vcmask 254976   ;;  %vm4743_vm14 = vcmask 523264   ;;  %vm4776_vm15 = vcmask 785408  }
  0x11   : > { %s6605_s8 = smov 18   ;;  %s6606_s9 = smov 21  }
  0x12   : > { %s6665_s26 = scalar_lea.vmem %s12463_s0, %s5997_s23  ;;  %s6607_s10 = smov 24  }
  0x13   : > { %v6668_v0 = vld [vmem:[%s6665_s26 + $0x18] sm:$0xff]  ;;  %v6671_v1 = vld [vmem:[%s6665_s26 + $0x20] sm:$0xff]  ;;  %v6679_v5 = vld [vmem:[%s6665_s26 + $0x8] sm:$0xff]  ;;  %s8019_s13 = scalar_lea.vmem %s12464_s1, %s5997_s23  ;;  %s6608_s11 = smov 27  }
  0x14   : > { %v6674_v2 = vld [vmem:[%s6665_s26] sm:$0xff]  ;;  %v434_v3 = vrot.slane %v6668_v0, 1  ;;  %v435_v4 = vrot.slane %v6671_v1, 1  ;;  %v6683_v7 = vld [vmem:[%s6665_s26 + $0x28] sm:$0x3]  ;;  %v430_v8 = vrot.slane %v6679_v5, 1 }
  0x15   : > { %v429_v6 = vrot.slane %v6674_v2, 1  ;;  %v437_v9 = vrot.slane %v6683_v7, 1  ;;  %v6688_v10 = vld [vmem:[%s6665_s26 + $0x10] sm:$0x3]  ;;  %v6691_v11 = vld [vmem:[%s6665_s26 + $0x38] sm:$0xff]  ;;  %v6721_v24 = vld [vmem:[%s6665_s26 + $0x48] sm:$0xff] }
  0x16   : > { %v6694_v12 = vsel %vm428_vm0, %v434_v3, %v435_v4  ;;  %v432_v13 = vrot.slane %v6688_v10, 1  ;;  %v6698_v14 = vld [vmem:[%s6665_s26 + $0x40] sm:$0x3]  ;;  %v6701_v15 = vld [vmem:[%s6665_s26 + $0x30] sm:$0xff]  ;;  %v440_v18 = vrot.slane %v6691_v11, 1  ;;  %v444_v29 = vrot.slane %v6721_v24, 1 }
  0x17   : > { %12679 = vst [vmem:[#allocation3_spill] sm:$0xff] %v6694_v12  ;;  %513 = vrot.lane.b32.xlu1 %v6694_v12, %s6600_s27  ;;  %v431_v16 = vsel %vm428_vm0, %v429_v6, %v430_v8  ;;  %v6708_v17 = vsel %vm428_vm0, %v435_v4, %v437_v9  ;;  %v442_v19 = vrot.slane %v6698_v14, 1  ;;  %v439_v21 = vrot.slane %v6701_v15, 1  ;;  %v6715_v22 = vld [vmem:[%s6665_s26 + $0x50] sm:$0xff]  ;;  %v6718_v23 = vld [vmem:[%s6665_s26 + $0x58] sm:$0x3] }
  0x18   : > { %509 = vrot.lane.b32.xlu0 %v431_v16, %s6600_s27  ;;  %12680 = vst [vmem:[#allocation4_spill] sm:$0xff] %v6708_v17  ;;  %v433_v20 = vsel %vm428_vm0, %v430_v8, %v432_v13  ;;  %v445_v26 = vrot.slane %v6715_v22, 1  ;;  %v447_v27 = vrot.slane %v6718_v23, 1  ;;  %v6736_v30 = vld [vmem:[%s6665_s26 + $0x68] sm:$0xff]  ;;  %v6739_v31 = vld [vmem:[%s6665_s26 + $0x70] sm:$0x3] }
  0x19   : > { %v6727_v25 = vsel %vm428_vm0, %v440_v18, %v442_v19  ;;  %v6732_v28 = vsel %vm428_vm0, %v439_v21, %v440_v18  ;;  %v6742_v32 = vld [vmem:[%s6665_s26 + $0x60] sm:$0xff]  ;;  %v450_v34 = vrot.slane %v6736_v30, 1  ;;  %v452_v35 = vrot.slane %v6739_v31, 1  ;;  %v6761_v39 = vld [vmem:[%s6665_s26 + $0x88] sm:$0x3]  ;;  %v6764_v40 = vld [vmem:[%s6665_s26 + $0x78] sm:$0xff] }
  0x1a   : > { %12681 = vst [vmem:[#allocation5_spill] sm:$0xff] %v6727_v25  ;;  %12682 = vst [vmem:[#allocation6_spill] sm:$0xff] %v6732_v28  ;;  %v6749_v33 = vsel %vm428_vm0, %v445_v26, %v447_v27  ;;  %v6754_v36 = vsel %vm428_vm0, %v444_v29, %v445_v26  ;;  %v449_v37 = vrot.slane %v6742_v32, 1  ;;  %v6758_v38 = vld [vmem:[%s6665_s26 + $0x80] sm:$0xff]  ;;  %v457_v43 = vrot.slane %v6761_v39, 1  ;;  %v6780_v46 = vld [vmem:[%s6665_s26 + $0x98] sm:$0xff] }
  0x1b   : > { %515 = vrot.lane.b32.xlu1 %v6708_v17, %s6600_s27  ;;  %12683 = vst [vmem:[#allocation7_spill] sm:$0xff] %v6749_v33  ;;  %12684 = vst [vmem:[#allocation8_spill] sm:$0xff] %v6754_v36  ;;  %v6771_v41 = vsel %vm428_vm0, %v450_v34, %v452_v35  ;;  %v455_v42 = vrot.slane %v6758_v38, 1  ;;  %v454_v45 = vrot.slane %v6764_v40, 1  ;;  %v6783_v47 = vld [vmem:[%s6665_s26 + $0xa0] sm:$0x3] }
  0x1c   : > { %511 = vrot.lane.b32.xlu0 %v433_v20, %s6600_s27  ;;  %12685 = vst [vmem:[#allocation9_spill] sm:$0xff] %v6771_v41  ;;  %v6776_v44 = vsel %vm428_vm0, %v449_v37, %v450_v34  ;;  %v6786_v48 = vld [vmem:[%s6665_s26 + $0x90] sm:$0xff]  ;;  %v460_v50 = vrot.slane %v6780_v46, 1  ;;  %v462_v51 = vrot.slane %v6783_v47, 1  ;;  %v6805_v55 = vld [vmem:[%s6665_s26 + $0xb8] sm:$0x3] }
  0x1d   : > { %12686 = vst [vmem:[#allocation10_spill] sm:$0xff] %v6776_v44  ;;  %v6793_v49 = vsel %vm428_vm0, %v455_v42, %v457_v43  ;;  %v6798_v52 = vsel %vm428_vm0, %v454_v45, %v455_v42  ;;  %v459_v53 = vrot.slane %v6786_v48, 1  ;;  %v6802_v54 = vld [vmem:[%s6665_s26 + $0xb0] sm:$0xff]  ;;  %v6808_v56 = vld [vmem:[%s6665_s26 + $0xa8] sm:$0xff]  ;;  %v467_v59 = vrot.slane %v6805_v55, 1  ;;  %v6830_v3 = vld [vmem:[%s6665_s26 + $0xc0] sm:$0xff] }
  0x1e   : > { %12687 = vst [vmem:[#allocation11_spill] sm:$0xff] %v6793_v49  ;;  %12688 = vst [vmem:[#allocation12_spill] sm:$0xff] %v6798_v52  ;;  %v6815_v57 = vsel %vm428_vm0, %v460_v50, %v462_v51  ;;  %v465_v58 = vrot.slane %v6802_v54, 1  ;;  %v464_v61 = vrot.slane %v6808_v56, 1  ;;  %v6824_v62 = vld [vmem:[%s6665_s26 + $0xc8] sm:$0xff]  ;;  %v469_v13 = vrot.slane %v6830_v3, 1 }
  0x1f   : > { %519 = vrot.lane.b32.xlu1 %v6727_v25, %s6600_s27  ;;  %12689 = vst [vmem:[#allocation13_spill] sm:$0xff] %v6815_v57  ;;  %v6820_v60 = vsel %vm428_vm0, %v459_v53, %v460_v50  ;;  %v6827_v63 = vld [vmem:[%s6665_s26 + $0xd0] sm:$0x3]  ;;  %v470_v6 = vrot.slane %v6824_v62, 1  ;;  %v6846_v16 = vld [vmem:[%s6665_s26 + $0xe0] sm:$0xff]  ;;  %v6852_v19 = vld [vmem:[%s6665_s26 + $0xd8] sm:$0xff] }
  0x20   : > { %517 = vrot.lane.b32.xlu0 %v6732_v28, %s6600_s27  ;;  %12690 = vst [vmem:[#allocation14_spill] sm:$0xff] %v6820_v60  ;;  %v6837_v4 = vsel %vm428_vm0, %v465_v58, %v467_v59  ;;  %v472_v8 = vrot.slane %v6827_v63, 1  ;;  %v6842_v9 = vsel %vm428_vm0, %v464_v61, %v465_v58  ;;  %v6849_v18 = vld [vmem:[%s6665_s26 + $0xe8] sm:$0x3]  ;;  %v475_v21 = vrot.slane %v6846_v16, 1  ;;  %v6868_v34 = vld [vmem:[%s6665_s26 + $0xf8] sm:$0xff] }
  0x21   : > { %12691 = vst [vmem:[#allocation15_spill] sm:$0xff] %v6837_v4  ;;  %12692 = vst [vmem:[#allocation16_spill] sm:$0xff] %v6842_v9  ;;  %v477_v26 = vrot.slane %v6849_v18, 1  ;;  %v6864_v27 = vsel %vm428_vm0, %v469_v13, %v470_v6  ;;  %v474_v29 = vrot.slane %v6852_v19, 1  ;;  %v6871_v35 = vld [vmem:[%s6665_s26 + $0x100] sm:$0x3] }
  0x22   : > { %v6859_v20 = vsel %vm428_vm0, %v470_v6, %v472_v8  ;;  %12694 = vst [vmem:[#allocation18_spill] sm:$0xff] %v6864_v27  ;;  %v6874_v37 = vld [vmem:[%s6665_s26 + $0xf0] sm:$0xff]  ;;  %v480_v43 = vrot.slane %v6868_v34, 1  ;;  %v482_v45 = vrot.slane %v6871_v35, 1  ;;  %v6893_v58 = vld [vmem:[%s6665_s26 + $0x118] sm:$0x3] }
  0x23   : > { %523 = vrot.lane.b32.xlu1 %v6749_v33, %s6600_s27  ;;  %12693 = vst [vmem:[#allocation17_spill] sm:$0xff] %v6859_v20  ;;  %v6881_v42 = vsel %vm428_vm0, %v475_v21, %v477_v26  ;;  %v6886_v50 = vsel %vm428_vm0, %v474_v29, %v475_v21  ;;  %v479_v51 = vrot.slane %v6874_v37, 1  ;;  %v6890_v53 = vld [vmem:[%s6665_s26 + $0x110] sm:$0xff]  ;;  %v6896_v59 = vld [vmem:[%s6665_s26 + $0x108] sm:$0xff]  ;;  %v487_v8 = vrot.slane %v6893_v58, 1  ;;  %s6613_s15 = smov 32  }
  0x24   : > { %521 = vrot.lane.b32.xlu0 %v6754_v36, %s6600_s27  ;;  %12695 = vst [vmem:[#allocation19_spill] sm:$0xff] %v6881_v42  ;;  %12696 = vst [vmem:[#allocation20_spill] sm:$0xff] %v6886_v50  ;;  %v6903_v61 = vsel %vm428_vm0, %v480_v43, %v482_v45  ;;  %v485_v6 = vrot.slane %v6890_v53, 1  ;;  %v484_v21 = vrot.slane %v6896_v59, 1  ;;  %v6912_v26 = vld [vmem:[%s6665_s26 + $0x128] sm:$0xff] }
  0x25   : > { %12697 = vst [vmem:[#allocation21_spill] sm:$0xff] %v6903_v61  ;;  %v6908_v13 = vsel %vm428_vm0, %v479_v51, %v480_v43  ;;  %v6915_v29 = vld [vmem:[%s6665_s26 + $0x130] sm:$0x3]  ;;  %v490_v43 = vrot.slane %v6912_v26, 1 }
  0x26   : > { %12698 = vst [vmem:[#allocation22_spill] sm:$0xff] %v6908_v13  ;;  %v6925_v45 = vsel %vm428_vm0, %v485_v6, %v487_v8  ;;  %v492_v51 = vrot.slane %v6915_v29, 1 }
  0x27   : > { %527 = vrot.lane.b32.xlu1 %v6771_v41, %s6600_s27  ;;  %12699 = vst [vmem:[#allocation23_spill] sm:$0xff] %v6925_v45 }
  0x28   : > { %525 = vrot.lane.b32.xlu0 %v6776_v44, %s6600_s27  ;;  %v6947_v8 = vsel %vm428_vm0, %v490_v43, %v492_v51  ;;  %v6981_v44 = vld [vmem:[%s6665_s26 + $0x178] sm:$0x3] }
  0x29   : > { %12701 = vst [vmem:[#allocation25_spill] sm:$0xff] %v6947_v8 }
  0x2b   : > { %531 = vrot.lane.b32.xlu1 %v6793_v49, %s6600_s27  ;;  %v6978_v49 = vld [vmem:[%s6665_s26 + $0x170] sm:$0xff] }
  0x2c   : > { %529 = vrot.lane.b32.xlu0 %v6798_v52, %s6600_s27 }
  0x2f   : > { %535 = vrot.lane.b32.xlu1 %v6815_v57, %s6600_s27 }
  0x30   : > { %533 = vrot.lane.b32.xlu0 %v6820_v60, %s6600_s27  ;;  %v6956_v60 = vld [vmem:[%s6665_s26 + $0x158] sm:$0xff] }
  0x33   : > { %539 = vrot.lane.b32.xlu1 %v6837_v4, %s6600_s27 }
  0x34   : > { %537 = vrot.lane.b32.xlu0 %v6842_v9, %s6600_s27 }
  0x37   : > { %543 = vrot.lane.b32.xlu1 %v6859_v20, %s6600_s27  ;;  %v6934_v20 = vld [vmem:[%s6665_s26 + $0x140] sm:$0xff] }
  0x38   : > { %541 = vrot.lane.b32.xlu0 %v6864_v27, %s6600_s27 }
  0x3b   : > { %547 = vrot.lane.b32.xlu1 %v6881_v42, %s6600_s27  ;;  %v6930_v42 = vsel %vm428_vm0, %v484_v21, %v485_v6  ;;  %v495_v6 = vrot.slane %v6934_v20, 1 }
  0x3c   : > { %545 = vrot.lane.b32.xlu0 %v6886_v50, %s6600_s27  ;;  %v6918_v50 = vld [vmem:[%s6665_s26 + $0x120] sm:$0xff]  ;;  %12700 = vst [vmem:[#allocation24_spill] sm:$0xff] %v6930_v42 }
  0x3d   : > { %v489_v27 = vrot.slane %v6918_v50, 1 }
  0x3f   : > { %551 = vrot.lane.b32.xlu1 %v6903_v61, %s6600_s27  ;;  %v6937_v61 = vld [vmem:[%s6665_s26 + $0x148] sm:$0x3]  ;;  %v6952_v9 = vsel %vm428_vm0, %v489_v27, %v490_v43  ;;  %v500_v27 = vrot.slane %v6956_v60, 1 }
  0x40   : > { %549 = vrot.lane.b32.xlu0 %v6908_v13, %s6600_s27  ;;  %v6940_v13 = vld [vmem:[%s6665_s26 + $0x138] sm:$0xff]  ;;  %v497_v21 = vrot.slane %v6937_v61, 1  ;;  %12702 = vst [vmem:[#allocation26_spill] sm:$0xff] %v6952_v9 }
  0x41   : > { %v494_v4 = vrot.slane %v6940_v13, 1 }
  0x42   : > { %v6969_v51 = vsel %vm428_vm0, %v495_v6, %v497_v21 }
  0x43   : > { %555 = vrot.lane.b32.xlu1 %v6925_v45, %s6600_s27  ;;  %v6959_v45 = vld [vmem:[%s6665_s26 + $0x160] sm:$0x3]  ;;  %12703 = vst [vmem:[#allocation27_spill] sm:$0xff] %v6969_v51  ;;  %v6974_v57 = vsel %vm428_vm0, %v494_v4, %v495_v6  ;;  %v505_v4 = vrot.slane %v6978_v49, 1  ;;  %v507_v6 = vrot.slane %v6981_v44, 1 }
  0x44   : > { %553 = vrot.lane.b32.xlu0 %v6930_v42, %s6600_s27  ;;  %v6962_v42 = vld [vmem:[%s6665_s26 + $0x150] sm:$0xff]  ;;  %v502_v43 = vrot.slane %v6959_v45, 1  ;;  %12704 = vst [vmem:[#allocation28_spill] sm:$0xff] %v6974_v57 }
  0x45   : > { %v499_v52 = vrot.slane %v6962_v42, 1 }
  0x46   : > { %v6991_v21 = vsel %vm428_vm0, %v500_v27, %v502_v43  ;;  %v607_v43 = vrot.slane %v6679_v5, 2  ;;  %v614_v5 = vrot.slane %v6683_v7, 2  ;;  %v616_v7 = vrot.slane %v6701_v15, 2 }
  0x47   : > { %559 = vrot.lane.b32.xlu1 %v6947_v8, %s6600_s27  ;;  %v6984_v8 = vld [vmem:[%s6665_s26 + $0x168] sm:$0xff]  ;;  %12705 = vst [vmem:[#allocation29_spill] sm:$0xff] %v6991_v21 }
  0x48   : > { %557 = vrot.lane.b32.xlu0 %v6952_v9, %s6600_s27  ;;  %v6996_v9 = vsel %vm428_vm0, %v499_v52, %v500_v27  ;;  %v504_v41 = vrot.slane %v6984_v8, 1  ;;  %v606_v52 = vrot.slane %v6674_v2, 2 }
  0x49   : > { %12706 = vst [vmem:[#allocation30_spill] sm:$0xff] %v6996_v9 }
  0x4a   : > { %v7009_v36 = vsel %vm428_vm0, %v504_v41, %v505_v4  ;;  %v611_v41 = vrot.slane %v6668_v0, 2 }
  0x4b   : > { %563 = vrot.lane.b32.xlu1 %v6969_v51, %s6600_s27  ;;  %v609_v51 = vrot.slane %v6688_v10, 2  ;;  %12708 = vst [vmem:[#allocation32_spill] sm:$0xff] %v7009_v36  ;;  %v608_v10 = vsel %vm605_vm1, %v606_v52, %v607_v43  ;;  %v622_v52 = vrot.slane %v6715_v22, 2 }
  0x4c   : > { %561 = vrot.lane.b32.xlu0 %v6974_v57, %s6600_s27  ;;  %v7004_v57 = vsel %vm428_vm0, %v505_v4, %v507_v6  ;;  %v612_v6 = vrot.slane %v6671_v1, 2  ;;  %v617_v4 = vrot.slane %v6691_v11, 2 }
  0x4d   : > { %12707 = vst [vmem:[#allocation31_spill] sm:$0xff] %v7004_v57  ;;  %v610_v27 = vsel %vm605_vm1, %v607_v43, %v609_v51  ;;  %v619_v51 = vrot.slane %v6698_v14, 2 }
  0x4e   : > { %v7024_v2 = vsel %vm605_vm1, %v612_v6, %v614_v5  ;;  %v7042_v14 = vsel %vm605_vm1, %v616_v7, %v617_v4  ;;  %v632_v7 = vrot.slane %v6758_v38, 2 }
  0x4f   : > { %567 = vrot.lane.b32.xlu1 %v6991_v21, %s6600_s27  ;;  %v7037_v43 = vsel %vm605_vm1, %v617_v4, %v619_v51  ;;  %v626_v4 = vrot.slane %v6742_v32, 2 }
  0x50   : > { %565 = vrot.lane.b32.xlu0 %v6996_v9, %s6600_s27 }
  0x53   : > { %571 = vrot.lane.b32.xlu1 %v7004_v57, %s6600_s27 }
  0x54   : > { %569 = vrot.lane.b32.xlu0 %v7009_v36, %s6600_s27  ;;  %v7029_v36 = vsel %vm605_vm1, %v611_v41, %v612_v6  ;;  %v621_v6 = vrot.slane %v6721_v24, 2  ;;  %v629_v41 = vrot.slane %v6739_v31, 2 }
  0x57   : > { %688 = vrot.lane.b32.xlu1 %v610_v27, %s6601_s28  ;;  %v624_v27 = vrot.slane %v6718_v23, 2  ;;  %v7055_v23 = vsel %vm605_vm1, %v621_v6, %v622_v52 }
  0x58   : > { %686 = vrot.lane.b32.xlu0 %v608_v10, %s6601_s28  ;;  %v627_v10 = vrot.slane %v6736_v30, 2  ;;  %12709 = vst [vmem:[#allocation33_spill] sm:$0xff] %v7055_v23 }
  0x59   : > { %v7050_v5 = vsel %vm605_vm1, %v622_v52, %v624_v27  ;;  %v634_v27 = vrot.slane %v6761_v39, 2  ;;  %v631_v52 = vrot.slane %v6764_v40, 2 }
  0x5a   : > { %v7063_v51 = vsel %vm605_vm1, %v627_v10, %v629_v41  ;;  %v7068_v31 = vsel %vm605_vm1, %v626_v4, %v627_v10  ;;  %v637_v41 = vrot.slane %v6780_v46, 2  ;;  %v636_v10 = vrot.slane %v6786_v48, 2 }
  0x5b   : > { %692 = vrot.lane.b32.xlu1 %v7024_v2, %s6601_s28  ;;  %12710 = vst [vmem:[#allocation34_spill] sm:$0xff] %v7068_v31  ;;  %v7076_v6 = vsel %vm605_vm1, %v632_v7, %v634_v27  ;;  %v7081_v39 = vsel %vm605_vm1, %v631_v52, %v632_v7  ;;  %v642_v27 = vrot.slane %v6802_v54, 2  ;;  %v641_v7 = vrot.slane %v6808_v56, 2 }
  0x5c   : > { %690 = vrot.lane.b32.xlu0 %v7029_v36, %s6601_s28  ;;  %12711 = vst [vmem:[#allocation35_spill] sm:$0xff] %v7081_v39 }
  0x5f   : > { %696 = vrot.lane.b32.xlu1 %v7037_v43, %s6601_s28 }
  0x60   : > { %694 = vrot.lane.b32.xlu0 %v7042_v14, %s6601_s28 }
  0x63   : > { %700 = vrot.lane.b32.xlu1 %v7050_v5, %s6601_s28 }
  0x64   : > { %698 = vrot.lane.b32.xlu0 %v7055_v23, %s6601_s28  ;;  %v639_v23 = vrot.slane %v6783_v47, 2  ;;  %v7094_v47 = vsel %vm605_vm1, %v636_v10, %v637_v41 }
  0x65   : > { %12712 = vst [vmem:[#allocation36_spill] sm:$0xff] %v7094_v47 }
  0x66   : > { %v7089_v4 = vsel %vm605_vm1, %v637_v41, %v639_v23  ;;  %v647_v23 = vrot.slane %v6824_v62, 2  ;;  %v646_v41 = vrot.slane %v6830_v3, 2 }
  0x67   : > { %704 = vrot.lane.b32.xlu1 %v7063_v51, %s6601_s28 }
  0x68   : > { %702 = vrot.lane.b32.xlu0 %v7068_v31, %s6601_s28  ;;  %v644_v31 = vrot.slane %v6805_v55, 2  ;;  %v7107_v55 = vsel %vm605_vm1, %v641_v7, %v642_v27 }
  0x69   : > { %12713 = vst [vmem:[#allocation37_spill] sm:$0xff] %v7107_v55 }
  0x6a   : > { %v7102_v52 = vsel %vm605_vm1, %v642_v27, %v644_v31  ;;  %v652_v31 = vrot.slane %v6846_v16, 2  ;;  %v651_v27 = vrot.slane %v6852_v19, 2 }
  0x6b   : > { %708 = vrot.lane.b32.xlu1 %v7076_v6, %s6601_s28 }
  0x6c   : > { %706 = vrot.lane.b32.xlu0 %v7081_v39, %s6601_s28  ;;  %v649_v39 = vrot.slane %v6827_v63, 2  ;;  %v7120_v63 = vsel %vm605_vm1, %v646_v41, %v647_v23 }
  0x6d   : > { %12714 = vst [vmem:[#allocation38_spill] sm:$0xff] %v7120_v63 }
  0x6e   : > { %v7115_v10 = vsel %vm605_vm1, %v647_v23, %v649_v39  ;;  %v657_v39 = vrot.slane %v6868_v34, 2  ;;  %v656_v23 = vrot.slane %v6874_v37, 2 }
  0x6f   : > { %712 = vrot.lane.b32.xlu1 %v7089_v4, %s6601_s28 }
  0x70   : > { %710 = vrot.lane.b32.xlu0 %v7094_v47, %s6601_s28  ;;  %v654_v47 = vrot.slane %v6849_v18, 2  ;;  %v7133_v18 = vsel %vm605_vm1, %v651_v27, %v652_v31 }
  0x71   : > { %12716 = vst [vmem:[#allocation40_spill] sm:$0xff] %v7133_v18 }
  0x72   : > { %v7128_v7 = vsel %vm605_vm1, %v652_v31, %v654_v47  ;;  %v662_v47 = vrot.slane %v6890_v53, 2  ;;  %v661_v31 = vrot.slane %v6896_v59, 2 }
  0x73   : > { %716 = vrot.lane.b32.xlu1 %v7102_v52, %s6601_s28  ;;  %12715 = vst [vmem:[#allocation39_spill] sm:$0xff] %v7128_v7 }
  0x74   : > { %714 = vrot.lane.b32.xlu0 %v7107_v55, %s6601_s28  ;;  %v659_v55 = vrot.slane %v6871_v35, 2  ;;  %v7146_v35 = vsel %vm605_vm1, %v656_v23, %v657_v39 }
  0x75   : > { %12717 = vst [vmem:[#allocation41_spill] sm:$0xff] %v7146_v35 }
  0x76   : > { %v7141_v41 = vsel %vm605_vm1, %v657_v39, %v659_v55  ;;  %v667_v55 = vrot.slane %v6912_v26, 2  ;;  %v666_v39 = vrot.slane %v6918_v50, 2 }
  0x77   : > { %720 = vrot.lane.b32.xlu1 %v7115_v10, %s6601_s28 }
  0x78   : > { %718 = vrot.lane.b32.xlu0 %v7120_v63, %s6601_s28  ;;  %v664_v63 = vrot.slane %v6893_v58, 2  ;;  %v7159_v58 = vsel %vm605_vm1, %v661_v31, %v662_v47 }
  0x79   : > { %12719 = vst [vmem:[#allocation43_spill] sm:$0xff] %v7159_v58 }
  0x7a   : > { %v7154_v27 = vsel %vm605_vm1, %v662_v47, %v664_v63  ;;  %v672_v63 = vrot.slane %v6934_v20, 2  ;;  %v671_v47 = vrot.slane %v6940_v13, 2 }
  0x7b   : > { %724 = vrot.lane.b32.xlu1 %v7128_v7, %s6601_s28  ;;  %12718 = vst [vmem:[#allocation42_spill] sm:$0xff] %v7154_v27 }
  0x7c   : > { %722 = vrot.lane.b32.xlu0 %v7133_v18, %s6601_s28  ;;  %v669_v18 = vrot.slane %v6915_v29, 2  ;;  %v7172_v29 = vsel %vm605_vm1, %v666_v39, %v667_v55 }
  0x7d   : > { %12720 = vst [vmem:[#allocation44_spill] sm:$0xff] %v7172_v29 }
  0x7e   : > { %v7167_v23 = vsel %vm605_vm1, %v667_v55, %v669_v18  ;;  %v677_v18 = vrot.slane %v6956_v60, 2  ;;  %v676_v55 = vrot.slane %v6962_v42, 2 }
  0x7f   : > { %728 = vrot.lane.b32.xlu1 %v7141_v41, %s6601_s28 }
  0x80   : > { %726 = vrot.lane.b32.xlu0 %v7146_v35, %s6601_s28  ;;  %v674_v35 = vrot.slane %v6937_v61, 2  ;;  %v7187_v61 = vsel %vm605_vm1, %v671_v47, %v672_v63  ;;  %v681_v47 = vrot.slane %v6984_v8, 2 }
  0x81   : > { %12723 = vst [vmem:[#allocation47_spill] sm:$0xff] %v7187_v61 }
  0x82   : > { %v7180_v31 = vsel %vm605_vm1, %v672_v63, %v674_v35  ;;  %v7204_v63 = vsel %vm605_vm1, %v676_v55, %v677_v18 }
  0x83   : > { %732 = vrot.lane.b32.xlu1 %v7154_v27, %s6601_s28  ;;  %12721 = vst [vmem:[#allocation45_spill] sm:$0xff] %v7180_v31  ;;  %12726 = vst [vmem:[#allocation50_spill] sm:$0xff] %v7204_v63 }
  0x84   : > { %730 = vrot.lane.b32.xlu0 %v7159_v58, %s6601_s28  ;;  %v679_v58 = vrot.slane %v6959_v45, 2  ;;  %v682_v45 = vrot.slane %v6978_v49, 2 }
  0x86   : > { %v7197_v35 = vsel %vm605_vm1, %v677_v18, %v679_v58 }
  0x87   : > { %736 = vrot.lane.b32.xlu1 %v7167_v23, %s6601_s28 }
  0x88   : > { %734 = vrot.lane.b32.xlu0 %v7172_v29, %s6601_s28 }
  0x89   : > { %v7184_v27 = vpop.permute.xlu1 %513 }
  0x8a   : > { %12722 = vst [vmem:[#allocation46_spill] sm:$0xff] %v7184_v27  ;;  %v7190_v39 = vpop.permute.xlu0 %509  ;;  %v684_v27 = vrot.slane %v6981_v44, 2  ;;  %v7219_v44 = vsel %vm605_vm1, %v681_v47, %v682_v45 }
  0x8b   : > { %12724 = vst [vmem:[#allocation48_spill] sm:$0xff] %v7190_v39  ;;  %740 = vrot.lane.b32.xlu1 %v7180_v31, %s6601_s28 }
  0x8c   : > { %738 = vrot.lane.b32.xlu0 %v7187_v61, %s6601_s28  ;;  %v7214_v58 = vsel %vm605_vm1, %v682_v45, %v684_v27 }
  0x8d   : > { %v7201_v29 = vpop.permute.xlu1 %515 }
  0x8e   : > { %12725 = vst [vmem:[#allocation49_spill] sm:$0xff] %v7201_v29  ;;  %v7207_v39 = vpop.permute.xlu0 %511 }
  0x8f   : > { %12727 = vst [vmem:[#allocation51_spill] sm:$0xff] %v7207_v39  ;;  %744 = vrot.lane.b32.xlu1 %v7197_v35, %s6601_s28 }
  0x90   : > { %742 = vrot.lane.b32.xlu0 %v7204_v63, %s6601_s28 }
  0x91   : > { %v7216_v61 = vpop.permute.xlu1 %519 }
  0x92   : > { %12728 = vst [vmem:[#allocation52_spill] sm:$0xff] %v7216_v61  ;;  %v7221_v18 = vpop.permute.xlu0 %517  ;;  %v12772_v61 = vld [vmem:[#allocation10_spill] sm:$0xff] }
  0x93   : > { %12729 = vst [vmem:[#allocation53_spill] sm:$0xff] %v7221_v18  ;;  %748 = vrot.lane.b32.xlu1 %v7214_v58, %s6601_s28 }
  0x94   : > { %746 = vrot.lane.b32.xlu0 %v7219_v44, %s6601_s28 }
  0x95   : > { %v7227_v55 = vpop.permute.xlu1 %523 }
  0x96   : > { %12730 = vst [vmem:[#allocation54_spill] sm:$0xff] %v7227_v55  ;;  %v7229_v29 = vpop.permute.xlu0 %521 }
  0x97   : > { %12731 = vst [vmem:[#allocation55_spill] sm:$0xff] %v7229_v29  ;;  %786 = vrot.lane.b32.xlu1 %v6671_v1, %s6602_s29  ;;  %v7353_v29 = vld [vmem:[%s6665_s26 + $0x180] sm:$0xff] }
  0x98   : > { %784 = vrot.lane.b32.xlu0 %v6668_v0, %s6602_s29 }
  0x99   : > { %v7235_v27 = vpop.permute.xlu1 %527 }
  0x9a   : > { %12732 = vst [vmem:[#allocation56_spill] sm:$0xff] %v7235_v27  ;;  %v7237_v45 = vpop.permute.xlu0 %525 }
  0x9b   : > { %12733 = vst [vmem:[#allocation57_spill] sm:$0xff] %v7237_v45  ;;  %790 = vrot.lane.b32.xlu1 %v6691_v11, %s6602_s29 }
  0x9c   : > { %788 = vrot.lane.b32.xlu0 %v6701_v15, %s6602_s29 }
  0x9d   : > { %v7243_v47 = vpop.permute.xlu1 %531 }
  0x9e   : > { %12734 = vst [vmem:[#allocation58_spill] sm:$0xff] %v7243_v47  ;;  %v7245_v55 = vpop.permute.xlu0 %529 }
  0x9f   : > { %12735 = vst [vmem:[#allocation59_spill] sm:$0xff] %v7245_v55  ;;  %794 = vrot.lane.b32.xlu1 %v6715_v22, %s6602_s29 }
  0xa0   : > { %792 = vrot.lane.b32.xlu0 %v6721_v24, %s6602_s29 }
  0xa1   : > { %v7251_v0 = vpop.permute.xlu1 %535 }
  0xa2   : > { %12736 = vst [vmem:[#allocation60_spill] sm:$0xff] %v7251_v0  ;;  %v7253_v1 = vpop.permute.xlu0 %533 }
  0xa3   : > { %12737 = vst [vmem:[#allocation61_spill] sm:$0xff] %v7253_v1  ;;  %798 = vrot.lane.b32.xlu1 %v6736_v30, %s6602_s29 }
  0xa4   : > { %796 = vrot.lane.b32.xlu0 %v6742_v32, %s6602_s29 }
  0xa5   : > { %v7259_v45 = vpop.permute.xlu1 %539 }
  0xa6   : > { %12738 = vst [vmem:[#allocation62_spill] sm:$0xff] %v7259_v45  ;;  %v7261_v47 = vpop.permute.xlu0 %537 }
  0xa7   : > { %12739 = vst [vmem:[#allocation63_spill] sm:$0xff] %v7261_v47  ;;  %802 = vrot.lane.b32.xlu1 %v6758_v38, %s6602_s29 }
  0xa8   : > { %800 = vrot.lane.b32.xlu0 %v6764_v40, %s6602_s29 }
  0xa9   : > { %v7267_v55 = vpop.permute.xlu1 %543 }
  0xaa   : > { %12740 = vst [vmem:[#allocation64_spill] sm:$0xff] %v7267_v55  ;;  %v7269_v0 = vpop.permute.xlu0 %541 }
  0xab   : > { %12741 = vst [vmem:[#allocation65_spill] sm:$0xff] %v7269_v0  ;;  %806 = vrot.lane.b32.xlu1 %v6780_v46, %s6602_s29 }
  0xac   : > { %804 = vrot.lane.b32.xlu0 %v6786_v48, %s6602_s29 }
  0xad   : > { %v7275_v1 = vpop.permute.xlu1 %547 }
  0xae   : > { %12742 = vst [vmem:[#allocation66_spill] sm:$0xff] %v7275_v1  ;;  %v7277_v45 = vpop.permute.xlu0 %545 }
  0xaf   : > { %12743 = vst [vmem:[#allocation67_spill] sm:$0xff] %v7277_v45  ;;  %810 = vrot.lane.b32.xlu1 %v6802_v54, %s6602_s29 }
  0xb0   : > { %808 = vrot.lane.b32.xlu0 %v6808_v56, %s6602_s29 }
  0xb1   : > { %v7283_v47 = vpop.permute.xlu1 %551 }
  0xb2   : > { %12744 = vst [vmem:[#allocation68_spill] sm:$0xff] %v7283_v47  ;;  %v7285_v55 = vpop.permute.xlu0 %549 }
  0xb3   : > { %12745 = vst [vmem:[#allocation69_spill] sm:$0xff] %v7285_v55  ;;  %814 = vrot.lane.b32.xlu1 %v6824_v62, %s6602_s29 }
  0xb4   : > { %812 = vrot.lane.b32.xlu0 %v6830_v3, %s6602_s29 }
  0xb5   : > { %v7291_v0 = vpop.permute.xlu1 %555 }
  0xb6   : > { %12746 = vst [vmem:[#allocation70_spill] sm:$0xff] %v7291_v0  ;;  %v7293_v1 = vpop.permute.xlu0 %553 }
  0xb7   : > { %12747 = vst [vmem:[#allocation71_spill] sm:$0xff] %v7293_v1  ;;  %818 = vrot.lane.b32.xlu1 %v6846_v16, %s6602_s29 }
  0xb8   : > { %816 = vrot.lane.b32.xlu0 %v6852_v19, %s6602_s29 }
  0xb9   : > { %v7299_v45 = vpop.permute.xlu1 %559 }
  0xba   : > { %12748 = vst [vmem:[#allocation72_spill] sm:$0xff] %v7299_v45  ;;  %v7301_v47 = vpop.permute.xlu0 %557 }
  0xbb   : > { %12749 = vst [vmem:[#allocation73_spill] sm:$0xff] %v7301_v47  ;;  %822 = vrot.lane.b32.xlu1 %v6868_v34, %s6602_s29 }
  0xbc   : > { %820 = vrot.lane.b32.xlu0 %v6874_v37, %s6602_s29 }
  0xbd   : > { %v7307_v55 = vpop.permute.xlu1 %563 }
  0xbe   : > { %12750 = vst [vmem:[#allocation74_spill] sm:$0xff] %v7307_v55  ;;  %v7309_v0 = vpop.permute.xlu0 %561 }
  0xbf   : > { %12751 = vst [vmem:[#allocation75_spill] sm:$0xff] %v7309_v0  ;;  %826 = vrot.lane.b32.xlu1 %v6890_v53, %s6602_s29 }
  0xc0   : > { %824 = vrot.lane.b32.xlu0 %v6896_v59, %s6602_s29 }
  0xc1   : > { %v7315_v1 = vpop.permute.xlu1 %567 }
  0xc2   : > { %12752 = vst [vmem:[#allocation76_spill] sm:$0xff] %v7315_v1  ;;  %v7317_v47 = vpop.permute.xlu0 %565 }
  0xc3   : > { %12753 = vst [vmem:[#allocation77_spill] sm:$0xff] %v7317_v47  ;;  %830 = vrot.lane.b32.xlu1 %v6912_v26, %s6602_s29 }
  0xc4   : > { %828 = vrot.lane.b32.xlu0 %v6918_v50, %s6602_s29 }
  0xc5   : > { %v7323_v55 = vpop.permute.xlu1 %571 }
  0xc6   : > { %12754 = vst [vmem:[#allocation78_spill] sm:$0xff] %v7323_v55  ;;  %v7325_v0 = vpop.permute.xlu0 %569 }
  0xc7   : > { %12755 = vst [vmem:[#allocation79_spill] sm:$0xff] %v7325_v0  ;;  %834 = vrot.lane.b32.xlu1 %v6934_v20, %s6602_s29  ;;  %v7348_v0 = vld [vmem:[%s6665_s26 + $0x188] sm:$0xff] }
  0xc8   : > { %832 = vrot.lane.b32.xlu0 %v6940_v13, %s6602_s29 }
  0xc9   : > { %v7331_v1 = vpop.permute.xlu1 %688 }
  0xca   : > { %12756 = vst [vmem:[#allocation80_spill] sm:$0xff] %v7331_v1  ;;  %v7333_v47 = vpop.permute.xlu0 %686  ;;  %v12776_v1 = vld [vmem:[#allocation12_spill] sm:$0xff] }
  0xcb   : > { %12757 = vst [vmem:[#allocation81_spill] sm:$0xff] %v7333_v47  ;;  %838 = vrot.lane.b32.xlu1 %v6956_v60, %s6602_s29 }
  0xcc   : > { %836 = vrot.lane.b32.xlu0 %v6962_v42, %s6602_s29 }
  0xcd   : > { %v7339_v45 = vpop.permute.xlu1 %692 }
  0xce   : > { %12758 = vst [vmem:[#allocation82_spill] sm:$0xff] %v7339_v45  ;;  %v7341_v55 = vpop.permute.xlu0 %690 }
  0xcf   : > { %12759 = vst [vmem:[#allocation83_spill] sm:$0xff] %v7341_v55  ;;  %842 = vrot.lane.b32.xlu1 %v6978_v49, %s6602_s29 }
  0xd0   : > { %840 = vrot.lane.b32.xlu0 %v6984_v8, %s6602_s29 }
  0xd1   : > { %v7350_v27 = vpop.permute.xlu1 %696 }
  0xd2   : > { %12760 = vst [vmem:[#allocation84_spill] sm:$0xff] %v7350_v27  ;;  %v7355_v18 = vpop.permute.xlu0 %694 }
  0xd3   : > { %12761 = vst [vmem:[#allocation85_spill] sm:$0xff] %v7355_v18  ;;  %846 = vrot.lane.b32.xlu1 %v7348_v0, %s6602_s29 }
  0xd4   : > { %844 = vrot.lane.b32.xlu0 %v7353_v29, %s6602_s29 }
  0xd5   : > { %v7361_v55 = vpop.permute.xlu1 %700 }
  0xd6   : > { %12762 = vst [vmem:[#allocation86_spill] sm:$0xff] %v7361_v55  ;;  %v7363_v45 = vpop.permute.xlu0 %698 }
  0xd7   : > { %12763 = vst [vmem:[#allocation87_spill] sm:$0xff] %v7363_v45  ;;  %888 = vrot.lane.b32.xlu1 %v6708_v17, %s6603_s30  ;;  %v12768_v17 = vld [vmem:[#allocation8_spill] sm:$0xff] }
  0xd8   : > { %886 = vrot.lane.b32.xlu0 %v6694_v12, %s6603_s30 }
  0xd9   : > { %v7369_v27 = vpop.permute.xlu1 %704 }
  0xda   : > { %12764 = vst [vmem:[#allocation88_spill] sm:$0xff] %v7369_v27  ;;  %v7371_v18 = vpop.permute.xlu0 %702 }
  0xdb   : > { %12765 = vst [vmem:[#allocation89_spill] sm:$0xff] %v7371_v18  ;;  %892 = vrot.lane.b32.xlu1 %v6727_v25, %s6603_s30  ;;  %v12771_v18 = vld [vmem:[#allocation9_spill] sm:$0xff] }
  0xdc   : > { %890 = vrot.lane.b32.xlu0 %v6732_v28, %s6603_s30 }
  0xdd   : > { %v7377_v55 = vpop.permute.xlu1 %708 }
  0xde   : > { %12766 = vst [vmem:[#allocation90_spill] sm:$0xff] %v7377_v55  ;;  %v7379_v45 = vpop.permute.xlu0 %706 }
  0xdf   : > { %12767 = vst [vmem:[#allocation91_spill] sm:$0xff] %v7379_v45  ;;  %896 = vrot.lane.b32.xlu1 %v6749_v33, %s6603_s30  ;;  %v12775_v45 = vld [vmem:[#allocation11_spill] sm:$0xff] }
  0xe0   : > { %894 = vrot.lane.b32.xlu0 %v12768_v17, %s6603_s30 }
  0xe1   : > { %v7385_v12 = vpop.permute.xlu1 %712 }
  0xe2   : > { %12769 = vst [vmem:[#allocation92_spill] sm:$0xff] %v7385_v12  ;;  %v7387_v27 = vpop.permute.xlu0 %710 }
  0xe3   : > { %12770 = vst [vmem:[#allocation93_spill] sm:$0xff] %v7387_v27  ;;  %900 = vrot.lane.b32.xlu1 %v12771_v18, %s6603_s30  ;;  %v12779_v27 = vld [vmem:[#allocation13_spill] sm:$0xff]  ;;  %v12780_v18 = vld [vmem:[#allocation14_spill] sm:$0xff] }
  0xe4   : > { %898 = vrot.lane.b32.xlu0 %v12772_v61, %s6603_s30 }
  0xe5   : > { %v7393_v47 = vpop.permute.xlu1 %716 }
  0xe6   : > { %12773 = vst [vmem:[#allocation94_spill] sm:$0xff] %v7393_v47  ;;  %v7395_v55 = vpop.permute.xlu0 %714 }
  0xe7   : > { %12774 = vst [vmem:[#allocation95_spill] sm:$0xff] %v7395_v55  ;;  %904 = vrot.lane.b32.xlu1 %v12775_v45, %s6603_s30  ;;  %v12783_v55 = vld [vmem:[#allocation15_spill] sm:$0xff]  ;;  %v12784_v45 = vld [vmem:[#allocation16_spill] sm:$0xff] }
  0xe8   : > { %902 = vrot.lane.b32.xlu0 %v12776_v1, %s6603_s30 }
  0xe9   : > { %v7401_v39 = vpop.permute.xlu1 %720 }
  0xea   : > { %12777 = vst [vmem:[#allocation96_spill] sm:$0xff] %v7401_v39  ;;  %v7403_v12 = vpop.permute.xlu0 %718 }
  0xeb   : > { %12778 = vst [vmem:[#allocation97_spill] sm:$0xff] %v7403_v12  ;;  %908 = vrot.lane.b32.xlu1 %v12779_v27, %s6603_s30  ;;  %v12787_v12 = vld [vmem:[#allocation17_spill] sm:$0xff]  ;;  %v12788_v27 = vld [vmem:[#allocation18_spill] sm:$0xff] }
  0xec   : > { %906 = vrot.lane.b32.xlu0 %v12780_v18, %s6603_s30 }
  0xed   : > { %v7409_v61 = vpop.permute.xlu1 %724 }
  0xee   : > { %12781 = vst [vmem:[#allocation98_spill] sm:$0xff] %v7409_v61  ;;  %v7411_v47 = vpop.permute.xlu0 %722 }
  0xef   : > { %12782 = vst [vmem:[#allocation99_spill] sm:$0xff] %v7411_v47  ;;  %912 = vrot.lane.b32.xlu1 %v12783_v55, %s6603_s30  ;;  %v12791_v47 = vld [vmem:[#allocation19_spill] sm:$0xff]  ;;  %v12792_v55 = vld [vmem:[#allocation20_spill] sm:$0xff] }
  0xf0   : > { %910 = vrot.lane.b32.xlu0 %v12784_v45, %s6603_s30 }
  0xf1   : > { %v7417_v1 = vpop.permute.xlu1 %728 }
  0xf2   : > { %12785 = vst [vmem:[#allocation100_spill] sm:$0xff] %v7417_v1  ;;  %v7419_v39 = vpop.permute.xlu0 %726 }
  0xf3   : > { %12786 = vst [vmem:[#allocation101_spill] sm:$0xff] %v7419_v39  ;;  %916 = vrot.lane.b32.xlu1 %v12787_v12, %s6603_s30  ;;  %v12795_v39 = vld [vmem:[#allocation21_spill] sm:$0xff] }
  0xf4   : > { %914 = vrot.lane.b32.xlu0 %v12788_v27, %s6603_s30  ;;  %v12796_v27 = vld [vmem:[#allocation22_spill] sm:$0xff]  ;;  %v12803_v12 = vld [vmem:[#allocation25_spill] sm:$0xff] }
  0xf5   : > { %v7425_v18 = vpop.permute.xlu1 %732 }
  0xf6   : > { %12789 = vst [vmem:[#allocation102_spill] sm:$0xff] %v7425_v18  ;;  %v7427_v61 = vpop.permute.xlu0 %730 }
  0xf7   : > { %12790 = vst [vmem:[#allocation103_spill] sm:$0xff] %v7427_v61  ;;  %920 = vrot.lane.b32.xlu1 %v12791_v47, %s6603_s30  ;;  %v12799_v47 = vld [vmem:[#allocation23_spill] sm:$0xff] }
  0xf8   : > { %918 = vrot.lane.b32.xlu0 %v12792_v55, %s6603_s30  ;;  %v12800_v55 = vld [vmem:[#allocation24_spill] sm:$0xff] }
  0xf9   : > { %v7433_v45 = vpop.permute.xlu1 %736 }
  0xfa   : > { %12793 = vst [vmem:[#allocation104_spill] sm:$0xff] %v7433_v45  ;;  %v7435_v1 = vpop.permute.xlu0 %734 }
  0xfb   : > { %12794 = vst [vmem:[#allocation105_spill] sm:$0xff] %v7435_v1  ;;  %924 = vrot.lane.b32.xlu1 %v12795_v39, %s6603_s30  ;;  %v12804_v39 = vld [vmem:[#allocation26_spill] sm:$0xff] }
  0xfc   : > { %922 = vrot.lane.b32.xlu0 %v12796_v27, %s6603_s30 }
  0xfd   : > { %v7441_v18 = vpop.permute.xlu1 %740 }
  0xfe   : > { %12797 = vst [vmem:[#allocation106_spill] sm:$0xff] %v7441_v18  ;;  %v7443_v61 = vpop.permute.xlu0 %738 }
  0xff   : > { %12798 = vst [vmem:[#allocation107_spill] sm:$0xff] %v7443_v61  ;;  %928 = vrot.lane.b32.xlu1 %v12799_v47, %s6603_s30  ;;  %v12807_v61 = vld [vmem:[#allocation27_spill] sm:$0xff]  ;;  %v12808_v47 = vld [vmem:[#allocation28_spill] sm:$0xff] }
 0x100   : > { %926 = vrot.lane.b32.xlu0 %v12800_v55, %s6603_s30 }
 0x101   : > { %v7449_v45 = vpop.permute.xlu1 %744 }
 0x102   : > { %12801 = vst [vmem:[#allocation108_spill] sm:$0xff] %v7449_v45  ;;  %v7451_v1 = vpop.permute.xlu0 %742  ;;  %v7468_v45 = vld [vmem:[%s6665_s26 + $0x190] sm:$0x3] }
 0x103   : > { %12802 = vst [vmem:[#allocation109_spill] sm:$0xff] %v7451_v1  ;;  %932 = vrot.lane.b32.xlu1 %v12803_v12, %s6603_s30 }
 0x104   : > { %930 = vrot.lane.b32.xlu0 %v12804_v39, %s6603_s30  ;;  %v882_v39 = vrot.slane %v7348_v0, 1 }
 0x105   : > { %v7457_v27 = vpop.permute.xlu1 %748 }
 0x106   : > { %12805 = vst [vmem:[#allocation110_spill] sm:$0xff] %v7457_v27  ;;  %v7459_v18 = vpop.permute.xlu0 %746  ;;  %v881_v27 = vrot.slane %v7353_v29, 1 }
 0x107   : > { %12806 = vst [vmem:[#allocation111_spill] sm:$0xff] %v7459_v18  ;;  %936 = vrot.lane.b32.xlu1 %v12807_v61, %s6603_s30  ;;  %v884_v18 = vrot.slane %v7468_v45, 1 }
 0x108   : > { %934 = vrot.lane.b32.xlu0 %v12808_v47, %s6603_s30 }
 0x109   : > { %v7465_v55 = vpop.permute.xlu1 %786 }
 0x10a   : > { %12809 = vst [vmem:[#allocation112_spill] sm:$0xff] %v7465_v55  ;;  %v7470_v1 = vpop.permute.xlu0 %784  ;;  %v7488_v55 = vsel %vm428_vm0, %v882_v39, %v884_v18 }
 0x10b   : > { %12810 = vst [vmem:[#allocation113_spill] sm:$0xff] %v7470_v1  ;;  %940 = vrot.lane.b32.xlu1 %v6991_v21, %s6603_s30  ;;  %v12813_v1 = vld [vmem:[#allocation32_spill] sm:$0xff]  ;;  %12814 = vst [vmem:[#allocation116_spill] sm:$0xff] %v7488_v55 }
 0x10c   : > { %938 = vrot.lane.b32.xlu0 %v6996_v9, %s6603_s30  ;;  %v7493_v9 = vsel %vm428_vm0, %v881_v27, %v882_v39 }
 0x10d   : > { %v7479_v61 = vpop.permute.xlu1 %790  ;;  %12816 = vst [vmem:[#allocation118_spill] sm:$0xff] %v7493_v9 }
 0x10e   : > { %12811 = vst [vmem:[#allocation114_spill] sm:$0xff] %v7479_v61  ;;  %v7481_v47 = vpop.permute.xlu0 %788 }
 0x10f   : > { %12812 = vst [vmem:[#allocation115_spill] sm:$0xff] %v7481_v47  ;;  %944 = vrot.lane.b32.xlu1 %v7004_v57, %s6603_s30 }
 0x110   : > { %942 = vrot.lane.b32.xlu0 %v12813_v1, %s6603_s30 }
 0x111   : > { %v7490_v21 = vpop.permute.xlu1 %794 }
 0x112   : > { %12815 = vst [vmem:[#allocation117_spill] sm:$0xff] %v7490_v21  ;;  %v7495_v12 = vpop.permute.xlu0 %792 }
 0x113   : > { %12817 = vst [vmem:[#allocation119_spill] sm:$0xff] %v7495_v12  ;;  %948 = vrot.lane.b32.xlu1 %v7488_v55, %s6603_s30 }
 0x114   : > { %946 = vrot.lane.b32.xlu0 %v7493_v9, %s6603_s30 }
 0x115   : > { %v7501_v61 = vpop.permute.xlu1 %798 }
 0x116   : > { %12818 = vst [vmem:[#allocation120_spill] sm:$0xff] %v7501_v61  ;;  %v7503_v47 = vpop.permute.xlu0 %796 }
 0x117   : > { %12819 = vst [vmem:[#allocation121_spill] sm:$0xff] %v7503_v47  ;;  %989 = vrot.lane.b32.xlu1 %v7024_v2, %s6604_s7  ;;  %v12824_v2 = vld [vmem:[#allocation33_spill] sm:$0xff] }
 0x118   : > { %987 = vrot.lane.b32.xlu0 %v7029_v36, %s6604_s7 }
 0x119   : > { %v7509_v39 = vpop.permute.xlu1 %802 }
 0x11a   : > { %12820 = vst [vmem:[#allocation122_spill] sm:$0xff] %v7509_v39  ;;  %v7511_v18 = vpop.permute.xlu0 %800 }
 0x11b   : > { %12821 = vst [vmem:[#allocation123_spill] sm:$0xff] %v7511_v18  ;;  %993 = vrot.lane.b32.xlu1 %v7037_v43, %s6604_s7  ;;  %v12827_v18 = vld [vmem:[#allocation34_spill] sm:$0xff] }
 0x11c   : > { %991 = vrot.lane.b32.xlu0 %v7042_v14, %s6604_s7 }
 0x11d   : > { %v7517_v27 = vpop.permute.xlu1 %806 }
 0x11e   : > { %12822 = vst [vmem:[#allocation124_spill] sm:$0xff] %v7517_v27  ;;  %v7519_v61 = vpop.permute.xlu0 %804 }
 0x11f   : > { %12823 = vst [vmem:[#allocation125_spill] sm:$0xff] %v7519_v61  ;;  %997 = vrot.lane.b32.xlu1 %v7050_v5, %s6604_s7  ;;  %v12830_v61 = vld [vmem:[#allocation35_spill] sm:$0xff] }
 0x120   : > { %995 = vrot.lane.b32.xlu0 %v12824_v2, %s6604_s7 }
 0x121   : > { %v7525_v36 = vpop.permute.xlu1 %810 }
 0x122   : > { %12825 = vst [vmem:[#allocation33_spill] sm:$0xff] %v7525_v36  ;;  %v7527_v39 = vpop.permute.xlu0 %808 }
 0x123   : > { %12826 = vst [vmem:[#allocation126_spill] sm:$0xff] %v7527_v39  ;;  %1001 = vrot.lane.b32.xlu1 %v7063_v51, %s6604_s7  ;;  %v12833_v39 = vld [vmem:[#allocation36_spill] sm:$0xff] }
 0x124   : > { %999 = vrot.lane.b32.xlu0 %v12827_v18, %s6604_s7 }
 0x125   : > { %v7533_v47 = vpop.permute.xlu1 %814 }
 0x126   : > { %12828 = vst [vmem:[#allocation34_spill] sm:$0xff] %v7533_v47  ;;  %v7535_v27 = vpop.permute.xlu0 %812 }
 0x127   : > { %12829 = vst [vmem:[#allocation127_spill] sm:$0xff] %v7535_v27  ;;  %1005 = vrot.lane.b32.xlu1 %v7076_v6, %s6604_s7  ;;  %v12836_v27 = vld [vmem:[#allocation37_spill] sm:$0xff] }
 0x128   : > { %1003 = vrot.lane.b32.xlu0 %v12830_v61, %s6604_s7 }
 0x129   : > { %v7541_v12 = vpop.permute.xlu1 %818 }
 0x12a   : > { %12831 = vst [vmem:[#allocation128_spill] sm:$0xff] %v7541_v12  ;;  %v7543_v36 = vpop.permute.xlu0 %816 }
 0x12b   : > { %12832 = vst [vmem:[#allocation129_spill] sm:$0xff] %v7543_v36  ;;  %1009 = vrot.lane.b32.xlu1 %v7089_v4, %s6604_s7  ;;  %v12839_v36 = vld [vmem:[#allocation38_spill] sm:$0xff] }
 0x12c   : > { %1007 = vrot.lane.b32.xlu0 %v12833_v39, %s6604_s7 }
 0x12d   : > { %v7549_v21 = vpop.permute.xlu1 %822 }
 0x12e   : > { %12834 = vst [vmem:[#allocation130_spill] sm:$0xff] %v7549_v21  ;;  %v7551_v47 = vpop.permute.xlu0 %820 }
 0x12f   : > { %12835 = vst [vmem:[#allocation131_spill] sm:$0xff] %v7551_v47  ;;  %1013 = vrot.lane.b32.xlu1 %v7102_v52, %s6604_s7  ;;  %v12842_v47 = vld [vmem:[#allocation40_spill] sm:$0xff] }
 0x130   : > { %1011 = vrot.lane.b32.xlu0 %v12836_v27, %s6604_s7 }
 0x131   : > { %v7557_v61 = vpop.permute.xlu1 %826 }
 0x132   : > { %12837 = vst [vmem:[#allocation132_spill] sm:$0xff] %v7557_v61  ;;  %v7559_v12 = vpop.permute.xlu0 %824 }
 0x133   : > { %12838 = vst [vmem:[#allocation133_spill] sm:$0xff] %v7559_v12  ;;  %1017 = vrot.lane.b32.xlu1 %v7115_v10, %s6604_s7  ;;  %v12845_v12 = vld [vmem:[#allocation41_spill] sm:$0xff] }
 0x134   : > { %1015 = vrot.lane.b32.xlu0 %v12839_v36, %s6604_s7 }
 0x135   : > { %v7565_v39 = vpop.permute.xlu1 %830 }
 0x136   : > { %12840 = vst [vmem:[#allocation134_spill] sm:$0xff] %v7565_v39  ;;  %v7567_v21 = vpop.permute.xlu0 %828 }
 0x137   : > { %12841 = vst [vmem:[#allocation135_spill] sm:$0xff] %v7567_v21  ;;  %1021 = vrot.lane.b32.xlu1 %v7128_v7, %s6604_s7  ;;  %v12848_v21 = vld [vmem:[#allocation42_spill] sm:$0xff]  ;;  %v12849_v7 = vld [vmem:[#allocation43_spill] sm:$0xff] }
 0x138   : > { %1019 = vrot.lane.b32.xlu0 %v12842_v47, %s6604_s7 }
 0x139   : > { %v7573_v27 = vpop.permute.xlu1 %834 }
 0x13a   : > { %12843 = vst [vmem:[#allocation136_spill] sm:$0xff] %v7573_v27  ;;  %v7575_v61 = vpop.permute.xlu0 %832 }
 0x13b   : > { %12844 = vst [vmem:[#allocation137_spill] sm:$0xff] %v7575_v61  ;;  %1025 = vrot.lane.b32.xlu1 %v7141_v41, %s6604_s7  ;;  %v12852_v61 = vld [vmem:[#allocation44_spill] sm:$0xff] }
 0x13c   : > { %1023 = vrot.lane.b32.xlu0 %v12845_v12, %s6604_s7 }
 0x13d   : > { %v7581_v36 = vpop.permute.xlu1 %838 }
 0x13e   : > { %12846 = vst [vmem:[#allocation138_spill] sm:$0xff] %v7581_v36  ;;  %v7583_v39 = vpop.permute.xlu0 %836 }
 0x13f   : > { %12847 = vst [vmem:[#allocation139_spill] sm:$0xff] %v7583_v39  ;;  %1029 = vrot.lane.b32.xlu1 %v12848_v21, %s6604_s7  ;;  %v12855_v39 = vld [vmem:[#allocation47_spill] sm:$0xff] }
 0x140   : > { %1027 = vrot.lane.b32.xlu0 %v12849_v7, %s6604_s7 }
 0x141   : > { %v7589_v47 = vpop.permute.xlu1 %842 }
 0x142   : > { %12850 = vst [vmem:[#allocation42_spill] sm:$0xff] %v7589_v47  ;;  %v7591_v27 = vpop.permute.xlu0 %840 }
 0x143   : > { %12851 = vst [vmem:[#allocation140_spill] sm:$0xff] %v7591_v27  ;;  %1033 = vrot.lane.b32.xlu1 %v7167_v23, %s6604_s7  ;;  %v983_v27 = vrot.slane %v7348_v0, 2 }
 0x144   : > { %1031 = vrot.lane.b32.xlu0 %v12852_v61, %s6604_s7 }
 0x145   : > { %v7597_v12 = vpop.permute.xlu1 %846 }
 0x146   : > { %12853 = vst [vmem:[#allocation141_spill] sm:$0xff] %v7597_v12  ;;  %v7599_v36 = vpop.permute.xlu0 %844  ;;  %v982_v12 = vrot.slane %v7353_v29, 2 }
 0x147   : > { %12854 = vst [vmem:[#allocation142_spill] sm:$0xff] %v7599_v36  ;;  %1037 = vrot.lane.b32.xlu1 %v7180_v31, %s6604_s7  ;;  %v985_v36 = vrot.slane %v7468_v45, 2 }
 0x148   : > { %1035 = vrot.lane.b32.xlu0 %v12855_v39, %s6604_s7 }
 0x149   : > { %v7605_v7 = vpop.permute.xlu1 %888 }
 0x14a   : > { %12856 = vst [vmem:[#allocation47_spill] sm:$0xff] %v7605_v7  ;;  %v7607_v47 = vpop.permute.xlu0 %886 }
 0x14b   : > { %12857 = vst [vmem:[#allocation143_spill] sm:$0xff] %v7607_v47  ;;  %1041 = vrot.lane.b32.xlu1 %v7197_v35, %s6604_s7  ;;  %v7625_v47 = vsel %vm605_vm1, %v983_v27, %v985_v36 }
 0x14c   : > { %1039 = vrot.lane.b32.xlu0 %v7204_v63, %s6604_s7  ;;  %v7630_v63 = vsel %vm605_vm1, %v982_v12, %v983_v27 }
 0x14d   : > { %v7616_v31 = vpop.permute.xlu1 %892 }
 0x14e   : > { %12858 = vst [vmem:[#allocation144_spill] sm:$0xff] %v7616_v31  ;;  %v7618_v61 = vpop.permute.xlu0 %890 }
 0x14f   : > { %12859 = vst [vmem:[#allocation145_spill] sm:$0xff] %v7618_v61  ;;  %1045 = vrot.lane.b32.xlu1 %v7214_v58, %s6604_s7 }
 0x150   : > { %1043 = vrot.lane.b32.xlu0 %v7219_v44, %s6604_s7 }
 0x151   : > { %v7627_v7 = vpop.permute.xlu1 %896 }
 0x152   : > { %12860 = vst [vmem:[#allocation146_spill] sm:$0xff] %v7627_v7  ;;  %v7632_v45 = vpop.permute.xlu0 %894  ;;  %v8279_v7 = vld [vmem:[%s8019_s13 + $0xf8] sm:$0xff] }
 0x153   : > { %12861 = vst [vmem:[#allocation147_spill] sm:$0xff] %v7632_v45  ;;  %1049 = vrot.lane.b32.xlu1 %v7625_v47, %s6604_s7 }
 0x154   : > { %1047 = vrot.lane.b32.xlu0 %v7630_v63, %s6604_s7 }
 0x155   : > { %v7638_v31 = vpop.permute.xlu1 %900 }
 0x156   : > { %12862 = vst [vmem:[#allocation148_spill] sm:$0xff] %v7638_v31  ;;  %v7640_v61 = vpop.permute.xlu0 %898 }
 0x157   : > { %12863 = vst [vmem:[#allocation149_spill] sm:$0xff] %v7640_v61  ;;  %1087 = vrot.lane.b32.xlu1 %v6691_v11, %s6605_s8  ;;  %v8227_v61 = vld [vmem:[%s8019_s13 + $0xc8] sm:$0xff] }
 0x158   : > { %1085 = vrot.lane.b32.xlu0 %v6701_v15, %s6605_s8 }
 0x159   : > { %v7646_v12 = vpop.permute.xlu1 %904 }
 0x15a   : > { %12864 = vst [vmem:[#allocation150_spill] sm:$0xff] %v7646_v12  ;;  %v7648_v27 = vpop.permute.xlu0 %902 }
 0x15b   : > { %12865 = vst [vmem:[#allocation151_spill] sm:$0xff] %v7648_v27  ;;  %1091 = vrot.lane.b32.xlu1 %v6715_v22, %s6605_s8  ;;  %v8183_v27 = vld [vmem:[%s8019_s13 + $0x90] sm:$0xff] }
 0x15c   : > { %1089 = vrot.lane.b32.xlu0 %v6721_v24, %s6605_s8  ;;  %v1726_v12 = vrot.slane %v8183_v27, 1 }
 0x15d   : > { %v7654_v36 = vpop.permute.xlu1 %908 }
 0x15e   : > { %12866 = vst [vmem:[#allocation152_spill] sm:$0xff] %v7654_v36  ;;  %v7656_v31 = vpop.permute.xlu0 %906  ;;  %v8149_v36 = vld [vmem:[%s8019_s13 + $0x80] sm:$0xff] }
 0x15f   : > { %12867 = vst [vmem:[#allocation153_spill] sm:$0xff] %v7656_v31  ;;  %1095 = vrot.lane.b32.xlu1 %v6736_v30, %s6605_s8 }
 0x160   : > { %1093 = vrot.lane.b32.xlu0 %v6742_v32, %s6605_s8 }
 0x161   : > { %v7662_v11 = vpop.permute.xlu1 %912 }
 0x162   : > { %12868 = vst [vmem:[#allocation154_spill] sm:$0xff] %v7662_v11  ;;  %v7664_v15 = vpop.permute.xlu0 %910 }
 0x163   : > { %12869 = vst [vmem:[#allocation155_spill] sm:$0xff] %v7664_v15  ;;  %1099 = vrot.lane.b32.xlu1 %v6758_v38, %s6605_s8 }
 0x164   : > { %1097 = vrot.lane.b32.xlu0 %v6764_v40, %s6605_s8 }
 0x165   : > { %v7670_v22 = vpop.permute.xlu1 %916 }
 0x166   : > { %12870 = vst [vmem:[#allocation156_spill] sm:$0xff] %v7670_v22  ;;  %v7672_v24 = vpop.permute.xlu0 %914 }
 0x167   : > { %12871 = vst [vmem:[#allocation157_spill] sm:$0xff] %v7672_v24  ;;  %1103 = vrot.lane.b32.xlu1 %v6780_v46, %s6605_s8 }
 0x168   : > { %1101 = vrot.lane.b32.xlu0 %v6786_v48, %s6605_s8 }
 0x169   : > { %v7678_v30 = vpop.permute.xlu1 %920 }
 0x16a   : > { %12872 = vst [vmem:[#allocation158_spill] sm:$0xff] %v7678_v30  ;;  %v7680_v32 = vpop.permute.xlu0 %918 }
 0x16b   : > { %12873 = vst [vmem:[#allocation159_spill] sm:$0xff] %v7680_v32  ;;  %1107 = vrot.lane.b32.xlu1 %v6802_v54, %s6605_s8 }
 0x16c   : > { %1105 = vrot.lane.b32.xlu0 %v6808_v56, %s6605_s8 }
 0x16d   : > { %v7686_v38 = vpop.permute.xlu1 %924 }
 0x16e   : > { %12874 = vst [vmem:[#allocation160_spill] sm:$0xff] %v7686_v38  ;;  %v7688_v40 = vpop.permute.xlu0 %922 }
 0x16f   : > { %12875 = vst [vmem:[#allocation161_spill] sm:$0xff] %v7688_v40  ;;  %1111 = vrot.lane.b32.xlu1 %v6824_v62, %s6605_s8  ;;  %v12916_v40 = vld [vmem:[#allocation17_spill] sm:$0xff] }
 0x170   : > { %1109 = vrot.lane.b32.xlu0 %v6830_v3, %s6605_s8 }
 0x171   : > { %v7694_v46 = vpop.permute.xlu1 %928 }
 0x172   : > { %12876 = vst [vmem:[#allocation162_spill] sm:$0xff] %v7694_v46  ;;  %v7696_v48 = vpop.permute.xlu0 %926 }
 0x173   : > { %12877 = vst [vmem:[#allocation163_spill] sm:$0xff] %v7696_v48  ;;  %1115 = vrot.lane.b32.xlu1 %v6846_v16, %s6605_s8  ;;  %v12912_v48 = vld [vmem:[#allocation15_spill] sm:$0xff] }
 0x174   : > { %1113 = vrot.lane.b32.xlu0 %v6852_v19, %s6605_s8 }
 0x175   : > { %v7702_v54 = vpop.permute.xlu1 %932 }
 0x176   : > { %12878 = vst [vmem:[#allocation164_spill] sm:$0xff] %v7702_v54  ;;  %v7704_v56 = vpop.permute.xlu0 %930  ;;  %v12908_v54 = vld [vmem:[#allocation13_spill] sm:$0xff] }
 0x177   : > { %12879 = vst [vmem:[#allocation165_spill] sm:$0xff] %v7704_v56  ;;  %1119 = vrot.lane.b32.xlu1 %v6868_v34, %s6605_s8 }
 0x178   : > { %1117 = vrot.lane.b32.xlu0 %v6874_v37, %s6605_s8 }
 0x179   : > { %v7710_v62 = vpop.permute.xlu1 %936 }
 0x17a   : > { %12880 = vst [vmem:[#allocation166_spill] sm:$0xff] %v7710_v62  ;;  %v7712_v3 = vpop.permute.xlu0 %934 }
 0x17b   : > { %12881 = vst [vmem:[#allocation167_spill] sm:$0xff] %v7712_v3  ;;  %1123 = vrot.lane.b32.xlu1 %v6890_v53, %s6605_s8  ;;  %v12904_v3 = vld [vmem:[#allocation11_spill] sm:$0xff] }
 0x17c   : > { %1121 = vrot.lane.b32.xlu0 %v6896_v59, %s6605_s8 }
 0x17d   : > { %v7718_v16 = vpop.permute.xlu1 %940 }
 0x17e   : > { %12882 = vst [vmem:[#allocation168_spill] sm:$0xff] %v7718_v16  ;;  %v7720_v19 = vpop.permute.xlu0 %938 }
 0x17f   : > { %12883 = vst [vmem:[#allocation169_spill] sm:$0xff] %v7720_v19  ;;  %1127 = vrot.lane.b32.xlu1 %v6912_v26, %s6605_s8  ;;  %v12900_v19 = vld [vmem:[#allocation9_spill] sm:$0xff] }
 0x180   : > { %1125 = vrot.lane.b32.xlu0 %v6918_v50, %s6605_s8 }
 0x181   : > { %v7726_v34 = vpop.permute.xlu1 %944 }
 0x182   : > { %12884 = vst [vmem:[#allocation170_spill] sm:$0xff] %v7726_v34  ;;  %v7728_v37 = vpop.permute.xlu0 %942 }
 0x183   : > { %12885 = vst [vmem:[#allocation171_spill] sm:$0xff] %v7728_v37  ;;  %1131 = vrot.lane.b32.xlu1 %v6934_v20, %s6605_s8 }
 0x184   : > { %1129 = vrot.lane.b32.xlu0 %v6940_v13, %s6605_s8 }
 0x185   : > { %v7734_v53 = vpop.permute.xlu1 %948 }
 0x186   : > { %12886 = vst [vmem:[#allocation172_spill] sm:$0xff] %v7734_v53  ;;  %v7736_v59 = vpop.permute.xlu0 %946 }
 0x187   : > { %12887 = vst [vmem:[#allocation173_spill] sm:$0xff] %v7736_v59  ;;  %1135 = vrot.lane.b32.xlu1 %v6956_v60, %s6605_s8  ;;  %v7759_v60 = vld [vmem:[%s6665_s26 + $0x1a0] sm:$0xff]  ;;  %v7764_v59 = vld [vmem:[%s6665_s26 + $0x198] sm:$0xff] }
 0x188   : > { %1133 = vrot.lane.b32.xlu0 %v6962_v42, %s6605_s8 }
 0x189   : > { %v7742_v50 = vpop.permute.xlu1 %989 }
 0x18a   : > { %12888 = vst [vmem:[#allocation174_spill] sm:$0xff] %v7742_v50  ;;  %v7744_v26 = vpop.permute.xlu0 %987  ;;  %v8331_v50 = vld [vmem:[%s8019_s13 + $0x128] sm:$0xff] }
 0x18b   : > { %12889 = vst [vmem:[#allocation175_spill] sm:$0xff] %v7744_v26  ;;  %1139 = vrot.lane.b32.xlu1 %v6978_v49, %s6605_s8 }
 0x18c   : > { %1137 = vrot.lane.b32.xlu0 %v6984_v8, %s6605_s8 }
 0x18d   : > { %v7750_v20 = vpop.permute.xlu1 %993 }
 0x18e   : > { %12890 = vst [vmem:[#allocation176_spill] sm:$0xff] %v7750_v20  ;;  %v7752_v13 = vpop.permute.xlu0 %991  ;;  %v8282_v20 = vld [vmem:[%s8019_s13 + $0x100] sm:$0x3] }
 0x18f   : > { %12891 = vst [vmem:[#allocation177_spill] sm:$0xff] %v7752_v13  ;;  %1143 = vrot.lane.b32.xlu1 %v7348_v0, %s6605_s8 }
 0x190   : > { %1141 = vrot.lane.b32.xlu0 %v7353_v29, %s6605_s8 }
 0x191   : > { %v7761_v42 = vpop.permute.xlu1 %997 }
 0x192   : > { %12892 = vst [vmem:[#allocation178_spill] sm:$0xff] %v7761_v42  ;;  %v7766_v49 = vpop.permute.xlu0 %995  ;;  %v8256_v42 = vld [vmem:[%s8019_s13 + $0xe8] sm:$0x3] }
 0x193   : > { %12893 = vst [vmem:[#allocation179_spill] sm:$0xff] %v7766_v49  ;;  %1147 = vrot.lane.b32.xlu1 %v7759_v60, %s6605_s8  ;;  %v8253_v49 = vld [vmem:[%s8019_s13 + $0xe0] sm:$0xff] }
 0x194   : > { %1145 = vrot.lane.b32.xlu0 %v7764_v59, %s6605_s8 }
 0x195   : > { %v7772_v8 = vpop.permute.xlu1 %1001 }
 0x196   : > { %12894 = vst [vmem:[#allocation180_spill] sm:$0xff] %v7772_v8  ;;  %v7774_v0 = vpop.permute.xlu0 %999  ;;  %v8204_v8 = vld [vmem:[%s8019_s13 + $0xb8] sm:$0x3] }
 0x197   : > { %12895 = vst [vmem:[#allocation181_spill] sm:$0xff] %v7774_v0  ;;  %1189 = vrot.lane.b32.xlu1 %v6727_v25, %s6606_s9  ;;  %v12901_v25 = vld [vmem:[#allocation10_spill] sm:$0xff] }
 0x198   : > { %1187 = vrot.lane.b32.xlu0 %v6732_v28, %s6606_s9 }
 0x199   : > { %v7780_v29 = vpop.permute.xlu1 %1005 }
 0x19a   : > { %12896 = vst [vmem:[#allocation182_spill] sm:$0xff] %v7780_v29  ;;  %v7782_v53 = vpop.permute.xlu0 %1003  ;;  %v8178_v29 = vld [vmem:[%s8019_s13 + $0xa0] sm:$0x3] }
 0x19b   : > { %12897 = vst [vmem:[#allocation183_spill] sm:$0xff] %v7782_v53  ;;  %1193 = vrot.lane.b32.xlu1 %v6749_v33, %s6606_s9  ;;  %v12905_v33 = vld [vmem:[#allocation12_spill] sm:$0xff] }
 0x19c   : > { %1191 = vrot.lane.b32.xlu0 %v12768_v17, %s6606_s9  ;;  %v8175_v53 = vld [vmem:[%s8019_s13 + $0x98] sm:$0xff] }
 0x19d   : > { %v7788_v37 = vpop.permute.xlu1 %1009 }
 0x19e   : > { %12898 = vst [vmem:[#allocation184_spill] sm:$0xff] %v7788_v37  ;;  %v7790_v34 = vpop.permute.xlu0 %1007 }
 0x19f   : > { %12899 = vst [vmem:[#allocation185_spill] sm:$0xff] %v7790_v34  ;;  %1197 = vrot.lane.b32.xlu1 %v12900_v19, %s6606_s9  ;;  %v12909_v19 = vld [vmem:[#allocation14_spill] sm:$0xff]  ;;  %v8131_v34 = vld [vmem:[%s8019_s13 + $0x60] sm:$0xff] }
 0x1a0   : > { %1195 = vrot.lane.b32.xlu0 %v12901_v25, %s6606_s9  ;;  %v1716_v31 = vrot.slane %v8131_v34, 1 }
 0x1a1   : > { %v7796_v28 = vpop.permute.xlu1 %1013 }
 0x1a2   : > { %12902 = vst [vmem:[#allocation186_spill] sm:$0xff] %v7796_v28  ;;  %v7798_v16 = vpop.permute.xlu0 %1011 }
 0x1a3   : > { %12903 = vst [vmem:[#allocation187_spill] sm:$0xff] %v7798_v16  ;;  %1201 = vrot.lane.b32.xlu1 %v12904_v3, %s6606_s9  ;;  %v12913_v3 = vld [vmem:[#allocation16_spill] sm:$0xff] }
 0x1a4   : > { %1199 = vrot.lane.b32.xlu0 %v12905_v33, %s6606_s9 }
 0x1a5   : > { %v7804_v17 = vpop.permute.xlu1 %1017 }
 0x1a6   : > { %12906 = vst [vmem:[#allocation188_spill] sm:$0xff] %v7804_v17  ;;  %v7806_v62 = vpop.permute.xlu0 %1015 }
 0x1a7   : > { %12907 = vst [vmem:[#allocation189_spill] sm:$0xff] %v7806_v62  ;;  %1205 = vrot.lane.b32.xlu1 %v12908_v54, %s6606_s9  ;;  %v12917_v54 = vld [vmem:[#allocation18_spill] sm:$0xff]  ;;  %v8073_v62 = vld [vmem:[%s8019_s13 + $0x38] sm:$0xff] }
 0x1a8   : > { %1203 = vrot.lane.b32.xlu0 %v12909_v19, %s6606_s9 }
 0x1a9   : > { %v7812_v25 = vpop.permute.xlu1 %1021 }
 0x1aa   : > { %12910 = vst [vmem:[#allocation190_spill] sm:$0xff] %v7812_v25  ;;  %v7814_v56 = vpop.permute.xlu0 %1019 }
 0x1ab   : > { %12911 = vst [vmem:[#allocation191_spill] sm:$0xff] %v7814_v56  ;;  %1209 = vrot.lane.b32.xlu1 %v12912_v48, %s6606_s9  ;;  %v12920_v56 = vld [vmem:[#allocation19_spill] sm:$0xff]  ;;  %v12921_v48 = vld [vmem:[#allocation20_spill] sm:$0xff] }
 0x1ac   : > { %1207 = vrot.lane.b32.xlu0 %v12913_v3, %s6606_s9 }
 0x1ad   : > { %v7820_v33 = vpop.permute.xlu1 %1025 }
 0x1ae   : > { %12914 = vst [vmem:[#allocation192_spill] sm:$0xff] %v7820_v33  ;;  %v7822_v46 = vpop.permute.xlu0 %1023 }
 0x1af   : > { %12915 = vst [vmem:[#allocation193_spill] sm:$0xff] %v7822_v46  ;;  %1213 = vrot.lane.b32.xlu1 %v12916_v40, %s6606_s9  ;;  %v12924_v46 = vld [vmem:[#allocation21_spill] sm:$0xff]  ;;  %v12925_v40 = vld [vmem:[#allocation22_spill] sm:$0xff] }
 0x1b0   : > { %1211 = vrot.lane.b32.xlu0 %v12917_v54, %s6606_s9 }
 0x1b1   : > { %v7828_v19 = vpop.permute.xlu1 %1029 }
 0x1b2   : > { %12918 = vst [vmem:[#allocation194_spill] sm:$0xff] %v7828_v19  ;;  %v7830_v38 = vpop.permute.xlu0 %1027 }
 0x1b3   : > { %12919 = vst [vmem:[#allocation195_spill] sm:$0xff] %v7830_v38  ;;  %1217 = vrot.lane.b32.xlu1 %v12920_v56, %s6606_s9  ;;  %v12928_v38 = vld [vmem:[#allocation23_spill] sm:$0xff] }
 0x1b4   : > { %1215 = vrot.lane.b32.xlu0 %v12921_v48, %s6606_s9  ;;  %v12929_v48 = vld [vmem:[#allocation24_spill] sm:$0xff] }
 0x1b5   : > { %v7836_v3 = vpop.permute.xlu1 %1033 }
 0x1b6   : > { %12922 = vst [vmem:[#allocation196_spill] sm:$0xff] %v7836_v3  ;;  %v7838_v33 = vpop.permute.xlu0 %1031 }
 0x1b7   : > { %12923 = vst [vmem:[#allocation197_spill] sm:$0xff] %v7838_v33  ;;  %1221 = vrot.lane.b32.xlu1 %v12924_v46, %s6606_s9  ;;  %v12932_v46 = vld [vmem:[#allocation25_spill] sm:$0xff]  ;;  %v12936_v33 = vld [vmem:[#allocation27_spill] sm:$0xff] }
 0x1b8   : > { %1219 = vrot.lane.b32.xlu0 %v12925_v40, %s6606_s9  ;;  %v12933_v40 = vld [vmem:[#allocation26_spill] sm:$0xff] }
 0x1b9   : > { %v7844_v54 = vpop.permute.xlu1 %1037 }
 0x1ba   : > { %12926 = vst [vmem:[#allocation198_spill] sm:$0xff] %v7844_v54  ;;  %v7846_v19 = vpop.permute.xlu0 %1035 }
 0x1bb   : > { %12927 = vst [vmem:[#allocation199_spill] sm:$0xff] %v7846_v19  ;;  %1225 = vrot.lane.b32.xlu1 %v12928_v38, %s6606_s9  ;;  %v12937_v38 = vld [vmem:[#allocation28_spill] sm:$0xff] }
 0x1bc   : > { %1223 = vrot.lane.b32.xlu0 %v12929_v48, %s6606_s9 }
 0x1bd   : > { %v7852_v56 = vpop.permute.xlu1 %1041 }
 0x1be   : > { %12930 = vst [vmem:[#allocation200_spill] sm:$0xff] %v7852_v56  ;;  %v7854_v3 = vpop.permute.xlu0 %1039 }
 0x1bf   : > { %12931 = vst [vmem:[#allocation201_spill] sm:$0xff] %v7854_v3  ;;  %1229 = vrot.lane.b32.xlu1 %v12932_v46, %s6606_s9  ;;  %v12940_v3 = vld [vmem:[#allocation29_spill] sm:$0xff]  ;;  %v12941_v46 = vld [vmem:[#allocation30_spill] sm:$0xff] }
 0x1c0   : > { %1227 = vrot.lane.b32.xlu0 %v12933_v40, %s6606_s9 }
 0x1c1   : > { %v7860_v54 = vpop.permute.xlu1 %1045 }
 0x1c2   : > { %12934 = vst [vmem:[#allocation202_spill] sm:$0xff] %v7860_v54  ;;  %v7862_v19 = vpop.permute.xlu0 %1043  ;;  %v7879_v54 = vld [vmem:[%s6665_s26 + $0x1a8] sm:$0x3] }
 0x1c3   : > { %12935 = vst [vmem:[#allocation203_spill] sm:$0xff] %v7862_v19  ;;  %1233 = vrot.lane.b32.xlu1 %v12936_v33, %s6606_s9  ;;  %v1183_v33 = vrot.slane %v7759_v60, 1 }
 0x1c4   : > { %1231 = vrot.lane.b32.xlu0 %v12937_v38, %s6606_s9  ;;  %v1185_v38 = vrot.slane %v7879_v54, 1 }
 0x1c5   : > { %v7868_v48 = vpop.permute.xlu1 %1049 }
 0x1c6   : > { %12938 = vst [vmem:[#allocation204_spill] sm:$0xff] %v7868_v48  ;;  %v7870_v56 = vpop.permute.xlu0 %1047 }
 0x1c7   : > { %12939 = vst [vmem:[#allocation205_spill] sm:$0xff] %v7870_v56  ;;  %1237 = vrot.lane.b32.xlu1 %v12940_v3, %s6606_s9  ;;  %v1182_v3 = vrot.slane %v7764_v59, 1 }
 0x1c8   : > { %1235 = vrot.lane.b32.xlu0 %v12941_v46, %s6606_s9 }
 0x1c9   : > { %v7876_v40 = vpop.permute.xlu1 %1087 }
 0x1ca   : > { %12942 = vst [vmem:[#allocation206_spill] sm:$0xff] %v7876_v40  ;;  %v7881_v19 = vpop.permute.xlu0 %1085 }
 0x1cb   : > { %12943 = vst [vmem:[#allocation207_spill] sm:$0xff] %v7881_v19  ;;  %1241 = vrot.lane.b32.xlu1 %v7004_v57, %s6606_s9  ;;  %v1186_v57 = vsel %vm428_vm0, %v1183_v33, %v1185_v38  ;;  %v8313_v19 = vld [vmem:[%s8019_s13 + $0x108] sm:$0xff] }
 0x1cc   : > { %1239 = vrot.lane.b32.xlu0 %v12813_v1, %s6606_s9  ;;  %v1184_v1 = vsel %vm428_vm0, %v1182_v3, %v1183_v33  ;;  %v1751_v26 = vrot.slane %v8313_v19, 1 }
 0x1cd   : > { %v7890_v56 = vpop.permute.xlu1 %1091 }
 0x1ce   : > { %12944 = vst [vmem:[#allocation208_spill] sm:$0xff] %v7890_v56  ;;  %v7892_v46 = vpop.permute.xlu0 %1089 }
 0x1cf   : > { %12945 = vst [vmem:[#allocation209_spill] sm:$0xff] %v7892_v46  ;;  %1245 = vrot.lane.b32.xlu1 %v7488_v55, %s6606_s9 }
 0x1d0   : > { %1243 = vrot.lane.b32.xlu0 %v7493_v9, %s6606_s9 }
 0x1d1   : > { %v7899_v48 = vpop.permute.xlu1 %1095 }
 0x1d2   : > { %12946 = vst [vmem:[#allocation210_spill] sm:$0xff] %v7899_v48  ;;  %v7902_v25 = vpop.permute.xlu0 %1093 }
 0x1d3   : > { %12947 = vst [vmem:[#allocation211_spill] sm:$0xff] %v7902_v25  ;;  %1249 = vrot.lane.b32.xlu1 %v1186_v57, %s6606_s9 }
 0x1d4   : > { %1247 = vrot.lane.b32.xlu0 %v1184_v1, %s6606_s9 }
 0x1d5   : > { %v7906_v32 = vpop.permute.xlu1 %1099 }
 0x1d6   : > { %12948 = vst [vmem:[#allocation212_spill] sm:$0xff] %v7906_v32  ;;  %v7908_v30 = vpop.permute.xlu0 %1097  ;;  %v8201_v32 = vld [vmem:[%s8019_s13 + $0xb0] sm:$0xff] }
 0x1d7   : > { %12949 = vst [vmem:[#allocation213_spill] sm:$0xff] %v7908_v30  ;;  %1290 = vrot.lane.b32.xlu1 %v7037_v43, %s6607_s10 }
 0x1d8   : > { %1288 = vrot.lane.b32.xlu0 %v7042_v14, %s6607_s10 }
 0x1d9   : > { %v7914_v38 = vpop.permute.xlu1 %1103 }
 0x1da   : > { %12950 = vst [vmem:[#allocation214_spill] sm:$0xff] %v7914_v38  ;;  %v7916_v33 = vpop.permute.xlu0 %1101 }
 0x1db   : > { %12951 = vst [vmem:[#allocation215_spill] sm:$0xff] %v7916_v33  ;;  %1294 = vrot.lane.b32.xlu1 %v7050_v5, %s6607_s10  ;;  %v12956_v5 = vld [vmem:[#allocation35_spill] sm:$0xff] }
 0x1dc   : > { %1292 = vrot.lane.b32.xlu0 %v12824_v2, %s6607_s10 }
 0x1dd   : > { %v7922_v57 = vpop.permute.xlu1 %1107 }
 0x1de   : > { %12952 = vst [vmem:[#allocation216_spill] sm:$0xff] %v7922_v57  ;;  %v7924_v1 = vpop.permute.xlu0 %1105  ;;  %v8126_v57 = vld [vmem:[%s8019_s13 + $0x70] sm:$0x3] }
 0x1df   : > { %12953 = vst [vmem:[#allocation217_spill] sm:$0xff] %v7924_v1  ;;  %1298 = vrot.lane.b32.xlu1 %v7063_v51, %s6607_s10  ;;  %v12959_v51 = vld [vmem:[#allocation36_spill] sm:$0xff]  ;;  %v8123_v1 = vld [vmem:[%s8019_s13 + $0x68] sm:$0xff] }
 0x1e0   : > { %1296 = vrot.lane.b32.xlu0 %v12827_v18, %s6607_s10 }
 0x1e1   : > { %v7930_v43 = vpop.permute.xlu1 %1111 }
 0x1e2   : > { %12954 = vst [vmem:[#allocation218_spill] sm:$0xff] %v7930_v43  ;;  %v7932_v14 = vpop.permute.xlu0 %1109  ;;  %v8105_v43 = vld [vmem:[%s8019_s13 + $0x48] sm:$0xff] }
 0x1e3   : > { %12955 = vst [vmem:[#allocation219_spill] sm:$0xff] %v7932_v14  ;;  %1302 = vrot.lane.b32.xlu1 %v7076_v6, %s6607_s10  ;;  %v12962_v6 = vld [vmem:[#allocation37_spill] sm:$0xff]  ;;  %v1711_v11 = vrot.slane %v8105_v43, 1 }
 0x1e4   : > { %1300 = vrot.lane.b32.xlu0 %v12956_v5, %s6607_s10 }
 0x1e5   : > { %v7938_v2 = vpop.permute.xlu1 %1115 }
 0x1e6   : > { %12957 = vst [vmem:[#allocation35_spill] sm:$0xff] %v7938_v2  ;;  %v7940_v3 = vpop.permute.xlu0 %1113 }
 0x1e7   : > { %12958 = vst [vmem:[#allocation220_spill] sm:$0xff] %v7940_v3  ;;  %1306 = vrot.lane.b32.xlu1 %v7089_v4, %s6607_s10  ;;  %v12965_v4 = vld [vmem:[#allocation38_spill] sm:$0xff] }
 0x1e8   : > { %1304 = vrot.lane.b32.xlu0 %v12959_v51, %s6607_s10 }
 0x1e9   : > { %v7946_v18 = vpop.permute.xlu1 %1119 }
 0x1ea   : > { %12960 = vst [vmem:[#allocation36_spill] sm:$0xff] %v7946_v18  ;;  %v7948_v55 = vpop.permute.xlu0 %1117 }
 0x1eb   : > { %12961 = vst [vmem:[#allocation221_spill] sm:$0xff] %v7948_v55  ;;  %1310 = vrot.lane.b32.xlu1 %v7102_v52, %s6607_s10  ;;  %v12968_v55 = vld [vmem:[#allocation39_spill] sm:$0xff]  ;;  %v12969_v52 = vld [vmem:[#allocation40_spill] sm:$0xff] }
 0x1ec   : > { %1308 = vrot.lane.b32.xlu0 %v12962_v6, %s6607_s10 }
 0x1ed   : > { %v7954_v5 = vpop.permute.xlu1 %1123 }
 0x1ee   : > { %12963 = vst [vmem:[#allocation37_spill] sm:$0xff] %v7954_v5  ;;  %v7956_v9 = vpop.permute.xlu0 %1121 }
 0x1ef   : > { %12964 = vst [vmem:[#allocation222_spill] sm:$0xff] %v7956_v9  ;;  %1314 = vrot.lane.b32.xlu1 %v7115_v10, %s6607_s10  ;;  %v12972_v10 = vld [vmem:[#allocation41_spill] sm:$0xff] }
 0x1f0   : > { %1312 = vrot.lane.b32.xlu0 %v12965_v4, %s6607_s10 }
 0x1f1   : > { %v7962_v51 = vpop.permute.xlu1 %1127 }
 0x1f2   : > { %12966 = vst [vmem:[#allocation38_spill] sm:$0xff] %v7962_v51  ;;  %v7964_v18 = vpop.permute.xlu0 %1125 }
 0x1f3   : > { %12967 = vst [vmem:[#allocation223_spill] sm:$0xff] %v7964_v18  ;;  %1318 = vrot.lane.b32.xlu1 %v12968_v55, %s6607_s10  ;;  %v12975_v55 = vld [vmem:[#allocation43_spill] sm:$0xff] }
 0x1f4   : > { %1316 = vrot.lane.b32.xlu0 %v12969_v52, %s6607_s10 }
 0x1f5   : > { %v7970_v6 = vpop.permute.xlu1 %1131 }
 0x1f6   : > { %12970 = vst [vmem:[#allocation39_spill] sm:$0xff] %v7970_v6  ;;  %v7972_v5 = vpop.permute.xlu0 %1129 }
 0x1f7   : > { %12971 = vst [vmem:[#allocation40_spill] sm:$0xff] %v7972_v5  ;;  %1322 = vrot.lane.b32.xlu1 %v7141_v41, %s6607_s10  ;;  %v12978_v41 = vld [vmem:[#allocation44_spill] sm:$0xff]  ;;  %v8053_v5 = vld [vmem:[%s8019_s13 + $0x20] sm:$0xff] }
 0x1f8   : > { %1320 = vrot.lane.b32.xlu0 %v12972_v10, %s6607_s10  ;;  %v1702_v9 = vrot.slane %v8053_v5, 1 }
 0x1f9   : > { %v7978_v4 = vpop.permute.xlu1 %1135 }
 0x1fa   : > { %12973 = vst [vmem:[#allocation41_spill] sm:$0xff] %v7978_v4  ;;  %v7980_v51 = vpop.permute.xlu0 %1133 }
 0x1fb   : > { %12974 = vst [vmem:[#allocation224_spill] sm:$0xff] %v7980_v51  ;;  %1326 = vrot.lane.b32.xlu1 %v12848_v21, %s6607_s10  ;;  %v12981_v21 = vld [vmem:[#allocation45_spill] sm:$0xff] }
 0x1fc   : > { %1324 = vrot.lane.b32.xlu0 %v12975_v55, %s6607_s10 }
 0x1fd   : > { %v7986_v52 = vpop.permute.xlu1 %1139 }
 0x1fe   : > { %12976 = vst [vmem:[#allocation43_spill] sm:$0xff] %v7986_v52  ;;  %v7988_v6 = vpop.permute.xlu0 %1137 }
 0x1ff   : > { %12977 = vst [vmem:[#allocation225_spill] sm:$0xff] %v7988_v6  ;;  %1330 = vrot.lane.b32.xlu1 %v7167_v23, %s6607_s10  ;;  %v12984_v23 = vld [vmem:[#allocation50_spill] sm:$0xff] }
 0x200   : > { %1328 = vrot.lane.b32.xlu0 %v12978_v41, %s6607_s10 }
 0x201   : > { %v7994_v10 = vpop.permute.xlu1 %1143 }
 0x202   : > { %12979 = vst [vmem:[#allocation44_spill] sm:$0xff] %v7994_v10  ;;  %v7996_v51 = vpop.permute.xlu0 %1141 }
 0x203   : > { %12980 = vst [vmem:[#allocation226_spill] sm:$0xff] %v7996_v51  ;;  %1334 = vrot.lane.b32.xlu1 %v12981_v21, %s6607_s10  ;;  %v1283_v21 = vrot.slane %v7764_v59, 2 }
 0x204   : > { %1332 = vrot.lane.b32.xlu0 %v12855_v39, %s6607_s10  ;;  %v1286_v39 = vrot.slane %v7879_v54, 2 }
 0x205   : > { %v8002_v55 = vpop.permute.xlu1 %1147 }
 0x206   : > { %12982 = vst [vmem:[#allocation45_spill] sm:$0xff] %v8002_v55  ;;  %v8004_v52 = vpop.permute.xlu0 %1145  ;;  %v8034_v55 = vld [vmem:[%s8019_s13 + $0x10] sm:$0x3] }
 0x207   : > { %12983 = vst [vmem:[#allocation227_spill] sm:$0xff] %v8004_v52  ;;  %1338 = vrot.lane.b32.xlu1 %v7197_v35, %s6607_s10  ;;  %v1284_v35 = vrot.slane %v7759_v60, 2  ;;  %v8031_v52 = vld [vmem:[%s8019_s13 + $0x8] sm:$0xff]  ;;  %v1699_v59 = vrot.slane %v8034_v55, 1 }
 0x208   : > { %1336 = vrot.lane.b32.xlu0 %v12984_v23, %s6607_s10  ;;  %v1697_v54 = vrot.slane %v8031_v52, 1 }
 0x209   : > { %v8010_v41 = vpop.permute.xlu1 %1189  ;;  %v1285_v6 = vsel %vm605_vm1, %v1283_v21, %v1284_v35 }
 0x20a   : > { %12985 = vst [vmem:[#allocation50_spill] sm:$0xff] %v8010_v41  ;;  %v8012_v10 = vpop.permute.xlu0 %1187  ;;  %v1700_v18 = vsel %vm428_vm0, %v1697_v54, %v1699_v59  ;;  %v8081_v59 = vld [vmem:[%s8019_s13 + $0x30] sm:$0xff]  ;;  %v8308_v41 = vld [vmem:[%s8019_s13 + $0x118] sm:$0x3] }
 0x20b   : > { %12986 = vst [vmem:[#allocation228_spill] sm:$0xff] %v8012_v10  ;;  %1342 = vrot.lane.b32.xlu1 %v7214_v58, %s6607_s10  ;;  %v8039_v58 = vld [vmem:[%s8019_s13] sm:$0xff]  ;;  %v1706_v14 = vrot.slane %v8081_v59, 1  ;;  %v8305_v10 = vld [vmem:[%s8019_s13 + $0x110] sm:$0xff] }
 0x20c   : > { %1340 = vrot.lane.b32.xlu0 %v7219_v44, %s6607_s10  ;;  %v1287_v44 = vsel %vm605_vm1, %v1284_v35, %v1286_v39  ;;  %v1696_v4 = vrot.slane %v8039_v58, 1  ;;  %v8061_v39 = vld [vmem:[%s8019_s13 + $0x18] sm:$0xff] }
 0x20d   : > { %v8028_v23 = vpop.permute.xlu1 %1193  ;;  %v1701_v2 = vrot.slane %v8061_v39, 1 }
 0x20e   : > { %12987 = vst [vmem:[#allocation229_spill] sm:$0xff] %v8028_v23  ;;  %v8036_v51 = vpop.permute.xlu0 %1191  ;;  %v1698_v3 = vsel %vm428_vm0, %v1696_v4, %v1697_v54  ;;  %v1707_v4 = vrot.slane %v8073_v62, 1  ;;  %v8261_v23 = vld [vmem:[%s8019_s13 + $0xd8] sm:$0xff] }
 0x20f   : > { %12988 = vst [vmem:[#allocation230_spill] sm:$0xff] %v8036_v51  ;;  %1346 = vrot.lane.b32.xlu1 %v7625_v47, %s6607_s10  ;;  %v8056_v47 = vld [vmem:[%s8019_s13 + $0x28] sm:$0x3]  ;;  %v8093_v22 = vsel %vm428_vm0, %v1701_v2, %v1702_v9  ;;  %v1741_v56 = vrot.slane %v8261_v23, 1  ;;  %v8287_v51 = vld [vmem:[%s8019_s13 + $0xf0] sm:$0xff] }
 0x210   : > { %1344 = vrot.lane.b32.xlu0 %v7630_v63, %s6607_s10  ;;  %v1704_v35 = vrot.slane %v8056_v47, 1  ;;  %v8119_v15 = vsel %vm428_vm0, %v1706_v14, %v1707_v4  ;;  %v1746_v13 = vrot.slane %v8287_v51, 1 }
 0x211   : > { %v8048_v60 = vpop.permute.xlu1 %1197 }
 0x212   : > { %12989 = vst [vmem:[#allocation231_spill] sm:$0xff] %v8048_v60  ;;  %v8058_v63 = vpop.permute.xlu0 %1195  ;;  %v8086_v17 = vsel %vm428_vm0, %v1702_v9, %v1704_v35  ;;  %v8235_v60 = vld [vmem:[%s8019_s13 + $0xc0] sm:$0xff] }
 0x213   : > { %12990 = vst [vmem:[#allocation232_spill] sm:$0xff] %v8058_v63  ;;  %1350 = vrot.lane.b32.xlu1 %v1287_v44, %s6607_s10  ;;  %v8076_v44 = vld [vmem:[%s8019_s13 + $0x40] sm:$0x3]  ;;  %v8230_v63 = vld [vmem:[%s8019_s13 + $0xd0] sm:$0x3]  ;;  %v1736_v48 = vrot.slane %v8235_v60, 1 }
 0x214   : > { %1348 = vrot.lane.b32.xlu0 %v1285_v6, %s6607_s10  ;;  %v1709_v54 = vrot.slane %v8076_v44, 1 }
 0x215   : > { %v8068_v21 = vpop.permute.xlu1 %1201 }
 0x216   : > { %12991 = vst [vmem:[#allocation233_spill] sm:$0xff] %v8068_v21  ;;  %v8078_v6 = vpop.permute.xlu0 %1199  ;;  %v8112_v9 = vsel %vm428_vm0, %v1707_v4, %v1709_v54  ;;  %v1717_v4 = vrot.slane %v8123_v1, 1 }
 0x217   : > { %12992 = vst [vmem:[#allocation234_spill] sm:$0xff] %v8078_v6  ;;  %1778 = vrot.lane.b32.xlu1 %v1700_v18, %s6600_s27  ;;  %v8097_v18 = vld [vmem:[%s8019_s13 + $0x50] sm:$0xff]  ;;  %v8209_v6 = vld [vmem:[%s8019_s13 + $0xa8] sm:$0xff] }
 0x218   : > { %1776 = vrot.lane.b32.xlu0 %v1698_v3, %s6600_s27  ;;  %v8100_v3 = vld [vmem:[%s8019_s13 + $0x58] sm:$0x3]  ;;  %v1712_v2 = vrot.slane %v8097_v18, 1  ;;  %v1731_v0 = vrot.slane %v8209_v6, 1 }
 0x219   : > { %v8090_v24 = vpop.permute.xlu1 %1205  ;;  %v1714_v16 = vrot.slane %v8100_v3, 1 }
 0x21a   : > { %12993 = vst [vmem:[#allocation235_spill] sm:$0xff] %v8090_v24  ;;  %v8102_v35 = vpop.permute.xlu0 %1203  ;;  %v8157_v24 = vld [vmem:[%s8019_s13 + $0x78] sm:$0xff] }
 0x21b   : > { %12994 = vst [vmem:[#allocation236_spill] sm:$0xff] %v8102_v35  ;;  %1782 = vrot.lane.b32.xlu1 %v8086_v17, %s6600_s27  ;;  %v8138_v14 = vsel %vm428_vm0, %v1712_v2, %v1714_v16  ;;  %v8152_v35 = vld [vmem:[%s8019_s13 + $0x88] sm:$0x3]  ;;  %v1721_v38 = vrot.slane %v8157_v24, 1 }
 0x21c   : > { %1780 = vrot.lane.b32.xlu0 %v8093_v22, %s6600_s27  ;;  %12997 = vst [vmem:[#allocation239_spill] sm:$0xff] %v8138_v14 }
 0x21d   : > { %v8116_v28 = vpop.permute.xlu1 %1209 }
 0x21e   : > { %12995 = vst [vmem:[#allocation237_spill] sm:$0xff] %v8116_v28  ;;  %v8128_v54 = vpop.permute.xlu0 %1207  ;;  %v1719_v28 = vrot.slane %v8126_v57, 1 }
 0x21f   : > { %12996 = vst [vmem:[#allocation238_spill] sm:$0xff] %v8128_v54  ;;  %1786 = vrot.lane.b32.xlu1 %v8112_v9, %s6600_s27  ;;  %v8145_v54 = vsel %vm428_vm0, %v1711_v11, %v1712_v2  ;;  %v1722_v2 = vrot.slane %v8149_v36, 1 }
 0x220   : > { %1784 = vrot.lane.b32.xlu0 %v8119_v15, %s6600_s27  ;;  %12999 = vst [vmem:[#allocation241_spill] sm:$0xff] %v8145_v54  ;;  %v8164_v11 = vsel %vm428_vm0, %v1717_v4, %v1719_v28 }
 0x221   : > { %v8142_v37 = vpop.permute.xlu1 %1213  ;;  %13001 = vst [vmem:[#allocation243_spill] sm:$0xff] %v8164_v11 }
 0x222   : > { %12998 = vst [vmem:[#allocation240_spill] sm:$0xff] %v8142_v37  ;;  %v8154_v16 = vpop.permute.xlu0 %1211  ;;  %v1724_v37 = vrot.slane %v8152_v35, 1 }
 0x223   : > { %13000 = vst [vmem:[#allocation242_spill] sm:$0xff] %v8154_v16  ;;  %1790 = vrot.lane.b32.xlu1 %v8138_v14, %s6600_s27  ;;  %v8171_v16 = vsel %vm428_vm0, %v1716_v31, %v1717_v4  ;;  %v1727_v4 = vrot.slane %v8175_v53, 1 }
 0x224   : > { %1788 = vrot.lane.b32.xlu0 %v8145_v54, %s6600_s27  ;;  %13003 = vst [vmem:[#allocation245_spill] sm:$0xff] %v8171_v16  ;;  %v8190_v31 = vsel %vm428_vm0, %v1722_v2, %v1724_v37 }
 0x225   : > { %v8168_v33 = vpop.permute.xlu1 %1217  ;;  %13005 = vst [vmem:[#allocation247_spill] sm:$0xff] %v8190_v31 }
 0x226   : > { %13002 = vst [vmem:[#allocation244_spill] sm:$0xff] %v8168_v33  ;;  %v8180_v28 = vpop.permute.xlu0 %1215  ;;  %v1729_v33 = vrot.slane %v8178_v29, 1 }
 0x227   : > { %13004 = vst [vmem:[#allocation246_spill] sm:$0xff] %v8180_v28  ;;  %1794 = vrot.lane.b32.xlu1 %v8164_v11, %s6600_s27  ;;  %v8197_v28 = vsel %vm428_vm0, %v1721_v38, %v1722_v2  ;;  %v1732_v2 = vrot.slane %v8201_v32, 1 }
 0x228   : > { %1792 = vrot.lane.b32.xlu0 %v8171_v16, %s6600_s27  ;;  %13007 = vst [vmem:[#allocation249_spill] sm:$0xff] %v8197_v28  ;;  %v8216_v38 = vsel %vm428_vm0, %v1727_v4, %v1729_v33  ;;  %v8409_v16 = vld [vmem:[%s8019_s13 + $0x170] sm:$0xff] }
 0x229   : > { %v8194_v21 = vpop.permute.xlu1 %1221  ;;  %13009 = vst [vmem:[#allocation251_spill] sm:$0xff] %v8216_v38 }
 0x22a   : > { %13006 = vst [vmem:[#allocation248_spill] sm:$0xff] %v8194_v21  ;;  %v8206_v37 = vpop.permute.xlu0 %1219  ;;  %v1734_v21 = vrot.slane %v8204_v8, 1 }
 0x22b   : > { %13008 = vst [vmem:[#allocation250_spill] sm:$0xff] %v8206_v37  ;;  %1798 = vrot.lane.b32.xlu1 %v8190_v31, %s6600_s27  ;;  %v8223_v37 = vsel %vm428_vm0, %v1726_v12, %v1727_v4  ;;  %v1737_v4 = vrot.slane %v8227_v61, 1 }
 0x22c   : > { %1796 = vrot.lane.b32.xlu0 %v8197_v28, %s6600_s27  ;;  %13011 = vst [vmem:[#allocation253_spill] sm:$0xff] %v8223_v37  ;;  %v8242_v12 = vsel %vm428_vm0, %v1732_v2, %v1734_v21 }
 0x22d   : > { %v8220_v30 = vpop.permute.xlu1 %1225  ;;  %13013 = vst [vmem:[#allocation255_spill] sm:$0xff] %v8242_v12 }
 0x22e   : > { %13010 = vst [vmem:[#allocation252_spill] sm:$0xff] %v8220_v30  ;;  %v8232_v33 = vpop.permute.xlu0 %1223  ;;  %v1739_v30 = vrot.slane %v8230_v63, 1 }
 0x22f   : > { %13012 = vst [vmem:[#allocation254_spill] sm:$0xff] %v8232_v33  ;;  %1802 = vrot.lane.b32.xlu1 %v8216_v38, %s6600_s27  ;;  %v8249_v33 = vsel %vm428_vm0, %v1731_v0, %v1732_v2  ;;  %v1742_v2 = vrot.slane %v8253_v49, 1  ;;  %v8391_v38 = vld [vmem:[%s8019_s13 + $0x150] sm:$0xff] }
 0x230   : > { %1800 = vrot.lane.b32.xlu0 %v8223_v37, %s6600_s27  ;;  %13015 = vst [vmem:[#allocation257_spill] sm:$0xff] %v8249_v33  ;;  %v8268_v0 = vsel %vm428_vm0, %v1737_v4, %v1739_v30 }
 0x231   : > { %v8246_v25 = vpop.permute.xlu1 %1229  ;;  %13017 = vst [vmem:[#allocation259_spill] sm:$0xff] %v8268_v0 }
 0x232   : > { %13014 = vst [vmem:[#allocation256_spill] sm:$0xff] %v8246_v25  ;;  %v8258_v21 = vpop.permute.xlu0 %1227  ;;  %v1744_v25 = vrot.slane %v8256_v42, 1 }
 0x233   : > { %13016 = vst [vmem:[#allocation258_spill] sm:$0xff] %v8258_v21  ;;  %1806 = vrot.lane.b32.xlu1 %v8242_v12, %s6600_s27  ;;  %v8275_v21 = vsel %vm428_vm0, %v1736_v48, %v1737_v4  ;;  %v1747_v4 = vrot.slane %v8279_v7, 1 }
 0x234   : > { %1804 = vrot.lane.b32.xlu0 %v8249_v33, %s6600_s27  ;;  %13019 = vst [vmem:[#allocation261_spill] sm:$0xff] %v8275_v21  ;;  %v8294_v48 = vsel %vm428_vm0, %v1742_v2, %v1744_v25  ;;  %v8365_v33 = vld [vmem:[%s8019_s13 + $0x138] sm:$0xff] }
 0x235   : > { %v8272_v45 = vpop.permute.xlu1 %1233  ;;  %13021 = vst [vmem:[#allocation263_spill] sm:$0xff] %v8294_v48  ;;  %v1761_v37 = vrot.slane %v8365_v33, 1 }
 0x236   : > { %13018 = vst [vmem:[#allocation260_spill] sm:$0xff] %v8272_v45  ;;  %v8284_v30 = vpop.permute.xlu0 %1231  ;;  %v1749_v45 = vrot.slane %v8282_v20, 1 }
 0x237   : > { %13020 = vst [vmem:[#allocation262_spill] sm:$0xff] %v8284_v30  ;;  %1810 = vrot.lane.b32.xlu1 %v8268_v0, %s6600_s27  ;;  %v8301_v30 = vsel %vm428_vm0, %v1741_v56, %v1742_v2  ;;  %v1752_v2 = vrot.slane %v8305_v10, 1 }
 0x238   : > { %1808 = vrot.lane.b32.xlu0 %v8275_v21, %s6600_s27  ;;  %13023 = vst [vmem:[#allocation265_spill] sm:$0xff] %v8301_v30  ;;  %v8320_v56 = vsel %vm428_vm0, %v1747_v4, %v1749_v45 }
 0x239   : > { %v8298_v46 = vpop.permute.xlu1 %1237  ;;  %13025 = vst [vmem:[#allocation267_spill] sm:$0xff] %v8320_v56 }
 0x23a   : > { %13022 = vst [vmem:[#allocation264_spill] sm:$0xff] %v8298_v46  ;;  %v8310_v25 = vpop.permute.xlu0 %1235  ;;  %v1754_v46 = vrot.slane %v8308_v41, 1 }
 0x23b   : > { %13024 = vst [vmem:[#allocation266_spill] sm:$0xff] %v8310_v25  ;;  %1814 = vrot.lane.b32.xlu1 %v8294_v48, %s6600_s27  ;;  %v8327_v25 = vsel %vm428_vm0, %v1746_v13, %v1747_v4  ;;  %v8339_v48 = vld [vmem:[%s8019_s13 + $0x120] sm:$0xff]  ;;  %v1757_v4 = vrot.slane %v8331_v50, 1 }
 0x23c   : > { %1812 = vrot.lane.b32.xlu0 %v8301_v30, %s6600_s27  ;;  %13027 = vst [vmem:[#allocation269_spill] sm:$0xff] %v8327_v25  ;;  %v8334_v30 = vld [vmem:[%s8019_s13 + $0x130] sm:$0x3]  ;;  %v8346_v13 = vsel %vm428_vm0, %v1752_v2, %v1754_v46  ;;  %v1756_v0 = vrot.slane %v8339_v48, 1 }
 0x23d   : > { %v8324_v40 = vpop.permute.xlu1 %1241  ;;  %13029 = vst [vmem:[#allocation271_spill] sm:$0xff] %v8346_v13 }
 0x23e   : > { %13026 = vst [vmem:[#allocation268_spill] sm:$0xff] %v8324_v40  ;;  %v8336_v45 = vpop.permute.xlu0 %1239  ;;  %v1759_v40 = vrot.slane %v8334_v30, 1 }
 0x23f   : > { %13028 = vst [vmem:[#allocation270_spill] sm:$0xff] %v8336_v45  ;;  %1818 = vrot.lane.b32.xlu1 %v8320_v56, %s6600_s27  ;;  %v8353_v45 = vsel %vm428_vm0, %v1751_v26, %v1752_v2  ;;  %v8357_v56 = vld [vmem:[%s8019_s13 + $0x140] sm:$0xff] }
 0x240   : > { %1816 = vrot.lane.b32.xlu0 %v8327_v25, %s6600_s27  ;;  %13031 = vst [vmem:[#allocation273_spill] sm:$0xff] %v8353_v45  ;;  %v8360_v25 = vld [vmem:[%s8019_s13 + $0x148] sm:$0x3]  ;;  %v8372_v26 = vsel %vm428_vm0, %v1757_v4, %v1759_v40  ;;  %v1762_v2 = vrot.slane %v8357_v56, 1 }
 0x241   : > { %v8350_v21 = vpop.permute.xlu1 %1245  ;;  %13033 = vst [vmem:[#allocation275_spill] sm:$0xff] %v8372_v26 }
 0x242   : > { %13030 = vst [vmem:[#allocation272_spill] sm:$0xff] %v8350_v21  ;;  %v8362_v46 = vpop.permute.xlu0 %1243  ;;  %v1764_v21 = vrot.slane %v8360_v25, 1  ;;  %v8405_v31 = vsel %vm428_vm0, %v1761_v37, %v1762_v2  ;;  %v1772_v37 = vrot.slane %v8409_v16, 1 }
 0x243   : > { %13032 = vst [vmem:[#allocation274_spill] sm:$0xff] %v8362_v46  ;;  %1822 = vrot.lane.b32.xlu1 %v8346_v13, %s6600_s27  ;;  %v8379_v46 = vsel %vm428_vm0, %v1756_v0, %v1757_v4  ;;  %v8383_v13 = vld [vmem:[%s8019_s13 + $0x158] sm:$0xff]  ;;  %13039 = vst [vmem:[#allocation281_spill] sm:$0xff] %v8405_v31 }
 0x244   : > { %1820 = vrot.lane.b32.xlu0 %v8353_v45, %s6600_s27  ;;  %13035 = vst [vmem:[#allocation277_spill] sm:$0xff] %v8379_v46  ;;  %v8386_v45 = vld [vmem:[%s8019_s13 + $0x160] sm:$0x3]  ;;  %v8398_v0 = vsel %vm428_vm0, %v1762_v2, %v1764_v21  ;;  %v1767_v4 = vrot.slane %v8383_v13, 1 }
 0x245   : > { %v8376_v12 = vpop.permute.xlu1 %1249  ;;  %13037 = vst [vmem:[#allocation279_spill] sm:$0xff] %v8398_v0 }
 0x246   : > { %13034 = vst [vmem:[#allocation276_spill] sm:$0xff] %v8376_v12  ;;  %v8388_v40 = vpop.permute.xlu0 %1247  ;;  %v1769_v12 = vrot.slane %v8386_v45, 1 }
 0x247   : > { %13036 = vst [vmem:[#allocation278_spill] sm:$0xff] %v8388_v40  ;;  %1826 = vrot.lane.b32.xlu1 %v8372_v26, %s6600_s27  ;;  %v1766_v40 = vrot.slane %v8391_v38, 1  ;;  %v8412_v26 = vld [vmem:[%s8019_s13 + $0x178] sm:$0x3] }
 0x248   : > { %1824 = vrot.lane.b32.xlu0 %v8379_v46, %s6600_s27  ;;  %v8417_v46 = vld [vmem:[%s8019_s13 + $0x168] sm:$0xff]  ;;  %v8424_v21 = vsel %vm428_vm0, %v1767_v4, %v1769_v12  ;;  %v1774_v2 = vrot.slane %v8412_v26, 1 }
 0x249   : > { %v8402_v28 = vpop.permute.xlu1 %1290  ;;  %13041 = vst [vmem:[#allocation283_spill] sm:$0xff] %v8424_v21  ;;  %v8431_v54 = vsel %vm428_vm0, %v1766_v40, %v1767_v4  ;;  %v1872_v4 = vrot.slane %v8039_v58, 2  ;;  %v1877_v58 = vrot.slane %v8061_v39, 2 }
 0x24a   : > { %13038 = vst [vmem:[#allocation280_spill] sm:$0xff] %v8402_v28  ;;  %v8414_v11 = vpop.permute.xlu0 %1288  ;;  %13043 = vst [vmem:[#allocation285_spill] sm:$0xff] %v8431_v54  ;;  %v8441_v12 = vsel %vm428_vm0, %v1772_v37, %v1774_v2 }
 0x24b   : > { %13040 = vst [vmem:[#allocation282_spill] sm:$0xff] %v8414_v11  ;;  %1830 = vrot.lane.b32.xlu1 %v8398_v0, %s6600_s27  ;;  %v1771_v11 = vrot.slane %v8417_v46, 1  ;;  %13045 = vst [vmem:[#allocation287_spill] sm:$0xff] %v8441_v12 }
 0x24c   : > { %1828 = vrot.lane.b32.xlu0 %v8405_v31, %s6600_s27  ;;  %v1873_v31 = vrot.slane %v8031_v52, 2  ;;  %v1878_v52 = vrot.slane %v8053_v5, 2 }
 0x24d   : > { %v8428_v28 = vpop.permute.xlu1 %1294  ;;  %v8448_v40 = vsel %vm428_vm0, %v1771_v11, %v1772_v37 }
 0x24e   : > { %13042 = vst [vmem:[#allocation284_spill] sm:$0xff] %v8428_v28  ;;  %v8434_v14 = vpop.permute.xlu0 %1292  ;;  %v1875_v28 = vrot.slane %v8034_v55, 2  ;;  %13047 = vst [vmem:[#allocation289_spill] sm:$0xff] %v8448_v40  ;;  %v1880_v55 = vrot.slane %v8056_v47, 2  ;;  %v1874_v11 = vsel %vm605_vm1, %v1872_v4, %v1873_v31 }
 0x24f   : > { %13044 = vst [vmem:[#allocation286_spill] sm:$0xff] %v8434_v14  ;;  %1834 = vrot.lane.b32.xlu1 %v8424_v21, %s6600_s27 }
 0x250   : > { %1832 = vrot.lane.b32.xlu0 %v8431_v54, %s6600_s27  ;;  %v1876_v2 = vsel %vm605_vm1, %v1873_v31, %v1875_v28  ;;  %v1883_v28 = vrot.slane %v8073_v62, 2  ;;  %v1882_v31 = vrot.slane %v8081_v59, 2 }
 0x251   : > { %v8445_v0 = vpop.permute.xlu1 %1298 }
 0x252   : > { %13046 = vst [vmem:[#allocation288_spill] sm:$0xff] %v8445_v0  ;;  %v8451_v14 = vpop.permute.xlu0 %1296 }
 0x253   : > { %13048 = vst [vmem:[#allocation290_spill] sm:$0xff] %v8451_v14  ;;  %1838 = vrot.lane.b32.xlu1 %v8441_v12, %s6600_s27  ;;  %v8469_v14 = vsel %vm605_vm1, %v1878_v52, %v1880_v55  ;;  %v1890_v55 = vrot.slane %v8100_v3, 2  ;;  %v1893_v3 = vrot.slane %v8123_v1, 2 }
 0x254   : > { %1836 = vrot.lane.b32.xlu0 %v8448_v40, %s6600_s27  ;;  %v1885_v40 = vrot.slane %v8076_v44, 2  ;;  %v1888_v44 = vrot.slane %v8097_v18, 2 }
 0x255   : > { %v8460_v0 = vpop.permute.xlu1 %1302 }
 0x256   : > { %13049 = vst [vmem:[#allocation291_spill] sm:$0xff] %v8460_v0  ;;  %v8464_v37 = vpop.permute.xlu0 %1300  ;;  %v8476_v0 = vsel %vm605_vm1, %v1877_v58, %v1878_v52  ;;  %v8493_v52 = vsel %vm605_vm1, %v1882_v31, %v1883_v28  ;;  %v1887_v58 = vrot.slane %v8105_v43, 2  ;;  %v1892_v31 = vrot.slane %v8131_v34, 2 }
 0x257   : > { %13050 = vst [vmem:[#allocation292_spill] sm:$0xff] %v8464_v37  ;;  %1954 = vrot.lane.b32.xlu1 %v1876_v2, %s6601_s28  ;;  %v8486_v2 = vsel %vm605_vm1, %v1883_v28, %v1885_v40  ;;  %v8503_v40 = vsel %vm605_vm1, %v1888_v44, %v1890_v55 }
 0x258   : > { %1952 = vrot.lane.b32.xlu0 %v1874_v11, %s6601_s28  ;;  %v8510_v28 = vsel %vm605_vm1, %v1887_v58, %v1888_v44  ;;  %v8527_v44 = vsel %vm605_vm1, %v1892_v31, %v1893_v3  ;;  %v1897_v58 = vrot.slane %v8157_v24, 2  ;;  %v1902_v31 = vrot.slane %v8183_v27, 2 }
 0x259   : > { %v8473_v47 = vpop.permute.xlu1 %1306  ;;  %13056 = vst [vmem:[#allocation298_spill] sm:$0xff] %v8510_v28  ;;  %13059 = vst [vmem:[#allocation301_spill] sm:$0xff] %v8527_v44 }
 0x25a   : > { %13051 = vst [vmem:[#allocation293_spill] sm:$0xff] %v8473_v47  ;;  %v8479_v4 = vpop.permute.xlu0 %1304 }
 0x25b   : > { %13052 = vst [vmem:[#allocation294_spill] sm:$0xff] %v8479_v4  ;;  %1958 = vrot.lane.b32.xlu1 %v8469_v14, %s6601_s28 }
 0x25c   : > { %1956 = vrot.lane.b32.xlu0 %v8476_v0, %s6601_s28 }
 0x25d   : > { %v8490_v11 = vpop.permute.xlu1 %1310 }
 0x25e   : > { %13053 = vst [vmem:[#allocation295_spill] sm:$0xff] %v8490_v11  ;;  %v8496_v4 = vpop.permute.xlu0 %1308  ;;  %v1895_v11 = vrot.slane %v8126_v57, 2  ;;  %v1898_v57 = vrot.slane %v8149_v36, 2 }
 0x25f   : > { %13054 = vst [vmem:[#allocation296_spill] sm:$0xff] %v8496_v4  ;;  %1962 = vrot.lane.b32.xlu1 %v8486_v2, %s6601_s28 }
 0x260   : > { %1960 = vrot.lane.b32.xlu0 %v8493_v52, %s6601_s28  ;;  %v8520_v55 = vsel %vm605_vm1, %v1893_v3, %v1895_v11  ;;  %v8544_v3 = vsel %vm605_vm1, %v1897_v58, %v1898_v57  ;;  %v1907_v58 = vrot.slane %v8209_v6, 2 }
 0x261   : > { %v8507_v47 = vpop.permute.xlu1 %1314  ;;  %13062 = vst [vmem:[#allocation304_spill] sm:$0xff] %v8544_v3 }
 0x262   : > { %13055 = vst [vmem:[#allocation297_spill] sm:$0xff] %v8507_v47  ;;  %v8513_v4 = vpop.permute.xlu0 %1312  ;;  %v1900_v47 = vrot.slane %v8152_v35, 2  ;;  %v1903_v35 = vrot.slane %v8175_v53, 2 }
 0x263   : > { %13057 = vst [vmem:[#allocation299_spill] sm:$0xff] %v8513_v4  ;;  %1966 = vrot.lane.b32.xlu1 %v8503_v40, %s6601_s28 }
 0x264   : > { %1964 = vrot.lane.b32.xlu0 %v8510_v28, %s6601_s28  ;;  %v8537_v11 = vsel %vm605_vm1, %v1898_v57, %v1900_v47  ;;  %v8561_v57 = vsel %vm605_vm1, %v1902_v31, %v1903_v35  ;;  %v1912_v31 = vrot.slane %v8235_v60, 2 }
 0x265   : > { %v8524_v37 = vpop.permute.xlu1 %1318  ;;  %13065 = vst [vmem:[#allocation307_spill] sm:$0xff] %v8561_v57 }
 0x266   : > { %13058 = vst [vmem:[#allocation300_spill] sm:$0xff] %v8524_v37  ;;  %v8530_v4 = vpop.permute.xlu0 %1316  ;;  %v1905_v37 = vrot.slane %v8178_v29, 2  ;;  %v1908_v29 = vrot.slane %v8201_v32, 2 }
 0x267   : > { %13060 = vst [vmem:[#allocation302_spill] sm:$0xff] %v8530_v4  ;;  %1970 = vrot.lane.b32.xlu1 %v8520_v55, %s6601_s28 }
 0x268   : > { %1968 = vrot.lane.b32.xlu0 %v8527_v44, %s6601_s28  ;;  %v8554_v47 = vsel %vm605_vm1, %v1903_v35, %v1905_v37  ;;  %v8578_v35 = vsel %vm605_vm1, %v1907_v58, %v1908_v29  ;;  %v1917_v58 = vrot.slane %v8261_v23, 2 }
 0x269   : > { %v8541_v28 = vpop.permute.xlu1 %1322  ;;  %13068 = vst [vmem:[#allocation310_spill] sm:$0xff] %v8578_v35 }
 0x26a   : > { %13061 = vst [vmem:[#allocation303_spill] sm:$0xff] %v8541_v28  ;;  %v8547_v4 = vpop.permute.xlu0 %1320  ;;  %v1910_v28 = vrot.slane %v8204_v8, 2  ;;  %v1913_v8 = vrot.slane %v8227_v61, 2 }
 0x26b   : > { %13063 = vst [vmem:[#allocation305_spill] sm:$0xff] %v8547_v4  ;;  %1974 = vrot.lane.b32.xlu1 %v8537_v11, %s6601_s28 }
 0x26c   : > { %1972 = vrot.lane.b32.xlu0 %v8544_v3, %s6601_s28  ;;  %v8571_v37 = vsel %vm605_vm1, %v1908_v29, %v1910_v28  ;;  %v8595_v29 = vsel %vm605_vm1, %v1912_v31, %v1913_v8  ;;  %v1922_v31 = vrot.slane %v8287_v51, 2 }
 0x26d   : > { %v8558_v44 = vpop.permute.xlu1 %1326  ;;  %13071 = vst [vmem:[#allocation313_spill] sm:$0xff] %v8595_v29 }
 0x26e   : > { %13064 = vst [vmem:[#allocation306_spill] sm:$0xff] %v8558_v44  ;;  %v8564_v4 = vpop.permute.xlu0 %1324  ;;  %v1915_v44 = vrot.slane %v8230_v63, 2  ;;  %v1918_v63 = vrot.slane %v8253_v49, 2 }
 0x26f   : > { %13066 = vst [vmem:[#allocation308_spill] sm:$0xff] %v8564_v4  ;;  %1978 = vrot.lane.b32.xlu1 %v8554_v47, %s6601_s28 }
 0x270   : > { %1976 = vrot.lane.b32.xlu0 %v8561_v57, %s6601_s28  ;;  %v8588_v28 = vsel %vm605_vm1, %v1913_v8, %v1915_v44  ;;  %v8612_v8 = vsel %vm605_vm1, %v1917_v58, %v1918_v63  ;;  %v1927_v58 = vrot.slane %v8313_v19, 2 }
 0x271   : > { %v8575_v3 = vpop.permute.xlu1 %1330  ;;  %13074 = vst [vmem:[#allocation316_spill] sm:$0xff] %v8612_v8 }
 0x272   : > { %13067 = vst [vmem:[#allocation309_spill] sm:$0xff] %v8575_v3  ;;  %v8581_v4 = vpop.permute.xlu0 %1328  ;;  %v1920_v3 = vrot.slane %v8256_v42, 2  ;;  %v1923_v42 = vrot.slane %v8279_v7, 2 }
 0x273   : > { %13069 = vst [vmem:[#allocation311_spill] sm:$0xff] %v8581_v4  ;;  %1982 = vrot.lane.b32.xlu1 %v8571_v37, %s6601_s28 }
 0x274   : > { %1980 = vrot.lane.b32.xlu0 %v8578_v35, %s6601_s28  ;;  %v8605_v44 = vsel %vm605_vm1, %v1918_v63, %v1920_v3  ;;  %v8629_v63 = vsel %vm605_vm1, %v1922_v31, %v1923_v42  ;;  %v1932_v31 = vrot.slane %v8339_v48, 2 }
 0x275   : > { %v8592_v57 = vpop.permute.xlu1 %1334  ;;  %13077 = vst [vmem:[#allocation319_spill] sm:$0xff] %v8629_v63 }
 0x276   : > { %13070 = vst [vmem:[#allocation312_spill] sm:$0xff] %v8592_v57  ;;  %v8598_v4 = vpop.permute.xlu0 %1332  ;;  %v1925_v57 = vrot.slane %v8282_v20, 2  ;;  %v1928_v20 = vrot.slane %v8305_v10, 2 }
 0x277   : > { %13072 = vst [vmem:[#allocation314_spill] sm:$0xff] %v8598_v4  ;;  %1986 = vrot.lane.b32.xlu1 %v8588_v28, %s6601_s28 }
 0x278   : > { %1984 = vrot.lane.b32.xlu0 %v8595_v29, %s6601_s28  ;;  %v8622_v3 = vsel %vm605_vm1, %v1923_v42, %v1925_v57  ;;  %v8646_v42 = vsel %vm605_vm1, %v1927_v58, %v1928_v20  ;;  %v1937_v58 = vrot.slane %v8365_v33, 2 }
 0x279   : > { %v8609_v35 = vpop.permute.xlu1 %1338  ;;  %13081 = vst [vmem:[#allocation323_spill] sm:$0xff] %v8646_v42 }
 0x27a   : > { %13073 = vst [vmem:[#allocation315_spill] sm:$0xff] %v8609_v35  ;;  %v8615_v4 = vpop.permute.xlu0 %1336  ;;  %v1930_v35 = vrot.slane %v8308_v41, 2  ;;  %v1933_v41 = vrot.slane %v8331_v50, 2 }
 0x27b   : > { %13075 = vst [vmem:[#allocation317_spill] sm:$0xff] %v8615_v4  ;;  %1990 = vrot.lane.b32.xlu1 %v8605_v44, %s6601_s28 }
 0x27c   : > { %1988 = vrot.lane.b32.xlu0 %v8612_v8, %s6601_s28  ;;  %v8639_v57 = vsel %vm605_vm1, %v1928_v20, %v1930_v35  ;;  %v8663_v20 = vsel %vm605_vm1, %v1932_v31, %v1933_v41  ;;  %v1942_v31 = vrot.slane %v8391_v38, 2 }
 0x27d   : > { %v8626_v29 = vpop.permute.xlu1 %1342  ;;  %13079 = vst [vmem:[#allocation321_spill] sm:$0xff] %v8639_v57  ;;  %13085 = vst [vmem:[#allocation327_spill] sm:$0xff] %v8663_v20 }
 0x27e   : > { %13076 = vst [vmem:[#allocation318_spill] sm:$0xff] %v8626_v29  ;;  %v8632_v4 = vpop.permute.xlu0 %1340  ;;  %v1935_v29 = vrot.slane %v8334_v30, 2  ;;  %v1938_v30 = vrot.slane %v8357_v56, 2 }
 0x27f   : > { %13078 = vst [vmem:[#allocation320_spill] sm:$0xff] %v8632_v4  ;;  %1994 = vrot.lane.b32.xlu1 %v8622_v3, %s6601_s28 }
 0x280   : > { %1992 = vrot.lane.b32.xlu0 %v8629_v63, %s6601_s28  ;;  %v8656_v35 = vsel %vm605_vm1, %v1933_v41, %v1935_v29  ;;  %v8680_v41 = vsel %vm605_vm1, %v1937_v58, %v1938_v30  ;;  %v1947_v58 = vrot.slane %v8417_v46, 2 }
 0x281   : > { %v8643_v8 = vpop.permute.xlu1 %1346  ;;  %13083 = vst [vmem:[#allocation325_spill] sm:$0xff] %v8656_v35  ;;  %13088 = vst [vmem:[#allocation330_spill] sm:$0xff] %v8680_v41 }
 0x282   : > { %13080 = vst [vmem:[#allocation322_spill] sm:$0xff] %v8643_v8  ;;  %v8649_v4 = vpop.permute.xlu0 %1344  ;;  %v1940_v8 = vrot.slane %v8360_v25, 2  ;;  %v1943_v25 = vrot.slane %v8383_v13, 2 }
 0x283   : > { %13082 = vst [vmem:[#allocation324_spill] sm:$0xff] %v8649_v4  ;;  %1998 = vrot.lane.b32.xlu1 %v8639_v57, %s6601_s28 }
 0x284   : > { %1996 = vrot.lane.b32.xlu0 %v8646_v42, %s6601_s28  ;;  %v8673_v29 = vsel %vm605_vm1, %v1938_v30, %v1940_v8  ;;  %v8697_v30 = vsel %vm605_vm1, %v1942_v31, %v1943_v25 }
 0x285   : > { %v8660_v63 = vpop.permute.xlu1 %1350  ;;  %13087 = vst [vmem:[#allocation329_spill] sm:$0xff] %v8673_v29  ;;  %13092 = vst [vmem:[#allocation334_spill] sm:$0xff] %v8697_v30 }
 0x286   : > { %13084 = vst [vmem:[#allocation326_spill] sm:$0xff] %v8660_v63  ;;  %v8666_v4 = vpop.permute.xlu0 %1348  ;;  %v1945_v63 = vrot.slane %v8386_v45, 2  ;;  %v1948_v45 = vrot.slane %v8409_v16, 2 }
 0x287   : > { %13086 = vst [vmem:[#allocation328_spill] sm:$0xff] %v8666_v4  ;;  %2002 = vrot.lane.b32.xlu1 %v8656_v35, %s6601_s28  ;;  %v1950_v35 = vrot.slane %v8412_v26, 2 }
 0x288   : > { %2000 = vrot.lane.b32.xlu0 %v8663_v20, %s6601_s28  ;;  %v8690_v8 = vsel %vm605_vm1, %v1943_v25, %v1945_v63  ;;  %v8712_v26 = vsel %vm605_vm1, %v1947_v58, %v1948_v45 }
 0x289   : > { %v8677_v42 = vpop.permute.xlu1 %1778  ;;  %13090 = vst [vmem:[#allocation332_spill] sm:$0xff] %v8690_v8  ;;  %v8707_v63 = vsel %vm605_vm1, %v1948_v45, %v1950_v35  ;;  %13096 = vst [vmem:[#allocation338_spill] sm:$0xff] %v8712_v26 }
 0x28a   : > { %v8683_v4 = vpop.permute.xlu0 %1776  ;;  %13094 = vst [vmem:[#allocation336_spill] sm:$0xff] %v8707_v63 }
 0x28b   : > { %13089 = vst [vmem:[#allocation331_spill] sm:$0xff] %v8683_v4  ;;  %2006 = vrot.lane.b32.xlu1 %v8673_v29, %s6601_s28  ;;  %v13179_v4 = vld [vmem:[#allocation281_spill] sm:$0xff] }
 0x28c   : > { %2004 = vrot.lane.b32.xlu0 %v8680_v41, %s6601_s28  ;;  %v13147_v41 = vld [vmem:[#allocation249_spill] sm:$0xff] }
 0x28d   : > { %v8694_v20 = vpop.permute.xlu1 %1782 }
 0x28e   : > { %13091 = vst [vmem:[#allocation333_spill] sm:$0xff] %v8694_v20  ;;  %v8700_v57 = vpop.permute.xlu0 %1780  ;;  %v13170_v20 = vld [vmem:[#allocation271_spill] sm:$0xff] }
 0x28f   : > { %13093 = vst [vmem:[#allocation335_spill] sm:$0xff] %v8700_v57  ;;  %2010 = vrot.lane.b32.xlu1 %v8690_v8, %s6601_s28  ;;  %v13174_v57 = vld [vmem:[#allocation275_spill] sm:$0xff] }
 0x290   : > { %2008 = vrot.lane.b32.xlu0 %v8697_v30, %s6601_s28 }
 0x291   : > { %v8709_v29 = vpop.permute.xlu1 %1786 }
 0x292   : > { %13095 = vst [vmem:[#allocation337_spill] sm:$0xff] %v8709_v29  ;;  %v8714_v25 = vpop.permute.xlu0 %1784 }
 0x293   : > { %13097 = vst [vmem:[#allocation339_spill] sm:$0xff] %v8714_v25  ;;  %2014 = vrot.lane.b32.xlu1 %v8707_v63, %s6601_s28  ;;  %v13163_v25 = vld [vmem:[#allocation265_spill] sm:$0xff] }
 0x294   : > { %2012 = vrot.lane.b32.xlu0 %v8712_v26, %s6601_s28 }
 0x295   : > { %v8720_v31 = vpop.permute.xlu1 %1790 }
 0x296   : > { %13098 = vst [vmem:[#allocation340_spill] sm:$0xff] %v8720_v31  ;;  %v8722_v8 = vpop.permute.xlu0 %1788 }
 0x297   : > { %13099 = vst [vmem:[#allocation341_spill] sm:$0xff] %v8722_v8  ;;  %2052 = vrot.lane.b32.xlu1 %v8053_v5, %s6602_s29 }
 0x298   : > { %2050 = vrot.lane.b32.xlu0 %v8061_v39, %s6602_s29 }
 0x299   : > { %v8728_v35 = vpop.permute.xlu1 %1794 }
 0x29a   : > { %13100 = vst [vmem:[#allocation342_spill] sm:$0xff] %v8728_v35  ;;  %v8730_v45 = vpop.permute.xlu0 %1792 }
 0x29b   : > { %13101 = vst [vmem:[#allocation343_spill] sm:$0xff] %v8730_v45  ;;  %2056 = vrot.lane.b32.xlu1 %v8073_v62, %s6602_s29 }
 0x29c   : > { %2054 = vrot.lane.b32.xlu0 %v8081_v59, %s6602_s29 }
 0x29d   : > { %v8736_v58 = vpop.permute.xlu1 %1798 }
 0x29e   : > { %13102 = vst [vmem:[#allocation344_spill] sm:$0xff] %v8736_v58  ;;  %v8738_v26 = vpop.permute.xlu0 %1796 }
 0x29f   : > { %13103 = vst [vmem:[#allocation345_spill] sm:$0xff] %v8738_v26  ;;  %2060 = vrot.lane.b32.xlu1 %v8097_v18, %s6602_s29 }
 0x2a0   : > { %2058 = vrot.lane.b32.xlu0 %v8105_v43, %s6602_s29 }
 0x2a1   : > { %v8744_v5 = vpop.permute.xlu1 %1802 }
 0x2a2   : > { %13104 = vst [vmem:[#allocation346_spill] sm:$0xff] %v8744_v5  ;;  %v8746_v39 = vpop.permute.xlu0 %1800 }
 0x2a3   : > { %13105 = vst [vmem:[#allocation347_spill] sm:$0xff] %v8746_v39  ;;  %2064 = vrot.lane.b32.xlu1 %v8123_v1, %s6602_s29 }
 0x2a4   : > { %2062 = vrot.lane.b32.xlu0 %v8131_v34, %s6602_s29 }
 0x2a5   : > { %v8752_v63 = vpop.permute.xlu1 %1806 }
 0x2a6   : > { %13106 = vst [vmem:[#allocation348_spill] sm:$0xff] %v8752_v63  ;;  %v8754_v30 = vpop.permute.xlu0 %1804 }
 0x2a7   : > { %13107 = vst [vmem:[#allocation349_spill] sm:$0xff] %v8754_v30  ;;  %2068 = vrot.lane.b32.xlu1 %v8149_v36, %s6602_s29 }
 0x2a8   : > { %2066 = vrot.lane.b32.xlu0 %v8157_v24, %s6602_s29 }
 0x2a9   : > { %v8760_v26 = vpop.permute.xlu1 %1810 }
 0x2aa   : > { %13108 = vst [vmem:[#allocation350_spill] sm:$0xff] %v8760_v26  ;;  %v8762_v5 = vpop.permute.xlu0 %1808 }
 0x2ab   : > { %13109 = vst [vmem:[#allocation351_spill] sm:$0xff] %v8762_v5  ;;  %2072 = vrot.lane.b32.xlu1 %v8175_v53, %s6602_s29 }
 0x2ac   : > { %2070 = vrot.lane.b32.xlu0 %v8183_v27, %s6602_s29 }
 0x2ad   : > { %v8768_v39 = vpop.permute.xlu1 %1814 }
 0x2ae   : > { %13110 = vst [vmem:[#allocation352_spill] sm:$0xff] %v8768_v39  ;;  %v8770_v63 = vpop.permute.xlu0 %1812 }
 0x2af   : > { %13111 = vst [vmem:[#allocation353_spill] sm:$0xff] %v8770_v63  ;;  %2076 = vrot.lane.b32.xlu1 %v8201_v32, %s6602_s29 }
 0x2b0   : > { %2074 = vrot.lane.b32.xlu0 %v8209_v6, %s6602_s29 }
 0x2b1   : > { %v8776_v30 = vpop.permute.xlu1 %1818 }
 0x2b2   : > { %13112 = vst [vmem:[#allocation354_spill] sm:$0xff] %v8776_v30  ;;  %v8778_v26 = vpop.permute.xlu0 %1816 }
 0x2b3   : > { %13113 = vst [vmem:[#allocation355_spill] sm:$0xff] %v8778_v26  ;;  %2080 = vrot.lane.b32.xlu1 %v8227_v61, %s6602_s29 }
 0x2b4   : > { %2078 = vrot.lane.b32.xlu0 %v8235_v60, %s6602_s29 }
 0x2b5   : > { %v8784_v5 = vpop.permute.xlu1 %1822 }
 0x2b6   : > { %13114 = vst [vmem:[#allocation356_spill] sm:$0xff] %v8784_v5  ;;  %v8786_v39 = vpop.permute.xlu0 %1820 }
 0x2b7   : > { %13115 = vst [vmem:[#allocation357_spill] sm:$0xff] %v8786_v39  ;;  %2084 = vrot.lane.b32.xlu1 %v8253_v49, %s6602_s29 }
 0x2b8   : > { %2082 = vrot.lane.b32.xlu0 %v8261_v23, %s6602_s29 }
 0x2b9   : > { %v8792_v63 = vpop.permute.xlu1 %1826 }
 0x2ba   : > { %13116 = vst [vmem:[#allocation358_spill] sm:$0xff] %v8792_v63  ;;  %v8794_v30 = vpop.permute.xlu0 %1824  ;;  %v13138_v63 = vld [vmem:[#allocation239_spill] sm:$0xff] }
 0x2bb   : > { %13117 = vst [vmem:[#allocation359_spill] sm:$0xff] %v8794_v30  ;;  %2088 = vrot.lane.b32.xlu1 %v8279_v7, %s6602_s29 }
 0x2bc   : > { %2086 = vrot.lane.b32.xlu0 %v8287_v51, %s6602_s29 }
 0x2bd   : > { %v8800_v26 = vpop.permute.xlu1 %1830 }
 0x2be   : > { %13118 = vst [vmem:[#allocation360_spill] sm:$0xff] %v8800_v26  ;;  %v8802_v5 = vpop.permute.xlu0 %1828 }
 0x2bf   : > { %13119 = vst [vmem:[#allocation361_spill] sm:$0xff] %v8802_v5  ;;  %2092 = vrot.lane.b32.xlu1 %v8305_v10, %s6602_s29 }
 0x2c0   : > { %2090 = vrot.lane.b32.xlu0 %v8313_v19, %s6602_s29 }
 0x2c1   : > { %v8808_v39 = vpop.permute.xlu1 %1834 }
 0x2c2   : > { %13120 = vst [vmem:[#allocation362_spill] sm:$0xff] %v8808_v39  ;;  %v8810_v30 = vpop.permute.xlu0 %1832 }
 0x2c3   : > { %13121 = vst [vmem:[#allocation363_spill] sm:$0xff] %v8810_v30  ;;  %2096 = vrot.lane.b32.xlu1 %v8331_v50, %s6602_s29 }
 0x2c4   : > { %2094 = vrot.lane.b32.xlu0 %v8339_v48, %s6602_s29 }
 0x2c5   : > { %v8816_v26 = vpop.permute.xlu1 %1838 }
 0x2c6   : > { %13122 = vst [vmem:[#allocation364_spill] sm:$0xff] %v8816_v26  ;;  %v8818_v5 = vpop.permute.xlu0 %1836 }
 0x2c7   : > { %13123 = vst [vmem:[#allocation365_spill] sm:$0xff] %v8818_v5  ;;  %2100 = vrot.lane.b32.xlu1 %v8357_v56, %s6602_s29  ;;  %v8846_v5 = vld [vmem:[%s8019_s13 + $0x180] sm:$0xff] }
 0x2c8   : > { %2098 = vrot.lane.b32.xlu0 %v8365_v33, %s6602_s29  ;;  %v8841_v33 = vld [vmem:[%s8019_s13 + $0x188] sm:$0xff]  ;;  %13130 = vst [vmem:[#allocation372_spill] sm:$0xff] %v8846_v5 }
 0x2c9   : > { %v8824_v19 = vpop.permute.xlu1 %1954  ;;  %13128 = vst [vmem:[#allocation370_spill] sm:$0xff] %v8841_v33 }
 0x2ca   : > { %13124 = vst [vmem:[#allocation366_spill] sm:$0xff] %v8824_v19  ;;  %v8826_v10 = vpop.permute.xlu0 %1952 }
 0x2cb   : > { %13125 = vst [vmem:[#allocation367_spill] sm:$0xff] %v8826_v10  ;;  %2104 = vrot.lane.b32.xlu1 %v8383_v13, %s6602_s29  ;;  %v13175_v10 = vld [vmem:[#allocation277_spill] sm:$0xff] }
 0x2cc   : > { %2102 = vrot.lane.b32.xlu0 %v8391_v38, %s6602_s29 }
 0x2cd   : > { %v8832_v50 = vpop.permute.xlu1 %1958 }
 0x2ce   : > { %13126 = vst [vmem:[#allocation368_spill] sm:$0xff] %v8832_v50  ;;  %v8834_v48 = vpop.permute.xlu0 %1956  ;;  %v13167_v50 = vld [vmem:[#allocation269_spill] sm:$0xff] }
 0x2cf   : > { %13127 = vst [vmem:[#allocation369_spill] sm:$0xff] %v8834_v48  ;;  %2108 = vrot.lane.b32.xlu1 %v8409_v16, %s6602_s29  ;;  %v13171_v48 = vld [vmem:[#allocation273_spill] sm:$0xff] }
 0x2d0   : > { %2106 = vrot.lane.b32.xlu0 %v8417_v46, %s6602_s29 }
 0x2d1   : > { %v8843_v56 = vpop.permute.xlu1 %1962 }
 0x2d2   : > { %13129 = vst [vmem:[#allocation371_spill] sm:$0xff] %v8843_v56  ;;  %v8848_v13 = vpop.permute.xlu0 %1960 }
 0x2d3   : > { %13131 = vst [vmem:[#allocation373_spill] sm:$0xff] %v8848_v13  ;;  %2112 = vrot.lane.b32.xlu1 %v8841_v33, %s6602_s29  ;;  %v13159_v13 = vld [vmem:[#allocation261_spill] sm:$0xff] }
 0x2d4   : > { %2110 = vrot.lane.b32.xlu0 %v8846_v5, %s6602_s29 }
 0x2d5   : > { %v8854_v38 = vpop.permute.xlu1 %1966 }
 0x2d6   : > { %13132 = vst [vmem:[#allocation374_spill] sm:$0xff] %v8854_v38  ;;  %v8856_v16 = vpop.permute.xlu0 %1964  ;;  %v13151_v38 = vld [vmem:[#allocation253_spill] sm:$0xff] }
 0x2d7   : > { %13133 = vst [vmem:[#allocation375_spill] sm:$0xff] %v8856_v16  ;;  %2154 = vrot.lane.b32.xlu1 %v8086_v17, %s6603_s30  ;;  %v13139_v17 = vld [vmem:[#allocation241_spill] sm:$0xff] }
 0x2d8   : > { %2152 = vrot.lane.b32.xlu0 %v8093_v22, %s6603_s30  ;;  %v13155_v16 = vld [vmem:[#allocation257_spill] sm:$0xff] }
 0x2d9   : > { %v8862_v46 = vpop.permute.xlu1 %1970 }
 0x2da   : > { %13134 = vst [vmem:[#allocation376_spill] sm:$0xff] %v8862_v46  ;;  %v8864_v26 = vpop.permute.xlu0 %1968  ;;  %v13143_v46 = vld [vmem:[#allocation245_spill] sm:$0xff] }
 0x2db   : > { %13135 = vst [vmem:[#allocation377_spill] sm:$0xff] %v8864_v26  ;;  %2158 = vrot.lane.b32.xlu1 %v8112_v9, %s6603_s30  ;;  %v13142_v26 = vld [vmem:[#allocation243_spill] sm:$0xff] }
 0x2dc   : > { %2156 = vrot.lane.b32.xlu0 %v8119_v15, %s6603_s30 }
 0x2dd   : > { %v8870_v30 = vpop.permute.xlu1 %1974 }
 0x2de   : > { %13136 = vst [vmem:[#allocation378_spill] sm:$0xff] %v8870_v30  ;;  %v8872_v39 = vpop.permute.xlu0 %1972 }
 0x2df   : > { %13137 = vst [vmem:[#allocation379_spill] sm:$0xff] %v8872_v39  ;;  %2162 = vrot.lane.b32.xlu1 %v13138_v63, %s6603_s30  ;;  %v13146_v39 = vld [vmem:[#allocation247_spill] sm:$0xff] }
 0x2e0   : > { %2160 = vrot.lane.b32.xlu0 %v13139_v17, %s6603_s30 }
 0x2e1   : > { %v8878_v22 = vpop.permute.xlu1 %1978 }
 0x2e2   : > { %13140 = vst [vmem:[#allocation239_spill] sm:$0xff] %v8878_v22  ;;  %v8880_v58 = vpop.permute.xlu0 %1976 }
 0x2e3   : > { %13141 = vst [vmem:[#allocation241_spill] sm:$0xff] %v8880_v58  ;;  %2166 = vrot.lane.b32.xlu1 %v13142_v26, %s6603_s30  ;;  %v13150_v58 = vld [vmem:[#allocation251_spill] sm:$0xff] }
 0x2e4   : > { %2164 = vrot.lane.b32.xlu0 %v13143_v46, %s6603_s30 }
 0x2e5   : > { %v8886_v45 = vpop.permute.xlu1 %1982 }
 0x2e6   : > { %13144 = vst [vmem:[#allocation243_spill] sm:$0xff] %v8886_v45  ;;  %v8888_v30 = vpop.permute.xlu0 %1980 }
 0x2e7   : > { %13145 = vst [vmem:[#allocation245_spill] sm:$0xff] %v8888_v30  ;;  %2170 = vrot.lane.b32.xlu1 %v13146_v39, %s6603_s30  ;;  %v13154_v30 = vld [vmem:[#allocation255_spill] sm:$0xff] }
 0x2e8   : > { %2168 = vrot.lane.b32.xlu0 %v13147_v41, %s6603_s30 }
 0x2e9   : > { %v8894_v35 = vpop.permute.xlu1 %1986 }
 0x2ea   : > { %13148 = vst [vmem:[#allocation247_spill] sm:$0xff] %v8894_v35  ;;  %v8896_v22 = vpop.permute.xlu0 %1984 }
 0x2eb   : > { %13149 = vst [vmem:[#allocation249_spill] sm:$0xff] %v8896_v22  ;;  %2174 = vrot.lane.b32.xlu1 %v13150_v58, %s6603_s30  ;;  %v13158_v22 = vld [vmem:[#allocation259_spill] sm:$0xff] }
 0x2ec   : > { %2172 = vrot.lane.b32.xlu0 %v13151_v38, %s6603_s30 }
 0x2ed   : > { %v8902_v31 = vpop.permute.xlu1 %1990 }
 0x2ee   : > { %13152 = vst [vmem:[#allocation251_spill] sm:$0xff] %v8902_v31  ;;  %v8904_v45 = vpop.permute.xlu0 %1988 }
 0x2ef   : > { %13153 = vst [vmem:[#allocation253_spill] sm:$0xff] %v8904_v45  ;;  %2178 = vrot.lane.b32.xlu1 %v13154_v30, %s6603_s30  ;;  %v13162_v45 = vld [vmem:[#allocation263_spill] sm:$0xff] }
 0x2f0   : > { %2176 = vrot.lane.b32.xlu0 %v13155_v16, %s6603_s30 }
 0x2f1   : > { %v8910_v8 = vpop.permute.xlu1 %1994 }
 0x2f2   : > { %13156 = vst [vmem:[#allocation255_spill] sm:$0xff] %v8910_v8  ;;  %v8912_v35 = vpop.permute.xlu0 %1992 }
 0x2f3   : > { %13157 = vst [vmem:[#allocation257_spill] sm:$0xff] %v8912_v35  ;;  %2182 = vrot.lane.b32.xlu1 %v13158_v22, %s6603_s30  ;;  %v13166_v35 = vld [vmem:[#allocation267_spill] sm:$0xff] }
 0x2f4   : > { %2180 = vrot.lane.b32.xlu0 %v13159_v13, %s6603_s30 }
 0x2f5   : > { %v8918_v56 = vpop.permute.xlu1 %1998 }
 0x2f6   : > { %13160 = vst [vmem:[#allocation259_spill] sm:$0xff] %v8918_v56  ;;  %v8920_v31 = vpop.permute.xlu0 %1996 }
 0x2f7   : > { %13161 = vst [vmem:[#allocation261_spill] sm:$0xff] %v8920_v31  ;;  %2186 = vrot.lane.b32.xlu1 %v13162_v45, %s6603_s30 }
 0x2f8   : > { %2184 = vrot.lane.b32.xlu0 %v13163_v25, %s6603_s30 }
 0x2f9   : > { %v8926_v29 = vpop.permute.xlu1 %2002 }
 0x2fa   : > { %13164 = vst [vmem:[#allocation263_spill] sm:$0xff] %v8926_v29  ;;  %v8928_v8 = vpop.permute.xlu0 %2000 }
 0x2fb   : > { %13165 = vst [vmem:[#allocation265_spill] sm:$0xff] %v8928_v8  ;;  %2190 = vrot.lane.b32.xlu1 %v13166_v35, %s6603_s30 }
 0x2fc   : > { %2188 = vrot.lane.b32.xlu0 %v13167_v50, %s6603_s30 }
 0x2fd   : > { %v8934_v56 = vpop.permute.xlu1 %2006 }
 0x2fe   : > { %13168 = vst [vmem:[#allocation267_spill] sm:$0xff] %v8934_v56  ;;  %v8936_v31 = vpop.permute.xlu0 %2004 }
 0x2ff   : > { %13169 = vst [vmem:[#allocation269_spill] sm:$0xff] %v8936_v31  ;;  %2194 = vrot.lane.b32.xlu1 %v13170_v20, %s6603_s30  ;;  %v13178_v31 = vld [vmem:[#allocation279_spill] sm:$0xff] }
 0x300   : > { %2192 = vrot.lane.b32.xlu0 %v13171_v48, %s6603_s30 }
 0x301   : > { %v8942_v29 = vpop.permute.xlu1 %2010 }
 0x302   : > { %13172 = vst [vmem:[#allocation271_spill] sm:$0xff] %v8942_v29  ;;  %v8944_v8 = vpop.permute.xlu0 %2008  ;;  %v8961_v29 = vld [vmem:[%s8019_s13 + $0x190] sm:$0x3] }
 0x303   : > { %13173 = vst [vmem:[#allocation380_spill] sm:$0xff] %v8944_v8  ;;  %2198 = vrot.lane.b32.xlu1 %v13174_v57, %s6603_s30  ;;  %13180 = vst [vmem:[#allocation383_spill] sm:$0xff] %v8961_v29  ;;  %v2148_v57 = vrot.slane %v8841_v33, 1 }
 0x304   : > { %2196 = vrot.lane.b32.xlu0 %v13175_v10, %s6603_s30  ;;  %v13181_v10 = vld [vmem:[#allocation289_spill] sm:$0xff] }
 0x305   : > { %v8950_v19 = vpop.permute.xlu1 %2014 }
 0x306   : > { %13176 = vst [vmem:[#allocation381_spill] sm:$0xff] %v8950_v19  ;;  %v8952_v56 = vpop.permute.xlu0 %2012  ;;  %v2147_v19 = vrot.slane %v8846_v5, 1 }
 0x307   : > { %13177 = vst [vmem:[#allocation382_spill] sm:$0xff] %v8952_v56  ;;  %2202 = vrot.lane.b32.xlu1 %v13178_v31, %s6603_s30  ;;  %v2150_v56 = vrot.slane %v8961_v29, 1 }
 0x308   : > { %2200 = vrot.lane.b32.xlu0 %v13179_v4, %s6603_s30 }
 0x309   : > { %v8958_v48 = vpop.permute.xlu1 %2052 }
 0x30a   : > { %v8963_v8 = vpop.permute.xlu0 %2050 }
 0x30b   : > { %2206 = vrot.lane.b32.xlu1 %v8424_v21, %s6603_s30  ;;  %v8981_v21 = vsel %vm428_vm0, %v2148_v57, %v2150_v56 }
 0x30c   : > { %2204 = vrot.lane.b32.xlu0 %v8431_v54, %s6603_s30  ;;  %13182 = vst [vmem:[#allocation384_spill] sm:$0xff] %v8981_v21  ;;  %v8986_v54 = vsel %vm428_vm0, %v2147_v19, %v2148_v57 }
 0x30d   : > { %v8972_v31 = vpop.permute.xlu1 %2056  ;;  %13183 = vst [vmem:[#allocation385_spill] sm:$0xff] %v8986_v54 }
 0x30e   : > { %v8974_v4 = vpop.permute.xlu0 %2054 }
 0x30f   : > { %2210 = vrot.lane.b32.xlu1 %v8441_v12, %s6603_s30 }
 0x310   : > { %2208 = vrot.lane.b32.xlu0 %v13181_v10, %s6603_s30  ;;  %v13193_v10 = vld [vmem:[#allocation301_spill] sm:$0xff] }
 0x311   : > { %v8983_v33 = vpop.permute.xlu1 %2060 }
 0x312   : > { %v8988_v29 = vpop.permute.xlu0 %2058 }
 0x313   : > { %2214 = vrot.lane.b32.xlu1 %v8981_v21, %s6603_s30 }
 0x314   : > { %2212 = vrot.lane.b32.xlu0 %v8986_v54, %s6603_s30 }
 0x315   : > { %v8994_v5 = vpop.permute.xlu1 %2064 }
 0x316   : > { %13184 = vst [vmem:[#allocation386_spill] sm:$0xff] %v8994_v5  ;;  %v8996_v12 = vpop.permute.xlu0 %2062 }
 0x317   : > { %13185 = vst [vmem:[#allocation387_spill] sm:$0xff] %v8996_v12  ;;  %2255 = vrot.lane.b32.xlu1 %v8469_v14, %s6604_s7  ;;  %v13190_v14 = vld [vmem:[#allocation298_spill] sm:$0xff] }
 0x318   : > { %2253 = vrot.lane.b32.xlu0 %v8476_v0, %s6604_s7 }
 0x319   : > { %v9002_v57 = vpop.permute.xlu1 %2068 }
 0x31a   : > { %13186 = vst [vmem:[#allocation388_spill] sm:$0xff] %v9002_v57  ;;  %v9004_v19 = vpop.permute.xlu0 %2066 }
 0x31b   : > { %13187 = vst [vmem:[#allocation389_spill] sm:$0xff] %v9004_v19  ;;  %2259 = vrot.lane.b32.xlu1 %v8486_v2, %s6604_s7 }
 0x31c   : > { %2257 = vrot.lane.b32.xlu0 %v8493_v52, %s6604_s7 }
 0x31d   : > { %v9010_v56 = vpop.permute.xlu1 %2072 }
 0x31e   : > { %13188 = vst [vmem:[#allocation390_spill] sm:$0xff] %v9010_v56  ;;  %v9012_v54 = vpop.permute.xlu0 %2070 }
 0x31f   : > { %13189 = vst [vmem:[#allocation391_spill] sm:$0xff] %v9012_v54  ;;  %2263 = vrot.lane.b32.xlu1 %v8503_v40, %s6604_s7  ;;  %v13196_v54 = vld [vmem:[#allocation304_spill] sm:$0xff] }
 0x320   : > { %2261 = vrot.lane.b32.xlu0 %v13190_v14, %s6604_s7 }
 0x321   : > { %v9018_v0 = vpop.permute.xlu1 %2076 }
 0x322   : > { %13191 = vst [vmem:[#allocation298_spill] sm:$0xff] %v9018_v0  ;;  %v9020_v21 = vpop.permute.xlu0 %2074 }
 0x323   : > { %13192 = vst [vmem:[#allocation392_spill] sm:$0xff] %v9020_v21  ;;  %2267 = vrot.lane.b32.xlu1 %v8520_v55, %s6604_s7  ;;  %v13199_v21 = vld [vmem:[#allocation307_spill] sm:$0xff] }
 0x324   : > { %2265 = vrot.lane.b32.xlu0 %v13193_v10, %s6604_s7 }
 0x325   : > { %v9026_v19 = vpop.permute.xlu1 %2080 }
 0x326   : > { %13194 = vst [vmem:[#allocation301_spill] sm:$0xff] %v9026_v19  ;;  %v9028_v56 = vpop.permute.xlu0 %2078 }
 0x327   : > { %13195 = vst [vmem:[#allocation393_spill] sm:$0xff] %v9028_v56  ;;  %2271 = vrot.lane.b32.xlu1 %v8537_v11, %s6604_s7  ;;  %v13202_v56 = vld [vmem:[#allocation310_spill] sm:$0xff] }
 0x328   : > { %2269 = vrot.lane.b32.xlu0 %v13196_v54, %s6604_s7 }
 0x329   : > { %v9034_v57 = vpop.permute.xlu1 %2084 }
 0x32a   : > { %13197 = vst [vmem:[#allocation304_spill] sm:$0xff] %v9034_v57  ;;  %v9036_v0 = vpop.permute.xlu0 %2082 }
 0x32b   : > { %13198 = vst [vmem:[#allocation394_spill] sm:$0xff] %v9036_v0  ;;  %2275 = vrot.lane.b32.xlu1 %v8554_v47, %s6604_s7 }
 0x32c   : > { %2273 = vrot.lane.b32.xlu0 %v13199_v21, %s6604_s7 }
 0x32d   : > { %v9042_v5 = vpop.permute.xlu1 %2088 }
 0x32e   : > { %13200 = vst [vmem:[#allocation307_spill] sm:$0xff] %v9042_v5  ;;  %v9044_v19 = vpop.permute.xlu0 %2086 }
 0x32f   : > { %13201 = vst [vmem:[#allocation395_spill] sm:$0xff] %v9044_v19  ;;  %2279 = vrot.lane.b32.xlu1 %v8571_v37, %s6604_s7 }
 0x330   : > { %2277 = vrot.lane.b32.xlu0 %v13202_v56, %s6604_s7 }
 0x331   : > { %v9050_v12 = vpop.permute.xlu1 %2092 }
 0x332   : > { %13203 = vst [vmem:[#allocation310_spill] sm:$0xff] %v9050_v12  ;;  %v9052_v57 = vpop.permute.xlu0 %2090 }
 0x333   : > { %2353 = vrot.lane.b32.xlu1 %v8073_v62, %s6605_s8 }
 0x334   : > { %2351 = vrot.lane.b32.xlu0 %v8081_v59, %s6605_s8 }
 0x335   : > { %v9058_v0 = vpop.permute.xlu1 %2096 }
 0x336   : > { %13204 = vst [vmem:[#allocation396_spill] sm:$0xff] %v9058_v0  ;;  %v9060_v5 = vpop.permute.xlu0 %2094  ;;  %v13229_v0 = vld [vmem:[#allocation367_spill] sm:$0xff] }
 0x337   : > { %2455 = vrot.lane.b32.xlu1 %v8112_v9, %s6606_s9 }
 0x338   : > { %2453 = vrot.lane.b32.xlu0 %v8119_v15, %s6606_s9 }
 0x339   : > { %v9066_v19 = vpop.permute.xlu1 %2100 }
 0x33a   : > { %13205 = vst [vmem:[#allocation397_spill] sm:$0xff] %v9066_v19  ;;  %v9068_v12 = vpop.permute.xlu0 %2098  ;;  %v13227_v19 = vld [vmem:[#allocation366_spill] sm:$0xff] }
 0x33b   : > { %13206 = vst [vmem:[#allocation398_spill] sm:$0xff] %v9068_v12  ;;  %2556 = vrot.lane.b32.xlu1 %v8486_v2, %s6607_s10 }
 0x33c   : > { %2554 = vrot.lane.b32.xlu0 %v8493_v52, %s6607_s10 }
 0x33d   : > { %v9074_v62 = vpop.permute.xlu1 %2104 }
 0x33e   : > { %13207 = vst [vmem:[#allocation399_spill] sm:$0xff] %v9074_v62  ;;  %v9076_v59 = vpop.permute.xlu0 %2102  ;;  %v9308_v62 = vld [vmem:[%s8019_s13 + $0x110] sm:$0xff] }
 0x33f   : > { %13208 = vst [vmem:[#allocation400_spill] sm:$0xff] %v9076_v59  ;;  %2357 = vrot.lane.b32.xlu1 %v8097_v18, %s6605_s8  ;;  %v3073_v59 = vld [vmem:[%s12465_s2 + $0x30] sm:$0x3f] }
 0x340   : > { %2355 = vrot.lane.b32.xlu0 %v8105_v43, %s6605_s8 }
 0x341   : > { %v9082_v15 = vpop.permute.xlu1 %2108 }
 0x342   : > { %13209 = vst [vmem:[#allocation401_spill] sm:$0xff] %v9082_v15  ;;  %v9084_v9 = vpop.permute.xlu0 %2106 }
 0x343   : > { %13210 = vst [vmem:[#allocation402_spill] sm:$0xff] %v9084_v9  ;;  %2459 = vrot.lane.b32.xlu1 %v13138_v63, %s6606_s9 }
 0x344   : > { %2457 = vrot.lane.b32.xlu0 %v13139_v17, %s6606_s9 }
 0x345   : > { %v9090_v2 = vpop.permute.xlu1 %2112 }
 0x346   : > { %13211 = vst [vmem:[#allocation403_spill] sm:$0xff] %v9090_v2  ;;  %v9092_v52 = vpop.permute.xlu0 %2110 }
 0x347   : > { %13212 = vst [vmem:[#allocation404_spill] sm:$0xff] %v9092_v52  ;;  %2560 = vrot.lane.b32.xlu1 %v8503_v40, %s6607_s10 }
 0x348   : > { %2558 = vrot.lane.b32.xlu0 %v13190_v14, %s6607_s10 }
 0x349   : > { %v9098_v43 = vpop.permute.xlu1 %2154 }
 0x34a   : > { %v9100_v18 = vpop.permute.xlu0 %2152 }
 0x34b   : > { %2361 = vrot.lane.b32.xlu1 %v8123_v1, %s6605_s8 }
 0x34c   : > { %2359 = vrot.lane.b32.xlu0 %v8131_v34, %s6605_s8 }
 0x34d   : > { %v9106_v63 = vpop.permute.xlu1 %2158 }
 0x34e   : > { %v9108_v17 = vpop.permute.xlu0 %2156 }
 0x34f   : > { %2463 = vrot.lane.b32.xlu1 %v13142_v26, %s6606_s9 }
 0x350   : > { %2461 = vrot.lane.b32.xlu0 %v13143_v46, %s6606_s9 }
 0x351   : > { %v9114_v40 = vpop.permute.xlu1 %2162 }
 0x352   : > { %v9116_v14 = vpop.permute.xlu0 %2160 }
 0x353   : > { %2564 = vrot.lane.b32.xlu1 %v8520_v55, %s6607_s10 }
 0x354   : > { %2562 = vrot.lane.b32.xlu0 %v13193_v10, %s6607_s10 }
 0x355   : > { %v9122_v34 = vpop.permute.xlu1 %2166 }
 0x356   : > { %v9124_v1 = vpop.permute.xlu0 %2164 }
 0x357   : > { %2365 = vrot.lane.b32.xlu1 %v8149_v36, %s6605_s8 }
 0x358   : > { %2363 = vrot.lane.b32.xlu0 %v8157_v24, %s6605_s8 }
 0x359   : > { %v9130_v26 = vpop.permute.xlu1 %2170 }
 0x35a   : > { %v9132_v46 = vpop.permute.xlu0 %2168 }
 0x35b   : > { %2467 = vrot.lane.b32.xlu1 %v13146_v39, %s6606_s9 }
 0x35c   : > { %2465 = vrot.lane.b32.xlu0 %v13147_v41, %s6606_s9 }
 0x35d   : > { %v9138_v55 = vpop.permute.xlu1 %2174 }
 0x35e   : > { %v9140_v10 = vpop.permute.xlu0 %2172 }
 0x35f   : > { %2568 = vrot.lane.b32.xlu1 %v8537_v11, %s6607_s10 }
 0x360   : > { %2566 = vrot.lane.b32.xlu0 %v13196_v54, %s6607_s10 }
 0x361   : > { %v9146_v36 = vpop.permute.xlu1 %2178 }
 0x362   : > { %v9148_v24 = vpop.permute.xlu0 %2176 }
 0x363   : > { %2369 = vrot.lane.b32.xlu1 %v8175_v53, %s6605_s8 }
 0x364   : > { %2367 = vrot.lane.b32.xlu0 %v8183_v27, %s6605_s8 }
 0x365   : > { %v9154_v41 = vpop.permute.xlu1 %2182 }
 0x366   : > { %v9156_v39 = vpop.permute.xlu0 %2180 }
 0x367   : > { %2471 = vrot.lane.b32.xlu1 %v13150_v58, %s6606_s9 }
 0x368   : > { %2469 = vrot.lane.b32.xlu0 %v13151_v38, %s6606_s9 }
 0x369   : > { %v9162_v54 = vpop.permute.xlu1 %2186 }
 0x36a   : > { %v9164_v11 = vpop.permute.xlu0 %2184 }
 0x36b   : > { %2572 = vrot.lane.b32.xlu1 %v8554_v47, %s6607_s10 }
 0x36c   : > { %2570 = vrot.lane.b32.xlu0 %v13199_v21, %s6607_s10 }
 0x36d   : > { %v9170_v27 = vpop.permute.xlu1 %2190 }
 0x36e   : > { %v9172_v53 = vpop.permute.xlu0 %2188 }
 0x36f   : > { %2373 = vrot.lane.b32.xlu1 %v8201_v32, %s6605_s8 }
 0x370   : > { %2371 = vrot.lane.b32.xlu0 %v8209_v6, %s6605_s8 }
 0x371   : > { %v9178_v58 = vpop.permute.xlu1 %2194 }
 0x372   : > { %v9180_v38 = vpop.permute.xlu0 %2192 }
 0x373   : > { %2475 = vrot.lane.b32.xlu1 %v13154_v30, %s6606_s9 }
 0x374   : > { %2473 = vrot.lane.b32.xlu0 %v13155_v16, %s6606_s9 }
 0x375   : > { %v9186_v21 = vpop.permute.xlu1 %2198 }
 0x376   : > { %13213 = vst [vmem:[#allocation405_spill] sm:$0xff] %v9186_v21  ;;  %v9188_v47 = vpop.permute.xlu0 %2196 }
 0x377   : > { %2576 = vrot.lane.b32.xlu1 %v8571_v37, %s6607_s10 }
 0x378   : > { %2574 = vrot.lane.b32.xlu0 %v13202_v56, %s6607_s10 }
 0x379   : > { %v9194_v32 = vpop.permute.xlu1 %2202 }
 0x37a   : > { %13214 = vst [vmem:[#allocation406_spill] sm:$0xff] %v9194_v32  ;;  %v9196_v6 = vpop.permute.xlu0 %2200  ;;  %v13226_v32 = vld [vmem:[#allocation331_spill] sm:$0xff] }
 0x37b   : > { %13215 = vst [vmem:[#allocation407_spill] sm:$0xff] %v9196_v6  ;;  %2377 = vrot.lane.b32.xlu1 %v8227_v61, %s6605_s8  ;;  %v13220_v61 = vld [vmem:[#allocation313_spill] sm:$0xff] }
 0x37c   : > { %2375 = vrot.lane.b32.xlu0 %v8235_v60, %s6605_s8  ;;  %v6503_v6 = vld [vmem:[%s8019_s13] sm:$0xff] }
 0x37d   : > { %v9202_v30 = vpop.permute.xlu1 %2206  ;;  %v2650_v12 = vsel %vm1384_vm2, %v6503_v6, %v13226_v32 }
 0x37e   : > { %13216 = vst [vmem:[#allocation408_spill] sm:$0xff] %v9202_v30  ;;  %v9204_v16 = vpop.permute.xlu0 %2204 }
 0x37f   : > { %13217 = vst [vmem:[#allocation409_spill] sm:$0xff] %v9204_v16  ;;  %2479 = vrot.lane.b32.xlu1 %v13158_v22, %s6606_s9 }
 0x380   : > { %2477 = vrot.lane.b32.xlu0 %v13159_v13, %s6606_s9 }
 0x381   : > { %v9210_v37 = vpop.permute.xlu1 %2210 }
 0x382   : > { %13218 = vst [vmem:[#allocation410_spill] sm:$0xff] %v9210_v37  ;;  %v9212_v56 = vpop.permute.xlu0 %2208 }
 0x383   : > { %13219 = vst [vmem:[#allocation411_spill] sm:$0xff] %v9212_v56  ;;  %2580 = vrot.lane.b32.xlu1 %v8588_v28, %s6607_s10  ;;  %v3067_v56 = vld [vmem:[%s12465_s2] sm:$0xff] }
 0x384   : > { %2578 = vrot.lane.b32.xlu0 %v13220_v61, %s6607_s10 }
 0x385   : > { %v9218_v60 = vpop.permute.xlu1 %2214 }
 0x386   : > { %13221 = vst [vmem:[#allocation313_spill] sm:$0xff] %v9218_v60  ;;  %v9220_v52 = vpop.permute.xlu0 %2212 }
 0x387   : > { %13222 = vst [vmem:[#allocation412_spill] sm:$0xff] %v9220_v52  ;;  %2283 = vrot.lane.b32.xlu1 %v8588_v28, %s6604_s7 }
 0x388   : > { %2281 = vrot.lane.b32.xlu0 %v13220_v61, %s6604_s7 }
 0x389   : > { %v9226_v13 = vpop.permute.xlu1 %2255 }
 0x38a   : > { %v9228_v22 = vpop.permute.xlu0 %2253 }
 0x38b   : > { %2381 = vrot.lane.b32.xlu1 %v8253_v49, %s6605_s8  ;;  %v13223_v49 = vld [vmem:[#allocation316_spill] sm:$0xff] }
 0x38c   : > { %2379 = vrot.lane.b32.xlu0 %v8261_v23, %s6605_s8  ;;  %13225 = vst [vmem:[#allocation316_spill] sm:$0xff] %v9308_v62 }
 0x38d   : > { %v9234_v2 = vpop.permute.xlu1 %2259 }
 0x38e   : > { %v9236_v60 = vpop.permute.xlu0 %2257 }
 0x38f   : > { %2483 = vrot.lane.b32.xlu1 %v13162_v45, %s6606_s9 }
 0x390   : > { %2481 = vrot.lane.b32.xlu0 %v13163_v25, %s6606_s9 }
 0x391   : > { %v9242_v28 = vpop.permute.xlu1 %2263 }
 0x392   : > { %v9244_v61 = vpop.permute.xlu0 %2261 }
 0x393   : > { %2584 = vrot.lane.b32.xlu1 %v8605_v44, %s6607_s10 }
 0x394   : > { %2582 = vrot.lane.b32.xlu0 %v13223_v49, %s6607_s10 }
 0x395   : > { %v9250_v23 = vpop.permute.xlu1 %2267 }
 0x396   : > { %v9252_v52 = vpop.permute.xlu0 %2265 }
 0x397   : > { %2287 = vrot.lane.b32.xlu1 %v8605_v44, %s6604_s7  ;;  %v3068_v44 = vld [vmem:[%s12465_s2 + $0x8] sm:$0xff] }
 0x398   : > { %2285 = vrot.lane.b32.xlu0 %v13223_v49, %s6604_s7  ;;  %v5897_v49 = vpack.c.bf16 %v3068_v44, %v3067_v56 }
 0x399   : > { %v9258_v25 = vpop.permute.xlu1 %2271 }
 0x39a   : > { %v9260_v45 = vpop.permute.xlu0 %2269  ;;  %5898 = vmatprep.subr.bf16.mxu0 %v5897_v49 }
 0x39b   : > { %2385 = vrot.lane.b32.xlu1 %v8279_v7, %s6605_s8  ;;  %5900 = vmatpush3.bf16.msra.mxu0 %v5897_v49  ;;  %v3069_v7 = vld [vmem:[%s12465_s2 + $0x10] sm:$0xff]  ;;  %v3072_v49 = vld [vmem:[%s12465_s2 + $0x28] sm:$0xff] }
 0x39c   : > { %2383 = vrot.lane.b32.xlu0 %v8287_v51, %s6605_s8  ;;  %v3070_v51 = vld [vmem:[%s12465_s2 + $0x18] sm:$0xff] }
 0x39d   : > { %v9272_v37 = vpop.permute.xlu1 %2275  ;;  %v5901_v56 = vpack.c.bf16 %v3070_v51, %v3069_v7 }
 0x39e   : > { %v9274_v9 = vpop.permute.xlu0 %2273 }
 0x39f   : > { %2487 = vrot.lane.b32.xlu1 %v13166_v35, %s6606_s9  ;;  %5902 = vmatprep.subr.bf16.mxu0 %v5901_v56  ;;  %v13224_v35 = vld [vmem:[#allocation319_spill] sm:$0xff] }
 0x3a0   : > { %2485 = vrot.lane.b32.xlu0 %v13167_v50, %s6606_s9  ;;  %5904 = vmatpush3.bf16.msra.mxu0 %v5901_v56  ;;  %v3071_v50 = vld [vmem:[%s12465_s2 + $0x20] sm:$0xff] }
 0x3a1   : > { %v9286_v15 = vpop.permute.xlu1 %2279  ;;  %v5905_v51 = vpack.c.bf16 %v3072_v49, %v3071_v50  ;;  %v6502_v49 = vld [vmem:[%s8019_s13 + $0x8] sm:$0xff] }
 0x3a2   : > { %v9288_v44 = vpop.permute.xlu0 %2277 }
 0x3a3   : > { %2588 = vrot.lane.b32.xlu1 %v8622_v3, %s6607_s10  ;;  %5906 = vmatprep.subr.bf16.mxu0 %v5905_v51 }
 0x3a4   : > { %2586 = vrot.lane.b32.xlu0 %v13224_v35, %s6607_s10  ;;  %5908 = vmatpush3.bf16.msra.mxu0 %v5905_v51  ;;  %v2651_v51 = vsel %vm1384_vm2, %v6502_v49, %v8677_v42 }
 0x3a5   : > { %v2354_v7 = vpop.permute.xlu1 %2353  ;;  %5791 = vmatprep.subr.msk.mxu0 %vm605_vm1, %v3073_v59  ;;  %v2683_v21 = vsel %vm1417_vm3, %v2651_v51, %v13227_v19 }
 0x3a6   : > { %v2352_v16 = vpop.permute.xlu0 %2351  ;;  %v2715_v42 = vsel %vm1450_vm4, %v2683_v21, %v8958_v48 }
 0x3a7   : > { %2291 = vrot.lane.b32.xlu1 %v8622_v3, %s6604_s7  ;;  %v9314_v3 = vld [vmem:[%s8019_s13 + $0x108] sm:$0xff]  ;;  %v2747_v32 = vsel %vm1483_vm5, %v2715_v42, %v9098_v43 }
 0x3a8   : > { %2289 = vrot.lane.b32.xlu0 %v13224_v35, %s6604_s7  ;;  %5792 = vmatpush3.msk.msra.mxu0 %vm605_vm1, %v3073_v59  ;;  %v13228_v59 = vld [vmem:[#allocation273_spill] sm:$0xff] }
 0x3a9   : > { %v2456_v56 = vpop.permute.xlu1 %2455 }
 0x3aa   : > { %v2454_v30 = vpop.permute.xlu0 %2453 }
 0x3ab   : > { %2389 = vrot.lane.b32.xlu1 %v9308_v62, %s6605_s8  ;;  %v2682_v62 = vsel %vm1417_vm3, %v2650_v12, %v13229_v0  ;;  %v2779_v12 = vsel %vm1516_vm6, %v2747_v32, %v9226_v13  ;;  %v13230_v0 = vld [vmem:[#allocation321_spill] sm:$0xff] }
 0x3ac   : > { %2387 = vrot.lane.b32.xlu0 %v9314_v3, %s6605_s8 }
 0x3ad   : > { %v2557_v35 = vpop.permute.xlu1 %2556 }
 0x3ae   : > { %v2555_v50 = vpop.permute.xlu0 %2554 }
 0x3af   : > { %2491 = vrot.lane.b32.xlu1 %v13170_v20, %s6606_s9  ;;  %v2714_v20 = vsel %vm1450_vm4, %v2682_v62, %v8963_v8  ;;  %v2811_v8 = vsel %vm1549_vm7, %v2779_v12, %v2354_v7  ;;  %v13231_v62 = vld [vmem:[#allocation323_spill] sm:$0xff] }
 0x3b0   : > { %2489 = vrot.lane.b32.xlu0 %v13228_v59, %s6606_s9  ;;  %v2746_v6 = vsel %vm1483_vm5, %v2714_v20, %v9100_v18  ;;  %v2843_v18 = vsel %vm1582_vm8, %v2811_v8, %v2456_v56  ;;  %v13232_v20 = vld [vmem:[#allocation335_spill] sm:$0xff]  ;;  %v9375_v8 = vld [vmem:[%s8019_s13 + $0x128] sm:$0xff] }
 0x3b1   : > { %v9335_v49 = vpop.permute.xlu1 %2357  ;;  %v2778_v48 = vsel %vm1516_vm6, %v2746_v6, %v9228_v22  ;;  %v2875_v51 = vsel %vm1615_vm9, %v2843_v18, %v2557_v35  ;;  %v6507_v18 = vld [vmem:[%s8019_s13 + $0x20] sm:$0xff] }
 0x3b2   : > { %v2356_v19 = vpop.permute.xlu0 %2355  ;;  %v2810_v43 = vsel %vm1549_vm7, %v2778_v48, %v2352_v16  ;;  %v6504_v16 = vld [vmem:[%s8019_s13 + $0x18] sm:$0xff] }
 0x3b3   : > { %2592 = vrot.lane.b32.xlu1 %v13230_v0, %s6607_s10  ;;  %v2842_v13 = vsel %vm1582_vm8, %v2810_v43, %v2454_v30  ;;  %v2652_v56 = vsel %vm1384_vm2, %v6504_v16, %v13232_v20  ;;  %v13233_v30 = vld [vmem:[#allocation369_spill] sm:$0xff] }
 0x3b4   : > { %2590 = vrot.lane.b32.xlu0 %v13231_v62, %s6607_s10  ;;  %v2874_v42 = vsel %vm1615_vm9, %v2842_v13, %v2555_v50  ;;  %v2684_v35 = vsel %vm1417_vm3, %v2652_v56, %v13233_v30  ;;  %v13234_v13 = vld [vmem:[#allocation333_spill] sm:$0xff]  ;;  %v6508_v30 = vld [vmem:[%s8019_s13 + $0x38] sm:$0xff] }
 0x3b5   : > { %v2460_v21 = vpop.permute.xlu1 %2459  ;;  %v2716_v50 = vsel %vm1450_vm4, %v2684_v35, %v8974_v4 }
 0x3b6   : > { %v2458_v59 = vpop.permute.xlu0 %2457  ;;  %v2748_v6 = vsel %vm1483_vm5, %v2716_v50, %v9108_v17 }
 0x3b7   : > { %2940 = vrot.lane.b32.xlu1 %v2875_v51, %s6608_s11  ;;  %v2780_v48 = vsel %vm1516_vm6, %v2748_v6, %v9236_v60  ;;  %v2653_v51 = vsel %vm1384_vm2, %v6507_v18, %v13234_v13  ;;  %v13238_v6 = vld [vmem:[#allocation327_spill] sm:$0xff] }
 0x3b8   : > { %2938 = vrot.lane.b32.xlu0 %v2874_v42, %s6608_s11  ;;  %v13236_v42 = vld [vmem:[#allocation368_spill] sm:$0xff]  ;;  %v13241_v13 = vld [vmem:[#allocation275_spill] sm:$0xff] }
 0x3b9   : > { %v2561_v22 = vpop.permute.xlu1 %2560  ;;  %v2685_v16 = vsel %vm1417_vm3, %v2653_v51, %v13236_v42  ;;  %v13242_v51 = vld [vmem:[#allocation373_spill] sm:$0xff] }
 0x3ba   : > { %v2559_v7 = vpop.permute.xlu0 %2558 }
 0x3bb   : > { %2295 = vrot.lane.b32.xlu1 %v13230_v0, %s6604_s7  ;;  %v2812_v0 = vsel %vm1549_vm7, %v2780_v48, %v2356_v19  ;;  %v13235_v19 = vld [vmem:[#allocation277_spill] sm:$0xff]  ;;  %v6509_v48 = vld [vmem:[%s8019_s13 + $0x30] sm:$0xff] }
 0x3bc   : > { %2293 = vrot.lane.b32.xlu0 %v13231_v62, %s6604_s7  ;;  %v9381_v62 = vld [vmem:[%s8019_s13 + $0x120] sm:$0xff]  ;;  %v2844_v4 = vsel %vm1582_vm8, %v2812_v0, %v2458_v59  ;;  %v2717_v59 = vsel %vm1450_vm4, %v2685_v16, %v8972_v31  ;;  %v13239_v0 = vld [vmem:[#allocation339_spill] sm:$0xff] }
 0x3bd   : > { %v2362_v32 = vpop.permute.xlu1 %2361  ;;  %v2876_v43 = vsel %vm1615_vm9, %v2844_v4, %v2559_v7  ;;  %v13237_v7 = vld [vmem:[#allocation337_spill] sm:$0xff]  ;;  %v2749_v50 = vsel %vm1483_vm5, %v2717_v59, %v9106_v63  ;;  %v2654_v4 = vsel %vm1384_vm2, %v6509_v48, %v13239_v0 }
 0x3be   : > { %v2360_v12 = vpop.permute.xlu0 %2359  ;;  %v2655_v35 = vsel %vm1384_vm2, %v6508_v30, %v13237_v7  ;;  %v2781_v31 = vsel %vm1516_vm6, %v2749_v50, %v9234_v2 }
 0x3bf   : > { %2393 = vrot.lane.b32.xlu1 %v9375_v8, %s6605_s8  ;;  %v2813_v42 = vsel %vm1549_vm7, %v2781_v31, %v9335_v49  ;;  %v13243_v49 = vld [vmem:[#allocation325_spill] sm:$0xff] }
 0x3c0   : > { %2391 = vrot.lane.b32.xlu0 %v9381_v62, %s6605_s8  ;;  %v2845_v2 = vsel %vm1582_vm8, %v2813_v42, %v2460_v21  ;;  %v9464_v42 = vld [vmem:[%s8019_s13 + $0x138] sm:$0xff] }
 0x3c1   : > { %v2464_v17 = vpop.permute.xlu1 %2463 }
 0x3c2   : > { %v2462_v60 = vpop.permute.xlu0 %2461 }
 0x3c3   : > { %2942 = vrot.lane.b32.xlu1 %v2876_v43, %s6608_s11  ;;  %v13240_v43 = vld [vmem:[#allocation371_spill] sm:$0xff] }
 0x3c4   : > { %2493 = vrot.lane.b32.xlu0 %v13235_v19, %s6606_s9  ;;  %v2687_v18 = vsel %vm1417_vm3, %v2655_v35, %v13240_v43  ;;  %v2686_v19 = vsel %vm1417_vm3, %v2654_v4, %v13242_v51  ;;  %v6510_v43 = vld [vmem:[%s8019_s13 + $0x48] sm:$0xff] }
 0x3c5   : > { %v2565_v20 = vpop.permute.xlu1 %2564  ;;  %v2719_v63 = vsel %vm1450_vm4, %v2687_v18, %v8983_v33  ;;  %v2718_v59 = vsel %vm1450_vm4, %v2686_v19, %v8988_v29  ;;  %v2877_v33 = vsel %vm1615_vm9, %v2845_v2, %v2561_v22  ;;  %v6513_v2 = vld [vmem:[%s8019_s13 + $0x50] sm:$0xff] }
 0x3c6   : > { %v2563_v56 = vpop.permute.xlu0 %2562  ;;  %v2751_v30 = vsel %vm1483_vm5, %v2719_v63, %v9114_v40  ;;  %v2750_v35 = vsel %vm1483_vm5, %v2718_v59, %v9116_v14  ;;  %v9458_v63 = vld [vmem:[%s8019_s13 + $0x140] sm:$0xff] }
 0x3c7   : > { %2594 = vrot.lane.b32.xlu1 %v13238_v6, %s6607_s10  ;;  %v2783_v50 = vsel %vm1516_vm6, %v2751_v30, %v9242_v28  ;;  %v2782_v29 = vsel %vm1516_vm6, %v2750_v35, %v9244_v61  ;;  %v13247_v35 = vld [vmem:[#allocation340_spill] sm:$0xff] }
 0x3c8   : > { %2495 = vrot.lane.b32.xlu0 %v13241_v13, %s6606_s9  ;;  %v2815_v40 = vsel %vm1549_vm7, %v2783_v50, %v2362_v32  ;;  %v2814_v21 = vsel %vm1549_vm7, %v2782_v29, %v2360_v12  ;;  %v13244_v12 = vld [vmem:[#allocation341_spill] sm:$0xff]  ;;  %v2657_v50 = vsel %vm1384_vm2, %v6513_v2, %v13247_v35 }
 0x3c9   : > { %v2366_v16 = vpop.permute.xlu1 %2365  ;;  %v2847_v14 = vsel %vm1582_vm8, %v2815_v40, %v2464_v17  ;;  %v2846_v28 = vsel %vm1582_vm8, %v2814_v21, %v2462_v60  ;;  %v2656_v17 = vsel %vm1384_vm2, %v6510_v43, %v13244_v12  ;;  %v13245_v60 = vld [vmem:[#allocation375_spill] sm:$0xff]  ;;  %v13250_v40 = vld [vmem:[#allocation386_spill] sm:$0xff]  ;;  %v6515_v43 = vld [vmem:[%s8019_s13 + $0x60] sm:$0xff] }
 0x3ca   : > { %v2364_v7 = vpop.permute.xlu0 %2363  ;;  %v2879_v22 = vsel %vm1615_vm9, %v2847_v14, %v2565_v20  ;;  %v2878_v4 = vsel %vm1615_vm9, %v2846_v28, %v2563_v56  ;;  %v2688_v20 = vsel %vm1417_vm3, %v2656_v17, %v13245_v60  ;;  %v13246_v56 = vld [vmem:[#allocation387_spill] sm:$0xff]  ;;  %v6514_v28 = vld [vmem:[%s8019_s13 + $0x68] sm:$0xff]  ;;  %v13254_v60 = vld [vmem:[#allocation376_spill] sm:$0xff] }
 0x3cb   : > { %2596 = vrot.lane.b32.xlu1 %v13243_v49, %s6607_s10  ;;  %v2720_v18 = vsel %vm1450_vm4, %v2688_v20, %v13246_v56  ;;  %v13253_v12 = vld [vmem:[#allocation343_spill] sm:$0xff]  ;;  %v13258_v2 = vld [vmem:[#allocation389_spill] sm:$0xff] }
 0x3cc   : > { %2944 = vrot.lane.b32.xlu0 %v2877_v33, %s6608_s11  ;;  %v2752_v13 = vsel %vm1483_vm5, %v2720_v18, %v9124_v1  ;;  %v13249_v33 = vld [vmem:[#allocation374_spill] sm:$0xff]  ;;  %v2658_v17 = vsel %vm1384_vm2, %v6515_v43, %v13253_v12  ;;  %v13255_v18 = vld [vmem:[#allocation279_spill] sm:$0xff]  ;;  %v6518_v43 = vld [vmem:[%s8019_s13 + $0x80] sm:$0xff] }
 0x3cd   : > { %v2468_v48 = vpop.permute.xlu1 %2467  ;;  %v2784_v19 = vsel %vm1516_vm6, %v2752_v13, %v9252_v52  ;;  %v13256_v13 = vld [vmem:[#allocation377_spill] sm:$0xff] }
 0x3ce   : > { %v2466_v0 = vpop.permute.xlu0 %2465 }
 0x3cf   : > { %2948 = vrot.lane.b32.xlu1 %v2879_v22, %s6608_s11  ;;  %v13251_v22 = vld [vmem:[#allocation342_spill] sm:$0xff] }
 0x3d0   : > { %2946 = vrot.lane.b32.xlu0 %v2878_v4, %s6608_s11 }
 0x3d1   : > { %v2569_v61 = vpop.permute.xlu1 %2568 }
 0x3d2   : > { %v2567_v32 = vpop.permute.xlu0 %2566 }
 0x3d3   : > { %2299 = vrot.lane.b32.xlu1 %v13243_v49, %s6604_s7  ;;  %v2689_v49 = vsel %vm1417_vm3, %v2657_v50, %v13249_v33 }
 0x3d4   : > { %2297 = vrot.lane.b32.xlu0 %v13238_v6, %s6604_s7  ;;  %v2816_v6 = vsel %vm1549_vm7, %v2784_v19, %v2364_v7  ;;  %v13248_v7 = vld [vmem:[#allocation281_spill] sm:$0xff]  ;;  %v2721_v21 = vsel %vm1450_vm4, %v2689_v49, %v13250_v40  ;;  %v2690_v19 = vsel %vm1417_vm3, %v2658_v17, %v13256_v13  ;;  %v13261_v17 = vld [vmem:[#allocation283_spill] sm:$0xff] }
 0x3d5   : > { %v2370_v31 = vpop.permute.xlu1 %2369  ;;  %v2848_v59 = vsel %vm1582_vm8, %v2816_v6, %v2466_v0  ;;  %v2659_v0 = vsel %vm1384_vm2, %v6514_v28, %v13251_v22  ;;  %v2753_v4 = vsel %vm1483_vm5, %v2721_v21, %v9122_v34  ;;  %v13257_v34 = vld [vmem:[#allocation388_spill] sm:$0xff]  ;;  %v2722_v35 = vsel %vm1450_vm4, %v2690_v19, %v13258_v2  ;;  %v13264_v19 = vld [vmem:[#allocation285_spill] sm:$0xff] }
 0x3d6   : > { %v2368_v51 = vpop.permute.xlu0 %2367  ;;  %v2880_v30 = vsel %vm1615_vm9, %v2848_v59, %v2567_v32  ;;  %v13252_v32 = vld [vmem:[#allocation330_spill] sm:$0xff]  ;;  %v2691_v20 = vsel %vm1417_vm3, %v2659_v0, %v13254_v60  ;;  %v2785_v56 = vsel %vm1516_vm6, %v2753_v4, %v9250_v23  ;;  %v2754_v33 = vsel %vm1483_vm5, %v2722_v35, %v9132_v46  ;;  %v6519_v60 = vld [vmem:[%s8019_s13 + $0x78] sm:$0xff] }
 0x3d7   : > { %2397 = vrot.lane.b32.xlu1 %v9458_v63, %s6605_s8  ;;  %v2723_v6 = vsel %vm1450_vm4, %v2691_v20, %v13257_v34  ;;  %v2817_v59 = vsel %vm1549_vm7, %v2785_v56, %v2366_v16  ;;  %v13259_v16 = vld [vmem:[#allocation329_spill] sm:$0xff]  ;;  %v2786_v21 = vsel %vm1516_vm6, %v2754_v33, %v9260_v45  ;;  %v13265_v34 = vld [vmem:[#allocation379_spill] sm:$0xff] }
 0x3d8   : > { %2395 = vrot.lane.b32.xlu0 %v9464_v42, %s6605_s8  ;;  %v2755_v50 = vsel %vm1483_vm5, %v2723_v6, %v9130_v26  ;;  %v2849_v23 = vsel %vm1582_vm8, %v2817_v59, %v2468_v48  ;;  %v2818_v26 = vsel %vm1549_vm7, %v2786_v21, %v2368_v51  ;;  %v13262_v20 = vld [vmem:[#allocation345_spill] sm:$0xff]  ;;  %v13266_v59 = vld [vmem:[#allocation390_spill] sm:$0xff]  ;;  %v13268_v21 = vld [vmem:[#allocation332_spill] sm:$0xff] }
 0x3d9   : > { %v2472_v1 = vpop.permute.xlu1 %2471  ;;  %v2787_v49 = vsel %vm1516_vm6, %v2755_v50, %v9258_v25  ;;  %v2881_v40 = vsel %vm1615_vm9, %v2849_v23, %v2569_v61  ;;  %v2660_v56 = vsel %vm1384_vm2, %v6519_v60, %v13262_v20  ;;  %v13267_v50 = vld [vmem:[#allocation391_spill] sm:$0xff] }
 0x3da   : > { %v2470_v52 = vpop.permute.xlu0 %2469  ;;  %v2819_v28 = vsel %vm1549_vm7, %v2787_v49, %v2370_v31  ;;  %v2692_v6 = vsel %vm1417_vm3, %v2660_v56, %v13265_v34  ;;  %v13271_v20 = vld [vmem:[#allocation287_spill] sm:$0xff] }
 0x3db   : > { %2950 = vrot.lane.b32.xlu1 %v2880_v30, %s6608_s11  ;;  %v2851_v46 = vsel %vm1582_vm8, %v2819_v28, %v2472_v1  ;;  %v2850_v25 = vsel %vm1582_vm8, %v2818_v26, %v2470_v52  ;;  %v9533_v52 = vld [vmem:[%s8019_s13 + $0x158] sm:$0xff]  ;;  %v2724_v23 = vsel %vm1450_vm4, %v2692_v6, %v13267_v50  ;;  %v6523_v56 = vld [vmem:[%s8019_s13 + $0x90] sm:$0xff]  ;;  %v13274_v6 = vld [vmem:[#allocation289_spill] sm:$0xff] }
 0x3dc   : > { %2497 = vrot.lane.b32.xlu0 %v13248_v7, %s6606_s9  ;;  %v13276_v50 = vld [vmem:[#allocation298_spill] sm:$0xff] }
 0x3dd   : > { %v2573_v29 = vpop.permute.xlu1 %2572 }
 0x3de   : > { %v2571_v14 = vpop.permute.xlu0 %2570  ;;  %v2883_v61 = vsel %vm1615_vm9, %v2851_v46, %v2573_v29  ;;  %v9538_v29 = vld [vmem:[%s8019_s13 + $0x150] sm:$0xff]  ;;  %v13269_v46 = vld [vmem:[#allocation334_spill] sm:$0xff] }
 0x3df   : > { %2598 = vrot.lane.b32.xlu1 %v13252_v32, %s6607_s10  ;;  %v2882_v0 = vsel %vm1615_vm9, %v2850_v25, %v2571_v14 }
 0x3e0   : > { %2499 = vrot.lane.b32.xlu0 %v13255_v18, %s6606_s9  ;;  %v13263_v18 = vld [vmem:[#allocation378_spill] sm:$0xff] }
 0x3e1   : > { %v2374_v30 = vpop.permute.xlu1 %2373 }
 0x3e2   : > { %v2372_v7 = vpop.permute.xlu0 %2371 }
 0x3e3   : > { %2600 = vrot.lane.b32.xlu1 %v13259_v16, %s6607_s10 }
 0x3e4   : > { %2952 = vrot.lane.b32.xlu0 %v2881_v40, %s6608_s11  ;;  %v2756_v40 = vsel %vm1483_vm5, %v2724_v23, %v9140_v10 }
 0x3e5   : > { %v2476_v48 = vpop.permute.xlu1 %2475  ;;  %v2788_v28 = vsel %vm1516_vm6, %v2756_v40, %v9274_v9  ;;  %v13277_v40 = vld [vmem:[#allocation392_spill] sm:$0xff] }
 0x3e6   : > { %v2474_v22 = vpop.permute.xlu0 %2473 }
 0x3e7   : > { %2956 = vrot.lane.b32.xlu1 %v2883_v61, %s6608_s11 }
 0x3e8   : > { %2954 = vrot.lane.b32.xlu0 %v2882_v0, %s6608_s11 }
 0x3e9   : > { %v2577_v45 = vpop.permute.xlu1 %2576 }
 0x3ea   : > { %v2575_v31 = vpop.permute.xlu0 %2574 }
 0x3eb   : > { %2303 = vrot.lane.b32.xlu1 %v13259_v16, %s6604_s7 }
 0x3ec   : > { %2301 = vrot.lane.b32.xlu0 %v13252_v32, %s6604_s7  ;;  %v13260_v32 = vld [vmem:[#allocation344_spill] sm:$0xff] }
 0x3ed   : > { %v9528_v51 = vpop.permute.xlu1 %2377  ;;  %v2661_v12 = vsel %vm1384_vm2, %v6518_v43, %v13260_v32 }
 0x3ee   : > { %v9530_v1 = vpop.permute.xlu0 %2375  ;;  %v2693_v13 = vsel %vm1417_vm3, %v2661_v12, %v13263_v18  ;;  %v6522_v12 = vld [vmem:[%s8019_s13 + $0x98] sm:$0xff]  ;;  %v13272_v18 = vld [vmem:[#allocation347_spill] sm:$0xff] }
 0x3ef   : > { %2401 = vrot.lane.b32.xlu1 %v9533_v52, %s6605_s8  ;;  %v2725_v2 = vsel %vm1450_vm4, %v2693_v13, %v13266_v59  ;;  %v2662_v13 = vsel %vm1384_vm2, %v6523_v56, %v13272_v18  ;;  %v13275_v59 = vld [vmem:[#allocation241_spill] sm:$0xff] }
 0x3f0   : > { %2399 = vrot.lane.b32.xlu0 %v9538_v29, %s6605_s8  ;;  %v2757_v33 = vsel %vm1483_vm5, %v2725_v2, %v9138_v55  ;;  %v2820_v55 = vsel %vm1549_vm7, %v2788_v28, %v2372_v7  ;;  %v2694_v2 = vsel %vm1417_vm3, %v2662_v13, %v13275_v59 }
 0x3f1   : > { %v9542_v14 = vpop.permute.xlu1 %2479  ;;  %v2789_v16 = vsel %vm1516_vm6, %v2757_v33, %v9272_v37  ;;  %v2852_v37 = vsel %vm1582_vm8, %v2820_v55, %v2474_v22  ;;  %v13278_v55 = vld [vmem:[#allocation336_spill] sm:$0xff] }
 0x3f2   : > { %v9544_v4 = vpop.permute.xlu0 %2477  ;;  %v2821_v26 = vsel %vm1549_vm7, %v2789_v16, %v2374_v30  ;;  %v2884_v9 = vsel %vm1615_vm9, %v2852_v37, %v2575_v31  ;;  %v9606_v31 = vld [vmem:[%s8019_s13 + $0x168] sm:$0xff]  ;;  %v2726_v16 = vsel %vm1450_vm4, %v2694_v2, %v13277_v40  ;;  %v13284_v2 = vld [vmem:[#allocation384_spill] sm:$0xff] }
 0x3f3   : > { %2503 = vrot.lane.b32.xlu1 %v13261_v17, %s6606_s9  ;;  %v2853_v25 = vsel %vm1582_vm8, %v2821_v26, %v2476_v48  ;;  %v13270_v17 = vld [vmem:[#allocation346_spill] sm:$0xff]  ;;  %v2758_v26 = vsel %vm1483_vm5, %v2726_v16, %v9148_v24  ;;  %v13286_v16 = vld [vmem:[#allocation243_spill] sm:$0xff] }
 0x3f4   : > { %2501 = vrot.lane.b32.xlu0 %v13264_v19, %s6606_s9  ;;  %v2885_v61 = vsel %vm1615_vm9, %v2853_v25, %v2577_v45  ;;  %v9601_v45 = vld [vmem:[%s8019_s13 + $0x170] sm:$0xff]  ;;  %v2663_v60 = vsel %vm1384_vm2, %v6522_v12, %v13270_v17  ;;  %v2790_v25 = vsel %vm1516_vm6, %v2758_v26, %v9288_v44  ;;  %v13287_v26 = vld [vmem:[#allocation385_spill] sm:$0xff] }
 0x3f5   : > { %v2581_v35 = vpop.permute.xlu1 %2580  ;;  %v13273_v19 = vld [vmem:[#allocation239_spill] sm:$0xff] }
 0x3f6   : > { %v2579_v49 = vpop.permute.xlu0 %2578  ;;  %v2695_v34 = vsel %vm1417_vm3, %v2663_v60, %v13273_v19  ;;  %v13281_v60 = vld [vmem:[#allocation372_spill] sm:$0xff] }
 0x3f7   : > { %2604 = vrot.lane.b32.xlu1 %v13268_v21, %s6607_s10  ;;  %v2727_v23 = vsel %vm1450_vm4, %v2695_v34, %v13276_v50  ;;  %v2248_v18 = vrot.slane %v13281_v60, 2  ;;  %v6524_v34 = vld [vmem:[%s8019_s13 + $0xb0] sm:$0xff]  ;;  %v6525_v50 = vld [vmem:[%s8019_s13 + $0xa8] sm:$0xff] }
 0x3f8   : > { %2602 = vrot.lane.b32.xlu0 %v13269_v46, %s6607_s10 }
 0x3f9   : > { %v9579_v10 = vpop.permute.xlu1 %2283 }
 0x3fa   : > { %v9583_v0 = vpop.permute.xlu0 %2281 }
 0x3fb   : > { %2960 = vrot.lane.b32.xlu1 %v2885_v61, %s6608_s11  ;;  %v13279_v61 = vld [vmem:[#allocation338_spill] sm:$0xff] }
 0x3fc   : > { %2958 = vrot.lane.b32.xlu0 %v2884_v9, %s6608_s11 }
 0x3fd   : > { %v9588_v30 = vpop.permute.xlu1 %2381 }
 0x3fe   : > { %v9590_v7 = vpop.permute.xlu0 %2379 }
 0x3ff   : > { %2307 = vrot.lane.b32.xlu1 %v13268_v21, %s6604_s7  ;;  %v2759_v21 = vsel %vm1483_vm5, %v2727_v23, %v9146_v36  ;;  %v2822_v36 = vsel %vm1549_vm7, %v2790_v25, %v9530_v1  ;;  %v13285_v23 = vld [vmem:[#allocation349_spill] sm:$0xff] }
 0x400   : > { %2305 = vrot.lane.b32.xlu0 %v13269_v46, %s6604_s7  ;;  %v2791_v46 = vsel %vm1516_vm6, %v2759_v21, %v9286_v15  ;;  %v2854_v15 = vsel %vm1582_vm8, %v2822_v36, %v9544_v4  ;;  %v2664_v40 = vsel %vm1384_vm2, %v6525_v50, %v13285_v23  ;;  %v13293_v50 = vld [vmem:[#allocation80_spill] sm:$0xff] }
 0x401   : > { %v9596_v48 = vpop.permute.xlu1 %2483  ;;  %v2823_v37 = vsel %vm1549_vm7, %v2791_v46, %v9528_v51  ;;  %v2886_v51 = vsel %vm1615_vm9, %v2854_v15, %v2579_v49  ;;  %v13280_v49 = vld [vmem:[#allocation370_spill] sm:$0xff]  ;;  %v13290_v15 = vld [vmem:[#allocation393_spill] sm:$0xff] }
 0x402   : > { %v9598_v22 = vpop.permute.xlu0 %2481  ;;  %v2855_v24 = vsel %vm1582_vm8, %v2823_v37, %v9542_v14  ;;  %v2249_v17 = vrot.slane %v13280_v49, 2  ;;  %v13289_v37 = vld [vmem:[#allocation301_spill] sm:$0xff] }
 0x403   : > { %2405 = vrot.lane.b32.xlu1 %v9601_v45, %s6605_s8  ;;  %v2887_v12 = vsel %vm1615_vm9, %v2855_v24, %v2581_v35 }
 0x404   : > { %2403 = vrot.lane.b32.xlu0 %v9606_v31, %s6605_s8  ;;  %v2250_v24 = vsel %vm605_vm1, %v2248_v18, %v2249_v17 }
 0x405   : > { %v9610_v43 = vpop.permute.xlu1 %2584 }
 0x406   : > { %v9612_v32 = vpop.permute.xlu0 %2582 }
 0x407   : > { %2507 = vrot.lane.b32.xlu1 %v13271_v20, %s6606_s9  ;;  %v13282_v20 = vld [vmem:[#allocation383_spill] sm:$0xff] }
 0x408   : > { %2505 = vrot.lane.b32.xlu0 %v13274_v6, %s6606_s9  ;;  %v2251_v56 = vrot.slane %v13282_v20, 2  ;;  %v13283_v6 = vld [vmem:[#allocation348_spill] sm:$0xff] }
 0x409   : > { %v9630_v33 = vpop.permute.xlu1 %2287  ;;  %v2665_v59 = vsel %vm1384_vm2, %v6524_v34, %v13283_v6  ;;  %v6526_v34 = vld [vmem:[%s6665_s26 + $0x8] sm:$0xff] }
 0x40a   : > { %v9636_v28 = vpop.permute.xlu0 %2285  ;;  %v2697_v21 = vsel %vm1417_vm3, %v2665_v59, %v13286_v16  ;;  %v2252_v46 = vsel %vm605_vm1, %v2249_v17, %v2251_v56  ;;  %v13294_v16 = vld [vmem:[#allocation81_spill] sm:$0xff] }
 0x40b   : > { %2608 = vrot.lane.b32.xlu1 %v13278_v55, %s6607_s10 }
 0x40c   : > { %2606 = vrot.lane.b32.xlu0 %v13279_v61, %s6607_s10 }
 0x40d   : > { %v9654_v9 = vpop.permute.xlu1 %2385 }
 0x40e   : > { %v9659_v44 = vpop.permute.xlu0 %2383 }
 0x40f   : > { %2964 = vrot.lane.b32.xlu1 %v2887_v12, %s6608_s11 }
 0x410   : > { %2962 = vrot.lane.b32.xlu0 %v2886_v51, %s6608_s11 }
 0x411   : > { %v9664_v1 = vpop.permute.xlu1 %2487 }
 0x412   : > { %v9666_v14 = vpop.permute.xlu0 %2485 }
 0x413   : > { %2311 = vrot.lane.b32.xlu1 %v13278_v55, %s6604_s7  ;;  %v13288_v55 = vld [vmem:[#allocation245_spill] sm:$0xff] }
 0x414   : > { %2309 = vrot.lane.b32.xlu0 %v13279_v61, %s6604_s7  ;;  %v2696_v25 = vsel %vm1417_vm3, %v2664_v40, %v13288_v55  ;;  %v2729_v61 = vsel %vm1450_vm4, %v2697_v21, %v13289_v37  ;;  %v13295_v21 = vld [vmem:[#allocation112_spill] sm:$0xff] }
 0x415   : > { %v9672_v4 = vpop.permute.xlu1 %2588  ;;  %v2728_v12 = vsel %vm1450_vm4, %v2696_v25, %v13290_v15  ;;  %v2761_v51 = vsel %vm1483_vm5, %v2729_v61, %v9154_v41  ;;  %v13297_v25 = vld [vmem:[#allocation47_spill] sm:$0xff]  ;;  %v9758_v15 = vld [vmem:[%s8019_s13 + $0x1a0] sm:$0xff] }
 0x416   : > { %v9674_v35 = vpop.permute.xlu0 %2586  ;;  %v2793_v20 = vsel %vm1516_vm6, %v2761_v51, %v9579_v10  ;;  %v13291_v10 = vld [vmem:[#allocation51_spill] sm:$0xff] }
 0x417   : > { %2409 = vrot.lane.b32.xlu1 %v13280_v49, %s6605_s8  ;;  %v2825_v56 = vsel %vm1549_vm7, %v2793_v20, %v9588_v30  ;;  %v1386_v6 = vsel %vm1384_vm2, %v6526_v34, %v13291_v10  ;;  %v13301_v34 = vld [vmem:[#allocation206_spill] sm:$0xff] }
 0x418   : > { %2407 = vrot.lane.b32.xlu0 %v13281_v60, %s6605_s8  ;;  %v2760_v60 = vsel %vm1483_vm5, %v2728_v12, %v9156_v39  ;;  %v2857_v18 = vsel %vm1582_vm8, %v2825_v56, %v9596_v48  ;;  %v1419_v23 = vsel %vm1417_vm3, %v1386_v6, %v13293_v50  ;;  %v13298_v12 = vld [vmem:[#allocation143_spill] sm:$0xff]  ;;  %v9770_v56 = vld [vmem:[%s8019_s13 + $0x198] sm:$0xff] }
 0x419   : > { %v9683_v13 = vpop.permute.xlu1 %2291  ;;  %v2792_v17 = vsel %vm1516_vm6, %v2760_v60, %v9583_v0  ;;  %v2889_v30 = vsel %vm1615_vm9, %v2857_v18, %v9610_v43  ;;  %v1452_v43 = vsel %vm1450_vm4, %v1419_v23, %v13295_v21  ;;  %v13299_v60 = vld [vmem:[#allocation174_spill] sm:$0xff]  ;;  %v13302_v6 = vld [vmem:[#allocation207_spill] sm:$0xff]  ;;  %v13304_v50 = vld [vmem:[#allocation228_spill] sm:$0xff] }
 0x41a   : > { %v9685_v19 = vpop.permute.xlu0 %2289  ;;  %v2824_v41 = vsel %vm1549_vm7, %v2792_v17, %v9590_v7  ;;  %v6527_v7 = vld [vmem:[%s6665_s26] sm:$0xff]  ;;  %v1485_v37 = vsel %vm1483_vm5, %v1452_v43, %v13297_v25  ;;  %v6528_v21 = vld [vmem:[%s6665_s26 + $0x18] sm:$0xff]  ;;  %v13306_v43 = vld [vmem:[#allocation46_spill] sm:$0xff] }
 0x41b   : > { %2511 = vrot.lane.b32.xlu1 %v13284_v2, %s6606_s9  ;;  %v2856_v0 = vsel %vm1582_vm8, %v2824_v41, %v9598_v22  ;;  %v13292_v2 = vld [vmem:[#allocation48_spill] sm:$0xff]  ;;  %v1518_v20 = vsel %vm1516_vm6, %v1485_v37, %v13299_v60  ;;  %v13300_v41 = vld [vmem:[#allocation175_spill] sm:$0xff]  ;;  %v13308_v37 = vld [vmem:[#allocation282_spill] sm:$0xff] }
 0x41c   : > { %2509 = vrot.lane.b32.xlu0 %v13287_v26, %s6606_s9  ;;  %v1385_v48 = vsel %vm1384_vm2, %v6527_v7, %v13292_v2  ;;  %v2888_v40 = vsel %vm1615_vm9, %v2856_v0, %v9612_v32  ;;  %v13296_v26 = vld [vmem:[#allocation113_spill] sm:$0xff]  ;;  %v9761_v32 = vld [vmem:[%s8019_s13 + $0x1a8] sm:$0x3]  ;;  %v1551_v10 = vsel %vm1549_vm7, %v1518_v20, %v13301_v34  ;;  %v2449_v2 = vrot.slane %v9758_v15, 1  ;;  %v6530_v20 = vld [vmem:[%s6665_s26 + $0x38] sm:$0xff] }
 0x41d   : > { %v9704_v36 = vpop.permute.xlu1 %2389  ;;  %v1418_v22 = vsel %vm1417_vm3, %v1385_v48, %v13294_v16  ;;  %v2451_v48 = vrot.slane %v9761_v32, 1  ;;  %v6531_v34 = vld [vmem:[%s6665_s26 + $0x30] sm:$0xff] }
 0x41e   : > { %v9711_v49 = vpop.permute.xlu0 %2387  ;;  %v1451_v55 = vsel %vm1450_vm4, %v1418_v22, %v13296_v26  ;;  %v2448_v22 = vrot.slane %v9770_v56, 1  ;;  %v1387_v26 = vsel %vm1384_vm2, %v6528_v21, %v13306_v43  ;;  %v13313_v21 = vld [vmem:[#allocation84_spill] sm:$0xff] }
 0x41f   : > { %2612 = vrot.lane.b32.xlu1 %v2252_v46, %s6607_s10  ;;  %v1484_v51 = vsel %vm1483_vm5, %v1451_v55, %v13298_v12  ;;  %v13307_v55 = vld [vmem:[#allocation49_spill] sm:$0xff] }
 0x420   : > { %2610 = vrot.lane.b32.xlu0 %v2250_v24, %s6607_s10  ;;  %v1517_v18 = vsel %vm1516_vm6, %v1484_v51, %v13300_v41  ;;  %v13309_v41 = vld [vmem:[#allocation52_spill] sm:$0xff] }
 0x421   : > { %v9727_v39 = vpop.permute.xlu1 %2491  ;;  %v1550_v0 = vsel %vm1549_vm7, %v1517_v18, %v13302_v6  ;;  %v1390_v18 = vsel %vm1384_vm2, %v6530_v20, %v13309_v41  ;;  %v13318_v41 = vld [vmem:[#allocation145_spill] sm:$0xff] }
 0x422   : > { %v9736_v59 = vpop.permute.xlu0 %2489  ;;  %v1583_v23 = vsel %vm1582_vm8, %v1550_v0, %v13304_v50  ;;  %v13311_v0 = vld [vmem:[#allocation82_spill] sm:$0xff]  ;;  %v13312_v50 = vld [vmem:[#allocation83_spill] sm:$0xff]  ;;  %v1423_v43 = vsel %vm1417_vm3, %v1390_v18, %v13313_v21  ;;  %v6533_v21 = vld [vmem:[%s8019_s13 + $0xc0] sm:$0xff] }
 0x423   : > { %2968 = vrot.lane.b32.xlu1 %v2889_v30, %s6608_s11  ;;  %v13303_v30 = vld [vmem:[#allocation50_spill] sm:$0xff]  ;;  %v1616_v12 = vsel %vm1615_vm9, %v1583_v23, %v13308_v37  ;;  %v1420_v23 = vsel %vm1417_vm3, %v1387_v26, %v13312_v50  ;;  %v2549_v26 = vrot.slane %v9770_v56, 2  ;;  %v13315_v37 = vld [vmem:[#allocation85_spill] sm:$0xff] }
 0x424   : > { %2966 = vrot.lane.b32.xlu0 %v2888_v40, %s6608_s11  ;;  %v1584_v7 = vsel %vm1582_vm8, %v1551_v10, %v13303_v30  ;;  %v13305_v40 = vld [vmem:[#allocation280_spill] sm:$0xff]  ;;  %v13310_v10 = vld [vmem:[#allocation53_spill] sm:$0xff] }
 0x425   : > { %v9755_v61 = vpop.permute.xlu1 %2592  ;;  %v1389_v6 = vsel %vm1384_vm2, %v6531_v34, %v13310_v10  ;;  %v13321_v10 = vld [vmem:[#allocation177_spill] sm:$0xff] }
 0x426   : > { %v9767_v17 = vpop.permute.xlu0 %2590  ;;  %v13323_v50 = vld [vmem:[#allocation209_spill] sm:$0xff] }
 0x427   : > { %2315 = vrot.lane.b32.xlu1 %v2252_v46, %s6604_s7  ;;  %v1617_v46 = vsel %vm1615_vm9, %v1584_v7, %v13305_v40  ;;  %v2550_v40 = vrot.slane %v9758_v15, 2 }
 0x428   : > { %2313 = vrot.lane.b32.xlu0 %v2250_v24, %s6604_s7  ;;  %v6529_v24 = vld [vmem:[%s6665_s26 + $0x20] sm:$0xff] }
 0x429   : > { %v2941_v16 = vpop.permute.xlu1 %2940  ;;  %v1388_v25 = vsel %vm1384_vm2, %v6529_v24, %v13307_v55  ;;  %v13314_v24 = vld [vmem:[#allocation115_spill] sm:$0xff] }
 0x42a   : > { %v3036_v51 = vsel %vm3034_vm10, %v1617_v46, %v2941_v16  ;;  %v2939_v60 = vpop.permute.xlu0 %2938  ;;  %v1421_v30 = vsel %vm1417_vm3, %v1388_v25, %v13311_v0  ;;  %v2452_v46 = vsel %vm428_vm0, %v2449_v2, %v2451_v48  ;;  %v2552_v16 = vrot.slane %v9761_v32, 2  ;;  %v6532_v0 = vld [vmem:[%s8019_s13 + $0xc8] sm:$0xff] }
 0x42b   : > { %2413 = vrot.lane.b32.xlu1 %v9758_v15, %s6605_s8  ;;  %v3035_v7 = vsel %vm3034_vm10, %v1616_v12, %v2939_v60  ;;  %v1453_v55 = vsel %vm1450_vm4, %v1420_v23, %v13314_v24  ;;  %v2450_v25 = vsel %vm428_vm0, %v2448_v22, %v2449_v2  ;;  %v1422_v48 = vsel %vm1417_vm3, %v1389_v6, %v13315_v37  ;;  %v13316_v12 = vld [vmem:[#allocation114_spill] sm:$0xff]  ;;  %v13317_v60 = vld [vmem:[#allocation117_spill] sm:$0xff]  ;;  %v13320_v2 = vld [vmem:[#allocation144_spill] sm:$0xff] }
 0x42c   : > { %2411 = vrot.lane.b32.xlu0 %v9770_v56, %s6605_s8  ;;  %5793 = vmatprep.mubr.msk.f32.mxu0 %vm3081_vm11, %v3035_v7  ;;  %v1454_v32 = vsel %vm1450_vm4, %v1421_v30, %v13316_v12  ;;  %v9832_v20 = vsel %vm1450_vm4, %v1423_v43, %v13317_v60  ;;  %v1486_v56 = vsel %vm1483_vm5, %v1453_v55, %v13318_v41  ;;  %v13322_v30 = vld [vmem:[#allocation350_spill] sm:$0xff]  ;;  %v13324_v43 = vld [vmem:[#allocation351_spill] sm:$0xff]  ;;  %v13328_v41 = vld [vmem:[#allocation304_spill] sm:$0xff] }
 0x42d   : > { %5794 = vmatmul.mubr.msk.f32.vlgmr.msra.gmra.mrb[0].mxu0 %vm3081_vm11, %v3036_v51  ;;  %v9823_v15 = vpop.permute.xlu1 %2295  ;;  %v13319_v51 = vld [vmem:[#allocation119_spill] sm:$0xff]  ;;  %v9844_v22 = vsel %vm1483_vm5, %v1454_v32, %v13320_v2  ;;  %v1519_v6 = vsel %vm1516_vm6, %v1486_v56, %v13321_v10  ;;  %v2667_v7 = vsel %vm1384_vm2, %v6532_v0, %v13322_v30  ;;  %v2666_v24 = vsel %vm1384_vm2, %v6533_v21, %v13324_v43  ;;  %v13326_v12 = vld [vmem:[#allocation230_spill] sm:$0xff]  ;;  %v6534_v0 = vld [vmem:[%s8019_s13 + $0xe0] sm:$0xff] }
 0x42e   : > { %v9836_v18 = vpop.permute.xlu0 %2293  ;;  %v9840_v34 = vsel %vm1450_vm4, %v1422_v48, %v13319_v51  ;;  %v1552_v23 = vsel %vm1549_vm7, %v1519_v6, %v13323_v50  ;;  %v13325_v55 = vld [vmem:[#allocation247_spill] sm:$0xff]  ;;  %v2553_v48 = vsel %vm605_vm1, %v2550_v40, %v2552_v16  ;;  %v2551_v2 = vsel %vm605_vm1, %v2549_v26, %v2550_v40  ;;  %v13329_v10 = vld [vmem:[#allocation286_spill] sm:$0xff]  ;;  %v13330_v30 = vld [vmem:[#allocation352_spill] sm:$0xff] }
 0x42f   : > { %2515 = vrot.lane.b32.xlu1 %v2452_v46, %s6606_s9  ;;  %v2699_v37 = vsel %vm1417_vm3, %v2667_v7, %v13325_v55  ;;  %v1585_v32 = vsel %vm1582_vm8, %v1552_v23, %v13326_v12  ;;  %v13327_v46 = vld [vmem:[#allocation249_spill] sm:$0xff]  ;;  %v13331_v16 = vld [vmem:[#allocation394_spill] sm:$0xff]  ;;  %v6535_v21 = vld [vmem:[%s8019_s13 + $0xd8] sm:$0xff] }
 0x430   : > { %2513 = vrot.lane.b32.xlu0 %v2450_v25, %s6606_s9  ;;  %v2698_v60 = vsel %vm1417_vm3, %v2666_v24, %v13327_v46  ;;  %v2731_v56 = vsel %vm1450_vm4, %v2699_v37, %v13328_v41  ;;  %v1618_v6 = vsel %vm1615_vm9, %v1585_v32, %v13329_v10  ;;  %v2669_v25 = vsel %vm1384_vm2, %v6534_v0, %v13330_v30  ;;  %v13332_v43 = vld [vmem:[#allocation353_spill] sm:$0xff]  ;;  %v6536_v55 = vld [vmem:[%s8019_s13 + $0xf8] sm:$0xff]  ;;  %v13333_v40 = vld [vmem:[#allocation354_spill] sm:$0xff]  ;;  %s6609_s9 = smov 96  }
 0x431   : > { %v2394_v51 = vpop.permute.xlu1 %2393  ;;  %v2730_v7 = vsel %vm1450_vm4, %v2698_v60, %v13331_v16  ;;  %v2763_v50 = vsel %vm1483_vm5, %v2731_v56, %v9162_v54  ;;  %v2668_v24 = vsel %vm1384_vm2, %v6535_v21, %v13332_v43  ;;  %v2671_v26 = vsel %vm1384_vm2, %v6536_v55, %v13333_v40  ;;  %v13334_v32 = vld [vmem:[#allocation251_spill] sm:$0xff]  ;;  %v13335_v46 = vld [vmem:[#allocation253_spill] sm:$0xff] }
 0x432   : > { %v2392_v23 = vpop.permute.xlu0 %2391  ;;  %v2762_v37 = vsel %vm1483_vm5, %v2730_v7, %v9164_v11  ;;  %v2795_v12 = vsel %vm1516_vm6, %v2763_v50, %v9630_v33  ;;  %v2701_v54 = vsel %vm1417_vm3, %v2669_v25, %v13334_v32  ;;  %v2700_v60 = vsel %vm1417_vm3, %v2668_v24, %v13335_v46  ;;  %v13336_v11 = vld [vmem:[#allocation307_spill] sm:$0xff]  ;;  %v13341_v24 = vld [vmem:[#allocation310_spill] sm:$0xff]  ;;  %v13342_v46 = vld [vmem:[#allocation176_spill] sm:$0xff] }
 0x433   : > { %2616 = vrot.lane.b32.xlu1 %v2553_v48, %s6607_s10  ;;  %v2794_v41 = vsel %vm1516_vm6, %v2762_v37, %v9636_v28  ;;  %v2827_v56 = vsel %vm1549_vm7, %v2795_v12, %v9654_v9  ;;  %v2733_v33 = vsel %vm1450_vm4, %v2701_v54, %v13336_v11  ;;  %v13337_v10 = vld [vmem:[#allocation395_spill] sm:$0xff] }
 0x434   : > { %2614 = vrot.lane.b32.xlu0 %v2551_v2, %s6607_s10  ;;  %v2732_v48 = vsel %vm1450_vm4, %v2700_v60, %v13337_v10  ;;  %v2826_v0 = vsel %vm1549_vm7, %v2794_v41, %v9659_v44  ;;  %v2859_v30 = vsel %vm1582_vm8, %v2827_v56, %v9664_v1  ;;  %v2765_v28 = vsel %vm1483_vm5, %v2733_v33, %v9170_v27  ;;  %v6537_v27 = vld [vmem:[%s8019_s13 + $0xf0] sm:$0xff]  ;;  %v13344_v60 = vld [vmem:[#allocation208_spill] sm:$0xff]  ;;  %v13346_v56 = vld [vmem:[#allocation229_spill] sm:$0xff] }
 0x435   : > { %v2943_v25 = vpop.permute.xlu1 %2942  ;;  %v2858_v9 = vsel %vm1582_vm8, %v2826_v0, %v9666_v14  ;;  %v2891_v2 = vsel %vm1615_vm9, %v2859_v30, %v9672_v4  ;;  %v2764_v50 = vsel %vm1483_vm5, %v2732_v48, %v9172_v53  ;;  %v2797_v1 = vsel %vm1516_vm6, %v2765_v28, %v9683_v13  ;;  %v13338_v14 = vld [vmem:[#allocation355_spill] sm:$0xff]  ;;  %v13340_v13 = vld [vmem:[#allocation257_spill] sm:$0xff]  ;;  %v13347_v48 = vld [vmem:[#allocation178_spill] sm:$0xff] }
 0x436   : > { %v3037_v16 = vsel %vm3034_vm10, %v1618_v6, %v2943_v25  ;;  %v2494_v7 = vpop.permute.xlu0 %2493  ;;  %v2890_v44 = vsel %vm1615_vm9, %v2858_v9, %v9674_v35  ;;  %v2670_v4 = vsel %vm1384_vm2, %v6537_v27, %v13338_v14  ;;  %v13339_v21 = vld [vmem:[#allocation255_spill] sm:$0xff]  ;;  %v2796_v53 = vsel %vm1516_vm6, %v2764_v50, %v9685_v19  ;;  %v13353_v14 = vld [vmem:[#allocation232_spill] sm:$0xff] }
 0x437   : > { %2972 = vrot.lane.b32.xlu1 %v2891_v2, %s6608_s11  ;;  %5796 = vmatprep.mubr.msk.f32.mxu0 %vm3081_vm11, %v3037_v16  ;;  %v2703_v6 = vsel %vm1417_vm3, %v2671_v26, %v13339_v21  ;;  %v2829_v35 = vsel %vm1549_vm7, %v2797_v1, %v9704_v36  ;;  %v2702_v43 = vsel %vm1417_vm3, %v2670_v4, %v13340_v13  ;;  %v13350_v2 = vld [vmem:[#allocation210_spill] sm:$0xff]  ;;  %v13354_v21 = vld [vmem:[#allocation288_spill] sm:$0xff] }
 0x438   : > { %2970 = vrot.lane.b32.xlu0 %v2890_v44, %s6608_s11  ;;  %v2735_v55 = vsel %vm1450_vm4, %v2703_v6, %v13341_v24  ;;  %v2828_v40 = vsel %vm1549_vm7, %v2796_v53, %v9711_v49  ;;  %v2861_v26 = vsel %vm1582_vm8, %v2829_v35, %v9727_v39  ;;  %v2734_v19 = vsel %vm1450_vm4, %v2702_v43, %v9052_v57  ;;  %v13351_v44 = vld [vmem:[#allocation211_spill] sm:$0xff]  ;;  %v13355_v35 = vld [vmem:[#allocation290_spill] sm:$0xff] }
 0x439   : > { %v2595_v37 = vpop.permute.xlu1 %2594  ;;  %v2767_v36 = vsel %vm1483_vm5, %v2735_v55, %v9178_v58  ;;  %v2860_v12 = vsel %vm1582_vm8, %v2828_v40, %v9736_v59  ;;  %v2893_v32 = vsel %vm1615_vm9, %v2861_v26, %v9755_v61  ;;  %v1520_v49 = vsel %vm1516_vm6, %v9844_v22, %v13342_v46  ;;  %v13343_v59 = vld [vmem:[#allocation146_spill] sm:$0xff] }
 0x43a   : > { %v2496_v54 = vpop.permute.xlu0 %2495  ;;  %v2766_v39 = vsel %vm1483_vm5, %v2734_v19, %v9180_v38  ;;  %v2892_v57 = vsel %vm1615_vm9, %v2860_v12, %v9767_v17  ;;  %v2799_v58 = vsel %vm1516_vm6, %v2767_v36, %v9823_v15  ;;  %v1489_v61 = vsel %vm1483_vm5, %v9832_v20, %v13343_v59  ;;  %v13345_v17 = vld [vmem:[#allocation147_spill] sm:$0xff]  ;;  %v6538_v26 = vld [vmem:[%s6665_s26 + $0x48] sm:$0xff] }
 0x43b   : > { %2976 = vrot.lane.b32.xlu1 %v2893_v32, %s6608_s11  ;;  %v1553_v41 = vsel %vm1549_vm7, %v1520_v49, %v13344_v60  ;;  %v2798_v22 = vsel %vm1516_vm6, %v2766_v39, %v9836_v18  ;;  %v2831_v38 = vsel %vm1549_vm7, %v2799_v58, %v2394_v51  ;;  %v1488_v15 = vsel %vm1483_vm5, %v9840_v34, %v13345_v17  ;;  %v13348_v18 = vld [vmem:[#allocation284_spill] sm:$0xff]  ;;  %v13349_v34 = vld [vmem:[#allocation179_spill] sm:$0xff]  ;;  %v13359_v49 = vld [vmem:[#allocation149_spill] sm:$0xff] }
 0x43c   : > { %2974 = vrot.lane.b32.xlu0 %v2892_v57, %s6608_s11  ;;  %v1586_v11 = vsel %vm1582_vm8, %v1553_v41, %v13346_v56  ;;  %v2830_v33 = vsel %vm1549_vm7, %v2798_v22, %v2392_v23  ;;  %v2863_v20 = vsel %vm1582_vm8, %v2831_v38, %v2496_v54  ;;  %v1522_v0 = vsel %vm1516_vm6, %v1489_v61, %v13347_v48  ;;  %v13357_v12 = vld [vmem:[#allocation87_spill] sm:$0xff]  ;;  %v13358_v54 = vld [vmem:[#allocation121_spill] sm:$0xff]  ;;  %v13363_v17 = vld [vmem:[#allocation234_spill] sm:$0xff] }
 0x43d   : > { %v2597_v10 = vpop.permute.xlu1 %2596  ;;  %v1619_v51 = vsel %vm1615_vm9, %v1586_v11, %v13348_v18  ;;  %v2862_v30 = vsel %vm1582_vm8, %v2830_v33, %v2494_v7  ;;  %v1521_v9 = vsel %vm1516_vm6, %v1488_v15, %v13349_v34  ;;  %v1555_v23 = vsel %vm1549_vm7, %v1522_v0, %v13350_v2  ;;  %v13352_v7 = vld [vmem:[#allocation231_spill] sm:$0xff]  ;;  %v13360_v58 = vld [vmem:[#allocation181_spill] sm:$0xff]  ;;  %v13365_v33 = vld [vmem:[#allocation292_spill] sm:$0xff] }
 0x43e   : > { %v2895_v25 = vsel %vm1615_vm9, %v2863_v20, %v2597_v10  ;;  %v2945_v28 = vpop.permute.xlu0 %2944  ;;  %v2894_v16 = vsel %vm1615_vm9, %v2862_v30, %v2595_v37  ;;  %v1554_v1 = vsel %vm1549_vm7, %v1521_v9, %v13351_v44  ;;  %v1588_v27 = vsel %vm1582_vm8, %v1555_v23, %v13352_v7  ;;  %v13356_v37 = vld [vmem:[#allocation55_spill] sm:$0xff]  ;;  %v13361_v60 = vld [vmem:[#allocation213_spill] sm:$0xff]  ;;  %v13366_v30 = vld [vmem:[#allocation54_spill] sm:$0xff] }
 0x43f   : > { %v3038_v50 = vsel %vm3034_vm10, %v1619_v51, %v2945_v28  ;;  %2980 = vrot.lane.b32.xlu1 %v2895_v25, %s6608_s11  ;;  %v1587_v4 = vsel %vm1582_vm8, %v1554_v1, %v13353_v14  ;;  %v1621_v6 = vsel %vm1615_vm9, %v1588_v27, %v13354_v21  ;;  %v1391_v19 = vsel %vm1384_vm2, %v6538_v26, %v13356_v37  ;;  %v13362_v22 = vld [vmem:[#allocation357_spill] sm:$0xff]  ;;  %v6539_v51 = vld [vmem:[%s6665_s26 + $0x50] sm:$0xff]  ;;  %v13367_v28 = vld [vmem:[#allocation356_spill] sm:$0xff] }
 0x440   : > { %2978 = vrot.lane.b32.xlu0 %v2894_v16, %s6608_s11  ;;  %5797 = vmatmul.mubr.msk.f32.gmra.mrb[2].mxu0 %vm3081_vm11, %v3038_v50  ;;  %v1620_v13 = vsel %vm1615_vm9, %v1587_v4, %v13355_v35  ;;  %v1424_v32 = vsel %vm1417_vm3, %v1391_v19, %v13357_v12  ;;  %v2672_v38 = vsel %vm1384_vm2, %v9314_v3, %v13362_v22  ;;  %v13364_v56 = vld [vmem:[#allocation261_spill] sm:$0xff]  ;;  %v13368_v34 = vld [vmem:[#allocation316_spill] sm:$0xff]  ;;  %v6540_v21 = vld [vmem:[%s6665_s26 + $0x68] sm:$0xff] }
 0x441   : > { %v2949_v53 = vpop.permute.xlu1 %2948  ;;  %v1457_v46 = vsel %vm1450_vm4, %v1424_v32, %v13358_v54  ;;  %v2704_v11 = vsel %vm1417_vm3, %v2672_v38, %v13364_v56  ;;  %v1392_v25 = vsel %vm1384_vm2, %v6539_v51, %v13366_v30  ;;  %v2673_v9 = vsel %vm1384_vm2, %v13368_v34, %v13367_v28  ;;  %v13371_v44 = vld [vmem:[#allocation120_spill] sm:$0xff]  ;;  %v6541_v37 = vld [vmem:[%s6665_s26 + $0x60] sm:$0xff]  ;;  %v13382_v38 = vld [vmem:[#allocation123_spill] sm:$0xff] }
 0x442   : > { %v3040_v43 = vsel %vm3034_vm10, %v1621_v6, %v2949_v53  ;;  %v2947_v24 = vpop.permute.xlu0 %2946  ;;  %v1490_v39 = vsel %vm1483_vm5, %v1457_v46, %v13359_v49  ;;  %v2736_v10 = vsel %vm1450_vm4, %v2704_v11, %v9060_v5  ;;  %v13369_v5 = vld [vmem:[#allocation86_spill] sm:$0xff]  ;;  %v13372_v7 = vld [vmem:[#allocation396_spill] sm:$0xff]  ;;  %v13376_v19 = vld [vmem:[#allocation57_spill] sm:$0xff] }
 0x443   : > { %v3039_v55 = vsel %vm3034_vm10, %v1620_v13, %v2947_v24  ;;  %v1523_v59 = vsel %vm1516_vm6, %v1490_v39, %v13360_v58  ;;  %v2768_v0 = vsel %vm1483_vm5, %v2736_v10, %v9188_v47  ;;  %v1425_v23 = vsel %vm1417_vm3, %v1392_v25, %v13369_v5  ;;  %v13370_v47 = vld [vmem:[#allocation259_spill] sm:$0xff]  ;;  %v13373_v6 = vld [vmem:[#allocation56_spill] sm:$0xff]  ;;  %v13379_v39 = vld [vmem:[#allocation89_spill] sm:$0xff] }
 0x444   : > { %5799 = vmatprep.mubr.msk.f32.mxu0 %vm3081_vm11, %v3039_v55  ;;  %v1556_v41 = vsel %vm1549_vm7, %v1523_v59, %v13361_v60  ;;  %v2705_v16 = vsel %vm1417_vm3, %v2673_v9, %v13370_v47  ;;  %v1458_v1 = vsel %vm1450_vm4, %v1425_v23, %v13371_v44  ;;  %v1394_v53 = vsel %vm1384_vm2, %v6540_v21, %v13373_v6  ;;  %v13374_v35 = vld [vmem:[#allocation148_spill] sm:$0xff]  ;;  %v13380_v59 = vld [vmem:[#allocation122_spill] sm:$0xff]  ;;  %v13385_v10 = vld [vmem:[#allocation151_spill] sm:$0xff] }
 0x445   : > { %5800 = vmatmul.mubr.msk.f32.gmra.mrb[4].mxu0 %vm3081_vm11, %v3040_v43  ;;  %v2300_v40 = vpop.permute.xlu1 %2299  ;;  %v1589_v15 = vsel %vm1582_vm8, %v1556_v41, %v13363_v17  ;;  %v2737_v27 = vsel %vm1450_vm4, %v2705_v16, %v13372_v7  ;;  %v1491_v13 = vsel %vm1483_vm5, %v1458_v1, %v13374_v35  ;;  %v13375_v43 = vld [vmem:[#allocation405_spill] sm:$0xff]  ;;  %v13377_v12 = vld [vmem:[#allocation88_spill] sm:$0xff]  ;;  %v13388_v25 = vld [vmem:[#allocation183_spill] sm:$0xff] }
 0x446   : > { %v2298_v36 = vpop.permute.xlu0 %2297  ;;  %v1622_v20 = vsel %vm1615_vm9, %v1589_v15, %v13365_v33  ;;  %v2769_v24 = vsel %vm1483_vm5, %v2737_v27, %v13375_v43  ;;  %v1427_v32 = vsel %vm1417_vm3, %v1394_v53, %v13377_v12  ;;  %v13378_v54 = vld [vmem:[#allocation180_spill] sm:$0xff]  ;;  %v13383_v15 = vld [vmem:[#allocation150_spill] sm:$0xff]  ;;  %v13390_v5 = vld [vmem:[#allocation215_spill] sm:$0xff] }
 0x447   : > { %v2800_v2 = vsel %vm1516_vm6, %v2768_v0, %v2298_v36  ;;  %v1393_v36 = vsel %vm1384_vm2, %v6541_v37, %v13376_v19  ;;  %v1524_v46 = vsel %vm1516_vm6, %v1491_v13, %v13378_v54  ;;  %v2801_v49 = vsel %vm1516_vm6, %v2769_v24, %v2300_v40  ;;  %v13381_v60 = vld [vmem:[#allocation212_spill] sm:$0xff]  ;;  %v13384_v40 = vld [vmem:[#allocation233_spill] sm:$0xff]  ;;  %v13386_v0 = vld [vmem:[#allocation182_spill] sm:$0xff] }
 0x448   : > { %v1426_v58 = vsel %vm1417_vm3, %v1393_v36, %v13379_v39  ;;  %v1557_v41 = vsel %vm1549_vm7, %v1524_v46, %v13381_v60  ;;  %v13389_v34 = vld [vmem:[#allocation214_spill] sm:$0xff]  ;;  %v13391_v47 = vld [vmem:[#allocation235_spill] sm:$0xff]  ;;  %v13393_v1 = vld [vmem:[#allocation293_spill] sm:$0xff] }
 0x449   : > { %v2398_v57 = vpop.permute.xlu1 %2397  ;;  %v1459_v17 = vsel %vm1450_vm4, %v1426_v58, %v13382_v38  ;;  %v1590_v11 = vsel %vm1582_vm8, %v1557_v41, %v13384_v40  ;;  %v13396_v37 = vld [vmem:[#allocation359_spill] sm:$0xff]  ;;  %v13399_v46 = vld [vmem:[#allocation397_spill] sm:$0xff]  ;;  %v13401_v60 = vld [vmem:[#allocation398_spill] sm:$0xff] }
 0x44a   : > { %v2396_v61 = vpop.permute.xlu0 %2395  ;;  %v2833_v22 = vsel %vm1549_vm7, %v2801_v49, %v2398_v57  ;;  %v2674_v19 = vsel %vm1384_vm2, %v9381_v62, %v13396_v37  ;;  %v13397_v36 = vld [vmem:[#allocation263_spill] sm:$0xff]  ;;  %v6542_v58 = vld [vmem:[%s6665_s26 + $0x80] sm:$0xff]  ;;  %v13402_v41 = vld [vmem:[#allocation406_spill] sm:$0xff] }
 0x44b   : > { %v2832_v50 = vsel %vm1549_vm7, %v2800_v2, %v2396_v61  ;;  %v1460_v61 = vsel %vm1450_vm4, %v1427_v32, %v13380_v59  ;;  %v13398_v32 = vld [vmem:[#allocation265_spill] sm:$0xff]  ;;  %v13400_v59 = vld [vmem:[#allocation58_spill] sm:$0xff]  ;;  %v6543_v38 = vld [vmem:[%s6665_s26 + $0x78] sm:$0xff] }
 0x44c   : > { %v1493_v56 = vsel %vm1483_vm5, %v1460_v61, %v13383_v15  ;;  %v2706_v54 = vsel %vm1417_vm3, %v2674_v19, %v13398_v32  ;;  %v1396_v61 = vsel %vm1384_vm2, %v6542_v58, %v13400_v59  ;;  %v13418_v19 = vld [vmem:[#allocation296_spill] sm:$0xff] }
 0x44d   : > { %v2951_v48 = vpop.permute.xlu1 %2950  ;;  %v13419_v59 = vld [vmem:[#allocation360_spill] sm:$0xff] }
 0x44e   : > { %v3041_v18 = vsel %vm3034_vm10, %v1622_v20, %v2951_v48  ;;  %v2498_v3 = vpop.permute.xlu0 %2497  ;;  %v1492_v48 = vsel %vm1483_vm5, %v1459_v17, %v13385_v10  ;;  %v13403_v17 = vld [vmem:[#allocation59_spill] sm:$0xff] }
 0x44f   : > { %5802 = vmatprep.mubr.msk.f32.mxu0 %vm3081_vm11, %v3041_v18  ;;  %v2864_v14 = vsel %vm1582_vm8, %v2832_v50, %v2498_v3  ;;  %v1526_v18 = vsel %vm1516_vm6, %v1493_v56, %v13386_v0  ;;  %v13387_v3 = vld [vmem:[#allocation291_spill] sm:$0xff]  ;;  %v1525_v28 = vsel %vm1516_vm6, %v1492_v48, %v13388_v25  ;;  %v13392_v50 = vld [vmem:[#allocation236_spill] sm:$0xff]  ;;  %v1395_v15 = vsel %vm1384_vm2, %v6543_v38, %v13403_v17  ;;  %v13404_v56 = vld [vmem:[#allocation90_spill] sm:$0xff] }
 0x450   : > { %v1623_v57 = vsel %vm1615_vm9, %v1590_v11, %v13387_v3  ;;  %v1559_v9 = vsel %vm1549_vm7, %v1526_v18, %v13389_v34  ;;  %v1558_v23 = vsel %vm1549_vm7, %v1525_v28, %v13390_v5  ;;  %v1429_v40 = vsel %vm1417_vm3, %v1396_v61, %v13404_v56  ;;  %v13405_v11 = vld [vmem:[#allocation407_spill] sm:$0xff]  ;;  %v13407_v0 = vld [vmem:[#allocation124_spill] sm:$0xff]  ;;  %v13410_v5 = vld [vmem:[#allocation153_spill] sm:$0xff] }
 0x451   : > { %v2599_v4 = vpop.permute.xlu1 %2598  ;;  %v1592_v16 = vsel %vm1582_vm8, %v1559_v9, %v13391_v47  ;;  %v1591_v44 = vsel %vm1582_vm8, %v1558_v23, %v13392_v50  ;;  %v13406_v10 = vld [vmem:[#allocation91_spill] sm:$0xff]  ;;  %v1462_v18 = vsel %vm1450_vm4, %v1429_v40, %v13407_v0  ;;  %v13409_v25 = vld [vmem:[#allocation152_spill] sm:$0xff]  ;;  %v2677_v61 = vsel %vm1384_vm2, %v9458_v63, %v13419_v59 }
 0x452   : > { %v2896_v55 = vsel %vm1615_vm9, %v2864_v14, %v2599_v4  ;;  %v2500_v26 = vpop.permute.xlu0 %2499  ;;  %v1625_v7 = vsel %vm1615_vm9, %v1592_v16, %v13393_v1  ;;  %v13394_v14 = vld [vmem:[#allocation294_spill] sm:$0xff]  ;;  %v1428_v48 = vsel %vm1417_vm3, %v1395_v15, %v13406_v10  ;;  %v1495_v28 = vsel %vm1483_vm5, %v1462_v18, %v13409_v25  ;;  %v13411_v47 = vld [vmem:[#allocation184_spill] sm:$0xff]  ;;  %v13423_v17 = vld [vmem:[#allocation399_spill] sm:$0xff] }
 0x453   : > { %2982 = vrot.lane.b32.xlu0 %v2896_v55, %s6608_s11  ;;  %v2865_v33 = vsel %vm1582_vm8, %v2833_v22, %v2500_v26  ;;  %v1624_v4 = vsel %vm1615_vm9, %v1591_v44, %v13394_v14  ;;  %v13395_v55 = vld [vmem:[#allocation358_spill] sm:$0xff]  ;;  %v1528_v16 = vsel %vm1516_vm6, %v1495_v28, %v13411_v47  ;;  %v13413_v14 = vld [vmem:[#allocation216_spill] sm:$0xff]  ;;  %v6545_v0 = vld [vmem:[%s6665_s26 + $0x90] sm:$0xff] }
 0x454   : > { %v2675_v26 = vsel %vm1384_vm2, %v9375_v8, %v13395_v55  ;;  %v2738_v8 = vsel %vm1450_vm4, %v2706_v54, %v13401_v60  ;;  %v13417_v55 = vld [vmem:[#allocation295_spill] sm:$0xff]  ;;  %v13420_v60 = vld [vmem:[#allocation361_spill] sm:$0xff]  ;;  %v6544_v40 = vld [vmem:[%s6665_s26 + $0x98] sm:$0xff] }
 0x455   : > { %v2601_v20 = vpop.permute.xlu1 %2600  ;;  %v2707_v12 = vsel %vm1417_vm3, %v2675_v26, %v13397_v36  ;;  %v13426_v10 = vld [vmem:[#allocation408_spill] sm:$0xff]  ;;  %v13427_v18 = vld [vmem:[#allocation61_spill] sm:$0xff] }
 0x456   : > { %v2897_v51 = vsel %vm1615_vm9, %v2865_v33, %v2601_v20  ;;  %v2953_v30 = vpop.permute.xlu0 %2952  ;;  %v2739_v49 = vsel %vm1450_vm4, %v2707_v12, %v13399_v46  ;;  %v2770_v33 = vsel %vm1483_vm5, %v2738_v8, %v13405_v11  ;;  %v2676_v8 = vsel %vm1384_vm2, %v9464_v42, %v13420_v60  ;;  %v13424_v11 = vld [vmem:[#allocation60_spill] sm:$0xff] }
 0x457   : > { %v3042_v2 = vsel %vm3034_vm10, %v1623_v57, %v2953_v30  ;;  %2984 = vrot.lane.b32.xlu1 %v2897_v51, %s6608_s11  ;;  %v2771_v62 = vsel %vm1483_vm5, %v2739_v49, %v13402_v41  ;;  %v13408_v51 = vld [vmem:[#allocation125_spill] sm:$0xff]  ;;  %v13421_v41 = vld [vmem:[#allocation267_spill] sm:$0xff] }
 0x458   : > { %5803 = vmatmul.mubr.msk.f32.gmra.mrb[6].mxu0 %vm3081_vm11, %v3042_v2  ;;  %v1461_v30 = vsel %vm1450_vm4, %v1428_v48, %v13408_v51 }
 0x459   : > { %v2957_v27 = vpop.permute.xlu1 %2956  ;;  %v1494_v23 = vsel %vm1483_vm5, %v1461_v30, %v13410_v5  ;;  %v13429_v30 = vld [vmem:[#allocation409_spill] sm:$0xff] }
 0x45a   : > { %v3044_v21 = vsel %vm3034_vm10, %v1625_v7, %v2957_v27  ;;  %v2955_v6 = vpop.permute.xlu0 %2954  ;;  %v13412_v7 = vld [vmem:[#allocation185_spill] sm:$0xff] }
 0x45b   : > { %v3043_v53 = vsel %vm3034_vm10, %v1624_v4, %v2955_v6  ;;  %v1527_v27 = vsel %vm1516_vm6, %v1494_v23, %v13412_v7  ;;  %v1561_v4 = vsel %vm1549_vm7, %v1528_v16, %v13413_v14  ;;  %v13414_v6 = vld [vmem:[#allocation217_spill] sm:$0xff]  ;;  %v13432_v16 = vld [vmem:[#allocation126_spill] sm:$0xff] }
 0x45c   : > { %5805 = vmatprep.mubr.msk.f32.mxu0 %vm3081_vm11, %v3043_v53  ;;  %v1560_v53 = vsel %vm1549_vm7, %v1527_v27, %v13414_v6  ;;  %v13435_v6 = vld [vmem:[#allocation186_spill] sm:$0xff] }
 0x45d   : > { %5806 = vmatmul.mubr.msk.f32.gmra.mrb[8].mxu0 %vm3081_vm11, %v3044_v21  ;;  %v2304_v35 = vpop.permute.xlu1 %2303 }
 0x45e   : > { %v2302_v13 = vpop.permute.xlu0 %2301  ;;  %v2803_v20 = vsel %vm1516_vm6, %v2771_v62, %v2304_v35  ;;  %v13415_v35 = vld [vmem:[#allocation237_spill] sm:$0xff]  ;;  %v2709_v62 = vsel %vm1417_vm3, %v2677_v61, %v13421_v41  ;;  %v13442_v61 = vld [vmem:[#allocation299_spill] sm:$0xff] }
 0x45f   : > { %v2802_v3 = vsel %vm1516_vm6, %v2770_v33, %v2302_v13  ;;  %v1594_v13 = vsel %vm1582_vm8, %v1561_v4, %v13415_v35  ;;  %v2741_v15 = vsel %vm1450_vm4, %v2709_v62, %v13423_v17  ;;  %v1398_v33 = vsel %vm1384_vm2, %v6544_v40, %v13424_v11  ;;  %v13434_v4 = vld [vmem:[#allocation155_spill] sm:$0xff] }
 0x460   : > { %v1627_v26 = vsel %vm1615_vm9, %v1594_v13, %v13417_v55  ;;  %v2773_v42 = vsel %vm1483_vm5, %v2741_v15, %v13426_v10  ;;  %v13444_v11 = vld [vmem:[#allocation363_spill] sm:$0xff]  ;;  %v13446_v10 = vld [vmem:[#allocation380_spill] sm:$0xff] }
 0x461   : > { %v2402_v43 = vpop.permute.xlu1 %2401 }
 0x462   : > { %v2400_v24 = vpop.permute.xlu0 %2399  ;;  %v2835_v57 = vsel %vm1549_vm7, %v2803_v20, %v2402_v43  ;;  %v13416_v43 = vld [vmem:[#allocation238_spill] sm:$0xff]  ;;  %v13425_v20 = vld [vmem:[#allocation400_spill] sm:$0xff] }
 0x463   : > { %v2834_v34 = vsel %vm1549_vm7, %v2802_v3, %v2400_v24  ;;  %v1593_v24 = vsel %vm1582_vm8, %v1560_v53, %v13416_v43  ;;  %v1397_v3 = vsel %vm1384_vm2, %v6545_v0, %v13427_v18 }
 0x464   : > { %v1626_v36 = vsel %vm1615_vm9, %v1593_v24, %v13418_v19  ;;  %v13436_v24 = vld [vmem:[#allocation187_spill] sm:$0xff] }
 0x465   : > { %v2504_v39 = vpop.permute.xlu1 %2503 }
 0x466   : > { %v2502_v22 = vpop.permute.xlu0 %2501  ;;  %v2867_v9 = vsel %vm1582_vm8, %v2835_v57, %v2504_v39  ;;  %v13428_v57 = vld [vmem:[#allocation92_spill] sm:$0xff] }
 0x467   : > { %v2866_v50 = vsel %vm1582_vm8, %v2834_v34, %v2502_v22  ;;  %v13422_v22 = vld [vmem:[#allocation269_spill] sm:$0xff]  ;;  %v1431_v51 = vsel %vm1417_vm3, %v1398_v33, %v13428_v57  ;;  %v2678_v33 = vsel %vm1384_vm2, %v9538_v29, %v13444_v11  ;;  %v13448_v57 = vld [vmem:[#allocation62_spill] sm:$0xff] }
 0x468   : > { %v2708_v38 = vsel %vm1417_vm3, %v2676_v8, %v13422_v22  ;;  %v13430_v34 = vld [vmem:[#allocation93_spill] sm:$0xff] }
 0x469   : > { %v2605_v2 = vpop.permute.xlu1 %2604  ;;  %v2740_v63 = vsel %vm1450_vm4, %v2708_v38, %v13425_v20  ;;  %v13445_v20 = vld [vmem:[#allocation271_spill] sm:$0xff] }
 0x46a   : > { %v2899_v44 = vsel %vm1615_vm9, %v2867_v9, %v2605_v2  ;;  %v2603_v1 = vpop.permute.xlu0 %2602  ;;  %v2772_v25 = vsel %vm1483_vm5, %v2740_v63, %v13429_v30  ;;  %v1430_v9 = vsel %vm1417_vm3, %v1397_v3, %v13430_v34  ;;  %v13431_v2 = vld [vmem:[#allocation33_spill] sm:$0xff]  ;;  %v6546_v3 = vld [vmem:[%s6665_s26 + $0xb0] sm:$0xff]  ;;  %v13449_v30 = vld [vmem:[#allocation402_spill] sm:$0xff] }
 0x46b   : > { %v2898_v21 = vsel %vm1615_vm9, %v2866_v50, %v2603_v1  ;;  %2988 = vrot.lane.b32.xlu1 %v2899_v44, %s6608_s11  ;;  %v1464_v5 = vsel %vm1450_vm4, %v1431_v51, %v13431_v2  ;;  %v1463_v50 = vsel %vm1450_vm4, %v1430_v9, %v13432_v16  ;;  %v13433_v44 = vld [vmem:[#allocation154_spill] sm:$0xff]  ;;  %v1400_v51 = vsel %vm1384_vm2, %v6546_v3, %v13448_v57  ;;  %v13451_v9 = vld [vmem:[#allocation63_spill] sm:$0xff]  ;;  %v13468_v3 = vld [vmem:[#allocation64_spill] sm:$0xff] }
 0x46c   : > { %2986 = vrot.lane.b32.xlu0 %v2898_v21, %s6608_s11  ;;  %v1497_v1 = vsel %vm1483_vm5, %v1464_v5, %v13433_v44  ;;  %v1496_v21 = vsel %vm1483_vm5, %v1463_v50, %v13434_v4  ;;  %v6547_v34 = vld [vmem:[%s6665_s26 + $0xa8] sm:$0xff]  ;;  %v13454_v44 = vld [vmem:[#allocation95_spill] sm:$0xff] }
 0x46d   : > { %v2961_v37 = vpop.permute.xlu1 %2960  ;;  %v1530_v53 = vsel %vm1516_vm6, %v1497_v1, %v13435_v6  ;;  %v1529_v55 = vsel %vm1516_vm6, %v1496_v21, %v13436_v24  ;;  %v1399_v2 = vsel %vm1384_vm2, %v6547_v34, %v13451_v9  ;;  %v13452_v5 = vld [vmem:[#allocation94_spill] sm:$0xff]  ;;  %v13456_v21 = vld [vmem:[#allocation127_spill] sm:$0xff]  ;;  %v6550_v9 = vld [vmem:[%s6665_s26 + $0xe0] sm:$0xff] }
 0x46e   : > { %v3046_v12 = vsel %vm3034_vm10, %v1627_v26, %v2961_v37  ;;  %v2959_v32 = vpop.permute.xlu0 %2958  ;;  %v13437_v26 = vld [vmem:[#allocation218_spill] sm:$0xff]  ;;  %v1432_v1 = vsel %vm1417_vm3, %v1399_v2, %v13454_v44  ;;  %v13475_v44 = vld [vmem:[#allocation67_spill] sm:$0xff] }
 0x46f   : > { %v3045_v54 = vsel %vm3034_vm10, %v1626_v36, %v2959_v32  ;;  %v1563_v37 = vsel %vm1549_vm7, %v1530_v53, %v13437_v26  ;;  %v13438_v36 = vld [vmem:[#allocation219_spill] sm:$0xff]  ;;  %v13439_v32 = vld [vmem:[#allocation240_spill] sm:$0xff]  ;;  %v1465_v6 = vsel %vm1450_vm4, %v1432_v1, %v13456_v21  ;;  %v13472_v2 = vld [vmem:[#allocation66_spill] sm:$0xff] }
 0x470   : > { %5808 = vmatprep.mubr.msk.f32.mxu0 %vm3081_vm11, %v3045_v54  ;;  %v1596_v54 = vsel %vm1582_vm8, %v1563_v37, %v13439_v32  ;;  %v13457_v53 = vld [vmem:[#allocation156_spill] sm:$0xff] }
 0x471   : > { %5809 = vmatmul.mubr.msk.f32.gmra.mrb[10].mxu0 %vm3081_vm11, %v3046_v12  ;;  %v2308_v46 = vpop.permute.xlu1 %2307  ;;  %v1562_v12 = vsel %vm1549_vm7, %v1529_v55, %v13438_v36  ;;  %v13458_v55 = vld [vmem:[#allocation157_spill] sm:$0xff]  ;;  %v13459_v37 = vld [vmem:[#allocation188_spill] sm:$0xff] }
 0x472   : > { %v2306_v49 = vpop.permute.xlu0 %2305  ;;  %v2805_v28 = vsel %vm1516_vm6, %v2773_v42, %v2308_v46  ;;  %v13440_v46 = vld [vmem:[#allocation242_spill] sm:$0xff]  ;;  %v2710_v42 = vsel %vm1417_vm3, %v2678_v33, %v13446_v10  ;;  %v1498_v26 = vsel %vm1483_vm5, %v1465_v6, %v13458_v55  ;;  %v13478_v6 = vld [vmem:[#allocation313_spill] sm:$0xff]  ;;  %v13480_v55 = vld [vmem:[#allocation96_spill] sm:$0xff] }
 0x473   : > { %v2804_v23 = vsel %vm1516_vm6, %v2772_v25, %v2306_v49  ;;  %v1595_v49 = vsel %vm1582_vm8, %v1562_v12, %v13440_v46  ;;  %v13450_v25 = vld [vmem:[#allocation410_spill] sm:$0xff] }
 0x474   : > { %v1628_v60 = vsel %vm1615_vm9, %v1595_v49, %v13442_v61  ;;  %v13461_v49 = vld [vmem:[#allocation35_spill] sm:$0xff] }
 0x475   : > { %v2406_v39 = vpop.permute.xlu1 %2405 }
 0x476   : > { %v2404_v58 = vpop.permute.xlu0 %2403  ;;  %v2837_v47 = vsel %vm1549_vm7, %v2805_v28, %v2406_v39  ;;  %v13441_v39 = vld [vmem:[#allocation297_spill] sm:$0xff] }
 0x477   : > { %v2836_v7 = vsel %vm1549_vm7, %v2804_v23, %v2404_v58  ;;  %v1629_v58 = vsel %vm1615_vm9, %v1596_v54, %v13441_v39  ;;  %v1433_v23 = vsel %vm1417_vm3, %v1400_v51, %v13452_v5  ;;  %v13460_v54 = vld [vmem:[#allocation189_spill] sm:$0xff]  ;;  %v13473_v5 = vld [vmem:[#allocation382_spill] sm:$0xff] }
 0x478   : > { %v1531_v46 = vsel %vm1516_vm6, %v1498_v26, %v13460_v54  ;;  %v13469_v51 = vld [vmem:[#allocation365_spill] sm:$0xff]  ;;  %v13483_v54 = vld [vmem:[#allocation128_spill] sm:$0xff] }
 0x479   : > { %v2508_v56 = vpop.permute.xlu1 %2507 }
 0x47a   : > { %v2506_v48 = vpop.permute.xlu0 %2505  ;;  %v2869_v27 = vsel %vm1582_vm8, %v2837_v47, %v2508_v56  ;;  %v13443_v56 = vld [vmem:[#allocation362_spill] sm:$0xff]  ;;  %v13453_v47 = vld [vmem:[#allocation411_spill] sm:$0xff] }
 0x47b   : > { %v2868_v35 = vsel %vm1582_vm8, %v2836_v7, %v2506_v48  ;;  %v2679_v40 = vsel %vm1384_vm2, %v9533_v52, %v13443_v56  ;;  %v13447_v48 = vld [vmem:[#allocation401_spill] sm:$0xff]  ;;  %v2742_v52 = vsel %vm1450_vm4, %v2710_v42, %v13449_v30  ;;  %v13455_v7 = vld [vmem:[#allocation34_spill] sm:$0xff]  ;;  %v2680_v30 = vsel %vm1384_vm2, %v9606_v31, %v13469_v51  ;;  %v6551_v31 = vld [vmem:[%s6665_s26 + $0xd8] sm:$0xff] }
 0x47c   : > { %v2711_v63 = vsel %vm1417_vm3, %v2679_v40, %v13445_v20  ;;  %v2774_v16 = vsel %vm1483_vm5, %v2742_v52, %v13453_v47  ;;  %v13470_v52 = vld [vmem:[#allocation381_spill] sm:$0xff]  ;;  %v13474_v47 = vld [vmem:[#allocation403_spill] sm:$0xff]  ;;  %v1403_v1 = vsel %vm1384_vm2, %v6551_v31, %v13475_v44  ;;  %v13500_v44 = vld [vmem:[#allocation192_spill] sm:$0xff] }
 0x47d   : > { %v2609_v14 = vpop.permute.xlu1 %2608  ;;  %v2743_v0 = vsel %vm1450_vm4, %v2711_v63, %v13447_v48  ;;  %v13467_v48 = vld [vmem:[#allocation364_spill] sm:$0xff] }
 0x47e   : > { %v2901_v13 = vsel %vm1615_vm9, %v2869_v27, %v2609_v14  ;;  %v2607_v43 = vpop.permute.xlu0 %2606  ;;  %v2775_v29 = vsel %vm1483_vm5, %v2743_v0, %v13450_v25  ;;  %v1466_v27 = vsel %vm1450_vm4, %v1433_v23, %v13455_v7  ;;  %v2681_v0 = vsel %vm1384_vm2, %v9601_v45, %v13467_v48  ;;  %v6552_v7 = vld [vmem:[%s6665_s26 + $0xf8] sm:$0xff] }
 0x47f   : > { %v2900_v19 = vsel %vm1615_vm9, %v2868_v35, %v2607_v43  ;;  %2992 = vrot.lane.b32.xlu1 %v2901_v13, %s6608_s11  ;;  %v1499_v35 = vsel %vm1483_vm5, %v1466_v27, %v13457_v53  ;;  %v2713_v25 = vsel %vm1417_vm3, %v2681_v0, %v13470_v52  ;;  %v1404_v45 = vsel %vm1384_vm2, %v6550_v9, %v13472_v2  ;;  %v13476_v27 = vld [vmem:[#allocation68_spill] sm:$0xff] }
 0x480   : > { %2990 = vrot.lane.b32.xlu0 %v2900_v19, %s6608_s11  ;;  %v1532_v19 = vsel %vm1516_vm6, %v1499_v35, %v13459_v37  ;;  %v2712_v23 = vsel %vm1417_vm3, %v2680_v30, %v13473_v5  ;;  %v13481_v37 = vld [vmem:[#allocation412_spill] sm:$0xff]  ;;  %v13493_v30 = vld [vmem:[#allocation221_spill] sm:$0xff] }
 0x481   : > { %v2965_v59 = vpop.permute.xlu1 %2964  ;;  %v1565_v39 = vsel %vm1549_vm7, %v1532_v19, %v13461_v49  ;;  %v13496_v9 = vld [vmem:[#allocation160_spill] sm:$0xff] }
 0x482   : > { %v3048_v8 = vsel %vm3034_vm10, %v1629_v58, %v2965_v59  ;;  %v2963_v41 = vpop.permute.xlu0 %2962  ;;  %v13462_v59 = vld [vmem:[#allocation220_spill] sm:$0xff] }
 0x483   : > { %v3047_v62 = vsel %vm3034_vm10, %v1628_v60, %v2963_v41  ;;  %v1564_v61 = vsel %vm1549_vm7, %v1531_v46, %v13462_v59  ;;  %v13463_v60 = vld [vmem:[#allocation244_spill] sm:$0xff]  ;;  %v13464_v41 = vld [vmem:[#allocation246_spill] sm:$0xff] }
 0x484   : > { %5811 = vmatprep.mubr.msk.f32.mxu0 %vm3081_vm11, %v3047_v62  ;;  %v1597_v62 = vsel %vm1582_vm8, %v1564_v61, %v13464_v41  ;;  %v13485_v61 = vld [vmem:[#allocation158_spill] sm:$0xff] }
 0x485   : > { %5812 = vmatmul.mubr.msk.f32.gmra.mrb[12].mxu0 %vm3081_vm11, %v3048_v8  ;;  %v2312_v22 = vpop.permute.xlu1 %2311  ;;  %v1598_v8 = vsel %vm1582_vm8, %v1565_v39, %v13463_v60 }
 0x486   : > { %v2310_v38 = vpop.permute.xlu0 %2309  ;;  %v2807_v50 = vsel %vm1516_vm6, %v2775_v29, %v2312_v22  ;;  %v13465_v22 = vld [vmem:[#allocation300_spill] sm:$0xff]  ;;  %v6549_v29 = vld [vmem:[%s6665_s26 + $0xc0] sm:$0xff] }
 0x487   : > { %v2806_v14 = vsel %vm1516_vm6, %v2774_v16, %v2310_v38  ;;  %v1631_v38 = vsel %vm1615_vm9, %v1598_v8, %v13465_v22  ;;  %v2745_v16 = vsel %vm1450_vm4, %v2713_v25, %v13474_v47  ;;  %v13486_v22 = vld [vmem:[#allocation159_spill] sm:$0xff]  ;;  %v13494_v25 = vld [vmem:[#allocation248_spill] sm:$0xff] }
 0x488   : > { %v2777_v53 = vsel %vm1483_vm5, %v2745_v16, %v13478_v6  ;;  %v13502_v6 = vld [vmem:[#allocation100_spill] sm:$0xff] }
 0x489   : > { %v2410_v17 = vpop.permute.xlu1 %2409 }
 0x48a   : > { %v2408_v15 = vpop.permute.xlu0 %2407  ;;  %v2839_v4 = vsel %vm1549_vm7, %v2807_v50, %v2410_v17 }
 0x48b   : > { %v2838_v13 = vsel %vm1549_vm7, %v2806_v14, %v2408_v15  ;;  %v13466_v15 = vld [vmem:[#allocation302_spill] sm:$0xff]  ;;  %v1406_v14 = vsel %vm1384_vm2, %v6552_v7, %v13476_v27  ;;  %v13501_v7 = vld [vmem:[#allocation305_spill] sm:$0xff] }
 0x48c   : > { %v1630_v56 = vsel %vm1615_vm9, %v1597_v62, %v13466_v15 }
 0x48d   : > { %v2512_v18 = vpop.permute.xlu1 %2511 }
 0x48e   : > { %v2510_v28 = vpop.permute.xlu0 %2509  ;;  %v2871_v43 = vsel %vm1582_vm8, %v2839_v4, %v2512_v18  ;;  %v6548_v18 = vld [vmem:[%s6665_s26 + $0xc8] sm:$0xff]  ;;  %v13477_v4 = vld [vmem:[#allocation404_spill] sm:$0xff] }
 0x48f   : > { %v2870_v36 = vsel %vm1582_vm8, %v2838_v13, %v2510_v28  ;;  %v1402_v57 = vsel %vm1384_vm2, %v6548_v18, %v13468_v3  ;;  %v13471_v28 = vld [vmem:[#allocation65_spill] sm:$0xff]  ;;  %v2744_v21 = vsel %vm1450_vm4, %v2712_v23, %v13477_v4  ;;  %v6553_v13 = vld [vmem:[%s6665_s26 + $0xf0] sm:$0xff] }
 0x490   : > { %v1401_v34 = vsel %vm1384_vm2, %v6549_v29, %v13471_v28  ;;  %v1435_v26 = vsel %vm1417_vm3, %v1402_v57, %v13480_v55  ;;  %v2776_v19 = vsel %vm1483_vm5, %v2744_v21, %v13481_v37  ;;  %v13491_v18 = vld [vmem:[#allocation99_spill] sm:$0xff]  ;;  %v13492_v57 = vld [vmem:[#allocation130_spill] sm:$0xff]  ;;  %v13505_v37 = vld [vmem:[#allocation101_spill] sm:$0xff] }
 0x491   : > { %v2613_v24 = vpop.permute.xlu1 %2612  ;;  %v1468_v46 = vsel %vm1450_vm4, %v1435_v26, %v13483_v54  ;;  %v1436_v3 = vsel %vm1417_vm3, %v1403_v1, %v13491_v18  ;;  %v13495_v28 = vld [vmem:[#allocation131_spill] sm:$0xff]  ;;  %v13519_v18 = vld [vmem:[#allocation256_spill] sm:$0xff] }
 0x492   : > { %v2903_v12 = vsel %vm1615_vm9, %v2871_v43, %v2613_v24  ;;  %v2611_v32 = vpop.permute.xlu0 %2610  ;;  %v13479_v43 = vld [vmem:[#allocation69_spill] sm:$0xff]  ;;  %v1501_v60 = vsel %vm1483_vm5, %v1468_v46, %v13485_v61  ;;  %v13498_v23 = vld [vmem:[#allocation303_spill] sm:$0xff]  ;;  %v13508_v46 = vld [vmem:[#allocation252_spill] sm:$0xff] }
 0x493   : > { %v2902_v58 = vsel %vm1615_vm9, %v2870_v36, %v2611_v32  ;;  %2996 = vrot.lane.b32.xlu1 %v2903_v12, %s6608_s11  ;;  %v1405_v24 = vsel %vm1384_vm2, %v6553_v13, %v13479_v43  ;;  %v13482_v12 = vld [vmem:[#allocation97_spill] sm:$0xff]  ;;  %v13511_v61 = vld [vmem:[#allocation254_spill] sm:$0xff] }
 0x494   : > { %2994 = vrot.lane.b32.xlu0 %v2902_v58, %s6608_s11  ;;  %v1434_v32 = vsel %vm1417_vm3, %v1401_v34, %v13482_v12  ;;  %v13484_v58 = vld [vmem:[#allocation129_spill] sm:$0xff]  ;;  %v1469_v34 = vsel %vm1450_vm4, %v1436_v3, %v13495_v28 }
 0x495   : > { %v2969_v17 = vpop.permute.xlu1 %2968  ;;  %v1467_v59 = vsel %vm1450_vm4, %v1434_v32, %v13484_v58  ;;  %v13504_v43 = vld [vmem:[#allocation37_spill] sm:$0xff]  ;;  %v13507_v32 = vld [vmem:[#allocation222_spill] sm:$0xff] }
 0x496   : > { %v3050_v40 = vsel %vm3034_vm10, %v1631_v38, %v2969_v17  ;;  %v2967_v11 = vpop.permute.xlu0 %2966  ;;  %v1500_v38 = vsel %vm1483_vm5, %v1467_v59, %v13486_v22  ;;  %v13487_v17 = vld [vmem:[#allocation190_spill] sm:$0xff] }
 0x497   : > { %v3049_v33 = vsel %vm3034_vm10, %v1630_v56, %v2967_v11  ;;  %v1534_v15 = vsel %vm1516_vm6, %v1501_v60, %v13487_v17  ;;  %v13510_v58 = vld [vmem:[#allocation162_spill] sm:$0xff] }
 0x498   : > { %5814 = vmatprep.mubr.msk.f32.mxu0 %vm3081_vm11, %v3049_v33  ;;  %v13488_v33 = vld [vmem:[#allocation98_spill] sm:$0xff] }
 0x499   : > { %5815 = vmatmul.mubr.msk.f32.gmra.mrb[14].mxu0 %vm3081_vm11, %v3050_v40  ;;  %v2316_v20 = vpop.permute.xlu1 %2315  ;;  %v13512_v60 = vld [vmem:[#allocation306_spill] sm:$0xff] }
 0x49a   : > { %v2314_v63 = vpop.permute.xlu0 %2313  ;;  %v2809_v36 = vsel %vm1516_vm6, %v2777_v53, %v2316_v20  ;;  %v1437_v20 = vsel %vm1417_vm3, %v1404_v45, %v13488_v33  ;;  %v13497_v45 = vld [vmem:[#allocation250_spill] sm:$0xff]  ;;  %v1439_v53 = vsel %vm1417_vm3, %v1406_v14, %v13502_v6  ;;  %v13516_v33 = vld [vmem:[#allocation195_spill] sm:$0xff] }
 0x49b   : > { %v2808_v49 = vsel %vm1516_vm6, %v2776_v19, %v2314_v63  ;;  %v13489_v63 = vld [vmem:[#allocation191_spill] sm:$0xff]  ;;  %v1470_v51 = vsel %vm1450_vm4, %v1437_v20, %v13492_v57  ;;  %v1438_v19 = vsel %vm1417_vm3, %v1405_v24, %v13505_v37  ;;  %v13520_v57 = vld [vmem:[#allocation258_spill] sm:$0xff] }
 0x49c   : > { %v1503_v2 = vsel %vm1483_vm5, %v1470_v51, %v13496_v9  ;;  %v13532_v37 = vld [vmem:[#allocation262_spill] sm:$0xff] }
 0x49d   : > { %v2414_v10 = vpop.permute.xlu1 %2413  ;;  %v1536_v1 = vsel %vm1516_vm6, %v1503_v2, %v13500_v44  ;;  %v13526_v44 = vld [vmem:[#allocation165_spill] sm:$0xff] }
 0x49e   : > { %v2412_v42 = vpop.permute.xlu0 %2411  ;;  %v2841_v39 = vsel %vm1549_vm7, %v2809_v36, %v2414_v10  ;;  %v1533_v10 = vsel %vm1516_vm6, %v1500_v38, %v13489_v63  ;;  %v1569_v55 = vsel %vm1549_vm7, %v1536_v1, %v13504_v43  ;;  %v13506_v36 = vld [vmem:[#allocation132_spill] sm:$0xff]  ;;  %v13514_v38 = vld [vmem:[#allocation194_spill] sm:$0xff] }
 0x49f   : > { %v2840_v8 = vsel %vm1549_vm7, %v2808_v49, %v2412_v42  ;;  %v13490_v42 = vld [vmem:[#allocation36_spill] sm:$0xff]  ;;  %v1566_v52 = vsel %vm1549_vm7, %v1533_v10, %v13493_v30  ;;  %v1472_v12 = vsel %vm1450_vm4, %v1439_v53, %v13506_v36  ;;  %v1602_v14 = vsel %vm1582_vm8, %v1569_v55, %v13508_v46  ;;  %v13509_v49 = vld [vmem:[#allocation133_spill] sm:$0xff]  ;;  %v13517_v63 = vld [vmem:[#allocation38_spill] sm:$0xff] }
 0x4a0   : > { %v1567_v48 = vsel %vm1549_vm7, %v1534_v15, %v13490_v42  ;;  %v1599_v5 = vsel %vm1582_vm8, %v1566_v52, %v13497_v45  ;;  %v1505_v59 = vsel %vm1483_vm5, %v1472_v12, %v13510_v58  ;;  %v13515_v15 = vld [vmem:[#allocation308_spill] sm:$0xff]  ;;  %v13521_v30 = vld [vmem:[#allocation309_spill] sm:$0xff]  ;;  %v6554_v45 = vld [vmem:[%s6665_s26 + $0x108] sm:$0xff] }
 0x4a1   : > { %v2516_v50 = vpop.permute.xlu1 %2515  ;;  %v1600_v29 = vsel %vm1582_vm8, %v1567_v48, %v13494_v25  ;;  %v1632_v27 = vsel %vm1615_vm9, %v1599_v5, %v13501_v7  ;;  %v1538_v17 = vsel %vm1516_vm6, %v1505_v59, %v13514_v38  ;;  %v13518_v48 = vld [vmem:[#allocation223_spill] sm:$0xff]  ;;  %v13529_v53 = vld [vmem:[#allocation102_spill] sm:$0xff]  ;;  %v13533_v36 = vld [vmem:[#allocation164_spill] sm:$0xff] }
 0x4a2   : > { %v2514_v35 = vpop.permute.xlu0 %2513  ;;  %v2873_v41 = vsel %vm1582_vm8, %v2841_v39, %v2516_v50  ;;  %v1633_v47 = vsel %vm1615_vm9, %v1600_v29, %v13498_v23  ;;  %v13499_v50 = vld [vmem:[#allocation161_spill] sm:$0xff]  ;;  %v1471_v39 = vsel %vm1450_vm4, %v1438_v19, %v13509_v49  ;;  %v1571_v10 = vsel %vm1549_vm7, %v1538_v17, %v13517_v63  ;;  %v13522_v29 = vld [vmem:[#allocation311_spill] sm:$0xff]  ;;  %v13531_v55 = vld [vmem:[#allocation134_spill] sm:$0xff] }
 0x4a3   : > { %v2872_v56 = vsel %vm1582_vm8, %v2840_v8, %v2514_v35  ;;  %v1502_v31 = vsel %vm1483_vm5, %v1469_v34, %v13499_v50  ;;  %v13503_v35 = vld [vmem:[#allocation193_spill] sm:$0xff]  ;;  %v1635_v8 = vsel %vm1615_vm9, %v1602_v14, %v13512_v60  ;;  %v1604_v3 = vsel %vm1582_vm8, %v1571_v10, %v13519_v18  ;;  %v13523_v5 = vld [vmem:[#allocation71_spill] sm:$0xff]  ;;  %v13535_v14 = vld [vmem:[#allocation196_spill] sm:$0xff] }
 0x4a4   : > { %v1535_v13 = vsel %vm1516_vm6, %v1502_v31, %v13503_v35  ;;  %v1637_v52 = vsel %vm1615_vm9, %v1604_v3, %v13521_v30  ;;  %v1407_v23 = vsel %vm1384_vm2, %v6554_v45, %v13523_v5  ;;  %v13525_v50 = vld [vmem:[#allocation135_spill] sm:$0xff]  ;;  %v13538_v60 = vld [vmem:[#allocation312_spill] sm:$0xff]  ;;  %v13545_v18 = vld [vmem:[#allocation166_spill] sm:$0xff] }
 0x4a5   : > { %v2617_v62 = vpop.permute.xlu1 %2616  ;;  %v1568_v54 = vsel %vm1549_vm7, %v1535_v13, %v13507_v32  ;;  %v6555_v7 = vld [vmem:[%s6665_s26 + $0x110] sm:$0xff]  ;;  %v13530_v13 = vld [vmem:[#allocation40_spill] sm:$0xff]  ;;  %v13534_v32 = vld [vmem:[#allocation314_spill] sm:$0xff] }
 0x4a6   : > { %v2905_v40 = vsel %vm1615_vm9, %v2873_v41, %v2617_v62  ;;  %v2615_v11 = vpop.permute.xlu0 %2614  ;;  %v1601_v24 = vsel %vm1582_vm8, %v1568_v54, %v13511_v61  ;;  %v13513_v62 = vld [vmem:[#allocation163_spill] sm:$0xff]  ;;  %v13537_v61 = vld [vmem:[#allocation260_spill] sm:$0xff]  ;;  %v13547_v30 = vld [vmem:[#allocation198_spill] sm:$0xff] }
 0x4a7   : > { %v2904_v0 = vsel %vm1615_vm9, %v2872_v56, %v2615_v11  ;;  %3000 = vrot.lane.b32.xlu1 %v2905_v40, %s6608_s11  ;;  %v1504_v22 = vsel %vm1483_vm5, %v1471_v39, %v13513_v62  ;;  %v1634_v56 = vsel %vm1615_vm9, %v1601_v24, %v13515_v15  ;;  %v13536_v58 = vld [vmem:[#allocation39_spill] sm:$0xff]  ;;  %v13539_v38 = vld [vmem:[#allocation72_spill] sm:$0xff]  ;;  %v6557_v15 = vld [vmem:[%s6665_s26 + $0x120] sm:$0xff] }
 0x4a8   : > { %2998 = vrot.lane.b32.xlu0 %v2904_v0, %s6608_s11  ;;  %v1537_v20 = vsel %vm1516_vm6, %v1504_v22, %v13516_v33  ;;  %v6556_v22 = vld [vmem:[%s6665_s26 + $0x128] sm:$0xff]  ;;  %v13543_v10 = vld [vmem:[#allocation136_spill] sm:$0xff] }
 0x4a9   : > { %v2973_v16 = vpop.permute.xlu1 %2972  ;;  %v1570_v0 = vsel %vm1549_vm7, %v1537_v20, %v13518_v48  ;;  %v1410_v17 = vsel %vm1384_vm2, %v6556_v22, %v13539_v38  ;;  %v13542_v20 = vld [vmem:[#allocation105_spill] sm:$0xff]  ;;  %v13551_v45 = vld [vmem:[#allocation264_spill] sm:$0xff] }
 0x4aa   : > { %v3052_v4 = vsel %vm3034_vm10, %v1633_v47, %v2973_v16  ;;  %v2971_v21 = vpop.permute.xlu0 %2970  ;;  %v1603_v51 = vsel %vm1582_vm8, %v1570_v0, %v13520_v57  ;;  %v13524_v47 = vld [vmem:[#allocation103_spill] sm:$0xff]  ;;  %v13544_v48 = vld [vmem:[#allocation137_spill] sm:$0xff]  ;;  %v13567_v22 = vld [vmem:[#allocation268_spill] sm:$0xff] }
 0x4ab   : > { %v3051_v26 = vsel %vm3034_vm10, %v1632_v27, %v2971_v21  ;;  %v1636_v28 = vsel %vm1615_vm9, %v1603_v51, %v13522_v29  ;;  %v1440_v16 = vsel %vm1417_vm3, %v1407_v23, %v13524_v47  ;;  %v13527_v27 = vld [vmem:[#allocation70_spill] sm:$0xff]  ;;  %v13528_v21 = vld [vmem:[#allocation197_spill] sm:$0xff]  ;;  %v13546_v57 = vld [vmem:[#allocation167_spill] sm:$0xff] }
 0x4ac   : > { %5817 = vmatprep.mubr.msk.f32.mxu0 %vm3081_vm11, %v3051_v26  ;;  %v1473_v31 = vsel %vm1450_vm4, %v1440_v16, %v13525_v50  ;;  %v13552_v23 = vld [vmem:[#allocation266_spill] sm:$0xff]  ;;  %v13553_v16 = vld [vmem:[#allocation315_spill] sm:$0xff] }
 0x4ad   : > { %5818 = vmatmul.mubr.msk.f32.gmra.mrb[16].mxu0 %vm3081_vm11, %v3052_v4  ;;  %v2977_v41 = vpop.permute.xlu1 %2976  ;;  %v1506_v1 = vsel %vm1483_vm5, %v1473_v31, %v13526_v44  ;;  %v1408_v4 = vsel %vm1384_vm2, %v6555_v7, %v13527_v27  ;;  %v13554_v44 = vld [vmem:[#allocation317_spill] sm:$0xff] }
 0x4ae   : > { %v3054_v40 = vsel %vm3034_vm10, %v1635_v8, %v2977_v41  ;;  %v2975_v11 = vpop.permute.xlu0 %2974  ;;  %v1539_v6 = vsel %vm1516_vm6, %v1506_v1, %v13528_v21  ;;  %v1441_v35 = vsel %vm1417_vm3, %v1408_v4, %v13529_v53  ;;  %v6558_v21 = vld [vmem:[%s6665_s26 + $0x140] sm:$0xff] }
 0x4af   : > { %v3053_v42 = vsel %vm3034_vm10, %v1634_v56, %v2975_v11  ;;  %v1572_v43 = vsel %vm1549_vm7, %v1539_v6, %v13530_v13  ;;  %v1474_v26 = vsel %vm1450_vm4, %v1441_v35, %v13531_v55  ;;  %v13540_v56 = vld [vmem:[#allocation73_spill] sm:$0xff]  ;;  %v13541_v11 = vld [vmem:[#allocation104_spill] sm:$0xff]  ;;  %v13555_v6 = vld [vmem:[#allocation74_spill] sm:$0xff] }
 0x4b0   : > { %5820 = vmatprep.mubr.msk.f32.mxu0 %vm3081_vm11, %v3053_v42  ;;  %v1605_v19 = vsel %vm1582_vm8, %v1572_v43, %v13532_v37  ;;  %v1507_v12 = vsel %vm1483_vm5, %v1474_v26, %v13533_v36  ;;  %v1443_v33 = vsel %vm1417_vm3, %v1410_v17, %v13541_v11  ;;  %v1412_v53 = vsel %vm1384_vm2, %v6558_v21, %v13555_v6  ;;  %v6559_v35 = vld [vmem:[%s6665_s26 + $0x138] sm:$0xff]  ;;  %v13556_v13 = vld [vmem:[#allocation75_spill] sm:$0xff]  ;;  %v13557_v55 = vld [vmem:[#allocation106_spill] sm:$0xff] }
 0x4b1   : > { %5821 = vmatmul.mubr.msk.f32.gmra.mrb[18].mxu0 %vm3081_vm11, %v3054_v40  ;;  %v2981_v25 = vpop.permute.xlu1 %2980  ;;  %v1638_v54 = vsel %vm1615_vm9, %v1605_v19, %v13534_v32  ;;  %v1540_v49 = vsel %vm1516_vm6, %v1507_v12, %v13535_v14  ;;  %v1409_v40 = vsel %vm1384_vm2, %v6557_v15, %v13540_v56  ;;  %v1476_v42 = vsel %vm1450_vm4, %v1443_v33, %v13543_v10  ;;  %v13558_v37 = vld [vmem:[#allocation107_spill] sm:$0xff]  ;;  %v13559_v36 = vld [vmem:[#allocation138_spill] sm:$0xff]  ;;  %v13570_v33 = vld [vmem:[#allocation320_spill] sm:$0xff] }
 0x4b2   : > { %v3056_v34 = vsel %vm3034_vm10, %v1637_v52, %v2981_v25  ;;  %v2979_v9 = vpop.permute.xlu0 %2978  ;;  %v1573_v59 = vsel %vm1549_vm7, %v1540_v49, %v13536_v58  ;;  %v1442_v63 = vsel %vm1417_vm3, %v1409_v40, %v13542_v20  ;;  %v1509_v3 = vsel %vm1483_vm5, %v1476_v42, %v13545_v18  ;;  %v13548_v25 = vld [vmem:[#allocation199_spill] sm:$0xff]  ;;  %v13562_v49 = vld [vmem:[#allocation169_spill] sm:$0xff]  ;;  %v13563_v58 = vld [vmem:[#allocation200_spill] sm:$0xff] }
 0x4b3   : > { %v3055_v2 = vsel %vm3034_vm10, %v1636_v28, %v2979_v9  ;;  %v1606_v24 = vsel %vm1582_vm8, %v1573_v59, %v13537_v61  ;;  %v1475_v0 = vsel %vm1450_vm4, %v1442_v63, %v13544_v48  ;;  %v1542_v52 = vsel %vm1516_vm6, %v1509_v3, %v13547_v30  ;;  %v13549_v28 = vld [vmem:[#allocation41_spill] sm:$0xff]  ;;  %v13550_v9 = vld [vmem:[#allocation224_spill] sm:$0xff]  ;;  %v13560_v32 = vld [vmem:[#allocation139_spill] sm:$0xff] }
 0x4b4   : > { %5823 = vmatprep.mubr.msk.f32.mxu0 %vm3081_vm11, %v3055_v2  ;;  %v1639_v8 = vsel %vm1615_vm9, %v1606_v24, %v13538_v60  ;;  %v1508_v51 = vsel %vm1483_vm5, %v1475_v0, %v13546_v57  ;;  %v1411_v43 = vsel %vm1384_vm2, %v6559_v35, %v13556_v13  ;;  %v1445_v26 = vsel %vm1417_vm3, %v1412_v53, %v13557_v55  ;;  %v13564_v61 = vld [vmem:[#allocation201_spill] sm:$0xff]  ;;  %v13565_v60 = vld [vmem:[#allocation43_spill] sm:$0xff]  ;;  %v13568_v17 = vld [vmem:[#allocation270_spill] sm:$0xff] }
 0x4b5   : > { %5824 = vmatmul.mubr.msk.f32.gmra.mrb[20].mxu0 %vm3081_vm11, %v3056_v34  ;;  %v1541_v29 = vsel %vm1516_vm6, %v1508_v51, %v13548_v25  ;;  %v1575_v34 = vsel %vm1549_vm7, %v1542_v52, %v13549_v28  ;;  %v1444_v19 = vsel %vm1417_vm3, %v1411_v43, %v13558_v37  ;;  %v1478_v12 = vsel %vm1450_vm4, %v1445_v26, %v13559_v36  ;;  %v13569_v56 = vld [vmem:[#allocation318_spill] sm:$0xff]  ;;  %v6560_v48 = vld [vmem:[%s6665_s26 + $0x158] sm:$0xff]  ;;  %v10565_v3 = vld [vmem:[%s12466_s3] ss:$0 sm:$0xff] }
 0x4b6   : > { %v1574_v2 = vsel %vm1549_vm7, %v1541_v29, %v13550_v9  ;;  %v1608_v5 = vsel %vm1582_vm8, %v1575_v34, %v13551_v45  ;;  %v13571_v0 = vld [vmem:[#allocation76_spill] sm:$0xff]  ;;  %v6561_v57 = vld [vmem:[%s6665_s26 + $0x150] sm:$0xff]  ;;  %v13572_v51 = vld [vmem:[#allocation77_spill] sm:$0xff] }
 0x4b7   : > { %v1607_v47 = vsel %vm1582_vm8, %v1574_v2, %v13552_v23  ;;  %v1641_v50 = vsel %vm1615_vm9, %v1608_v5, %v13553_v16  ;;  %v1414_v18 = vsel %vm1384_vm2, %v6560_v48, %v13571_v0  ;;  %v1413_v30 = vsel %vm1384_vm2, %v6561_v57, %v13572_v51  ;;  %v13573_v52 = vld [vmem:[#allocation108_spill] sm:$0xff]  ;;  %v13574_v29 = vld [vmem:[#allocation109_spill] sm:$0xff]  ;;  %v13575_v34 = vld [vmem:[#allocation42_spill] sm:$0xff] }
 0x4b8   : > { %v1640_v1 = vsel %vm1615_vm9, %v1607_v47, %v13554_v44  ;;  %v1447_v25 = vsel %vm1417_vm3, %v1414_v18, %v13573_v52  ;;  %v1446_v28 = vsel %vm1417_vm3, %v1413_v30, %v13574_v29  ;;  %v13576_v45 = vld [vmem:[#allocation140_spill] sm:$0xff]  ;;  %v13577_v23 = vld [vmem:[#allocation170_spill] sm:$0xff]  ;;  %v13596_v57 = vld [vmem:[#allocation205_spill] sm:$0xff] }
 0x4b9   : > { %v1480_v9 = vsel %vm1450_vm4, %v1447_v25, %v13575_v34  ;;  %v1479_v5 = vsel %vm1450_vm4, %v1446_v28, %v13576_v45  ;;  %v13581_v6 = vld [vmem:[#allocation44_spill] sm:$0xff]  ;;  %v13582_v35 = vld [vmem:[#allocation226_spill] sm:$0xff]  ;;  %v13597_v30 = vld [vmem:[#allocation45_spill] sm:$0xff] }
 0x4ba   : > { %v1513_v47 = vsel %vm1483_vm5, %v1480_v9, %v13577_v23  ;;  %v13583_v43 = vld [vmem:[#allocation272_spill] sm:$0xff]  ;;  %v13584_v26 = vld [vmem:[#allocation274_spill] sm:$0xff]  ;;  %v13598_v25 = vld [vmem:[#allocation227_spill] sm:$0xff] }
 0x4bb   : > { %v13595_v0 = vld [vmem:[#allocation204_spill] sm:$0xff] }
 0x4bc   : > { %v13599_v28 = vld [vmem:[#allocation276_spill] sm:$0xff] }
 0x4c5   : > { %v2983_v46 = vpop.permute.xlu0 %2982 }
 0x4c6   : > { %v3057_v39 = vsel %vm3034_vm10, %v1638_v54, %v2983_v46  ;;  %v1477_v54 = vsel %vm1450_vm4, %v1444_v19, %v13560_v32  ;;  %v13561_v46 = vld [vmem:[#allocation168_spill] sm:$0xff]  ;;  %v13585_v19 = vld [vmem:[#allocation322_spill] sm:$0xff] }
 0x4c7   : > { %5826 = vmatprep.mubr.msk.f32.mxu0 %vm3081_vm11, %v3057_v39  ;;  %v1511_v14 = vsel %vm1483_vm5, %v1478_v12, %v13561_v46  ;;  %v1510_v39 = vsel %vm1483_vm5, %v1477_v54, %v13562_v49  ;;  %v13586_v32 = vld [vmem:[#allocation324_spill] sm:$0xff] }
 0x4c8   : > { %v1544_v59 = vsel %vm1516_vm6, %v1511_v14, %v13563_v58  ;;  %v1543_v24 = vsel %vm1516_vm6, %v1510_v39, %v13564_v61  ;;  %v6562_v39 = vld [vmem:[%s6665_s26 + $0x170] sm:$0xff]  ;;  %v13587_v58 = vld [vmem:[#allocation78_spill] sm:$0xff] }
 0x4c9   : > { %v2985_v41 = vpop.permute.xlu1 %2984  ;;  %v6563_v61 = vld [vmem:[%s6665_s26 + $0x168] sm:$0xff]  ;;  %s6611_s26 = smov 64  }
 0x4ca   : > { %v3058_v62 = vsel %vm3034_vm10, %v1639_v8, %v2985_v41  ;;  %v1577_v8 = vsel %vm1549_vm7, %v1544_v59, %v13565_v60  ;;  %v13566_v41 = vld [vmem:[#allocation225_spill] sm:$0xff]  ;;  %v1416_v59 = vsel %vm1384_vm2, %v6562_v39, %v13587_v58 }
 0x4cb   : > { %5827 = vmatmul.mubr.msk.f32.gmra.mrb[22].mxu0 %vm3081_vm11, %v3058_v62  ;;  %v1576_v62 = vsel %vm1549_vm7, %v1543_v24, %v13566_v41  ;;  %v1610_v38 = vsel %vm1582_vm8, %v1577_v8, %v13567_v22  ;;  %v13588_v24 = vld [vmem:[#allocation79_spill] sm:$0xff]  ;;  %v13589_v8 = vld [vmem:[#allocation110_spill] sm:$0xff] }
 0x4cc   : > { %v1609_v15 = vsel %vm1582_vm8, %v1576_v62, %v13568_v17  ;;  %v1643_v40 = vsel %vm1615_vm9, %v1610_v38, %v13569_v56  ;;  %v1415_v60 = vsel %vm1384_vm2, %v6563_v61, %v13588_v24  ;;  %v1449_v41 = vsel %vm1417_vm3, %v1416_v59, %v13589_v8  ;;  %v13590_v22 = vld [vmem:[#allocation111_spill] sm:$0xff]  ;;  %v13591_v17 = vld [vmem:[#allocation141_spill] sm:$0xff] }
 0x4cd   : > { %v1642_v20 = vsel %vm1615_vm9, %v1609_v15, %v13570_v33  ;;  %v1448_v38 = vsel %vm1417_vm3, %v1415_v60, %v13590_v22  ;;  %v1482_v15 = vsel %vm1450_vm4, %v1449_v41, %v13591_v17 }
 0x4dd   : > { %v2989_v31 = vpop.permute.xlu1 %2988 }
 0x4de   : > { %v3060_v7 = vsel %vm3034_vm10, %v1641_v50, %v2989_v31  ;;  %v2987_v27 = vpop.permute.xlu0 %2986  ;;  %v13578_v31 = vld [vmem:[#allocation171_spill] sm:$0xff] }
 0x4df   : > { %v3059_v4 = vsel %vm3034_vm10, %v1640_v1, %v2987_v27  ;;  %v1512_v44 = vsel %vm1483_vm5, %v1479_v5, %v13578_v31  ;;  %v13579_v1 = vld [vmem:[#allocation202_spill] sm:$0xff] }
 0x4e0   : > { %5829 = vmatprep.mubr.msk.f32.mxu0 %vm3081_vm11, %v3059_v4  ;;  %v13580_v4 = vld [vmem:[#allocation203_spill] sm:$0xff]  ;;  %v13601_v5 = vld [vmem:[#allocation326_spill] sm:$0xff] }
 0x4e1   : > { %5830 = vmatmul.mubr.msk.f32.gmra.mrb[24].mxu0 %vm3081_vm11, %v3060_v7  ;;  %v1546_v7 = vsel %vm1516_vm6, %v1513_v47, %v13579_v1  ;;  %v1545_v21 = vsel %vm1516_vm6, %v1512_v44, %v13580_v4  ;;  %v13602_v44 = vld [vmem:[#allocation328_spill] sm:$0xff] }
 0x4e2   : > { %v1579_v53 = vsel %vm1549_vm7, %v1546_v7, %v13581_v6  ;;  %v1578_v13 = vsel %vm1549_vm7, %v1545_v21, %v13582_v35 }
 0x4e3   : > { %v1612_v55 = vsel %vm1582_vm8, %v1579_v53, %v13583_v43  ;;  %v1611_v37 = vsel %vm1582_vm8, %v1578_v13, %v13584_v26 }
 0x4e4   : > { %v1645_v36 = vsel %vm1615_vm9, %v1612_v55, %v13585_v19  ;;  %v1644_v54 = vsel %vm1615_vm9, %v1611_v37, %v13586_v32 }
 0x4f1   : > { %v2993_v11 = vpop.permute.xlu1 %2992 }
 0x4f2   : > { %v3062_v63 = vsel %vm3034_vm10, %v1643_v40, %v2993_v11  ;;  %v2991_v10 = vpop.permute.xlu0 %2990  ;;  %v13592_v11 = vld [vmem:[#allocation142_spill] sm:$0xff] }
 0x4f3   : > { %v3061_v42 = vsel %vm3034_vm10, %v1642_v20, %v2991_v10  ;;  %v1481_v33 = vsel %vm1450_vm4, %v1448_v38, %v13592_v11  ;;  %v13593_v20 = vld [vmem:[#allocation172_spill] sm:$0xff] }
 0x4f4   : > { %5832 = vmatprep.mubr.msk.f32.mxu0 %vm3081_vm11, %v3061_v42  ;;  %v13594_v42 = vld [vmem:[#allocation173_spill] sm:$0xff] }
 0x4f5   : > { %5833 = vmatmul.mubr.msk.f32.gmra.mrb[26].mxu0 %vm3081_vm11, %v3062_v63  ;;  %v1515_v63 = vsel %vm1483_vm5, %v1482_v15, %v13593_v20  ;;  %v1514_v48 = vsel %vm1483_vm5, %v1481_v33, %v13594_v42 }
 0x4f6   : > { %v1548_v18 = vsel %vm1516_vm6, %v1515_v63, %v13595_v0  ;;  %v1547_v51 = vsel %vm1516_vm6, %v1514_v48, %v13596_v57 }
 0x4f7   : > { %v1581_v52 = vsel %vm1549_vm7, %v1548_v18, %v13597_v30  ;;  %v1580_v29 = vsel %vm1549_vm7, %v1547_v51, %v13598_v25 }
 0x4f8   : > { %v1614_v34 = vsel %vm1582_vm8, %v1581_v52, %v13599_v28 }
 0x4f9   : > { %v1647_v23 = vsel %vm1615_vm9, %v1614_v34, %v13601_v5  ;;  %v6610_v34 = vmov 0.0  }
 0x4fa   : > { %3740 = vst.msk [vmem:[#allocation2 + $0x60] sm:$0xff] %vm3726_vm12, %v6610_v34  ;;  %3741 = vst.msk [vmem:[#allocation2 + $0x68] sm:$0xff] %vm3726_vm12, %v6610_v34 }
 0x4fb   : > { %3727 = vst.msk [vmem:[#allocation2] sm:$0xff] %vm3726_vm12, %v6610_v34  ;;  %3728 = vst.msk [vmem:[#allocation2 + $0x8] sm:$0xff] %vm3726_vm12, %v6610_v34 }
 0x4fc   : > { %3731 = vst.msk [vmem:[#allocation2 + $0x18] sm:$0xff] %vm3726_vm12, %v6610_v34  ;;  %3732 = vst.msk [vmem:[#allocation2 + $0x20] sm:$0xff] %vm3726_vm12, %v6610_v34 }
 0x4fd   : > { %3734 = vst.msk [vmem:[#allocation2 + $0x30] sm:$0xff] %vm3726_vm12, %v6610_v34  ;;  %3735 = vst.msk [vmem:[#allocation2 + $0x38] sm:$0xff] %vm3726_vm12, %v6610_v34 }
 0x4fe   : > { %3737 = vst.msk [vmem:[#allocation2 + $0x48] sm:$0xff] %vm3726_vm12, %v6610_v34  ;;  %3738 = vst.msk [vmem:[#allocation2 + $0x50] sm:$0xff] %vm3726_vm12, %v6610_v34 }
 0x4ff   : > { %3743 = vst.msk [vmem:[#allocation2 + $0x78] sm:$0xff] %vm3726_vm12, %v6610_v34  ;;  %3744 = vst.msk [vmem:[#allocation2 + $0x80] sm:$0xff] %vm3726_vm12, %v6610_v34 }
 0x500   : > { %v5795_v2 = vpop.f32.mrb[0].mxu0  ;;  %3746 = vst.msk [vmem:[#allocation2 + $0x90] sm:$0xff] %vm3726_vm12, %v6610_v34  ;;  %3747 = vst.msk [vmem:[#allocation2 + $0x98] sm:$0xff] %vm3726_vm12, %v6610_v34 }
 0x501   : > { %v10581_v16 = vadd.f32 %v5795_v2, %v10565_v3  ;;  %v3247_v50 = vpop.f32.mrb[1].mxu0  ;;  %v13600_v2 = vld [vmem:[#allocation278_spill] sm:$0xff]  ;;  %3749 = vst.msk [vmem:[#allocation2 + $0xa8] sm:$0xff] %vm3726_vm12, %v6610_v34  ;;  %3750 = vst.msk [vmem:[#allocation2 + $0xb0] sm:$0xff] %vm3726_vm12, %v6610_v34 }
 0x502   : > { %v10588_v27 = vadd.f32 %v10565_v3, %v3247_v50  ;;  %v1613_v45 = vsel %vm1582_vm8, %v1580_v29, %v13600_v2  ;;  %3752 = vst.msk [vmem:[#allocation2 + $0xc0] sm:$0xff] %vm3726_vm12, %v6610_v34  ;;  %3753 = vst.msk [vmem:[#allocation2 + $0xc8] sm:$0xff] %vm3726_vm12, %v6610_v34 }
 0x503   : > { %3440 = vrot.lane.b32.xlu1 %v10581_v16, %s6609_s9  ;;  %v1646_v1 = vsel %vm1615_vm9, %v1613_v45, %v13602_v44  ;;  %3755 = vst.msk [vmem:[#allocation2 + $0xd8] sm:$0xff] %vm3726_vm12, %v6610_v34  ;;  %3756 = vst.msk [vmem:[#allocation2 + $0xe0] sm:$0xff] %vm3726_vm12, %v6610_v34 }
 0x504   : > { %3438 = vrot.lane.b32.xlu0 %v10588_v27, %s6609_s9  ;;  %3758 = vst.msk [vmem:[#allocation2 + $0xf0] sm:$0xff] %vm3726_vm12, %v6610_v34  ;;  %3759 = vst.msk [vmem:[#allocation2 + $0xf8] sm:$0xff] %vm3726_vm12, %v6610_v34 }
 0x505   : > { %v2997_v12 = vpop.permute.xlu1 %2996  ;;  %3761 = vst.msk [vmem:[#allocation2 + $0x108] sm:$0xff] %vm3726_vm12, %v6610_v34  ;;  %3762 = vst.msk [vmem:[#allocation2 + $0x110] sm:$0xff] %vm3726_vm12, %v6610_v34 }
 0x506   : > { %v3064_v46 = vsel %vm3034_vm10, %v1645_v36, %v2997_v12  ;;  %v2995_v14 = vpop.permute.xlu0 %2994  ;;  %3764 = vst.msk [vmem:[#allocation2 + $0x120] sm:$0xff] %vm3726_vm12, %v6610_v34  ;;  %3765 = vst.msk [vmem:[#allocation2 + $0x128] sm:$0xff] %vm3726_vm12, %v6610_v34 }
 0x507   : > { %v3063_v49 = vsel %vm3034_vm10, %v1644_v54, %v2995_v14  ;;  %3767 = vst.msk [vmem:[#allocation2 + $0x138] sm:$0xff] %vm3726_vm12, %v6610_v34  ;;  %3768 = vst.msk [vmem:[#allocation2 + $0x140] sm:$0xff] %vm3726_vm12, %v6610_v34 }
 0x508   : > { %5835 = vmatprep.mubr.msk.f32.mxu0 %vm3081_vm11, %v3063_v49  ;;  %3770 = vst.msk [vmem:[#allocation2 + $0x150] sm:$0xff] %vm3726_vm12, %v6610_v34  ;;  %3771 = vst.msk [vmem:[#allocation2 + $0x158] sm:$0xff] %vm3726_vm12, %v6610_v34 }
 0x509   : > { %5836 = vmatmul.mubr.msk.f32.gmra.mrb[28].mxu0 %vm3081_vm11, %v3064_v46  ;;  %3773 = vst.msk [vmem:[#allocation2 + $0x168] sm:$0xff] %vm3726_vm12, %v6610_v34  ;;  %3774 = vst.msk [vmem:[#allocation2 + $0x170] sm:$0xff] %vm3726_vm12, %v6610_v34 }
 0x50a   : > { %3776 = vst.msk [vmem:[#allocation2 + $0x180] sm:$0xff] %vm3726_vm12, %v6610_v34  ;;  %3777 = vst.msk [vmem:[#allocation2 + $0x188] sm:$0xff] %vm3726_vm12, %v6610_v34 }
 0x50b   : > { %3779 = vst.msk [vmem:[#allocation2 + $0x198] sm:$0xff] %vm3726_vm12, %v6610_v34  ;;  %3780 = vst.msk [vmem:[#allocation2 + $0x1a0] sm:$0xff] %vm3726_vm12, %v6610_v34 }
 0x50c   : > { %3742 = vst.msk [vmem:[#allocation2 + $0x70] sm:$0x3] %vm3729_vm13, %v6610_v34  ;;  %3730 = vst.msk [vmem:[#allocation2 + $0x10] sm:$0x3] %vm3729_vm13, %v6610_v34 }
 0x50d   : > { %3733 = vst.msk [vmem:[#allocation2 + $0x28] sm:$0x3] %vm3729_vm13, %v6610_v34  ;;  %3736 = vst.msk [vmem:[#allocation2 + $0x40] sm:$0x3] %vm3729_vm13, %v6610_v34 }
 0x50e   : > { %3739 = vst.msk [vmem:[#allocation2 + $0x58] sm:$0x3] %vm3729_vm13, %v6610_v34  ;;  %3745 = vst.msk [vmem:[#allocation2 + $0x88] sm:$0x3] %vm3729_vm13, %v6610_v34 }
 0x50f   : > { %3748 = vst.msk [vmem:[#allocation2 + $0xa0] sm:$0x3] %vm3729_vm13, %v6610_v34  ;;  %3751 = vst.msk [vmem:[#allocation2 + $0xb8] sm:$0x3] %vm3729_vm13, %v6610_v34 }
 0x510   : > { %3754 = vst.msk [vmem:[#allocation2 + $0xd0] sm:$0x3] %vm3729_vm13, %v6610_v34  ;;  %3757 = vst.msk [vmem:[#allocation2 + $0xe8] sm:$0x3] %vm3729_vm13, %v6610_v34 }
 0x511   : > { %3760 = vst.msk [vmem:[#allocation2 + $0x100] sm:$0x3] %vm3729_vm13, %v6610_v34  ;;  %3763 = vst.msk [vmem:[#allocation2 + $0x118] sm:$0x3] %vm3729_vm13, %v6610_v34 }
 0x512   : > { %3766 = vst.msk [vmem:[#allocation2 + $0x130] sm:$0x3] %vm3729_vm13, %v6610_v34  ;;  %3769 = vst.msk [vmem:[#allocation2 + $0x148] sm:$0x3] %vm3729_vm13, %v6610_v34 }
 0x513   : > { %v5798_v62 = vpop.f32.mrb[2].mxu0  ;;  %3772 = vst.msk [vmem:[#allocation2 + $0x160] sm:$0x3] %vm3729_vm13, %v6610_v34  ;;  %3775 = vst.msk [vmem:[#allocation2 + $0x178] sm:$0x3] %vm3729_vm13, %v6610_v34 }
 0x514   : > { %v10625_v56 = vadd.f32 %v5798_v62, %v10565_v3  ;;  %v3257_v40 = vpop.f32.mrb[3].mxu0  ;;  %3778 = vst.msk [vmem:[#allocation2 + $0x190] sm:$0x3] %vm3729_vm13, %v6610_v34  ;;  %3781 = vst.msk [vmem:[#allocation2 + $0x1a8] sm:$0x3] %vm3729_vm13, %v6610_v34 }
 0x515   : > { %v10632_v10 = vadd.f32 %v10565_v3, %v3257_v40 }
 0x516   : > { %3444 = vrot.lane.b32.xlu1 %v10625_v56, %s6609_s9 }
 0x517   : > { %3442 = vrot.lane.b32.xlu0 %v10632_v10, %s6609_s9 }
 0x518   : > { %v5801_v9 = vpop.f32.mrb[4].mxu0 }
 0x519   : > { %v10655_v47 = vadd.f32 %v5801_v9, %v10565_v3  ;;  %v3267_v50 = vpop.f32.mrb[5].mxu0  ;;  %v3001_v31 = vpop.permute.xlu1 %3000 }
 0x51a   : > { %v10660_v7 = vadd.f32 %v10565_v3, %v3267_v50  ;;  %v3066_v4 = vsel %vm3034_vm10, %v1647_v23, %v3001_v31  ;;  %v2999_v21 = vpop.permute.xlu0 %2998 }
 0x51b   : > { %v3065_v6 = vsel %vm3034_vm10, %v1646_v1, %v2999_v21  ;;  %3448 = vrot.lane.b32.xlu1 %v10655_v47, %s6609_s9 }
 0x51c   : > { %3446 = vrot.lane.b32.xlu0 %v10660_v7, %s6609_s9  ;;  %5838 = vmatprep.mubr.msk.f32.mxu0 %vm3081_vm11, %v3065_v6 }
 0x51d   : > { %5839 = vmatmul.mubr.msk.f32.gmra.mrb[30].mxu0 %vm3081_vm11, %v3066_v4 }
 0x52b   : > { %v5804_v53 = vpop.f32.mrb[6].mxu0 }
 0x52c   : > { %v10671_v35 = vadd.f32 %v5804_v53, %v10565_v3  ;;  %v3277_v13 = vpop.f32.mrb[7].mxu0 }
 0x52d   : > { %v10674_v43 = vadd.f32 %v10565_v3, %v3277_v13 }
 0x52e   : > { %3452 = vrot.lane.b32.xlu1 %v10671_v35, %s6609_s9 }
 0x52f   : > { %3450 = vrot.lane.b32.xlu0 %v10674_v43, %s6609_s9 }
 0x530   : > { %v5807_v55 = vpop.f32.mrb[8].mxu0 }
 0x531   : > { %v10681_v26 = vadd.f32 %v5807_v55, %v10565_v3  ;;  %v3287_v37 = vpop.f32.mrb[9].mxu0 }
 0x532   : > { %v10684_v19 = vadd.f32 %v10565_v3, %v3287_v37  ;;  %v10982_v37 = vld [vmem:[#allocation2] sm:$0xff] }
 0x533   : > { %3456 = vrot.lane.b32.xlu1 %v10681_v26, %s6609_s9 }
 0x534   : > { %3454 = vrot.lane.b32.xlu0 %v10684_v19, %s6609_s9 }
 0x544   : > { %v5810_v36 = vpop.f32.mrb[10].mxu0 }
 0x545   : > { %v10691_v12 = vadd.f32 %v5810_v36, %v10565_v3  ;;  %v3297_v32 = vpop.f32.mrb[11].mxu0  ;;  %v10984_v36 = vld [vmem:[#allocation2 + $0x8] sm:$0xff] }
 0x546   : > { %v10694_v54 = vadd.f32 %v10565_v3, %v3297_v32  ;;  %v10986_v32 = vld [vmem:[#allocation2 + $0x10] sm:$0x3] }
 0x547   : > { %3460 = vrot.lane.b32.xlu1 %v10691_v12, %s6609_s9  ;;  %13609 = vst [vmem:[#allocation323_spill] sm:$0xff] %v10986_v32 }
 0x548   : > { %3458 = vrot.lane.b32.xlu0 %v10694_v54, %s6609_s9 }
 0x558   : > { %v5813_v46 = vpop.f32.mrb[12].mxu0 }
 0x559   : > { %v10701_v14 = vadd.f32 %v5813_v46, %v10565_v3  ;;  %v3307_v49 = vpop.f32.mrb[13].mxu0 }
 0x55a   : > { %v10704_v39 = vadd.f32 %v10565_v3, %v3307_v49 }
 0x55b   : > { %3464 = vrot.lane.b32.xlu1 %v10701_v14, %s6609_s9 }
 0x55c   : > { %3462 = vrot.lane.b32.xlu0 %v10704_v39, %s6609_s9 }
 0x56c   : > { %v5816_v58 = vpop.f32.mrb[14].mxu0 }
 0x56d   : > { %v10711_v59 = vadd.f32 %v5816_v58, %v10565_v3  ;;  %v3317_v61 = vpop.f32.mrb[15].mxu0  ;;  %v3917_v58 = vrot.slane %v10982_v37, 1 }
 0x56e   : > { %v10714_v24 = vadd.f32 %v10565_v3, %v3317_v61  ;;  %v3918_v61 = vrot.slane %v10984_v36, 1 }
 0x56f   : > { %3468 = vrot.lane.b32.xlu1 %v10711_v59, %s6609_s9 }
 0x570   : > { %3466 = vrot.lane.b32.xlu0 %v10714_v24, %s6609_s9 }
 0x576   : > { %v10968_v6 = vpop.permute.xlu0 %3438 }
 0x580   : > { %v5819_v60 = vpop.f32.mrb[16].mxu0 }
 0x581   : > { %v10721_v8 = vadd.f32 %v5819_v60, %v10565_v3  ;;  %v3327_v41 = vpop.f32.mrb[17].mxu0  ;;  %v3920_v60 = vrot.slane %v10986_v32, 1 }
 0x582   : > { %v10724_v62 = vadd.f32 %v10565_v3, %v3327_v41 }
 0x583   : > { %3472 = vrot.lane.b32.xlu1 %v10721_v8, %s6609_s9 }
 0x584   : > { %3470 = vrot.lane.b32.xlu0 %v10724_v62, %s6609_s9  ;;  %v5822_v22 = vpop.f32.mrb[18].mxu0 }
 0x585   : > { %v10731_v38 = vadd.f32 %v5822_v22, %v10565_v3  ;;  %v3337_v17 = vpop.f32.mrb[19].mxu0 }
 0x586   : > { %v10734_v15 = vadd.f32 %v10565_v3, %v3337_v17  ;;  %v3919_v17 = vsel %vm428_vm0, %v3917_v58, %v3918_v61 }
 0x587   : > { %3476 = vrot.lane.b32.xlu1 %v10731_v38, %s6609_s9 }
 0x588   : > { %3474 = vrot.lane.b32.xlu0 %v10734_v15, %s6609_s9  ;;  %v5825_v40 = vpop.f32.mrb[20].mxu0 }
 0x589   : > { %v10741_v11 = vadd.f32 %v5825_v40, %v10565_v3  ;;  %v3347_v33 = vpop.f32.mrb[21].mxu0  ;;  %v10976_v13 = vpop.permute.xlu0 %3442  ;;  %v3921_v40 = vsel %vm428_vm0, %v3918_v61, %v3920_v60  ;;  %v4909_v61 = vld [vmem:[%s12467_s4 + $0x20] sm:$0xff]  ;;  %v4910_v60 = vld [vmem:[%s12467_s4 + $0x28] sm:$0xff] }
 0x58a   : > { %v10744_v20 = vadd.f32 %v10565_v3, %v3347_v33  ;;  %v6020_v33 = vpack.i.bf16 %v3921_v40, %v3919_v17  ;;  %v5916_v17 = vpack.c.bf16 %v4910_v60, %v4909_v61  ;;  %v4914_v61 = vld [vmem:[%s12467_s4 + $0x48] sm:$0xff] }
 0x58b   : > { %3480 = vrot.lane.b32.xlu1 %v10741_v11, %s6609_s9 }
 0x58c   : > { %3478 = vrot.lane.b32.xlu0 %v10744_v20, %s6609_s9 }
 0x58e   : > { %v10988_v46 = vpop.permute.xlu0 %3446 }
 0x59e   : > { %v5828_v63 = vpop.f32.mrb[22].mxu0 }
 0x59f   : > { %v10751_v42 = vadd.f32 %v5828_v63, %v10565_v3  ;;  %v3357_v48 = vpop.f32.mrb[23].mxu0 }
 0x5a0   : > { %v10754_v0 = vadd.f32 %v10565_v3, %v3357_v48 }
 0x5a1   : > { %3484 = vrot.lane.b32.xlu1 %v10751_v42, %s6609_s9  ;;  %v10997_v41 = vpop.permute.xlu0 %3450 }
 0x5a2   : > { %13603 = vst [vmem:[#allocation319_spill] sm:$0xff] %v10754_v0  ;;  %3482 = vrot.lane.b32.xlu0 %v10754_v0, %s6609_s9 }
 0x5a6   : > { %v11009_v48 = vpop.permute.xlu0 %3454 }
 0x5b4   : > { %v5831_v18 = vpop.f32.mrb[24].mxu0 }
 0x5b5   : > { %v10761_v57 = vadd.f32 %v5831_v18, %v10565_v3  ;;  %v3367_v51 = vpop.f32.mrb[25].mxu0  ;;  %v4905_v18 = vld [vmem:[%s12467_s4] sm:$0xff] }
 0x5b6   : > { %v10764_v30 = vadd.f32 %v10565_v3, %v3367_v51  ;;  %v4906_v51 = vld [vmem:[%s12467_s4 + $0x8] sm:$0xff] }
 0x5b7   : > { %3488 = vrot.lane.b32.xlu1 %v10761_v57, %s6609_s9 }
 0x5b8   : > { %13604 = vst [vmem:[#allocation331_spill] sm:$0xff] %v10764_v30  ;;  %3486 = vrot.lane.b32.xlu0 %v10764_v30, %s6609_s9 }
 0x5ba   : > { %v11020_v34 = vpop.permute.xlu0 %3458 }
 0x5c8   : > { %v5834_v52 = vpop.f32.mrb[26].mxu0 }
 0x5c9   : > { %v10771_v25 = vadd.f32 %v5834_v52, %v10565_v3  ;;  %v3377_v29 = vpop.f32.mrb[27].mxu0  ;;  %v6612_v52 = vmov 0.0|0.0  }
 0x5ca   : > { %v10774_v28 = vadd.f32 %v10565_v3, %v3377_v29  ;;  %5965 = vmatprep.subr.bf16.mxu1 %v6612_v52  ;;  %v5910_v29 = vpack.c.bf16 %v4906_v51, %v4905_v18  ;;  %5909 = vmatprep.subr.bf16.mxu0 %v6612_v52  ;;  %v4911_v18 = vld [vmem:[%s12467_s4 + $0x30] sm:$0xff]  ;;  %v4912_v51 = vld [vmem:[%s12467_s4 + $0x38] sm:$0xff] }
 0x5cb   : > { %3492 = vrot.lane.b32.xlu1 %v10771_v25, %s6609_s9 }
 0x5cc   : > { %13605 = vst [vmem:[#allocation366_spill] sm:$0xff] %v10774_v28  ;;  %3490 = vrot.lane.b32.xlu0 %v10774_v28, %s6609_s9  ;;  %5981 = vmatpush1.bf16.msra.mxu1 %v5910_v29 }
 0x5cd   : > { %5911 = vmatpush1.bf16.msra.mxu0 %v5910_v29  ;;  %5966 = vmatprep.subr.bf16.mxu1 %v6612_v52  ;;  %v5919_v29 = vpack.c.bf16 %v4912_v51, %v4911_v18  ;;  %v4915_v18 = vld [vmem:[%s12467_s4 + $0x50] sm:$0xff]  ;;  %v4916_v51 = vld [vmem:[%s12467_s4 + $0x58] sm:$0xff] }
 0x5ce   : > { %5912 = vmatprep.subr.bf16.mxu0 %v6612_v52  ;;  %v11032_v58 = vpop.permute.xlu0 %3462 }
 0x5dc   : > { %v5837_v9 = vpop.f32.mrb[28].mxu0 }
 0x5dd   : > { %v10853_v2 = vadd.f32 %v5837_v9, %v10565_v3  ;;  %v3387_v45 = vpop.f32.mrb[29].mxu0  ;;  %v4907_v9 = vld [vmem:[%s12467_s4 + $0x10] sm:$0xff] }
 0x5de   : > { %v10856_v5 = vadd.f32 %v10565_v3, %v3387_v45  ;;  %v4908_v45 = vld [vmem:[%s12467_s4 + $0x18] sm:$0xff] }
 0x5df   : > { %3496 = vrot.lane.b32.xlu1 %v10853_v2, %s6609_s9 }
 0x5e0   : > { %13606 = vst [vmem:[#allocation273_spill] sm:$0xff] %v10856_v5  ;;  %3494 = vrot.lane.b32.xlu0 %v10856_v5, %s6609_s9 }
 0x5e3   : > { %3610 = vrot.lane.b32.xlu1 %v10674_v43, %s6611_s26 }
 0x5e7   : > { %3606 = vrot.lane.b32.xlu1 %v10660_v7, %s6611_s26 }
 0x5eb   : > { %3614 = vrot.lane.b32.xlu1 %v10684_v19, %s6611_s26 }
 0x5ef   : > { %3618 = vrot.lane.b32.xlu1 %v10694_v54, %s6611_s26 }
 0x5f0   : > { %v5840_v23 = vpop.f32.mrb[30].mxu0 }
 0x5f1   : > { %v3397_v50 = vpop.f32.mrb[31].mxu0  ;;  %v10926_v44 = vadd.f32 %v5840_v23, %v10565_v3 }
 0x5f2   : > { %v10907_v31 = vadd.f32 %v10565_v3, %v3397_v50  ;;  %v10944_v3 = vpop.permute.xlu1 %3440  ;;  %v5913_v50 = vpack.c.bf16 %v4908_v45, %v4907_v9 }
 0x5f3   : > { %3598 = vrot.lane.b32.xlu1 %v10588_v27, %s6611_s26  ;;  %13608 = vst [vmem:[#allocation321_spill] sm:$0xff] %v10926_v44 }
 0x5f4   : > { %13607 = vst [vmem:[#allocation367_spill] sm:$0xff] %v10907_v31  ;;  %3498 = vrot.lane.b32.xlu0 %v10907_v31, %s6609_s9  ;;  %5982 = vmatpush1.bf16.msra.mxu1 %v5913_v50 }
 0x5f5   : > { %5914 = vmatpush1.bf16.msra.mxu0 %v5913_v50  ;;  %5967 = vmatprep.subr.bf16.mxu1 %v6612_v52  ;;  %v4913_v50 = vld [vmem:[%s12467_s4 + $0x40] sm:$0xff] }
 0x5f6   : > { %v10950_v1 = vpop.permute.xlu1 %3444  ;;  %5915 = vmatprep.subr.bf16.mxu0 %v6612_v52  ;;  %v5922_v60 = vpack.c.bf16 %v4914_v61, %v4913_v50  ;;  %v4917_v61 = vld [vmem:[%s12467_s4 + $0x60] sm:$0xff] }
 0x5f7   : > { %3622 = vrot.lane.b32.xlu1 %v10704_v39, %s6611_s26 }
 0x5f8   : > { %3612 = vrot.lane.b32.xlu0 %v10671_v35, %s6611_s26  ;;  %5983 = vmatpush1.bf16.msra.mxu1 %v5916_v17 }
 0x5f9   : > { %5917 = vmatpush1.bf16.msra.mxu0 %v5916_v17  ;;  %5968 = vmatprep.subr.bf16.mxu1 %v6612_v52 }
 0x5fa   : > { %v10956_v4 = vpop.permute.xlu1 %3448  ;;  %5918 = vmatprep.subr.bf16.mxu0 %v6612_v52 }
 0x5fb   : > { %3602 = vrot.lane.b32.xlu1 %v10632_v10, %s6611_s26 }
 0x5fc   : > { %3608 = vrot.lane.b32.xlu0 %v10655_v47, %s6611_s26  ;;  %5984 = vmatpush1.bf16.msra.mxu1 %v5919_v29 }
 0x5fd   : > { %5920 = vmatpush1.bf16.msra.mxu0 %v5919_v29  ;;  %5969 = vmatprep.subr.bf16.mxu1 %v6612_v52  ;;  %v5925_v29 = vpack.c.bf16 %v4916_v51, %v4915_v18  ;;  %v3540_v18 = vmul.f32 %v10997_v41, %v10674_v43  ;;  %v3538_v41 = vmul.f32 %v10988_v46, %v10660_v7 }
 0x5fe   : > { %v10962_v21 = vpop.permute.xlu1 %3452  ;;  %5921 = vmatprep.subr.bf16.mxu0 %v6612_v52 }
 0x5ff   : > { %3626 = vrot.lane.b32.xlu1 %v10714_v24, %s6611_s26  ;;  %v3570_v46 = vadd.f32 %v3538_v41, %v10660_v7  ;;  %v3544_v7 = vmul.f32 %v11020_v34, %v10694_v54  ;;  %v4926_v34 = vld [vmem:[%s12467_s4 + $0xa8] sm:$0xff] }
 0x600   : > { %3616 = vrot.lane.b32.xlu0 %v10681_v26, %s6611_s26  ;;  %5985 = vmatpush1.bf16.msra.mxu1 %v5922_v60 }
 0x601   : > { %5923 = vmatpush1.bf16.msra.mxu0 %v5922_v60  ;;  %5970 = vmatprep.subr.bf16.mxu1 %v6612_v52  ;;  %v4918_v60 = vld [vmem:[%s12467_s4 + $0x68] sm:$0xff] }
 0x602   : > { %v10974_v53 = vpop.permute.xlu1 %3456  ;;  %5924 = vmatprep.subr.bf16.mxu0 %v6612_v52  ;;  %v5928_v32 = vpack.c.bf16 %v4918_v60, %v4917_v61 }
 0x603   : > { %3500 = vrot.lane.b32.xlu1 %v10926_v44, %s6609_s9 }
 0x604   : > { %3620 = vrot.lane.b32.xlu0 %v10691_v12, %s6611_s26  ;;  %5986 = vmatpush1.bf16.msra.mxu1 %v5925_v29 }
 0x605   : > { %5926 = vmatpush1.bf16.msra.mxu0 %v5925_v29  ;;  %5971 = vmatprep.subr.bf16.mxu1 %v6612_v52 }
 0x606   : > { %v10980_v55 = vpop.permute.xlu1 %3460  ;;  %5927 = vmatprep.subr.bf16.mxu0 %v6612_v52 }
 0x607   : > { %3632 = vrot.lane.b32.xlu1 %v10721_v8, %s6611_s26 }
 0x608   : > { %3600 = vrot.lane.b32.xlu0 %v10581_v16, %s6611_s26  ;;  %5987 = vmatpush1.bf16.msra.mxu1 %v5928_v32 }
 0x609   : > { %5929 = vmatpush1.bf16.msra.mxu0 %v5928_v32  ;;  %5972 = vmatprep.subr.bf16.mxu1 %v6612_v52  ;;  %v3572_v32 = vadd.f32 %v3540_v18, %v10674_v43  ;;  %v3542_v43 = vmul.f32 %v11009_v48, %v10684_v19 }
 0x60a   : > { %v10992_v49 = vpop.permute.xlu1 %3464  ;;  %5930 = vmatprep.subr.bf16.mxu0 %v6612_v52 }
 0x60b   : > { %3636 = vrot.lane.b32.xlu1 %v10731_v38, %s6611_s26  ;;  %v3574_v48 = vadd.f32 %v3542_v43, %v10684_v19  ;;  %v3534_v19 = vmul.f32 %v10968_v6, %v10588_v27  ;;  %v3576_v43 = vadd.f32 %v3544_v7, %v10694_v54  ;;  %v4928_v6 = vld [vmem:[%s12467_s4 + $0xb8] sm:$0xff]  ;;  %v3546_v54 = vmul.f32 %v11032_v58, %v10704_v39  ;;  %v4930_v58 = vld [vmem:[%s12467_s4 + $0xc8] sm:$0xff] }
 0x60c   : > { %3624 = vrot.lane.b32.xlu0 %v10701_v14, %s6611_s26 }
 0x60d   : > { %v3566_v7 = vadd.f32 %v3534_v19, %v10588_v27  ;;  %v3578_v19 = vadd.f32 %v3546_v54, %v10704_v39  ;;  %v4932_v39 = vld [vmem:[%s12467_s4 + $0xd8] sm:$0xff] }
 0x60e   : > { %v11001_v22 = vpop.permute.xlu1 %3468 }
 0x60f   : > { %3640 = vrot.lane.b32.xlu1 %v10741_v11, %s6611_s26 }
 0x610   : > { %3604 = vrot.lane.b32.xlu0 %v10625_v56, %s6611_s26 }
 0x612   : > { %v11007_v63 = vpop.permute.xlu1 %3472 }
 0x613   : > { %3644 = vrot.lane.b32.xlu1 %v10751_v42, %s6611_s26 }
 0x614   : > { %3628 = vrot.lane.b32.xlu0 %v10711_v59, %s6611_s26 }
 0x616   : > { %v11030_v23 = vpop.permute.xlu1 %3476 }
 0x617   : > { %3648 = vrot.lane.b32.xlu1 %v10761_v57, %s6611_s26 }
 0x618   : > { %3630 = vrot.lane.b32.xlu0 %v10724_v62, %s6611_s26 }
 0x61a   : > { %v11042_v40 = vpop.permute.xlu1 %3480 }
 0x61b   : > { %3652 = vrot.lane.b32.xlu1 %v10771_v25, %s6611_s26 }
 0x61c   : > { %3634 = vrot.lane.b32.xlu0 %v10734_v15, %s6611_s26 }
 0x61e   : > { %v11054_v9 = vpop.permute.xlu1 %3484 }
 0x61f   : > { %3656 = vrot.lane.b32.xlu1 %v10853_v2, %s6611_s26 }
 0x620   : > { %3638 = vrot.lane.b32.xlu0 %v10744_v20, %s6611_s26 }
 0x623   : > { %3660 = vrot.lane.b32.xlu1 %v10926_v44, %s6611_s26  ;;  %v4921_v44 = vld [vmem:[%s12467_s4 + $0x80] sm:$0xff] }
 0x624   : > { %3642 = vrot.lane.b32.xlu0 %v10754_v0, %s6611_s26 }
 0x628   : > { %3646 = vrot.lane.b32.xlu0 %v10764_v30, %s6611_s26 }
 0x629   : > { %v11066_v17 = vpop.permute.xlu1 %3488 }
 0x62c   : > { %3650 = vrot.lane.b32.xlu0 %v10774_v28, %s6611_s26  ;;  %v4920_v28 = vld [vmem:[%s12467_s4 + $0x78] sm:$0xff] }
 0x630   : > { %3654 = vrot.lane.b32.xlu0 %v10856_v5, %s6611_s26  ;;  %v4919_v5 = vld [vmem:[%s12467_s4 + $0x70] sm:$0xff] }
 0x631   : > { %v5931_v61 = vpack.c.bf16 %v4920_v28, %v4919_v5  ;;  %v4922_v28 = vld [vmem:[%s12467_s4 + $0x88] sm:$0xff] }
 0x632   : > { %v5934_v5 = vpack.c.bf16 %v4922_v28, %v4921_v44  ;;  %v4924_v44 = vld [vmem:[%s12467_s4 + $0x98] sm:$0xff] }
 0x633   : > { %5988 = vmatpush1.bf16.msra.mxu1 %v5931_v61  ;;  %5932 = vmatpush1.bf16.msra.mxu0 %v5931_v61 }
 0x634   : > { %3658 = vrot.lane.b32.xlu0 %v10907_v31, %s6611_s26  ;;  %5973 = vmatprep.subr.bf16.mxu1 %v6612_v52 }
 0x635   : > { %5933 = vmatprep.subr.bf16.mxu0 %v6612_v52 }
 0x637   : > { %5989 = vmatpush1.bf16.msra.mxu1 %v5934_v5  ;;  %5935 = vmatpush1.bf16.msra.mxu0 %v5934_v5 }
 0x638   : > { %6021 = vrot.lane.b32.xlu0 %v6020_v33, %s6613_s15  ;;  %v11044_v33 = vpop.permute.xlu0 %3466  ;;  %5974 = vmatprep.subr.bf16.mxu1 %v6612_v52 }
 0x639   : > { %5936 = vmatprep.subr.bf16.mxu0 %v6612_v52 }
 0x63c   : > { %v11056_v45 = vpop.permute.xlu0 %3470 }
 0x63d   : > { %v11078_v50 = vpop.permute.xlu1 %3492 }
 0x640   : > { %v11076_v31 = vpop.permute.xlu0 %3474 }
 0x644   : > { %v11092_v29 = vpop.permute.xlu0 %3478 }
 0x648   : > { %v11105_v30 = vpop.permute.xlu0 %3482 }
 0x64c   : > { %v11119_v61 = vpop.permute.xlu0 %3486 }
 0x650   : > { %v11133_v28 = vpop.permute.xlu0 %3490 }
 0x651   : > { %v11090_v51 = vpop.permute.xlu1 %3496 }
 0x655   : > { %v3611_v60 = vpop.permute.xlu1 %3610 }
 0x656   : > { %v3700_v0 = vadd.f32 %v3611_v60, %v3572_v32  ;;  %v4923_v60 = vld [vmem:[%s12467_s4 + $0x90] sm:$0xff] }
 0x658   : > { %3789 = vst.msk [vmem:[#allocation2 + $0x61] sm:$0xff] %vm3726_vm12, %v3700_v0  ;;  %v5937_v0 = vpack.c.bf16 %v4924_v44, %v4923_v60  ;;  %v11147_v60 = vpop.permute.xlu0 %3494 }
 0x659   : > { %v3607_v18 = vpop.permute.xlu1 %3606 }
 0x65a   : > { %v3698_v32 = vadd.f32 %v3607_v18, %v3570_v46  ;;  %5990 = vmatpush1.bf16.msra.mxu1 %v5937_v0  ;;  %5938 = vmatpush1.bf16.msra.mxu0 %v5937_v0  ;;  %v4925_v46 = vld [vmem:[%s12467_s4 + $0xa0] sm:$0xff]  ;;  %v4927_v0 = vld [vmem:[%s12467_s4 + $0xb0] sm:$0xff] }
 0x65b   : > { %5975 = vmatprep.subr.bf16.mxu1 %v6612_v52  ;;  %5939 = vmatprep.subr.bf16.mxu0 %v6612_v52  ;;  %v5940_v18 = vpack.c.bf16 %v4926_v34, %v4925_v46 }
 0x65c   : > { %3787 = vst.msk [vmem:[#allocation2 + $0x49] sm:$0xff] %vm3726_vm12, %v3698_v32 }
 0x65d   : > { %v3615_v41 = vpop.permute.xlu1 %3614 }
 0x65e   : > { %v3702_v5 = vadd.f32 %v3615_v41, %v3574_v48  ;;  %5991 = vmatpush1.bf16.msra.mxu1 %v5940_v18  ;;  %5941 = vmatpush1.bf16.msra.mxu0 %v5940_v18  ;;  %v5943_v48 = vpack.c.bf16 %v4928_v6, %v4927_v0  ;;  %v3541_v41 = vmul.f32 %v10962_v21, %v10671_v35  ;;  %v4929_v18 = vld [vmem:[%s12467_s4 + $0xc0] sm:$0xff] }
 0x65f   : > { %5976 = vmatprep.subr.bf16.mxu1 %v6612_v52  ;;  %5942 = vmatprep.subr.bf16.mxu0 %v6612_v52  ;;  %v5946_v27 = vpack.c.bf16 %v4930_v58, %v4929_v18  ;;  %v3536_v21 = vmul.f32 %v10976_v13, %v10632_v10  ;;  %v4931_v13 = vld [vmem:[%s12467_s4 + $0xd0] sm:$0xff] }
 0x660   : > { %3791 = vst.msk [vmem:[#allocation2 + $0x79] sm:$0xff] %vm3726_vm12, %v3702_v5 }
 0x661   : > { %v3619_v32 = vpop.permute.xlu1 %3618  ;;  %v3568_v54 = vadd.f32 %v3536_v21, %v10632_v10  ;;  %v4934_v21 = vld [vmem:[%s12467_s4 + $0xe8] sm:$0xff] }
 0x662   : > { %v3704_v44 = vadd.f32 %v3619_v32, %v3576_v43  ;;  %5992 = vmatpush1.bf16.msra.mxu1 %v5943_v48  ;;  %5944 = vmatpush1.bf16.msra.mxu0 %v5943_v48  ;;  %v3539_v43 = vmul.f32 %v10956_v4, %v10655_v47  ;;  %v5949_v48 = vpack.c.bf16 %v4932_v39, %v4931_v13 }
 0x663   : > { %5977 = vmatprep.subr.bf16.mxu1 %v6612_v52  ;;  %5945 = vmatprep.subr.bf16.mxu0 %v6612_v52  ;;  %v11223_v39 = vld [vmem:[#allocation2 + $0x48] sm:$0xff] }
 0x664   : > { %3793 = vst.msk [vmem:[#allocation2 + $0x91] sm:$0xff] %vm3726_vm12, %v3704_v44  ;;  %v3573_v44 = vadd.f32 %v3541_v41, %v10671_v35  ;;  %v3548_v35 = vmul.f32 %v11044_v33, %v10714_v24 }
 0x665   : > { %v3599_v5 = vpop.permute.xlu1 %3598 }
 0x666   : > { %v3694_v46 = vadd.f32 %v3599_v5, %v3566_v7  ;;  %v11163_v34 = vpop.permute.xlu0 %3498  ;;  %5993 = vmatpush1.bf16.msra.mxu1 %v5946_v27  ;;  %5947 = vmatpush1.bf16.msra.mxu0 %v5946_v27  ;;  %v3543_v7 = vmul.f32 %v10974_v53, %v10681_v26  ;;  %v3571_v5 = vadd.f32 %v3539_v43, %v10655_v47  ;;  %v4933_v27 = vld [vmem:[%s12467_s4 + $0xe0] sm:$0xff] }
 0x667   : > { %5978 = vmatprep.subr.bf16.mxu1 %v6612_v52  ;;  %5948 = vmatprep.subr.bf16.mxu0 %v6612_v52  ;;  %v3580_v10 = vadd.f32 %v3548_v35, %v10714_v24  ;;  %v3545_v53 = vmul.f32 %v10980_v55, %v10691_v12  ;;  %v3535_v24 = vmul.f32 %v10944_v3, %v10581_v16  ;;  %v4935_v3 = vld [vmem:[%s12467_s4 + $0xf0] sm:$0xff] }
 0x668   : > { %3783 = vst.msk [vmem:[#allocation2 + $0x19] sm:$0xff] %vm3726_vm12, %v3694_v46  ;;  %v3575_v47 = vadd.f32 %v3543_v7, %v10681_v26  ;;  %v11215_v26 = vld [vmem:[#allocation2 + $0x60] sm:$0xff] }
 0x669   : > { %v3623_v32 = vpop.permute.xlu1 %3622  ;;  %v3577_v13 = vadd.f32 %v3545_v53, %v10691_v12  ;;  %v3553_v12 = vmul.f32 %v11030_v23, %v10731_v38  ;;  %v3567_v7 = vadd.f32 %v3535_v24, %v10581_v16  ;;  %v4113_v23 = vrot.slane %v11215_v26, 2 }
 0x66a   : > { %v3706_v0 = vadd.f32 %v3623_v32, %v3578_v19  ;;  %v3613_v6 = vpop.permute.xlu0 %3612  ;;  %5994 = vmatpush1.bf16.msra.mxu1 %v5949_v48  ;;  %5950 = vmatpush1.bf16.msra.mxu0 %v5949_v48  ;;  %v5952_v32 = vpack.c.bf16 %v4934_v21, %v4933_v27 }
 0x66b   : > { %v3701_v4 = vadd.f32 %v3613_v6, %v3573_v44  ;;  %5979 = vmatprep.subr.bf16.mxu1 %v6612_v52  ;;  %5951 = vmatprep.subr.bf16.mxu0 %v6612_v52  ;;  %v3551_v44 = vmul.f32 %v11007_v63, %v10721_v8  ;;  %v4936_v63 = vld [vmem:[%s12467_s4 + $0xf8] sm:$0xff]  ;;  %v3585_v21 = vadd.f32 %v3553_v12, %v10731_v38 }
 0x66c   : > { %3795 = vst.msk [vmem:[#allocation2 + $0xa9] sm:$0xff] %vm3726_vm12, %v3706_v0  ;;  %v5955_v35 = vpack.c.bf16 %v4936_v63, %v4935_v3 }
 0x66d   : > { %3790 = vst.msk [vmem:[#allocation2 + $0x69] sm:$0xff] %vm3726_vm12, %v3701_v4  ;;  %v3603_v41 = vpop.permute.xlu1 %3602  ;;  %v3547_v4 = vmul.f32 %v10992_v49, %v10701_v14  ;;  %v4108_v49 = vrot.slane %v11223_v39, 2 }
 0x66e   : > { %v3696_v46 = vadd.f32 %v3603_v41, %v3568_v54  ;;  %v3609_v18 = vpop.permute.xlu0 %3608  ;;  %5995 = vmatpush1.bf16.msra.mxu1 %v5952_v32  ;;  %5953 = vmatpush1.bf16.msra.mxu0 %v5952_v32 }
 0x66f   : > { %v3699_v33 = vadd.f32 %v3609_v18, %v3571_v5  ;;  %5980 = vmatprep.subr.bf16.mxu1 %v6612_v52  ;;  %5954 = vmatprep.subr.bf16.mxu0 %v6612_v52  ;;  %v3583_v52 = vadd.f32 %v3551_v44, %v10721_v8 }
 0x670   : > { %3785 = vst.msk [vmem:[#allocation2 + $0x31] sm:$0xff] %vm3726_vm12, %v3696_v46  ;;  %v3537_v46 = vmul.f32 %v10950_v1, %v10625_v56 }
 0x671   : > { %3788 = vst.msk [vmem:[#allocation2 + $0x51] sm:$0xff] %vm3726_vm12, %v3699_v33  ;;  %v3627_v58 = vpop.permute.xlu1 %3626 }
 0x672   : > { %v3708_v19 = vadd.f32 %v3627_v58, %v3580_v10  ;;  %v3617_v43 = vpop.permute.xlu0 %3616  ;;  %5996 = vmatpush1.bf16.msra.mxu1 %v5955_v35  ;;  %v11249_v10 = vld [vmem:[#allocation2 + $0x78] sm:$0xff]  ;;  %v3932_v58 = vrot.slane %v11223_v39, 1  ;;  %5956 = vmatpush1.bf16.msra.mxu0 %v5955_v35 }
 0x673   : > { %v3703_v55 = vadd.f32 %v3617_v43, %v3575_v47  ;;  %v3942_v63 = vrot.slane %v11249_v10, 1 }
 0x674   : > { %3797 = vst.msk [vmem:[#allocation2 + $0xc1] sm:$0xff] %vm3726_vm12, %v3708_v19  ;;  %v11217_v0 = vld [vmem:[#allocation2 + $0x68] sm:$0xff]  ;;  %v11239_v5 = vld [vmem:[#allocation2 + $0x70] sm:$0x3]  ;;  %v3579_v19 = vadd.f32 %v3547_v4, %v10701_v14 }
 0x675   : > { %3792 = vst.msk [vmem:[#allocation2 + $0x81] sm:$0xff] %vm3726_vm12, %v3703_v55  ;;  %v11220_v6 = vpop.permute.xlu1 %3500  ;;  %v4114_v41 = vrot.slane %v11217_v0, 2  ;;  %v4116_v43 = vrot.slane %v11239_v5, 2 }
 0x676   : > { %v3621_v48 = vpop.permute.xlu0 %3620 }
 0x677   : > { %v3705_v54 = vadd.f32 %v3621_v48, %v3577_v13  ;;  %v11264_v44 = vsel %vm605_vm1, %v4113_v23, %v4114_v41  ;;  %v3555_v13 = vmul.f32 %v11042_v40, %v10741_v11 }
 0x678   : > { %v11244_v18 = vld [vmem:[#allocation2 + $0x50] sm:$0xff]  ;;  %v3826_v33 = vld [vmem:[#allocation2 + $0x58] sm:$0x3] }
 0x679   : > { %3794 = vst.msk [vmem:[#allocation2 + $0x99] sm:$0xff] %vm3726_vm12, %v3705_v54  ;;  %v3633_v16 = vpop.permute.xlu1 %3632  ;;  %v4109_v53 = vrot.slane %v11244_v18, 2  ;;  %v3933_v1 = vrot.slane %v11244_v18, 1  ;;  %v3935_v8 = vrot.slane %v3826_v33, 1  ;;  %v4111_v54 = vrot.slane %v3826_v33, 2 }
 0x67a   : > { %v3711_v47 = vadd.f32 %v3633_v16, %v3583_v52  ;;  %v3601_v27 = vpop.permute.xlu0 %3600  ;;  %v11289_v16 = vsel %vm605_vm1, %v4114_v41, %v4116_v43 }
 0x67b   : > { %v3695_v32 = vadd.f32 %v3601_v27, %v3567_v7  ;;  %v11258_v24 = vsel %vm605_vm1, %v4108_v49, %v4109_v53  ;;  %v11261_v55 = vsel %vm428_vm0, %v3932_v58, %v3933_v1  ;;  %v11280_v48 = vsel %vm428_vm0, %v3933_v1, %v3935_v8 }
 0x67c   : > { %3800 = vst.msk [vmem:[#allocation2 + $0xe1] sm:$0xff] %vm3726_vm12, %v3711_v47  ;;  %v6030_v14 = vpack.i.bf16 %v11258_v24, %v11249_v10  ;;  %v6025_v38 = vpack.i.bf16 %v11261_v55, %v11264_v44  ;;  %v11273_v3 = vld [vmem:[#allocation2 + $0x80] sm:$0xff]  ;;  %v11276_v4 = vld [vmem:[#allocation2 + $0x88] sm:$0x3]  ;;  %v3549_v7 = vmul.f32 %v11001_v22, %v10711_v59  ;;  %v3557_v1 = vmul.f32 %v11054_v9, %v10751_v42 }
 0x67d   : > { %3784 = vst.msk [vmem:[#allocation2 + $0x21] sm:$0xff] %vm3726_vm12, %v3695_v32  ;;  %v3637_v12 = vpop.permute.xlu1 %3636  ;;  %v3943_v40 = vrot.slane %v11273_v3, 1  ;;  %v3945_v35 = vrot.slane %v11276_v4, 1  ;;  %v3587_v22 = vadd.f32 %v3555_v13, %v10741_v11  ;;  %v6040_v33 = vpack.i.bf16 %v11280_v48, %v11289_v16 }
 0x67e   : > { %v3713_v52 = vadd.f32 %v3637_v12, %v3585_v21  ;;  %6031 = vrot.lane.b32.xlu0 %v6030_v14, %s6611_s26  ;;  %6026 = vrot.lane.b32.xlu1 %v6025_v38, %s6613_s15  ;;  %v3625_v49 = vpop.permute.xlu0 %3624  ;;  %v3569_v47 = vadd.f32 %v3537_v46, %v10625_v56  ;;  %v11308_v9 = vsel %vm605_vm1, %v4109_v53, %v4111_v54  ;;  %v4119_v21 = vrot.slane %v11273_v3, 2  ;;  %v11328_v12 = vld [vmem:[#allocation2 + $0x90] sm:$0xff] }
 0x67f   : > { %v3707_v23 = vadd.f32 %v3625_v49, %v3579_v19  ;;  %v11292_v58 = vsel %vm428_vm0, %v3942_v63, %v3943_v40  ;;  %v11305_v27 = vsel %vm428_vm0, %v3943_v40, %v3945_v35  ;;  %v3581_v43 = vadd.f32 %v3549_v7, %v10711_v59 }
 0x680   : > { %3802 = vst.msk [vmem:[#allocation2 + $0xf9] sm:$0xff] %vm3726_vm12, %v3713_v52  ;;  %v6035_v8 = vpack.i.bf16 %v11215_v26, %v11292_v58  ;;  %v11314_v32 = vld [vmem:[#allocation2 + $0x98] sm:$0xff]  ;;  %v3550_v56 = vmul.f32 %v11056_v45, %v10724_v62  ;;  %v3938_v13 = vrot.slane %v11217_v0, 1  ;;  %v4118_v53 = vrot.slane %v11249_v10, 2  ;;  %v11341_v49 = vld [vmem:[#allocation2 + $0xa0] sm:$0x3] }
 0x681   : > { %3796 = vst.msk [vmem:[#allocation2 + $0xb1] sm:$0xff] %vm3726_vm12, %v3707_v23  ;;  %v3641_v41 = vpop.permute.xlu1 %3640  ;;  %v3559_v14 = vmul.f32 %v11066_v17, %v10761_v57  ;;  %v3589_v38 = vadd.f32 %v3557_v1, %v10751_v42  ;;  %v6050_v59 = vpack.i.bf16 %v11217_v0, %v11305_v27  ;;  %v6045_v63 = vpack.i.bf16 %v11308_v9, %v11273_v3 }
 0x682   : > { %v3715_v11 = vadd.f32 %v3641_v41, %v3587_v22  ;;  %6041 = vrot.lane.b32.xlu0 %v6040_v33, %s6613_s15  ;;  %6036 = vrot.lane.b32.xlu1 %v6035_v8, %s6609_s9  ;;  %v3605_v19 = vpop.permute.xlu0 %3604  ;;  %v3937_v40 = vrot.slane %v11215_v26, 1  ;;  %v11333_v35 = vsel %vm605_vm1, %v4118_v53, %v4119_v21  ;;  %v4121_v17 = vrot.slane %v11276_v4, 2 }
 0x683   : > { %v3697_v46 = vadd.f32 %v3605_v19, %v3569_v47  ;;  %13610 = vst [vmem:[#allocation335_spill] sm:$0xff] %v11333_v35  ;;  %v3948_v42 = vrot.slane %v11314_v32, 1  ;;  %v3552_v54 = vmul.f32 %v11076_v31, %v10734_v15  ;;  %v3940_v22 = vrot.slane %v11239_v5, 1 }
 0x684   : > { %3804 = vst.msk [vmem:[#allocation2 + $0x111] sm:$0xff] %vm3726_vm12, %v3715_v11  ;;  %v11344_v1 = vsel %vm428_vm0, %v3937_v40, %v3938_v13  ;;  %v3947_v4 = vrot.slane %v11328_v12, 1  ;;  %v3561_v33 = vmul.f32 %v11078_v50, %v10771_v25  ;;  %v3591_v31 = vadd.f32 %v3559_v14, %v10761_v57 }
 0x685   : > { %3786 = vst.msk [vmem:[#allocation2 + $0x39] sm:$0xff] %vm3726_vm12, %v3697_v46  ;;  %v3645_v45 = vpop.permute.xlu1 %3644  ;;  %v6060_v8 = vpack.i.bf16 %v11264_v44, %v11328_v12  ;;  %v6055_v41 = vpack.i.bf16 %v11344_v1, %v11333_v35  ;;  %v3582_v5 = vadd.f32 %v3550_v56, %v10724_v62  ;;  %v11359_v11 = vsel %vm605_vm1, %v4119_v21, %v4121_v17  ;;  %v11367_v46 = vld [vmem:[#allocation2 + $0x20] sm:$0xff] }
 0x686   : > { %v3717_v7 = vadd.f32 %v3645_v45, %v3589_v38  ;;  %6051 = vrot.lane.b32.xlu0 %v6050_v59, %s6609_s9  ;;  %6046 = vrot.lane.b32.xlu1 %v6045_v63, %s6611_s26  ;;  %v3629_v52 = vpop.permute.xlu0 %3628  ;;  %13611 = vst [vmem:[#allocation369_spill] sm:$0xff] %v11359_v11  ;;  %v11362_v50 = vsel %vm428_vm0, %v3947_v4, %v3948_v42  ;;  %v3950_v19 = vrot.slane %v11341_v49, 1  ;;  %v11381_v63 = vld [vmem:[#allocation2 + $0x18] sm:$0xff]  ;;  %v4124_v45 = vrot.slane %v11314_v32, 2 }
 0x687   : > { %v3709_v23 = vadd.f32 %v3629_v52, %v3581_v43  ;;  %v11370_v14 = vsel %vm428_vm0, %v3938_v13, %v3940_v22  ;;  %v3584_v62 = vadd.f32 %v3552_v54, %v10734_v15  ;;  %v3563_v21 = vmul.f32 %v11090_v51, %v10853_v2 }
 0x688   : > { %3806 = vst.msk [vmem:[#allocation2 + $0x129] sm:$0xff] %vm3726_vm12, %v3717_v7  ;;  %v3593_v56 = vadd.f32 %v3561_v33, %v10771_v25  ;;  %v6070_v38 = vpack.i.bf16 %v11370_v14, %v11359_v11  ;;  %v6065_v59 = vpack.i.bf16 %v11249_v10, %v11362_v50  ;;  %v3554_v13 = vmul.f32 %v11092_v29, %v10744_v20 }
 0x689   : > { %3798 = vst.msk [vmem:[#allocation2 + $0xc9] sm:$0xff] %vm3726_vm12, %v3709_v23  ;;  %v3649_v47 = vpop.permute.xlu1 %3648  ;;  %v11387_v51 = vsel %vm428_vm0, %v3948_v42, %v3950_v19  ;;  %v4099_v25 = vrot.slane %v11367_v46, 2  ;;  %v4093_v17 = vrot.slane %v10982_v37, 2  ;;  %v4094_v29 = vrot.slane %v10984_v36, 2  ;;  %v13612_v23 = vld [vmem:[#allocation321_spill] sm:$0xff] }
 0x68a   : > { %v3719_v57 = vadd.f32 %v3649_v47, %v3591_v31  ;;  %6061 = vrot.lane.b32.xlu0 %v6060_v8, %s6611_s26  ;;  %6056 = vrot.lane.b32.xlu1 %v6055_v41, %s6613_s15  ;;  %v3631_v43 = vpop.permute.xlu0 %3630  ;;  %v4123_v7 = vrot.slane %v11328_v12, 2  ;;  %v4098_v42 = vrot.slane %v11381_v63, 2  ;;  %v4126_v52 = vrot.slane %v11341_v49, 2  ;;  %v13613_v31 = vld [vmem:[#allocation319_spill] sm:$0xff] }
 0x68b   : > { %v3710_v53 = vadd.f32 %v3631_v43, %v3582_v5  ;;  %v3565_v22 = vmul.f32 %v11220_v6, %v13612_v23  ;;  %v3595_v4 = vadd.f32 %v3563_v21, %v10853_v2  ;;  %v6080_v33 = vpack.i.bf16 %v11273_v3, %v11387_v51 }
 0x68c   : > { %3808 = vst.msk [vmem:[#allocation2 + $0x141] sm:$0xff] %vm3726_vm12, %v3719_v57  ;;  %v6075_v37 = vpack.i.bf16 %v11289_v16, %v11314_v32  ;;  %v3556_v8 = vmul.f32 %v11105_v30, %v13613_v31  ;;  %v3586_v49 = vadd.f32 %v3554_v13, %v10744_v20  ;;  %v11411_v6 = vsel %vm605_vm1, %v4123_v7, %v4124_v45  ;;  %v11420_v30 = vld [vmem:[#allocation2 + $0xb0] sm:$0xff]  ;;  %v11422_v5 = vld [vmem:[#allocation2 + $0x38] sm:$0xff] }
 0x68d   : > { %3799 = vst.msk [vmem:[#allocation2 + $0xd9] sm:$0xff] %vm3726_vm12, %v3710_v53  ;;  %v3653_v15 = vpop.permute.xlu1 %3652  ;;  %13614 = vst [vmem:[#allocation333_spill] sm:$0xff] %v11411_v6  ;;  %v11416_v2 = vsel %vm605_vm1, %v4098_v42, %v4099_v25  ;;  %v11425_v20 = vsel %vm605_vm1, %v4124_v45, %v4126_v52  ;;  %v13616_v57 = vld [vmem:[#allocation331_spill] sm:$0xff]  ;;  %v3597_v53 = vadd.f32 %v3565_v22, %v13612_v23  ;;  %v3928_v45 = vrot.slane %v11422_v5, 1 }
 0x68e   : > { %v3721_v40 = vadd.f32 %v3653_v15, %v3593_v56  ;;  %6071 = vrot.lane.b32.xlu0 %v6070_v38, %s6613_s15  ;;  %6066 = vrot.lane.b32.xlu1 %v6065_v59, %s6609_s9  ;;  %v3635_v10 = vpop.permute.xlu0 %3634  ;;  %13615 = vst [vmem:[#allocation277_spill] sm:$0xff] %v11425_v20  ;;  %v3558_v43 = vmul.f32 %v11119_v61, %v13616_v57  ;;  %v11435_v56 = vld [vmem:[#allocation2 + $0xa8] sm:$0xff]  ;;  %v11437_v38 = vld [vmem:[#allocation2 + $0x30] sm:$0xff]  ;;  %v3953_v15 = vrot.slane %v11420_v30, 1 }
 0x68f   : > { %v3712_v54 = vadd.f32 %v3635_v10, %v3584_v62  ;;  %v6085_v62 = vpack.i.bf16 %v11292_v58, %v11411_v6  ;;  %v6090_v21 = vpack.i.bf16 %v11425_v20, %v11416_v2  ;;  %v3588_v13 = vadd.f32 %v3556_v8, %v13613_v31 }
 0x690   : > { %3810 = vst.msk [vmem:[#allocation2 + $0x159] sm:$0xff] %vm3726_vm12, %v3721_v40  ;;  %v4095_v61 = vsel %vm605_vm1, %v4093_v17, %v4094_v29  ;;  %v3952_v42 = vrot.slane %v11435_v56, 1  ;;  %v3927_v52 = vrot.slane %v11437_v38, 1  ;;  %v6095_v17 = vpack.i.bf16 %v11333_v35, %v11435_v56 }
 0x691   : > { %3801 = vst.msk [vmem:[#allocation2 + $0xf1] sm:$0xff] %vm3726_vm12, %v3712_v54  ;;  %v3657_v41 = vpop.permute.xlu1 %3656  ;;  %v11448_v54 = vld [vmem:[#allocation2 + $0x28] sm:$0x3]  ;;  %v6100_v23 = vpack.i.bf16 %v4095_v61, %v11437_v38  ;;  %v3590_v22 = vadd.f32 %v3558_v43, %v13616_v57  ;;  %v13619_v43 = vld [vmem:[#allocation323_spill] sm:$0xff]  ;;  %v4128_v36 = vrot.slane %v11435_v56, 2 }
 0x692   : > { %v3723_v3 = vadd.f32 %v3657_v41, %v3595_v4  ;;  %6081 = vrot.lane.b32.xlu0 %v6080_v33, %s6609_s9  ;;  %6076 = vrot.lane.b32.xlu1 %v6075_v37, %s6611_s26  ;;  %v3639_v47 = vpop.permute.xlu0 %3638  ;;  %v13617_v4 = vld [vmem:[#allocation366_spill] sm:$0xff]  ;;  %v11461_v37 = vsel %vm428_vm0, %v3952_v42, %v3953_v15  ;;  %v11464_v31 = vsel %vm428_vm0, %v3927_v52, %v3928_v45  ;;  %v4101_v8 = vrot.slane %v11448_v54, 2 }
 0x693   : > { %v3714_v19 = vadd.f32 %v3639_v47, %v3586_v49  ;;  %v3560_v33 = vmul.f32 %v11133_v28, %v13617_v4  ;;  %v11469_v49 = vld [vmem:[#allocation2 + $0xb8] sm:$0x3]  ;;  %v13618_v47 = vld [vmem:[#allocation273_spill] sm:$0xff]  ;;  %v6110_v57 = vpack.i.bf16 %v11381_v63, %v11464_v31 }
 0x694   : > { %3812 = vst.msk [vmem:[#allocation2 + $0x171] sm:$0xff] %vm3726_vm12, %v3723_v3  ;;  %v3562_v28 = vmul.f32 %v11147_v60, %v13618_v47 }
 0x695   : > { %3803 = vst.msk [vmem:[#allocation2 + $0x109] sm:$0xff] %vm3726_vm12, %v3714_v19  ;;  %v3661_v59 = vpop.permute.xlu1 %3660  ;;  %v6105_v19 = vpack.i.bf16 %v11328_v12, %v11461_v37  ;;  %v3823_v12 = vld [vmem:[#allocation2 + $0x40] sm:$0x3] }
 0x696   : > { %v3725_v40 = vadd.f32 %v3661_v59, %v3597_v53  ;;  %6086 = vrot.lane.b32.xlu1 %v6085_v62, %s6613_s15  ;;  %6091 = vrot.lane.b32.xlu0 %v6090_v21, %s6613_s15  ;;  %v3643_v10 = vpop.permute.xlu0 %3642  ;;  %v4096_v53 = vrot.slane %v13619_v43, 2  ;;  %v3592_v62 = vadd.f32 %v3560_v33, %v13617_v4  ;;  %v11483_v21 = vsel %vm605_vm1, %v4099_v25, %v4101_v8  ;;  %v3839_v43 = vld [vmem:[#allocation2 + $0xc0] sm:$0xff] }
 0x697   : > { %v3716_v7 = vadd.f32 %v3643_v10, %v3588_v13  ;;  %v3955_v59 = vrot.slane %v11469_v49, 1  ;;  %v6115_v61 = vpack.i.bf16 %v11483_v21, %v11305_v27  ;;  %v3594_v10 = vadd.f32 %v3562_v28, %v13618_v47  ;;  %v11520_v47 = vld [vmem:[#allocation2 + $0xc8] sm:$0xff] }
 0x698   : > { %3814 = vst.msk [vmem:[#allocation2 + $0x189] sm:$0xff] %vm3726_vm12, %v3725_v40  ;;  %v6120_v40 = vpack.i.bf16 %v11359_v11, %v11420_v30  ;;  %v4097_v25 = vsel %vm605_vm1, %v4094_v29, %v4096_v53  ;;  %v3923_v28 = vrot.slane %v11367_v46, 1  ;;  %v3922_v53 = vrot.slane %v11381_v63, 1 }
 0x699   : > { %3805 = vst.msk [vmem:[#allocation2 + $0x121] sm:$0xff] %vm3726_vm12, %v3716_v7  ;;  %v13620_v7 = vld [vmem:[#allocation367_spill] sm:$0xff]  ;;  %v11500_v52 = vsel %vm428_vm0, %v3953_v15, %v3955_v59  ;;  %v6125_v29 = vpack.i.bf16 %v4097_v25, %v11422_v5  ;;  %v3958_v59 = vrot.slane %v11520_v47, 1 }
 0x69a   : > { %6096 = vrot.lane.b32.xlu1 %v6095_v17, %s6611_s26  ;;  %6101 = vrot.lane.b32.xlu0 %v6100_v23, %s6611_s26  ;;  %v3647_v41 = vpop.permute.xlu0 %3646  ;;  %v3564_v42 = vmul.f32 %v11163_v34, %v13620_v7  ;;  %v3930_v17 = vrot.slane %v3823_v12, 1  ;;  %v4129_v23 = vrot.slane %v11420_v30, 2  ;;  %v6130_v34 = vpack.i.bf16 %v11314_v32, %v11500_v52 }
 0x69b   : > { %v3718_v3 = vadd.f32 %v3647_v41, %v3590_v22  ;;  %v4104_v41 = vrot.slane %v11422_v5, 2 }
 0x69c   : > { %v3596_v15 = vadd.f32 %v3564_v42, %v13620_v7  ;;  %v11512_v33 = vsel %vm428_vm0, %v3928_v45, %v3930_v17  ;;  %v11515_v8 = vsel %vm605_vm1, %v4128_v36, %v4129_v23  ;;  %v4106_v42 = vrot.slane %v3823_v12, 2  ;;  %v3841_v17 = vld [vmem:[#allocation2 + $0xd0] sm:$0x3] }
 0x69d   : > { %3807 = vst.msk [vmem:[#allocation2 + $0x139] sm:$0xff] %vm3726_vm12, %v3718_v3  ;;  %13621 = vst [vmem:[#allocation368_spill] sm:$0xff] %v11515_v8  ;;  %v6135_v45 = vpack.i.bf16 %v11367_v46, %v11512_v33  ;;  %v3957_v46 = vrot.slane %v3839_v43, 1  ;;  %v4134_v36 = vrot.slane %v11520_v47, 2 }
 0x69e   : > { %6106 = vrot.lane.b32.xlu1 %v6105_v19, %s6609_s9  ;;  %6111 = vrot.lane.b32.xlu0 %v6110_v57, %s6609_s9  ;;  %v3651_v60 = vpop.permute.xlu0 %3650  ;;  %v4103_v19 = vrot.slane %v11437_v38, 2  ;;  %v6140_v57 = vpack.i.bf16 %v11362_v50, %v11515_v8 }
 0x69f   : > { %v3720_v13 = vadd.f32 %v3651_v60, %v3592_v62  ;;  %v11537_v60 = vsel %vm428_vm0, %v3922_v53, %v3923_v28  ;;  %v11543_v63 = vsel %vm428_vm0, %v3957_v46, %v3958_v59 }
 0x6a0   : > { %v11531_v62 = vsel %vm605_vm1, %v4103_v19, %v4104_v41  ;;  %v6160_v25 = vpack.i.bf16 %v11435_v56, %v11543_v63  ;;  %v3960_v56 = vrot.slane %v3841_v17, 1 }
 0x6a1   : > { %3809 = vst.msk [vmem:[#allocation2 + $0x151] sm:$0xff] %vm3726_vm12, %v3720_v13  ;;  %v6145_v13 = vpack.i.bf16 %v11537_v60, %v11531_v62 }
 0x6a2   : > { %6116 = vrot.lane.b32.xlu1 %v6115_v61, %s6613_s15  ;;  %6121 = vrot.lane.b32.xlu0 %v6120_v40, %s6611_s26  ;;  %v3655_v22 = vpop.permute.xlu0 %3654  ;;  %v6150_v61 = vpack.i.bf16 %v11411_v6, %v3839_v43  ;;  %v4131_v40 = vrot.slane %v11469_v49, 2  ;;  %v3925_v49 = vrot.slane %v11448_v54, 1 }
 0x6a3   : > { %v3722_v4 = vadd.f32 %v3655_v22, %v3594_v10  ;;  %v6155_v10 = vpack.i.bf16 %v11416_v2, %v11223_v39  ;;  %v6165_v22 = vpack.i.bf16 %v11437_v38, %v11261_v55  ;;  %v6180_v38 = vpack.i.bf16 %v11425_v20, %v11520_v47 }
 0x6a4   : > { %v11553_v7 = vsel %vm605_vm1, %v4129_v23, %v4131_v40  ;;  %v11568_v12 = vsel %vm428_vm0, %v3923_v28, %v3925_v49  ;;  %v11575_v23 = vsel %vm428_vm0, %v3958_v59, %v3960_v56  ;;  %v6195_v28 = vpack.i.bf16 %v11422_v5, %v11280_v48 }
 0x6a5   : > { %3811 = vst.msk [vmem:[#allocation2 + $0x169] sm:$0xff] %vm3726_vm12, %v3722_v4  ;;  %13622 = vst [vmem:[#allocation337_spill] sm:$0xff] %v11553_v7  ;;  %v6170_v2 = vpack.i.bf16 %v11387_v51, %v11553_v7  ;;  %v11563_v4 = vsel %vm605_vm1, %v4104_v41, %v4106_v42  ;;  %v4136_v59 = vrot.slane %v3841_v17, 2  ;;  %v6215_v5 = vpack.i.bf16 %v11531_v62, %v11215_v26 }
 0x6a6   : > { %6126 = vrot.lane.b32.xlu1 %v6125_v29, %s6611_s26  ;;  %6131 = vrot.lane.b32.xlu0 %v6130_v34, %s6609_s9  ;;  %v3659_v3 = vpop.permute.xlu0 %3658  ;;  %v6175_v54 = vpack.i.bf16 %v11568_v12, %v11563_v4  ;;  %v4133_v29 = vrot.slane %v3839_v43, 2  ;;  %v6185_v34 = vpack.i.bf16 %v11483_v21, %v11244_v18  ;;  %v6235_v49 = vpack.i.bf16 %v11512_v33, %v11308_v9 }
 0x6a7   : > { %v3724_v32 = vadd.f32 %v3659_v3, %v3596_v15  ;;  %v6190_v15 = vpack.i.bf16 %v11420_v30, %v11575_v23  ;;  %v3842_v3 = vld [vmem:[#allocation2 + $0xd8] sm:$0xff]  ;;  %v6205_v30 = vpack.i.bf16 %v11464_v31, %v11258_v24 }
 0x6a8   : > { %v11585_v41 = vsel %vm605_vm1, %v4133_v29, %v4134_v36  ;;  %v3962_v21 = vrot.slane %v3842_v3, 1  ;;  %v4138_v56 = vrot.slane %v3842_v3, 2  ;;  %v6245_v29 = vpack.i.bf16 %v11563_v4, %v11217_v0 }
 0x6a9   : > { %3813 = vst.msk [vmem:[#allocation2 + $0x181] sm:$0xff] %vm3726_vm12, %v3724_v32  ;;  %13623 = vst [vmem:[#allocation327_spill] sm:$0xff] %v11585_v41  ;;  %v11589_v32 = vld [vmem:[#allocation2 + $0xe0] sm:$0xff]  ;;  %v6200_v19 = vpack.i.bf16 %v11461_v37, %v11585_v41 }
 0x6aa   : > { %6136 = vrot.lane.b32.xlu1 %v6135_v45, %s6609_s9  ;;  %6141 = vrot.lane.b32.xlu0 %v6140_v57, %s6613_s15  ;;  %v3963_v45 = vrot.slane %v11589_v32, 1  ;;  %v6210_v57 = vpack.i.bf16 %v11515_v8, %v3842_v3 }
 0x6ac   : > { %v11602_v53 = vsel %vm428_vm0, %v3962_v21, %v3963_v45  ;;  %v6255_v21 = vpack.i.bf16 %v11244_v18, %v11370_v14 }
 0x6ad   : > { %v6220_v46 = vpack.i.bf16 %v3839_v43, %v11602_v53  ;;  %v4938_v43 = vld [vmem:[%s12467_s4 + $0x108] sm:$0xff] }
 0x6ae   : > { %6146 = vrot.lane.b32.xlu1 %v6145_v13, %s6613_s15  ;;  %6151 = vrot.lane.b32.xlu0 %v6150_v61, %s6611_s26  ;;  %v11610_v13 = vsel %vm605_vm1, %v4134_v36, %v4136_v59  ;;  %v6225_v61 = vpack.i.bf16 %v11223_v39, %v11344_v1  ;;  %v11639_v36 = vld [vmem:[#allocation2 + $0xf8] sm:$0xff] }
 0x6af   : > { %13624 = vst [vmem:[#allocation339_spill] sm:$0xff] %v11610_v13  ;;  %v6230_v40 = vpack.i.bf16 %v11500_v52, %v11610_v13 }
 0x6b2   : > { %6156 = vrot.lane.b32.xlu1 %v6155_v10, %s6611_s26  ;;  %6161 = vrot.lane.b32.xlu0 %v6160_v25, %s6609_s9  ;;  %v3844_v10 = vld [vmem:[#allocation2 + $0xe8] sm:$0x3]  ;;  %v4937_v25 = vld [vmem:[%s12467_s4 + $0x100] sm:$0xff] }
 0x6b3   : > { %v11626_v42 = vpack.c.bf16 %v4938_v43, %v4937_v25  ;;  %v3965_v17 = vrot.slane %v3844_v10, 1  ;;  %v11668_v25 = vld [vmem:[#allocation2 + $0x108] sm:$0xff]  ;;  %v11670_v43 = vld [vmem:[#allocation2 + $0x110] sm:$0xff] }
 0x6b5   : > { %5958 = vmatprep.subr.bf16.mxu0 %v11626_v42 }
 0x6b6   : > { %6166 = vrot.lane.b32.xlu1 %v6165_v22, %s6609_s9  ;;  %6171 = vrot.lane.b32.xlu0 %v6170_v2, %s6613_s15  ;;  %v6240_v22 = vpack.i.bf16 %v11553_v7, %v11589_v32  ;;  %v11634_v2 = vsel %vm428_vm0, %v3963_v45, %v3965_v17 }
 0x6ba   : > { %6176 = vrot.lane.b32.xlu1 %v6175_v54, %s6613_s15  ;;  %6181 = vrot.lane.b32.xlu0 %v6180_v38, %s6611_s26  ;;  %v4139_v54 = vrot.slane %v11589_v32, 2  ;;  %v3845_v38 = vld [vmem:[#allocation2 + $0xf0] sm:$0xff] }
 0x6be   : > { %6186 = vrot.lane.b32.xlu1 %v6185_v34, %s6611_s26  ;;  %6191 = vrot.lane.b32.xlu0 %v6190_v15, %s6609_s9  ;;  %v6250_v34 = vpack.i.bf16 %v11520_v47, %v11634_v2  ;;  %v11646_v15 = vsel %vm605_vm1, %v4138_v56, %v4139_v54  ;;  %v4141_v47 = vrot.slane %v3844_v10, 2  ;;  %v3972_v56 = vrot.slane %v11668_v25, 1 }
 0x6bf   : > { %13625 = vst [vmem:[#allocation371_spill] sm:$0xff] %v11646_v15  ;;  %v6260_v45 = vpack.i.bf16 %v11543_v63, %v11646_v15 }
 0x6c2   : > { %6196 = vrot.lane.b32.xlu1 %v6195_v28, %s6609_s9  ;;  %6201 = vrot.lane.b32.xlu0 %v6200_v19, %s6613_s15  ;;  %v3967_v28 = vrot.slane %v3845_v38, 1  ;;  %v3968_v19 = vrot.slane %v11639_v36, 1 }
 0x6c6   : > { %6206 = vrot.lane.b32.xlu1 %v6205_v30, %s6613_s15  ;;  %6211 = vrot.lane.b32.xlu0 %v6210_v57, %s6611_s26  ;;  %v11656_v30 = vsel %vm428_vm0, %v3967_v28, %v3968_v19  ;;  %v6265_v57 = vpack.i.bf16 %v11585_v41, %v3845_v38 }
 0x6c7   : > { %13626 = vst [vmem:[#allocation275_spill] sm:$0xff] %v11656_v30  ;;  %v6270_v59 = vpack.i.bf16 %v3842_v3, %v11656_v30  ;;  %v6280_v3 = vpack.i.bf16 %v11610_v13, %v11639_v36 }
 0x6ca   : > { %6216 = vrot.lane.b32.xlu1 %v6215_v5, %s6611_s26  ;;  %6221 = vrot.lane.b32.xlu0 %v6220_v46, %s6609_s9  ;;  %v3847_v5 = vld [vmem:[#allocation2 + $0x100] sm:$0x3]  ;;  %v11663_v46 = vsel %vm605_vm1, %v4139_v54, %v4141_v47  ;;  %v3973_v54 = vrot.slane %v11670_v43, 1  ;;  %v3850_v47 = vld [vmem:[#allocation2 + $0x118] sm:$0x3] }
 0x6cb   : > { %13627 = vst [vmem:[#allocation373_spill] sm:$0xff] %v11663_v46  ;;  %v3970_v10 = vrot.slane %v3847_v5, 1  ;;  %v6275_v17 = vpack.i.bf16 %v11575_v23, %v11663_v46 }
 0x6cc   : > { %v11691_v28 = vsel %vm428_vm0, %v3972_v56, %v3973_v54 }
 0x6ce   : > { %6226 = vrot.lane.b32.xlu1 %v6225_v61, %s6609_s9  ;;  %6231 = vrot.lane.b32.xlu0 %v6230_v40, %s6613_s15  ;;  %v4143_v61 = vrot.slane %v3845_v38, 2  ;;  %v4144_v40 = vrot.slane %v11639_v36, 2 }
 0x6d2   : > { %6236 = vrot.lane.b32.xlu1 %v6235_v49, %s6613_s15  ;;  %6241 = vrot.lane.b32.xlu0 %v6240_v22, %s6611_s26  ;;  %v11677_v49 = vsel %vm428_vm0, %v3968_v19, %v3970_v10  ;;  %v11680_v22 = vsel %vm605_vm1, %v4143_v61, %v4144_v40  ;;  %v4146_v19 = vrot.slane %v3847_v5, 2  ;;  %v11705_v61 = vpop.permute.xlu0 %6021  ;;  %v11707_v5 = vld [vmem:[#allocation2 + $0x120] sm:$0xff]  ;;  %v11709_v10 = vld [vmem:[#allocation2 + $0x128] sm:$0xff] }
 0x6d3   : > { %13628 = vst [vmem:[#allocation325_spill] sm:$0xff] %v11680_v22 }
 0x6d6   : > { %6246 = vrot.lane.b32.xlu1 %v6245_v29, %s6611_s26  ;;  %6251 = vrot.lane.b32.xlu0 %v6250_v34, %s6609_s9  ;;  %v6285_v29 = vpack.i.bf16 %v11589_v32, %v11677_v49  ;;  %v6290_v34 = vpack.i.bf16 %v11602_v53, %v11680_v22  ;;  %v4148_v32 = vrot.slane %v11668_v25, 2 }
 0x6da   : > { %6256 = vrot.lane.b32.xlu1 %v6255_v21, %s6609_s9  ;;  %6261 = vrot.lane.b32.xlu0 %v6260_v45, %s6613_s15  ;;  %v6295_v21 = vpack.i.bf16 %v11646_v15, %v11668_v25  ;;  %v6300_v45 = vpack.i.bf16 %v3845_v38, %v11691_v28 }
 0x6de   : > { %6266 = vrot.lane.b32.xlu1 %v6265_v57, %s6611_s26  ;;  %6271 = vrot.lane.b32.xlu0 %v6270_v59, %s6609_s9  ;;  %v11699_v57 = vsel %vm605_vm1, %v4144_v40, %v4146_v19  ;;  %v4149_v59 = vrot.slane %v11670_v43, 2  ;;  %v6310_v40 = vpack.i.bf16 %v11663_v46, %v11670_v43 }
 0x6df   : > { %v6305_v38 = vpack.i.bf16 %v11634_v2, %v11699_v57 }
 0x6e0   : > { %v11719_v56 = vsel %vm605_vm1, %v4148_v32, %v4149_v59 }
 0x6e1   : > { %13629 = vst [vmem:[#allocation341_spill] sm:$0xff] %v11719_v56 }
 0x6e2   : > { %6276 = vrot.lane.b32.xlu1 %v6275_v17, %s6613_s15  ;;  %6281 = vrot.lane.b32.xlu0 %v6280_v3, %s6611_s26  ;;  %v3975_v17 = vrot.slane %v3850_v47, 1 }
 0x6e4   : > { %v11716_v3 = vsel %vm428_vm0, %v3973_v54, %v3975_v17  ;;  %v6320_v54 = vpack.i.bf16 %v11656_v30, %v11719_v56 }
 0x6e6   : > { %6286 = vrot.lane.b32.xlu1 %v6285_v29, %s6609_s9  ;;  %6291 = vrot.lane.b32.xlu0 %v6290_v34, %s6613_s15  ;;  %v3977_v29 = vrot.slane %v11707_v5, 1  ;;  %v3978_v34 = vrot.slane %v11709_v10, 1 }
 0x6e8   : > { %v11730_v32 = vsel %vm428_vm0, %v3977_v29, %v3978_v34  ;;  %v4151_v29 = vrot.slane %v3850_v47, 2 }
 0x6e9   : > { %13630 = vst [vmem:[#allocation375_spill] sm:$0xff] %v11730_v32 }
 0x6ea   : > { %6296 = vrot.lane.b32.xlu1 %v6295_v21, %s6611_s26  ;;  %6301 = vrot.lane.b32.xlu0 %v6300_v45, %s6609_s9  ;;  %v6315_v45 = vpack.i.bf16 %v11639_v36, %v11716_v3 }
 0x6ee   : > { %6306 = vrot.lane.b32.xlu1 %v6305_v38, %s6613_s15  ;;  %6311 = vrot.lane.b32.xlu0 %v6310_v40, %s6611_s26  ;;  %v6325_v38 = vpack.i.bf16 %v11680_v22, %v11707_v5  ;;  %v11736_v40 = vld [vmem:[#allocation2 + $0x130] sm:$0x3]  ;;  %v11746_v22 = vld [vmem:[#allocation2 + $0x138] sm:$0xff] }
 0x6f0   : > { %v6027_v19 = vpop.permute.xlu1 %6026  ;;  %v6032_v21 = vpop.permute.xlu0 %6031 }
 0x6f1   : > { %v6029_v17 = vunpack.i.h.bf16 %v6027_v19  ;;  %v6028_v46 = vunpack.i.l.bf16 %v6027_v19  ;;  %v6034_v15 = vunpack.i.h.bf16 %v6032_v21  ;;  %v6033_v13 = vunpack.i.l.bf16 %v6032_v21 }
 0x6f2   : > { %6316 = vrot.lane.b32.xlu1 %v6315_v45, %s6609_s9  ;;  %6321 = vrot.lane.b32.xlu0 %v6320_v54, %s6613_s15  ;;  %v6330_v21 = vpack.i.bf16 %v11668_v25, %v11730_v32  ;;  %v4153_v45 = vrot.slane %v11707_v5, 2  ;;  %v4154_v54 = vrot.slane %v11709_v10, 2 }
 0x6f3   : > { %v4815_v36 = vsel %vm3726_vm12, %v11344_v1, %v6028_v46  ;;  %v4717_v19 = vsel %vm3726_vm12, %v11223_v39, %v6029_v17  ;;  %v11749_v1 = vsel %vm605_vm1, %v4149_v59, %v4151_v29  ;;  %v3980_v39 = vrot.slane %v11736_v40, 1  ;;  %v11752_v46 = vld [vmem:[#allocation2 + $0x140] sm:$0xff] }
 0x6f4   : > { %v6037_v41 = vpop.permute.xlu1 %6036  ;;  %v6042_v7 = vpop.permute.xlu0 %6041  ;;  %13631 = vst [vmem:[#allocation387_spill] sm:$0xff] %v11749_v1  ;;  %v4847_v25 = vsel %vm4743_vm14, %v4815_v36, %v6033_v13  ;;  %v4750_v6 = vsel %vm4743_vm14, %v4717_v19, %v6034_v15  ;;  %v6340_v59 = vpack.i.bf16 %v11699_v57, %v11709_v10  ;;  %v3982_v29 = vrot.slane %v11746_v22, 1 }
 0x6f5   : > { %v6039_v8 = vunpack.i.h.bf16 %v6037_v41  ;;  %v6038_v20 = vunpack.i.l.bf16 %v6037_v41  ;;  %v6044_v47 = vunpack.i.h.bf16 %v6042_v7  ;;  %v6043_v17 = vunpack.i.l.bf16 %v6042_v7 }
 0x6f6   : > { %6326 = vrot.lane.b32.xlu1 %v6325_v38, %s6611_s26  ;;  %6331 = vrot.lane.b32.xlu0 %v6330_v21, %s6609_s9  ;;  %v6335_v7 = vpack.i.bf16 %v11677_v49, %v11749_v1  ;;  %v11766_v38 = vsel %vm428_vm0, %v3978_v34, %v3980_v39  ;;  %v11769_v13 = vsel %vm605_vm1, %v4153_v45, %v4154_v54 }
 0x6f7   : > { %v4879_v11 = vsel %vm4776_vm15, %v4847_v25, %v6038_v20  ;;  %v4783_v41 = vsel %vm4776_vm15, %v4750_v6, %v6039_v8  ;;  %13632 = vst [vmem:[#allocation340_spill] sm:$0xff] %v11766_v38  ;;  %13633 = vst [vmem:[#allocation281_spill] sm:$0xff] %v11769_v13  ;;  %v3983_v20 = vrot.slane %v11752_v46, 1  ;;  %v4718_v34 = vsel %vm3726_vm12, %v11244_v18, %v6044_v47 }
 0x6f8   : > { %v6047_v30 = vpop.permute.xlu1 %6046  ;;  %v6052_v35 = vpop.permute.xlu0 %6051  ;;  %5106 = vmatprep.mubr.f32.mxu1 %v4879_v11  ;;  %v4816_v11 = vsel %vm3726_vm12, %v11370_v14, %v6043_v17  ;;  %v6350_v25 = vpack.i.bf16 %v11691_v28, %v11769_v13 }
 0x6f9   : > { %v6049_v6 = vunpack.i.h.bf16 %v6047_v30  ;;  %v6048_v8 = vunpack.i.l.bf16 %v6047_v30  ;;  %v6054_v15 = vunpack.i.h.bf16 %v6052_v35  ;;  %v6053_v36 = vunpack.i.l.bf16 %v6052_v35  ;;  %5107 = vmatmul.mubr.f32.vlgmr.msra.gmra.mrb[0].mxu1 %v4783_v41 }
 0x6fa   : > { %6336 = vrot.lane.b32.xlu1 %v6335_v7, %s6613_s15  ;;  %6341 = vrot.lane.b32.xlu0 %v6340_v59, %s6611_s26  ;;  %v6345_v35 = vpack.i.bf16 %v11670_v43, %v11766_v38  ;;  %v11787_v18 = vsel %vm428_vm0, %v3982_v29, %v3983_v20  ;;  %v4156_v7 = vrot.slane %v11736_v40, 2  ;;  %v11792_v43 = vld [vmem:[#allocation2 + $0x148] sm:$0x3]  ;;  %v4158_v40 = vrot.slane %v11746_v22, 2 }
 0x6fb   : > { %v4848_v19 = vsel %vm4743_vm14, %v4816_v11, %v6048_v8  ;;  %v4751_v21 = vsel %vm4743_vm14, %v4718_v34, %v6049_v6  ;;  %v6355_v6 = vpack.i.bf16 %v11719_v56, %v11746_v22  ;;  %v6360_v11 = vpack.i.bf16 %v11707_v5, %v11787_v18 }
 0x6fc   : > { %v6057_v45 = vpop.permute.xlu1 %6056  ;;  %v6062_v39 = vpop.permute.xlu0 %6061  ;;  %v4880_v30 = vsel %vm4776_vm15, %v4848_v19, %v6053_v36  ;;  %v4784_v41 = vsel %vm4776_vm15, %v4751_v21, %v6054_v15  ;;  %v11803_v34 = vsel %vm605_vm1, %v4154_v54, %v4156_v7  ;;  %v4159_v19 = vrot.slane %v11752_v46, 2 }
 0x6fd   : > { %v6059_v14 = vunpack.i.h.bf16 %v6057_v45  ;;  %v6058_v17 = vunpack.i.l.bf16 %v6057_v45  ;;  %5111 = vmatprep.mubr.f32.mxu1 %v4880_v30  ;;  %v6064_v47 = vunpack.i.h.bf16 %v6062_v39  ;;  %v6063_v59 = vunpack.i.l.bf16 %v6062_v39  ;;  %13634 = vst [vmem:[#allocation374_spill] sm:$0xff] %v11803_v34  ;;  %v11810_v30 = vld [vmem:[#allocation2 + $0x158] sm:$0xff] }
 0x6fe   : > { %6346 = vrot.lane.b32.xlu1 %v6345_v35, %s6609_s9  ;;  %6351 = vrot.lane.b32.xlu0 %v6350_v25, %s6613_s15  ;;  %v3985_v39 = vrot.slane %v11792_v43, 1 }
 0x6ff   : > { %5112 = vmatmul.mubr.f32.gmra.mrb[2].mxu1 %v4784_v41  ;;  %v4817_v8 = vsel %vm3726_vm12, %v11292_v58, %v6058_v17  ;;  %v4719_v29 = vsel %vm3726_vm12, %v11215_v26, %v6059_v14  ;;  %v11808_v58 = vld [vmem:[#allocation2 + $0x150] sm:$0xff]  ;;  %v6365_v14 = vpack.i.bf16 %v11716_v3, %v11803_v34  ;;  %v6370_v17 = vpack.i.bf16 %v11749_v1, %v11752_v46  ;;  %v6565_v1 = vld [vmem:[#allocation2 + $0x78] sm:$0xff] }
 0x700   : > { %v6067_v15 = vpop.permute.xlu1 %6066  ;;  %v6072_v36 = vpop.permute.xlu0 %6071  ;;  %v4849_v5 = vsel %vm4743_vm14, %v4817_v8, %v6063_v59  ;;  %v4752_v54 = vsel %vm4743_vm14, %v4719_v29, %v6064_v47  ;;  %v11826_v59 = vsel %vm605_vm1, %v4158_v40, %v4159_v19  ;;  %v3987_v47 = vrot.slane %v11808_v58, 1 }
 0x701   : > { %v6069_v21 = vunpack.i.h.bf16 %v6067_v15  ;;  %v6068_v45 = vunpack.i.l.bf16 %v6067_v15  ;;  %v6074_v26 = vunpack.i.h.bf16 %v6072_v36  ;;  %v6073_v35 = vunpack.i.l.bf16 %v6072_v36 }
 0x702   : > { %6356 = vrot.lane.b32.xlu1 %v6355_v6, %s6611_s26  ;;  %6361 = vrot.lane.b32.xlu0 %v6360_v11, %s6609_s9  ;;  %v11823_v6 = vsel %vm428_vm0, %v3983_v20, %v3985_v39  ;;  %v3988_v8 = vrot.slane %v11810_v30, 1 }
 0x703   : > { %v4881_v25 = vsel %vm4776_vm15, %v4849_v5, %v6068_v45  ;;  %v4785_v41 = vsel %vm4776_vm15, %v4752_v54, %v6069_v21  ;;  %v4818_v20 = vsel %vm3726_vm12, %v11305_v27, %v6073_v35  ;;  %v4720_v40 = vsel %vm3726_vm12, %v11217_v0, %v6074_v26  ;;  %v11853_v26 = vld [vmem:[#allocation2 + $0x160] sm:$0x3] }
 0x704   : > { %v6077_v7 = vpop.permute.xlu1 %6076  ;;  %v6082_v15 = vpop.permute.xlu0 %6081  ;;  %5116 = vmatprep.mubr.f32.mxu1 %v4881_v25  ;;  %v6375_v39 = vpack.i.bf16 %v11709_v10, %v11823_v6  ;;  %v11847_v35 = vsel %vm428_vm0, %v3987_v47, %v3988_v8  ;;  %v6023_v0 = vunpack.i.l.bf16 %v11705_v61  ;;  %v4161_v10 = vrot.slane %v11792_v43, 2 }
 0x705   : > { %v6079_v29 = vunpack.i.h.bf16 %v6077_v7  ;;  %v6078_v36 = vunpack.i.l.bf16 %v6077_v7  ;;  %v6084_v11 = vunpack.i.h.bf16 %v6082_v15  ;;  %v6083_v21 = vunpack.i.l.bf16 %v6082_v15  ;;  %5117 = vmatmul.mubr.f32.gmra.mrb[4].mxu1 %v4785_v41 }
 0x706   : > { %6366 = vrot.lane.b32.xlu1 %v6365_v14, %s6613_s15  ;;  %6371 = vrot.lane.b32.xlu0 %v6370_v17, %s6611_s26  ;;  %v6380_v14 = vpack.i.bf16 %v11730_v32, %v11826_v59  ;;  %v6385_v17 = vpack.i.bf16 %v11769_v13, %v11808_v58  ;;  %v6390_v7 = vpack.i.bf16 %v11746_v22, %v11847_v35  ;;  %v4163_v15 = vrot.slane %v11808_v58, 2 }
 0x707   : > { %v4850_v45 = vsel %vm4743_vm14, %v4818_v20, %v6078_v36  ;;  %v4753_v5 = vsel %vm4743_vm14, %v4720_v40, %v6079_v29  ;;  %v11861_v29 = vld [vmem:[#allocation2 + $0x168] sm:$0xff]  ;;  %v11865_v40 = vsel %vm605_vm1, %v4159_v19, %v4161_v10 }
 0x708   : > { %v6087_v54 = vpop.permute.xlu1 %6086  ;;  %v11840_v25 = vpop.permute.xlu0 %6091  ;;  %v4882_v41 = vsel %vm4776_vm15, %v4850_v45, %v6083_v21  ;;  %v4786_v27 = vsel %vm4776_vm15, %v4753_v5, %v6084_v11  ;;  %v11867_v45 = vld [vmem:[#allocation2 + $0x170] sm:$0xff]  ;;  %v3992_v19 = vrot.slane %v11861_v29, 1  ;;  %v6395_v10 = vpack.i.bf16 %v11766_v38, %v11865_v40 }
 0x709   : > { %5121 = vmatprep.mubr.f32.mxu1 %v4882_v41  ;;  %v6089_v36 = vunpack.i.h.bf16 %v6087_v54  ;;  %v6088_v11 = vunpack.i.l.bf16 %v6087_v54  ;;  %v6093_v21 = vunpack.i.l.bf16 %v11840_v25  ;;  %v6400_v41 = vpack.i.bf16 %v11803_v34, %v11810_v30 }
 0x70a   : > { %6376 = vrot.lane.b32.xlu1 %v6375_v39, %s6609_s9  ;;  %6381 = vrot.lane.b32.xlu0 %v6380_v14, %s6613_s15  ;;  %v6564_v39 = vld [vmem:[#allocation2] sm:$0xff]  ;;  %v3990_v14 = vrot.slane %v11853_v26, 1 }
 0x70b   : > { %5122 = vmatmul.mubr.f32.gmra.mrb[6].mxu1 %v4786_v27  ;;  %v4711_v22 = vsel %vm3726_vm12, %v6564_v39, %v6023_v0  ;;  %v13635_v39 = vrot.slane %v11810_v30, 2  ;;  %v4819_v38 = vsel %vm3726_vm12, %v11362_v50, %v6088_v11 }
 0x70c   : > { %v6097_v43 = vpop.permute.xlu1 %6096  ;;  %v6102_v20 = vpop.permute.xlu0 %6101  ;;  %v11879_v0 = vsel %vm428_vm0, %v3988_v8, %v3990_v14  ;;  %v4721_v8 = vsel %vm3726_vm12, %v6565_v1, %v6089_v36 }
 0x70d   : > { %v6104_v5 = vunpack.i.h.bf16 %v6102_v20  ;;  %v6099_v27 = vunpack.i.h.bf16 %v6097_v43  ;;  %v6098_v54 = vunpack.i.l.bf16 %v6097_v43  ;;  %v6103_v47 = vunpack.i.l.bf16 %v6102_v20 }
 0x70e   : > { %6386 = vrot.lane.b32.xlu1 %v6385_v17, %s6611_s26  ;;  %6391 = vrot.lane.b32.xlu0 %v6390_v7, %s6609_s9  ;;  %v11884_v34 = vsel %vm605_vm1, %v4163_v15, %v13635_v39  ;;  %v3993_v43 = vrot.slane %v11867_v45, 1  ;;  %v4809_v7 = vsel %vm3726_vm12, %v11537_v60, %v6093_v21  ;;  %v4939_v39 = vld [vmem:[%s12467_s4 + $0x110] sm:$0xff] }
 0x70f   : > { %v4744_v20 = vsel %vm4743_vm14, %v4711_v22, %v6104_v5  ;;  %v4940_v22 = vld [vmem:[%s12467_s4 + $0x118] sm:$0xff]  ;;  %v4841_v50 = vsel %vm4743_vm14, %v4809_v7, %v6103_v47  ;;  %v4851_v60 = vsel %vm4743_vm14, %v4819_v38, %v6098_v54  ;;  %v4754_v1 = vsel %vm4743_vm14, %v4721_v8, %v6099_v27  ;;  %v6566_v8 = vld [vmem:[#allocation2 + $0x80] sm:$0xff] }
 0x710   : > { %v6107_v17 = vpop.permute.xlu1 %6106  ;;  %v6112_v13 = vpop.permute.xlu0 %6111  ;;  %v6410_v38 = vpack.i.bf16 %v11787_v18, %v11884_v34  ;;  %v5961_v47 = vpack.c.bf16 %v4940_v22, %v4939_v39  ;;  %v6094_v27 = vunpack.i.h.bf16 %v11840_v25  ;;  %v6024_v25 = vunpack.i.h.bf16 %v11705_v61 }
 0x711   : > { %v6109_v14 = vunpack.i.h.bf16 %v6107_v17  ;;  %v6108_v32 = vunpack.i.l.bf16 %v6107_v17  ;;  %v6114_v56 = vunpack.i.h.bf16 %v6112_v13  ;;  %v6113_v15 = vunpack.i.l.bf16 %v6112_v13 }
 0x712   : > { %6396 = vrot.lane.b32.xlu1 %v6395_v10, %s6613_s15  ;;  %6401 = vrot.lane.b32.xlu0 %v6400_v41, %s6611_s26  ;;  %v6405_v41 = vpack.i.bf16 %v11752_v46, %v11879_v0  ;;  %v11919_v10 = vld [vmem:[#allocation2 + $0x178] sm:$0x3]  ;;  %v6415_v7 = vpack.i.bf16 %v11826_v59, %v11861_v29 }
 0x713   : > { %v4873_v13 = vsel %vm4776_vm15, %v4841_v50, %v6113_v15  ;;  %v4883_v36 = vsel %vm4776_vm15, %v4851_v60, %v6108_v32  ;;  %v4777_v11 = vsel %vm4776_vm15, %v4744_v20, %v6114_v56  ;;  %v4787_v21 = vsel %vm4776_vm15, %v4754_v1, %v6109_v14 }
 0x714   : > { %v6117_v5 = vpop.permute.xlu1 %6116  ;;  %v6122_v17 = vpop.permute.xlu0 %6121  ;;  %5076 = vmatprep.mubr.f32.mxu0 %v4873_v13  ;;  %5126 = vmatprep.mubr.f32.mxu1 %v4883_v36  ;;  %v11916_v56 = vsel %vm428_vm0, %v3992_v19, %v3993_v43  ;;  %v4166_v32 = vrot.slane %v11853_v26, 2  ;;  %v13636_v19 = vrot.slane %v11810_v30, 2  ;;  %v3995_v61 = vrot.slane %v11919_v10, 1 }
 0x715   : > { %v6118_v54 = vunpack.i.l.bf16 %v6117_v5  ;;  %5077 = vmatmul.mubr.f32.vlgmr.msra.gmra.mrb[32].mxu0 %v4777_v11  ;;  %5127 = vmatmul.mubr.f32.gmra.mrb[8].mxu1 %v4787_v21  ;;  %v6124_v20 = vunpack.i.h.bf16 %v6122_v17  ;;  %v6123_v46 = vunpack.i.l.bf16 %v6122_v17  ;;  %v6420_v22 = vpack.i.bf16 %v11808_v58, %v11916_v56  ;;  %v11940_v21 = vld [vmem:[#allocation2 + $0x180] sm:$0xff] }
 0x716   : > { %6406 = vrot.lane.b32.xlu1 %v6405_v41, %s6609_s9  ;;  %6411 = vrot.lane.b32.xlu0 %v6410_v38, %s6613_s15  ;;  %v11930_v26 = vsel %vm605_vm1, %v13636_v19, %v4166_v32  ;;  %v4168_v50 = vrot.slane %v11861_v29, 2  ;;  %v4169_v60 = vrot.slane %v11867_v45, 2  ;;  %v6119_v1 = vunpack.i.h.bf16 %v6117_v5 }
 0x717   : > { %v4722_v14 = vsel %vm3726_vm12, %v6566_v8, %v6118_v54  ;;  %5960 = vmatpush3.bf16.msra.mxu0 %v11626_v42  ;;  %v4820_v11 = vsel %vm3726_vm12, %v11387_v51, %v6094_v27  ;;  %v11942_v42 = vld [vmem:[#allocation2 + $0x188] sm:$0xff]  ;;  %v6430_v51 = vpack.i.bf16 %v11865_v40, %v11867_v45 }
 0x718   : > { %v6127_v15 = vpop.permute.xlu1 %6126  ;;  %v6132_v39 = vpop.permute.xlu0 %6131  ;;  %5962 = vmatprep.subr.bf16.mxu0 %v5961_v47  ;;  %v4852_v58 = vsel %vm4743_vm14, %v4820_v11, %v6123_v46  ;;  %v4755_v38 = vsel %vm4743_vm14, %v4722_v14, %v6124_v20  ;;  %v6567_v27 = vld [vmem:[#allocation2 + $0x8] sm:$0xff]  ;;  %v11958_v20 = vsel %vm428_vm0, %v3993_v43, %v3995_v61  ;;  %v4368_v46 = vrot.slane %v11940_v21, 1 }
 0x719   : > { %v6134_v13 = vunpack.i.h.bf16 %v6132_v39  ;;  %v6133_v36 = vunpack.i.l.bf16 %v6132_v39  ;;  %v6129_v17 = vunpack.i.h.bf16 %v6127_v15  ;;  %v6128_v41 = vunpack.i.l.bf16 %v6127_v15 }
 0x71a   : > { %6416 = vrot.lane.b32.xlu1 %v6415_v7, %s6611_s26  ;;  %6421 = vrot.lane.b32.xlu0 %v6420_v22, %s6609_s9  ;;  %v4712_v32 = vsel %vm3726_vm12, %v6567_v27, %v6024_v25  ;;  %v6425_v7 = vpack.i.bf16 %v11823_v6, %v11930_v26  ;;  %v4369_v14 = vrot.slane %v11942_v42, 1  ;;  %v11967_v25 = vsel %vm605_vm1, %v4168_v50, %v4169_v60 }
 0x71b   : > { %v4884_v5 = vsel %vm4776_vm15, %v4852_v58, %v6133_v36  ;;  %v4788_v54 = vsel %vm4776_vm15, %v4755_v38, %v6134_v13  ;;  %5964 = vmatpush3.bf16.msra.mxu0 %v5961_v47  ;;  %v4810_v47 = vsel %vm3726_vm12, %v11568_v12, %v6119_v1  ;;  %v4745_v22 = vsel %vm4743_vm14, %v4712_v32, %v6129_v17 }
 0x71c   : > { %v6137_v8 = vpop.permute.xlu1 %6136  ;;  %v6142_v19 = vpop.permute.xlu0 %6141  ;;  %5131 = vmatprep.mubr.f32.mxu1 %v4884_v5  ;;  %v4842_v43 = vsel %vm4743_vm14, %v4810_v47, %v6128_v41  ;;  %v6435_v12 = vpack.i.bf16 %v11810_v30, %v11958_v20  ;;  %v6440_v58 = vpack.i.bf16 %v11847_v35, %v11967_v25  ;;  %v11980_v38 = vsel %vm428_vm0, %v4368_v46, %v4369_v14  ;;  %v11982_v41 = vld [vmem:[#allocation2 + $0x190] sm:$0x3]  ;;  %v12004_v47 = vld [vmem:[#allocation2 + $0x1a0] sm:$0xff] }
 0x71d   : > { %v6139_v15 = vunpack.i.h.bf16 %v6137_v8  ;;  %v6138_v39 = vunpack.i.l.bf16 %v6137_v8  ;;  %5132 = vmatmul.mubr.f32.gmra.mrb[10].mxu1 %v4788_v54  ;;  %v6144_v1 = vunpack.i.h.bf16 %v6142_v19  ;;  %v6143_v36 = vunpack.i.l.bf16 %v6142_v19  ;;  %v6568_v46 = vld [vmem:[#allocation2 + $0x90] sm:$0xff] }
 0x71e   : > { %6426 = vrot.lane.b32.xlu1 %v6425_v7, %s6613_s15  ;;  %6431 = vrot.lane.b32.xlu0 %v6430_v51, %s6611_s26  ;;  %v4171_v30 = vrot.slane %v11919_v10, 2  ;;  %v6445_v54 = vpack.i.bf16 %v11884_v34, %v11940_v21  ;;  %v6450_v51 = vpack.i.bf16 %v11861_v29, %v11980_v38  ;;  %v4371_v27 = vrot.slane %v11982_v41, 1  ;;  %v12002_v29 = vld [vmem:[#allocation2 + $0x198] sm:$0xff] }
 0x71f   : > { %v4874_v61 = vsel %vm4776_vm15, %v4842_v43, %v6138_v39  ;;  %v4778_v13 = vsel %vm4776_vm15, %v4745_v22, %v6139_v15  ;;  %v4405_v32 = vrot.slane %v11940_v21, 2  ;;  %v4821_v7 = vsel %vm3726_vm12, %v11461_v37, %v6143_v36 }
 0x720   : > { %v6147_v11 = vpop.permute.xlu1 %6146  ;;  %v6152_v50 = vpop.permute.xlu0 %6151  ;;  %5081 = vmatprep.mubr.f32.mxu0 %v4874_v61  ;;  %v4723_v15 = vsel %vm3726_vm12, %v6568_v46, %v6144_v1  ;;  %v11999_v10 = vsel %vm605_vm1, %v4169_v60, %v4171_v30  ;;  %v4406_v39 = vrot.slane %v11942_v42, 2 }
 0x721   : > { %5082 = vmatmul.mubr.f32.gmra.mrb[34].mxu0 %v4778_v13  ;;  %v6154_v17 = vunpack.i.h.bf16 %v6152_v50  ;;  %v6153_v5 = vunpack.i.l.bf16 %v6152_v50  ;;  %v6149_v43 = vunpack.i.h.bf16 %v6147_v11  ;;  %v6148_v22 = vunpack.i.l.bf16 %v6147_v11 }
 0x722   : > { %6436 = vrot.lane.b32.xlu1 %v6435_v12, %s6609_s9  ;;  %6441 = vrot.lane.b32.xlu0 %v6440_v58, %s6613_s15  ;;  %v4605_v58 = vrot.slane %v12002_v29, 1  ;;  %v4606_v11 = vrot.slane %v12004_v47, 1 }
 0x723   : > { %v4853_v1 = vsel %vm4743_vm14, %v4821_v7, %v6153_v5  ;;  %v4756_v60 = vsel %vm4743_vm14, %v4723_v15, %v6154_v17  ;;  %v12019_v5 = vsel %vm428_vm0, %v4369_v14, %v4371_v27  ;;  %v12022_v17 = vsel %vm605_vm1, %v4405_v32, %v4406_v39  ;;  %v6569_v15 = vld [vmem:[#allocation2 + $0x18] sm:$0xff] }
 0x724   : > { %v6157_v8 = vpop.permute.xlu1 %6156  ;;  %v6162_v19 = vpop.permute.xlu0 %6161  ;;  %v4811_v46 = vsel %vm3726_vm12, %v11464_v31, %v6148_v22  ;;  %v6465_v31 = vpack.i.bf16 %v11867_v45, %v12019_v5  ;;  %v12037_v22 = vld [vmem:[#allocation2 + $0x1a8] sm:$0x3] }
 0x725   : > { %v6164_v61 = vunpack.i.h.bf16 %v6162_v19  ;;  %v6163_v13 = vunpack.i.l.bf16 %v6162_v19  ;;  %v6159_v12 = vunpack.i.h.bf16 %v6157_v8  ;;  %v6158_v37 = vunpack.i.l.bf16 %v6157_v8 }
 0x726   : > { %6446 = vrot.lane.b32.xlu1 %v6445_v54, %s6611_s26  ;;  %6451 = vrot.lane.b32.xlu0 %v6450_v51, %s6609_s9  ;;  %v6455_v54 = vpack.i.bf16 %v11879_v0, %v11999_v10  ;;  %v6460_v51 = vpack.i.bf16 %v11930_v26, %v11942_v42  ;;  %v4608_v45 = vrot.slane %v12037_v22, 1 }
 0x727   : > { %v4885_v36 = vsel %vm4776_vm15, %v4853_v1, %v6163_v13  ;;  %v4789_v50 = vsel %vm4776_vm15, %v4756_v60, %v6164_v61  ;;  %v4713_v61 = vsel %vm3726_vm12, %v6569_v15, %v6149_v43  ;;  %v4843_v13 = vsel %vm4743_vm14, %v4811_v46, %v6158_v37  ;;  %v6570_v46 = vld [vmem:[#allocation2 + $0x98] sm:$0xff] }
 0x728   : > { %v6167_v30 = vpop.permute.xlu1 %6166  ;;  %v6172_v19 = vpop.permute.xlu0 %6171  ;;  %5136 = vmatprep.mubr.f32.mxu1 %v4885_v36  ;;  %v4746_v14 = vsel %vm4743_vm14, %v4713_v61, %v6159_v12  ;;  %v6470_v43 = vpack.i.bf16 %v11916_v56, %v12022_v17  ;;  %v4607_v12 = vsel %vm428_vm0, %v4605_v58, %v4606_v11 }
 0x729   : > { %v6169_v8 = vunpack.i.h.bf16 %v6167_v30  ;;  %v6168_v7 = vunpack.i.l.bf16 %v6167_v30  ;;  %5137 = vmatmul.mubr.f32.gmra.mrb[12].mxu1 %v4789_v50  ;;  %v6174_v1 = vunpack.i.h.bf16 %v6172_v19  ;;  %v6173_v60 = vunpack.i.l.bf16 %v6172_v19 }
 0x72a   : > { %6456 = vrot.lane.b32.xlu1 %v6455_v54, %s6613_s15  ;;  %6461 = vrot.lane.b32.xlu0 %v6460_v51, %s6611_s26  ;;  %v4408_v19 = vrot.slane %v11982_v41, 2  ;;  %v6475_v54 = vpack.i.bf16 %v11967_v25, %v12002_v29 }
 0x72b   : > { %v4875_v27 = vsel %vm4776_vm15, %v4843_v13, %v6168_v7  ;;  %v4779_v32 = vsel %vm4776_vm15, %v4746_v14, %v6169_v8  ;;  %v6480_v7 = vpack.i.bf16 %v11940_v21, %v4607_v12  ;;  %v4822_v58 = vsel %vm3726_vm12, %v11500_v52, %v6173_v60 }
 0x72c   : > { %v6177_v36 = vpop.permute.xlu1 %6176  ;;  %v6182_v50 = vpop.permute.xlu0 %6181  ;;  %5086 = vmatprep.mubr.f32.mxu0 %v4875_v27  ;;  %v4724_v15 = vsel %vm3726_vm12, %v6570_v46, %v6174_v1  ;;  %v12051_v61 = vsel %vm605_vm1, %v4406_v39, %v4408_v19  ;;  %v4609_v12 = vsel %vm428_vm0, %v4606_v11, %v4608_v45 }
 0x72d   : > { %5087 = vmatmul.mubr.f32.gmra.mrb[36].mxu0 %v4779_v32  ;;  %v6184_v37 = vunpack.i.h.bf16 %v6182_v50  ;;  %v6183_v30 = vunpack.i.l.bf16 %v6182_v50  ;;  %v6179_v13 = vunpack.i.h.bf16 %v6177_v36  ;;  %v6178_v41 = vunpack.i.l.bf16 %v6177_v36 }
 0x72e   : > { %6466 = vrot.lane.b32.xlu1 %v6465_v31, %s6609_s9  ;;  %6471 = vrot.lane.b32.xlu0 %v6470_v43, %s6613_s15  ;;  %v6485_v36 = vpack.i.bf16 %v11958_v20, %v12051_v61  ;;  %v6490_v43 = vpack.i.bf16 %v11999_v10, %v12004_v47 }
 0x72f   : > { %v4854_v21 = vsel %vm4743_vm14, %v4822_v58, %v6183_v30  ;;  %v4757_v52 = vsel %vm4743_vm14, %v4724_v15, %v6184_v37  ;;  %v4812_v37 = vsel %vm3726_vm12, %v11512_v33, %v6178_v41  ;;  %v6571_v30 = vld [vmem:[#allocation2 + $0x20] sm:$0xff]  ;;  %v6495_v33 = vpack.i.bf16 %v11942_v42, %v4609_v12 }
 0x730   : > { %v6187_v51 = vpop.permute.xlu1 %6186  ;;  %v6192_v8 = vpop.permute.xlu0 %6191 }
 0x731   : > { %v6194_v14 = vunpack.i.h.bf16 %v6192_v8  ;;  %v6193_v27 = vunpack.i.l.bf16 %v6192_v8  ;;  %v6189_v32 = vunpack.i.h.bf16 %v6187_v51  ;;  %v6188_v50 = vunpack.i.l.bf16 %v6187_v51 }
 0x732   : > { %6476 = vrot.lane.b32.xlu1 %v6475_v54, %s6611_s26  ;;  %6481 = vrot.lane.b32.xlu0 %v6480_v7, %s6609_s9  ;;  %v4714_v51 = vsel %vm3726_vm12, %v6571_v30, %v6179_v13 }
 0x733   : > { %v4886_v60 = vsel %vm4776_vm15, %v4854_v21, %v6193_v27  ;;  %v4790_v1 = vsel %vm4776_vm15, %v4757_v52, %v6194_v14  ;;  %v4844_v8 = vsel %vm4743_vm14, %v4812_v37, %v6188_v50  ;;  %v4747_v7 = vsel %vm4743_vm14, %v4714_v51, %v6189_v32  ;;  %v6572_v21 = vld [vmem:[#allocation2 + $0xa8] sm:$0xff] }
 0x734   : > { %v6197_v39 = vpop.permute.xlu1 %6196  ;;  %v6202_v31 = vpop.permute.xlu0 %6201  ;;  %5141 = vmatprep.mubr.f32.mxu1 %v4886_v60 }
 0x735   : > { %v6199_v19 = vunpack.i.h.bf16 %v6197_v39  ;;  %v6198_v54 = vunpack.i.l.bf16 %v6197_v39  ;;  %5142 = vmatmul.mubr.f32.gmra.mrb[14].mxu1 %v4790_v1  ;;  %v6204_v45 = vunpack.i.h.bf16 %v6202_v31  ;;  %v6203_v46 = vunpack.i.l.bf16 %v6202_v31 }
 0x736   : > { %6486 = vrot.lane.b32.xlu1 %v6485_v36, %s6613_s15  ;;  %6491 = vrot.lane.b32.xlu0 %v6490_v43, %s6611_s26  ;;  %s5703_s15 = sshll.u32 %s13688_s22, 8 }
 0x737   : > { %v4876_v58 = vsel %vm4776_vm15, %v4844_v8, %v6198_v54  ;;  %v4780_v11 = vsel %vm4776_vm15, %v4747_v7, %v6199_v19  ;;  %v4823_v32 = vsel %vm3726_vm12, %v11543_v63, %v6203_v46  ;;  %v4725_v52 = vsel %vm3726_vm12, %v6572_v21, %v6204_v45  ;;  %v6573_v7 = vld [vmem:[#allocation2 + $0x30] sm:$0xff]  ;;  %s12315_s7 = scalar_lea.vmem %s12469_s6, %s5703_s15 }
 0x738   : > { %v6207_v15 = vpop.permute.xlu1 %6206  ;;  %v6212_v14 = vpop.permute.xlu0 %6211  ;;  %5091 = vmatprep.mubr.f32.mxu0 %v4876_v58 }
 0x739   : > { %5092 = vmatmul.mubr.f32.gmra.mrb[38].mxu0 %v4780_v11  ;;  %v6214_v13 = vunpack.i.h.bf16 %v6212_v14  ;;  %v6213_v41 = vunpack.i.l.bf16 %v6212_v14  ;;  %v6209_v60 = vunpack.i.h.bf16 %v6207_v15  ;;  %v6208_v1 = vunpack.i.l.bf16 %v6207_v15 }
 0x73a   : > { %6496 = vrot.lane.b32.xlu1 %v6495_v33, %s6609_s9 }
 0x73b   : > { %v4855_v42 = vsel %vm4743_vm14, %v4823_v32, %v6213_v41  ;;  %v4758_v12 = vsel %vm4743_vm14, %v4725_v52, %v6214_v13  ;;  %v4813_v8 = vsel %vm3726_vm12, %v11261_v55, %v6208_v1  ;;  %v4715_v58 = vsel %vm3726_vm12, %v6573_v7, %v6209_v60  ;;  %v6574_v52 = vld [vmem:[#allocation2 + $0xb0] sm:$0xff]  ;;  %v6575_v7 = vld [vmem:[#allocation2 + $0x38] sm:$0xff] }
 0x73c   : > { %v6217_v27 = vpop.permute.xlu1 %6216  ;;  %v6222_v50 = vpop.permute.xlu0 %6221 }
 0x73d   : > { %v6224_v39 = vunpack.i.h.bf16 %v6222_v50  ;;  %v6223_v31 = vunpack.i.l.bf16 %v6222_v50  ;;  %v6219_v36 = vunpack.i.h.bf16 %v6217_v27  ;;  %v6218_v43 = vunpack.i.l.bf16 %v6217_v27 }
 0x73f   : > { %v4887_v19 = vsel %vm4776_vm15, %v4855_v42, %v6223_v31  ;;  %v4791_v54 = vsel %vm4776_vm15, %v4758_v12, %v6224_v39  ;;  %v4845_v11 = vsel %vm4743_vm14, %v4813_v8, %v6218_v43  ;;  %v4748_v45 = vsel %vm4743_vm14, %v4715_v58, %v6219_v36 }
 0x740   : > { %v6227_v37 = vpop.permute.xlu1 %6226  ;;  %v6232_v30 = vpop.permute.xlu0 %6231  ;;  %5146 = vmatprep.mubr.f32.mxu1 %v4887_v19 }
 0x741   : > { %v6229_v63 = vunpack.i.h.bf16 %v6227_v37  ;;  %v6228_v51 = vunpack.i.l.bf16 %v6227_v37  ;;  %5147 = vmatmul.mubr.f32.gmra.mrb[16].mxu1 %v4791_v54  ;;  %v6234_v14 = vunpack.i.h.bf16 %v6232_v30  ;;  %v6233_v33 = vunpack.i.l.bf16 %v6232_v30 }
 0x743   : > { %v4877_v46 = vsel %vm4776_vm15, %v4845_v11, %v6228_v51  ;;  %v4781_v15 = vsel %vm4776_vm15, %v4748_v45, %v6229_v63  ;;  %v4824_v21 = vsel %vm3726_vm12, %v11575_v23, %v6233_v33  ;;  %v4726_v60 = vsel %vm3726_vm12, %v6574_v52, %v6234_v14 }
 0x744   : > { %v6237_v13 = vpop.permute.xlu1 %6236  ;;  %v6242_v41 = vpop.permute.xlu0 %6241  ;;  %5096 = vmatprep.mubr.f32.mxu0 %v4877_v46 }
 0x745   : > { %5097 = vmatmul.mubr.f32.gmra.mrb[40].mxu0 %v4781_v15  ;;  %v6244_v27 = vunpack.i.h.bf16 %v6242_v41  ;;  %v6243_v50 = vunpack.i.l.bf16 %v6242_v41  ;;  %v6239_v1 = vunpack.i.h.bf16 %v6237_v13  ;;  %v6238_v39 = vunpack.i.l.bf16 %v6237_v13 }
 0x747   : > { %v4856_v12 = vsel %vm4743_vm14, %v4824_v21, %v6243_v50  ;;  %v4759_v19 = vsel %vm4743_vm14, %v4726_v60, %v6244_v27  ;;  %v4814_v8 = vsel %vm3726_vm12, %v11280_v48, %v6238_v39  ;;  %v4716_v58 = vsel %vm3726_vm12, %v6575_v7, %v6239_v1  ;;  %v6576_v21 = vld [vmem:[#allocation2 + $0xc0] sm:$0xff] }
 0x748   : > { %v6247_v55 = vpop.permute.xlu1 %6246  ;;  %v6252_v32 = vpop.permute.xlu0 %6251 }
 0x749   : > { %v6254_v31 = vunpack.i.h.bf16 %v6252_v32  ;;  %v6253_v36 = vunpack.i.l.bf16 %v6252_v32  ;;  %v6249_v43 = vunpack.i.h.bf16 %v6247_v55  ;;  %v6248_v42 = vunpack.i.l.bf16 %v6247_v55 }
 0x74b   : > { %v4888_v54 = vsel %vm4776_vm15, %v4856_v12, %v6253_v36  ;;  %v4792_v37 = vsel %vm4776_vm15, %v4759_v19, %v6254_v31  ;;  %v4846_v46 = vsel %vm4743_vm14, %v4814_v8, %v6248_v42  ;;  %v4749_v15 = vsel %vm4743_vm14, %v4716_v58, %v6249_v43 }
 0x74c   : > { %v6257_v30 = vpop.permute.xlu1 %6256  ;;  %v6262_v63 = vpop.permute.xlu0 %6261  ;;  %5151 = vmatprep.mubr.f32.mxu1 %v4888_v54  ;;  %v6577_v54 = vld [vmem:[#allocation2 + $0xc8] sm:$0xff] }
 0x74d   : > { %v6259_v23 = vunpack.i.h.bf16 %v6257_v30  ;;  %v6258_v51 = vunpack.i.l.bf16 %v6257_v30  ;;  %5152 = vmatmul.mubr.f32.gmra.mrb[18].mxu1 %v4792_v37  ;;  %v6264_v11 = vunpack.i.h.bf16 %v6262_v63  ;;  %v6263_v45 = vunpack.i.l.bf16 %v6262_v63 }
 0x74f   : > { %v4878_v14 = vsel %vm4776_vm15, %v4846_v46, %v6258_v51  ;;  %v4782_v33 = vsel %vm4776_vm15, %v4749_v15, %v6259_v23  ;;  %v4825_v32 = vsel %vm3726_vm12, %v11602_v53, %v6263_v45  ;;  %v4727_v52 = vsel %vm3726_vm12, %v6576_v21, %v6264_v11 }
 0x750   : > { %v6267_v13 = vpop.permute.xlu1 %6266  ;;  %v6272_v41 = vpop.permute.xlu0 %6271  ;;  %5101 = vmatprep.mubr.f32.mxu0 %v4878_v14 }
 0x751   : > { %v6269_v27 = vunpack.i.h.bf16 %v6267_v13  ;;  %v6268_v50 = vunpack.i.l.bf16 %v6267_v13  ;;  %v6274_v55 = vunpack.i.h.bf16 %v6272_v41  ;;  %v6273_v48 = vunpack.i.l.bf16 %v6272_v41  ;;  %5102 = vmatmul.mubr.f32.gmra.mrb[42].mxu0 %v4782_v33  ;;  %v13638_v33 = vld [vmem:[#allocation275_spill] sm:$0xff]  ;;  %v6578_v41 = vld [vmem:[#allocation2 + $0xd8] sm:$0xff] }
 0x752   : > { %5849 = vmatprep.mubr.msk.f32.mxu0 %vm3726_vm12, %v11531_v62 }
 0x753   : > { %v4857_v60 = vsel %vm4743_vm14, %v4825_v32, %v6268_v50  ;;  %v4760_v1 = vsel %vm4743_vm14, %v4727_v52, %v6269_v27 }
 0x754   : > { %v6277_v39 = vpop.permute.xlu1 %6276  ;;  %v6282_v31 = vpop.permute.xlu0 %6281  ;;  %v4889_v36 = vsel %vm4776_vm15, %v4857_v60, %v6273_v48  ;;  %v4793_v43 = vsel %vm4776_vm15, %v4760_v1, %v6274_v55  ;;  %v13639_v1 = vld [vmem:[#allocation369_spill] sm:$0xff] }
 0x755   : > { %v6279_v42 = vunpack.i.h.bf16 %v6277_v39  ;;  %v6278_v12 = vunpack.i.l.bf16 %v6277_v39  ;;  %5156 = vmatprep.mubr.f32.mxu1 %v4889_v36  ;;  %5850 = vmatmul.mubr.msk.f32.vlgmr.msra.gmra.mrb[44].mxu0 %vm3726_vm12, %v11563_v4  ;;  %v6284_v62 = vunpack.i.h.bf16 %v6282_v31  ;;  %v6283_v53 = vunpack.i.l.bf16 %v6282_v31  ;;  %v13640_v36 = vld [vmem:[#allocation333_spill] sm:$0xff] }
 0x756   : > { %5157 = vmatmul.mubr.f32.gmra.mrb[20].mxu1 %v4793_v43  ;;  %5852 = vmatprep.mubr.msk.f32.mxu0 %vm3726_vm12, %v11258_v24 }
 0x757   : > { %v4826_v19 = vsel %vm3726_vm12, %v11634_v2, %v6278_v12  ;;  %v4728_v37 = vsel %vm3726_vm12, %v6577_v54, %v6279_v42  ;;  %v6579_v42 = vld [vmem:[#allocation2 + $0xe0] sm:$0xff] }
 0x758   : > { %v6287_v30 = vpop.permute.xlu1 %6286  ;;  %v6292_v63 = vpop.permute.xlu0 %6291  ;;  %v4858_v24 = vsel %vm4743_vm14, %v4826_v19, %v6283_v53  ;;  %v4761_v7 = vsel %vm4743_vm14, %v4728_v37, %v6284_v62  ;;  %v13641_v37 = vld [vmem:[#allocation277_spill] sm:$0xff] }
 0x759   : > { %v6289_v23 = vunpack.i.h.bf16 %v6287_v30  ;;  %v6288_v51 = vunpack.i.l.bf16 %v6287_v30  ;;  %5853 = vmatmul.mubr.msk.f32.gmra.mrb[46].mxu0 %vm3726_vm12, %v11308_v9  ;;  %v6294_v4 = vunpack.i.h.bf16 %v6292_v63  ;;  %v6293_v8 = vunpack.i.l.bf16 %v6292_v63 }
 0x75a   : > { %5855 = vmatprep.mubr.msk.f32.mxu0 %vm3726_vm12, %v11264_v44  ;;  %v13637_v44 = vld [vmem:[#allocation335_spill] sm:$0xff] }
 0x75b   : > { %v4890_v2 = vsel %vm4776_vm15, %v4858_v24, %v6288_v51  ;;  %v4794_v58 = vsel %vm4776_vm15, %v4761_v7, %v6289_v23  ;;  %v4827_v13 = vsel %vm3726_vm12, %v13638_v33, %v6293_v8  ;;  %v4729_v27 = vsel %vm3726_vm12, %v6578_v41, %v6294_v4  ;;  %v13642_v23 = vld [vmem:[#allocation368_spill] sm:$0xff] }
 0x75c   : > { %v6297_v11 = vpop.permute.xlu1 %6296  ;;  %v6302_v45 = vpop.permute.xlu0 %6301  ;;  %5161 = vmatprep.mubr.f32.mxu1 %v4890_v2 }
 0x75d   : > { %v6299_v46 = vunpack.i.h.bf16 %v6297_v11  ;;  %v6298_v15 = vunpack.i.l.bf16 %v6297_v11  ;;  %v6304_v14 = vunpack.i.h.bf16 %v6302_v45  ;;  %v6303_v9 = vunpack.i.l.bf16 %v6302_v45  ;;  %5162 = vmatmul.mubr.f32.gmra.mrb[22].mxu1 %v4794_v58  ;;  %5856 = vmatmul.mubr.msk.f32.gmra.mrb[48].mxu0 %vm3726_vm12, %v11289_v16 }
 0x75e   : > { %5858 = vmatprep.mubr.msk.f32.mxu0 %vm3726_vm12, %v13637_v44 }
 0x75f   : > { %v4859_v50 = vsel %vm4743_vm14, %v4827_v13, %v6298_v15  ;;  %v4762_v55 = vsel %vm4743_vm14, %v4729_v27, %v6299_v46  ;;  %v13643_v46 = vld [vmem:[#allocation337_spill] sm:$0xff]  ;;  %v13644_v15 = vld [vmem:[#allocation327_spill] sm:$0xff] }
 0x760   : > { %v6307_v48 = vpop.permute.xlu1 %6306  ;;  %v6312_v32 = vpop.permute.xlu0 %6311  ;;  %v4891_v21 = vsel %vm4776_vm15, %v4859_v50, %v6303_v9  ;;  %v4795_v52 = vsel %vm4776_vm15, %v4762_v55, %v6304_v14  ;;  %v6580_v9 = vld [vmem:[#allocation2 + $0xf0] sm:$0xff] }
 0x761   : > { %v6309_v16 = vunpack.i.h.bf16 %v6307_v48  ;;  %v6308_v60 = vunpack.i.l.bf16 %v6307_v48  ;;  %5166 = vmatprep.mubr.f32.mxu1 %v4891_v21  ;;  %5859 = vmatmul.mubr.msk.f32.gmra.mrb[50].mxu0 %vm3726_vm12, %v13639_v1  ;;  %v6314_v39 = vunpack.i.h.bf16 %v6312_v32  ;;  %v6313_v31 = vunpack.i.l.bf16 %v6312_v32  ;;  %v13645_v21 = vld [vmem:[#allocation339_spill] sm:$0xff]  ;;  %v6581_v1 = vld [vmem:[#allocation2 + $0xf8] sm:$0xff] }
 0x762   : > { %5167 = vmatmul.mubr.f32.gmra.mrb[24].mxu1 %v4795_v52  ;;  %5861 = vmatprep.mubr.msk.f32.mxu0 %vm3726_vm12, %v13640_v36 }
 0x763   : > { %v4828_v43 = vsel %vm3726_vm12, %v11677_v49, %v6308_v60  ;;  %v4730_v12 = vsel %vm3726_vm12, %v6579_v42, %v6309_v16  ;;  %v13646_v16 = vld [vmem:[#allocation371_spill] sm:$0xff] }
 0x764   : > { %v6317_v62 = vpop.permute.xlu1 %6316  ;;  %v6322_v53 = vpop.permute.xlu0 %6321  ;;  %v4860_v51 = vsel %vm4743_vm14, %v4828_v43, %v6313_v31  ;;  %v4763_v4 = vsel %vm4743_vm14, %v4730_v12, %v6314_v39  ;;  %v13647_v12 = vld [vmem:[#allocation373_spill] sm:$0xff] }
 0x765   : > { %v6319_v19 = vunpack.i.h.bf16 %v6317_v62  ;;  %v6318_v54 = vunpack.i.l.bf16 %v6317_v62  ;;  %5862 = vmatmul.mubr.msk.f32.gmra.mrb[52].mxu0 %vm3726_vm12, %v13641_v37  ;;  %v6324_v30 = vunpack.i.h.bf16 %v6322_v53  ;;  %v6323_v63 = vunpack.i.l.bf16 %v6322_v53 }
 0x766   : > { %5864 = vmatprep.mubr.msk.f32.mxu0 %vm3726_vm12, %v13642_v23 }
 0x767   : > { %v4892_v49 = vsel %vm4776_vm15, %v4860_v51, %v6318_v54  ;;  %v4796_v8 = vsel %vm4776_vm15, %v4763_v4, %v6319_v19  ;;  %v4829_v14 = vsel %vm3726_vm12, %v11691_v28, %v6323_v63  ;;  %v4731_v44 = vsel %vm3726_vm12, %v6580_v9, %v6324_v30  ;;  %v13648_v19 = vld [vmem:[#allocation325_spill] sm:$0xff] }
 0x768   : > { %v6327_v24 = vpop.permute.xlu1 %6326  ;;  %v6332_v7 = vpop.permute.xlu0 %6331  ;;  %5171 = vmatprep.mubr.f32.mxu1 %v4892_v49 }
 0x769   : > { %v6329_v2 = vunpack.i.h.bf16 %v6327_v24  ;;  %v6328_v58 = vunpack.i.l.bf16 %v6327_v24  ;;  %v6334_v11 = vunpack.i.h.bf16 %v6332_v7  ;;  %v6333_v45 = vunpack.i.l.bf16 %v6332_v7  ;;  %5172 = vmatmul.mubr.f32.gmra.mrb[26].mxu1 %v4796_v8  ;;  %5865 = vmatmul.mubr.msk.f32.gmra.mrb[54].mxu0 %vm3726_vm12, %v13643_v46  ;;  %v13649_v24 = vld [vmem:[#allocation341_spill] sm:$0xff]  ;;  %v13650_v7 = vld [vmem:[#allocation375_spill] sm:$0xff] }
 0x76a   : > { %5867 = vmatprep.mubr.msk.f32.mxu0 %vm3726_vm12, %v13644_v15 }
 0x76b   : > { %v4861_v33 = vsel %vm4743_vm14, %v4829_v14, %v6328_v58  ;;  %v4764_v13 = vsel %vm4743_vm14, %v4731_v44, %v6329_v2  ;;  %v6582_v58 = vld [vmem:[#allocation2 + $0x108] sm:$0xff] }
 0x76c   : > { %v6337_v41 = vpop.permute.xlu1 %6336  ;;  %v6342_v27 = vpop.permute.xlu0 %6341  ;;  %v4893_v50 = vsel %vm4776_vm15, %v4861_v33, %v6333_v45  ;;  %v4797_v55 = vsel %vm4776_vm15, %v4764_v13, %v6334_v11  ;;  %v13651_v13 = vld [vmem:[#allocation387_spill] sm:$0xff] }
 0x76d   : > { %v6339_v48 = vunpack.i.h.bf16 %v6337_v41  ;;  %v6338_v32 = vunpack.i.l.bf16 %v6337_v41  ;;  %5176 = vmatprep.mubr.f32.mxu1 %v4893_v50  ;;  %5868 = vmatmul.mubr.msk.f32.gmra.mrb[56].mxu0 %vm3726_vm12, %v13645_v21  ;;  %v6344_v28 = vunpack.i.h.bf16 %v6342_v27  ;;  %v6343_v52 = vunpack.i.l.bf16 %v6342_v27  ;;  %v13652_v50 = vld [vmem:[#allocation281_spill] sm:$0xff] }
 0x76e   : > { %5177 = vmatmul.mubr.f32.gmra.mrb[28].mxu1 %v4797_v55  ;;  %5870 = vmatprep.mubr.msk.f32.mxu0 %vm3726_vm12, %v13646_v16  ;;  %v13653_v55 = vld [vmem:[#allocation340_spill] sm:$0xff] }
 0x76f   : > { %v4830_v60 = vsel %vm3726_vm12, %v11716_v3, %v6338_v32  ;;  %v4732_v39 = vsel %vm3726_vm12, %v6581_v1, %v6339_v48  ;;  %v6583_v32 = vld [vmem:[#allocation2 + $0x110] sm:$0xff]  ;;  %v13654_v1 = vld [vmem:[#allocation374_spill] sm:$0xff] }
 0x770   : > { %v6347_v31 = vpop.permute.xlu1 %6346  ;;  %v6352_v36 = vpop.permute.xlu0 %6351  ;;  %v4862_v54 = vsel %vm4743_vm14, %v4830_v60, %v6343_v52  ;;  %v4765_v37 = vsel %vm4743_vm14, %v4732_v39, %v6344_v28 }
 0x771   : > { %v6349_v43 = vunpack.i.h.bf16 %v6347_v31  ;;  %v6348_v42 = vunpack.i.l.bf16 %v6347_v31  ;;  %5871 = vmatmul.mubr.msk.f32.gmra.mrb[58].mxu0 %vm3726_vm12, %v13647_v12  ;;  %v6354_v62 = vunpack.i.h.bf16 %v6352_v36  ;;  %v6353_v53 = vunpack.i.l.bf16 %v6352_v36 }
 0x772   : > { %5873 = vmatprep.mubr.msk.f32.mxu0 %vm3726_vm12, %v13648_v19 }
 0x773   : > { %v4894_v3 = vsel %vm4776_vm15, %v4862_v54, %v6348_v42  ;;  %v4798_v30 = vsel %vm4776_vm15, %v4765_v37, %v6349_v43  ;;  %v4831_v2 = vsel %vm3726_vm12, %v13650_v7, %v6353_v53  ;;  %v4733_v11 = vsel %vm3726_vm12, %v6582_v58, %v6354_v62  ;;  %v6585_v58 = vld [vmem:[#allocation2 + $0x128] sm:$0xff] }
 0x774   : > { %v6357_v63 = vpop.permute.xlu1 %6356  ;;  %v6362_v23 = vpop.permute.xlu0 %6361  ;;  %5181 = vmatprep.mubr.f32.mxu1 %v4894_v3 }
 0x775   : > { %v6359_v51 = vunpack.i.h.bf16 %v6357_v63  ;;  %v6358_v4 = vunpack.i.l.bf16 %v6357_v63  ;;  %v6364_v49 = vunpack.i.h.bf16 %v6362_v23  ;;  %v6363_v8 = vunpack.i.l.bf16 %v6362_v23  ;;  %5182 = vmatmul.mubr.f32.gmra.mrb[30].mxu1 %v4798_v30  ;;  %5874 = vmatmul.mubr.msk.f32.gmra.mrb[60].mxu0 %vm3726_vm12, %v11699_v57  ;;  %v6584_v30 = vld [vmem:[#allocation2 + $0x120] sm:$0xff] }
 0x776   : > { %5876 = vmatprep.mubr.msk.f32.mxu0 %vm3726_vm12, %v13649_v24 }
 0x777   : > { %v4863_v45 = vsel %vm4743_vm14, %v4831_v2, %v6358_v4  ;;  %v4766_v46 = vsel %vm4743_vm14, %v4733_v11, %v6359_v51 }
 0x778   : > { %v6367_v15 = vpop.permute.xlu1 %6366  ;;  %v6372_v14 = vpop.permute.xlu0 %6371  ;;  %v4895_v9 = vsel %vm4776_vm15, %v4863_v45, %v6363_v8  ;;  %v4799_v44 = vsel %vm4776_vm15, %v4766_v46, %v6364_v49  ;;  %v4706_v45 = vrot.slane %v12002_v29, 2  ;;  %v4707_v46 = vrot.slane %v12004_v47, 2 }
 0x779   : > { %v6369_v57 = vunpack.i.h.bf16 %v6367_v15  ;;  %v6368_v33 = vunpack.i.l.bf16 %v6367_v15  ;;  %5186 = vmatprep.mubr.f32.mxu1 %v4895_v9  ;;  %5877 = vmatmul.mubr.msk.f32.gmra.mrb[62].mxu0 %vm3726_vm12, %v13651_v13  ;;  %v6374_v41 = vunpack.i.h.bf16 %v6372_v14  ;;  %v6373_v27 = vunpack.i.l.bf16 %v6372_v14 }
 0x77a   : > { %5187 = vmatmul.mubr.f32.gmra.mrb[32].mxu1 %v4799_v44  ;;  %5879 = vmatprep.mubr.msk.f32.mxu0 %vm3726_vm12, %v13652_v50  ;;  %v4709_v44 = vrot.slane %v12037_v22, 2  ;;  %v4708_v13 = vsel %vm605_vm1, %v4706_v45, %v4707_v46 }
 0x77b   : > { %v4832_v48 = vsel %vm3726_vm12, %v13653_v55, %v6368_v33  ;;  %v4734_v21 = vsel %vm3726_vm12, %v6583_v32, %v6369_v57 }
 0x77c   : > { %v6377_v28 = vpop.permute.xlu1 %6376  ;;  %v6382_v52 = vpop.permute.xlu0 %6381  ;;  %v4864_v36 = vsel %vm4743_vm14, %v4832_v48, %v6373_v27  ;;  %v4767_v43 = vsel %vm4743_vm14, %v4734_v21, %v6374_v41  ;;  %v6586_v48 = vld [vmem:[#allocation2 + $0x138] sm:$0xff]  ;;  %v4710_v21 = vsel %vm605_vm1, %v4707_v46, %v4709_v44 }
 0x77d   : > { %v6379_v16 = vunpack.i.h.bf16 %v6377_v28  ;;  %v6378_v60 = vunpack.i.l.bf16 %v6377_v28  ;;  %5880 = vmatmul.mubr.msk.f32.gmra.mrb[64].mxu0 %vm3726_vm12, %v13654_v1  ;;  %v6384_v39 = vunpack.i.h.bf16 %v6382_v52  ;;  %v6383_v31 = vunpack.i.l.bf16 %v6382_v52  ;;  %v6589_v44 = vld [vmem:[#allocation2 + $0x158] sm:$0xff] }
 0x77e   : > { %5882 = vmatprep.mubr.msk.f32.mxu0 %vm3726_vm12, %v11826_v59 }
 0x77f   : > { %v4896_v42 = vsel %vm4776_vm15, %v4864_v36, %v6378_v60  ;;  %v4800_v12 = vsel %vm4776_vm15, %v4767_v43, %v6379_v16  ;;  %v4833_v59 = vsel %vm3726_vm12, %v11787_v18, %v6383_v31  ;;  %v4735_v63 = vsel %vm3726_vm12, %v6584_v30, %v6384_v39 }
 0x780   : > { %v6387_v62 = vpop.permute.xlu1 %6386  ;;  %v6392_v53 = vpop.permute.xlu0 %6391  ;;  %5191 = vmatprep.mubr.f32.mxu1 %v4896_v42  ;;  %v6587_v42 = vld [vmem:[#allocation2 + $0x140] sm:$0xff] }
 0x781   : > { %v6389_v19 = vunpack.i.h.bf16 %v6387_v62  ;;  %v6388_v54 = vunpack.i.l.bf16 %v6387_v62  ;;  %v6394_v37 = vunpack.i.h.bf16 %v6392_v53  ;;  %v6393_v3 = vunpack.i.l.bf16 %v6392_v53  ;;  %5192 = vmatmul.mubr.f32.gmra.mrb[34].mxu1 %v4800_v12  ;;  %5883 = vmatmul.mubr.msk.f32.gmra.mrb[66].mxu0 %vm3726_vm12, %v11865_v40 }
 0x782   : > { %5885 = vmatprep.mubr.msk.f32.mxu0 %vm3726_vm12, %v11884_v34 }
 0x783   : > { %v4865_v23 = vsel %vm4743_vm14, %v4833_v59, %v6388_v54  ;;  %v4768_v51 = vsel %vm4743_vm14, %v4735_v63, %v6389_v19 }
 0x784   : > { %v6397_v4 = vpop.permute.xlu1 %6396  ;;  %v6402_v49 = vpop.permute.xlu0 %6401  ;;  %v4897_v8 = vsel %vm4776_vm15, %v4865_v23, %v6393_v3  ;;  %v4801_v24 = vsel %vm4776_vm15, %v4768_v51, %v6394_v37 }
 0x785   : > { %v6399_v40 = vunpack.i.h.bf16 %v6397_v4  ;;  %v6398_v7 = vunpack.i.l.bf16 %v6397_v4  ;;  %5196 = vmatprep.mubr.f32.mxu1 %v4897_v8  ;;  %5886 = vmatmul.mubr.msk.f32.gmra.mrb[68].mxu0 %vm3726_vm12, %v11930_v26  ;;  %v6404_v18 = vunpack.i.h.bf16 %v6402_v49  ;;  %v6403_v34 = vunpack.i.l.bf16 %v6402_v49 }
 0x786   : > { %5197 = vmatmul.mubr.f32.gmra.mrb[36].mxu1 %v4801_v24  ;;  %5888 = vmatprep.mubr.msk.f32.mxu0 %vm3726_vm12, %v11967_v25 }
 0x787   : > { %v4834_v2 = vsel %vm3726_vm12, %v11823_v6, %v6398_v7  ;;  %v4736_v11 = vsel %vm3726_vm12, %v6585_v58, %v6399_v40  ;;  %v6588_v7 = vld [vmem:[#allocation2 + $0x150] sm:$0xff] }
 0x788   : > { %v6407_v15 = vpop.permute.xlu1 %6406  ;;  %v6412_v14 = vpop.permute.xlu0 %6411  ;;  %v4866_v6 = vsel %vm4743_vm14, %v4834_v2, %v6403_v34  ;;  %v4769_v29 = vsel %vm4743_vm14, %v4736_v11, %v6404_v18 }
 0x789   : > { %v6409_v9 = vunpack.i.h.bf16 %v6407_v15  ;;  %v6408_v26 = vunpack.i.l.bf16 %v6407_v15  ;;  %5889 = vmatmul.mubr.msk.f32.gmra.mrb[70].mxu0 %vm3726_vm12, %v11999_v10  ;;  %v6414_v25 = vunpack.i.h.bf16 %v6412_v14  ;;  %v6413_v57 = vunpack.i.l.bf16 %v6412_v14 }
 0x78a   : > { %5891 = vmatprep.mubr.msk.f32.mxu0 %vm3726_vm12, %v12022_v17 }
 0x78b   : > { %v4898_v47 = vsel %vm4776_vm15, %v4866_v6, %v6408_v26  ;;  %v4802_v33 = vsel %vm4776_vm15, %v4769_v29, %v6409_v9  ;;  %v4835_v17 = vsel %vm3726_vm12, %v11847_v35, %v6413_v57  ;;  %v4737_v32 = vsel %vm3726_vm12, %v6586_v48, %v6414_v25 }
 0x78c   : > { %v6417_v41 = vpop.permute.xlu1 %6416  ;;  %v6422_v27 = vpop.permute.xlu0 %6421  ;;  %5201 = vmatprep.mubr.f32.mxu1 %v4898_v47 }
 0x78d   : > { %v6419_v10 = vunpack.i.h.bf16 %v6417_v41  ;;  %v6418_v22 = vunpack.i.l.bf16 %v6417_v41  ;;  %v6424_v50 = vunpack.i.h.bf16 %v6422_v27  ;;  %v6423_v55 = vunpack.i.l.bf16 %v6422_v27  ;;  %5202 = vmatmul.mubr.f32.gmra.mrb[38].mxu1 %v4802_v33  ;;  %5892 = vmatmul.mubr.msk.f32.gmra.mrb[72].mxu0 %vm3726_vm12, %v12051_v61 }
 0x78e   : > { %5894 = vmatprep.mubr.msk.f32.mxu0 %vm3726_vm12, %v4708_v13 }
 0x78f   : > { %v4867_v28 = vsel %vm4743_vm14, %v4835_v17, %v6418_v22  ;;  %v4770_v52 = vsel %vm4743_vm14, %v4737_v32, %v6419_v10 }
 0x790   : > { %v6427_v16 = vpop.permute.xlu1 %6426  ;;  %v6432_v60 = vpop.permute.xlu0 %6431  ;;  %v4899_v1 = vsel %vm4776_vm15, %v4867_v28, %v6423_v55  ;;  %v4803_v61 = vsel %vm4776_vm15, %v4770_v52, %v6424_v50  ;;  %v6590_v28 = vld [vmem:[#allocation2 + $0x168] sm:$0xff] }
 0x791   : > { %v6429_v39 = vunpack.i.h.bf16 %v6427_v16  ;;  %v6428_v31 = vunpack.i.l.bf16 %v6427_v16  ;;  %5206 = vmatprep.mubr.f32.mxu1 %v4899_v1  ;;  %5895 = vmatmul.mubr.msk.f32.gmra.mrb[74].mxu0 %vm3726_vm12, %v4710_v21  ;;  %v6434_v35 = vunpack.i.h.bf16 %v6432_v60  ;;  %v6433_v36 = vunpack.i.l.bf16 %v6432_v60 }
 0x792   : > { %5207 = vmatmul.mubr.f32.gmra.mrb[40].mxu1 %v4803_v61 }
 0x793   : > { %v4836_v43 = vsel %vm3726_vm12, %v11879_v0, %v6428_v31  ;;  %v4738_v12 = vsel %vm3726_vm12, %v6587_v42, %v6429_v39 }
 0x794   : > { %v6437_v62 = vpop.permute.xlu1 %6436  ;;  %v6442_v53 = vpop.permute.xlu0 %6441  ;;  %v4868_v59 = vsel %vm4743_vm14, %v4836_v43, %v6433_v36  ;;  %v4771_v30 = vsel %vm4743_vm14, %v4738_v12, %v6434_v35  ;;  %v6591_v12 = vld [vmem:[#allocation2 + $0x170] sm:$0xff] }
 0x795   : > { %v6439_v19 = vunpack.i.h.bf16 %v6437_v62  ;;  %v6438_v54 = vunpack.i.l.bf16 %v6437_v62  ;;  %v6444_v37 = vunpack.i.h.bf16 %v6442_v53  ;;  %v6443_v3 = vunpack.i.l.bf16 %v6442_v53 }
 0x797   : > { %v4900_v63 = vsel %vm4776_vm15, %v4868_v59, %v6438_v54  ;;  %v4804_v23 = vsel %vm4776_vm15, %v4771_v30, %v6439_v19  ;;  %v4837_v40 = vsel %vm3726_vm12, %v11916_v56, %v6443_v3  ;;  %v4739_v18 = vsel %vm3726_vm12, %v6588_v7, %v6444_v37 }
 0x798   : > { %v6447_v51 = vpop.permute.xlu1 %6446  ;;  %v6452_v4 = vpop.permute.xlu0 %6451  ;;  %5211 = vmatprep.mubr.f32.mxu1 %v4900_v63 }
 0x799   : > { %v6449_v0 = vunpack.i.h.bf16 %v6447_v51  ;;  %v6448_v49 = vunpack.i.l.bf16 %v6447_v51  ;;  %v6454_v8 = vunpack.i.h.bf16 %v6452_v4  ;;  %v6453_v24 = vunpack.i.l.bf16 %v6452_v4  ;;  %5212 = vmatmul.mubr.f32.gmra.mrb[42].mxu1 %v4804_v23 }
 0x79b   : > { %v4869_v34 = vsel %vm4743_vm14, %v4837_v40, %v6448_v49  ;;  %v4772_v2 = vsel %vm4743_vm14, %v4739_v18, %v6449_v0 }
 0x79c   : > { %v6457_v58 = vpop.permute.xlu1 %6456  ;;  %v6462_v11 = vpop.permute.xlu0 %6461  ;;  %v4901_v45 = vsel %vm4776_vm15, %v4869_v34, %v6453_v24  ;;  %v4805_v46 = vsel %vm4776_vm15, %v4772_v2, %v6454_v8 }
 0x79d   : > { %v6459_v15 = vunpack.i.h.bf16 %v6457_v58  ;;  %v6458_v14 = vunpack.i.l.bf16 %v6457_v58  ;;  %5216 = vmatprep.mubr.f32.mxu1 %v4901_v45  ;;  %v6464_v9 = vunpack.i.h.bf16 %v6462_v11  ;;  %v6463_v26 = vunpack.i.l.bf16 %v6462_v11 }
 0x79e   : > { %5217 = vmatmul.mubr.f32.gmra.mrb[44].mxu1 %v4805_v46 }
 0x79f   : > { %v4838_v56 = vsel %vm3726_vm12, %v11958_v20, %v6458_v14  ;;  %v4740_v25 = vsel %vm3726_vm12, %v6589_v44, %v6459_v15 }
 0x7a0   : > { %v6467_v57 = vpop.permute.xlu1 %6466  ;;  %v6472_v6 = vpop.permute.xlu0 %6471  ;;  %v4870_v41 = vsel %vm4743_vm14, %v4838_v56, %v6463_v26  ;;  %v4773_v27 = vsel %vm4743_vm14, %v4740_v25, %v6464_v9 }
 0x7a1   : > { %v6469_v29 = vunpack.i.h.bf16 %v6467_v57  ;;  %v6468_v47 = vunpack.i.l.bf16 %v6467_v57  ;;  %v6474_v33 = vunpack.i.h.bf16 %v6472_v6  ;;  %v6473_v13 = vunpack.i.l.bf16 %v6472_v6 }
 0x7a3   : > { %v4902_v10 = vsel %vm4776_vm15, %v4870_v41, %v6468_v47  ;;  %v4806_v22 = vsel %vm4776_vm15, %v4773_v27, %v6469_v29  ;;  %v4839_v21 = vsel %vm3726_vm12, %v11980_v38, %v6473_v13  ;;  %v4741_v52 = vsel %vm3726_vm12, %v6590_v28, %v6474_v33  ;;  %v12305_v27 = vld [vmem:[%s12468_s5] ss:$0 sm:$0xff]  ;;  %v13655_v28 = vld [vmem:[#allocation4_spill] sm:$0xff] }
 0x7a4   : > { %v6477_v50 = vpop.permute.xlu1 %6476  ;;  %v6482_v55 = vpop.permute.xlu0 %6481  ;;  %5221 = vmatprep.mubr.f32.mxu1 %v4902_v10 }
 0x7a5   : > { %v6479_v20 = vunpack.i.h.bf16 %v6477_v50  ;;  %v6478_v17 = vunpack.i.l.bf16 %v6477_v50  ;;  %v6484_v48 = vunpack.i.h.bf16 %v6482_v55  ;;  %v6483_v32 = vunpack.i.l.bf16 %v6482_v55  ;;  %5222 = vmatmul.mubr.f32.gmra.mrb[46].mxu1 %v4806_v22 }
 0x7a7   : > { %v4871_v16 = vsel %vm4743_vm14, %v4839_v21, %v6478_v17  ;;  %v4774_v60 = vsel %vm4743_vm14, %v4741_v52, %v6479_v20 }
 0x7a8   : > { %v6487_v1 = vpop.permute.xlu1 %6486  ;;  %v6492_v61 = vpop.permute.xlu0 %6491  ;;  %v4903_v39 = vsel %vm4776_vm15, %v4871_v16, %v6483_v32  ;;  %v4807_v31 = vsel %vm4776_vm15, %v4774_v60, %v6484_v48  ;;  %v13656_v60 = vld [vmem:[#allocation3_spill] sm:$0xff] }
 0x7a9   : > { %v6489_v35 = vunpack.i.h.bf16 %v6487_v1  ;;  %v6488_v36 = vunpack.i.l.bf16 %v6487_v1  ;;  %5226 = vmatprep.mubr.f32.mxu1 %v4903_v39  ;;  %v6494_v43 = vunpack.i.h.bf16 %v6492_v61  ;;  %v6493_v42 = vunpack.i.l.bf16 %v6492_v61 }
 0x7aa   : > { %5227 = vmatmul.mubr.f32.gmra.mrb[48].mxu1 %v4807_v31 }
 0x7ab   : > { %v4840_v38 = vsel %vm3726_vm12, %v12019_v5, %v6488_v36  ;;  %v4742_v62 = vsel %vm3726_vm12, %v6591_v12, %v6489_v35  ;;  %v13658_v12 = vld [vmem:[#allocation6_spill] sm:$0xff] }
 0x7ac   : > { %v6497_v53 = vpop.permute.xlu1 %6496  ;;  %v4872_v37 = vsel %vm4743_vm14, %v4840_v38, %v6493_v42  ;;  %v4775_v3 = vsel %vm4743_vm14, %v4742_v62, %v6494_v43  ;;  %v13657_v43 = vld [vmem:[#allocation5_spill] sm:$0xff] }
 0x7ad   : > { %v6499_v19 = vunpack.i.h.bf16 %v6497_v53  ;;  %v6498_v54 = vunpack.i.l.bf16 %v6497_v53 }
 0x7af   : > { %v4904_v59 = vsel %vm4776_vm15, %v4872_v37, %v6498_v54  ;;  %v4808_v30 = vsel %vm4776_vm15, %v4775_v3, %v6499_v19 }
 0x7b0   : > { %5231 = vmatprep.mubr.f32.mxu1 %v4904_v59 }
 0x7b1   : > { %5232 = vmatmul.mubr.f32.gmra.mrb[50].mxu1 %v4808_v30 }
 0x7cc   : > { %v12282_v63 = vpop.f32.mrb[0].mxu1 }
 0x7cd   : > { %v5110_v23 = vpop.f32.mrb[1].mxu1 }
 0x7ce   : > { %v13659_v23 = vld [vmem:[#allocation7_spill] sm:$0xff] }
 0x7d2   : > { %v12284_v5 = vpop.f32.mrb[2].mxu1 }
 0x7d3   : > { %v5115_v51 = vpop.f32.mrb[3].mxu1  ;;  %v5114_v30 = vadd.f32 %v12305_v27, %v12284_v5 }
 0x7d8   : > { %v12286_v4 = vpop.f32.mrb[4].mxu1 }
 0x7d9   : > { %v5120_v0 = vpop.f32.mrb[5].mxu1 }
 0x7da   : > { %v5109_v0 = vadd.f32 %v12305_v27, %v12282_v63 }
 0x7de   : > { %v12288_v49 = vpop.f32.mrb[6].mxu1 }
 0x7df   : > { %v5125_v8 = vpop.f32.mrb[7].mxu1 }
 0x7e0   : > { %v13660_v8 = vld [vmem:[#allocation8_spill] sm:$0xff] }
 0x7e8   : > { %v5078_v24 = vpop.f32.mrb[32].mxu0  ;;  %v12290_v40 = vpop.f32.mrb[8].mxu1 }
 0x7e9   : > { %v5080_v7 = vpop.f32.mrb[33].mxu0  ;;  %v5130_v18 = vpop.f32.mrb[9].mxu1  ;;  %v5079_v22 = vadd.f32 %v12305_v27, %v5078_v24 }
 0x7f0   : > { %v12292_v34 = vpop.f32.mrb[10].mxu1 }
 0x7f1   : > { %v5135_v2 = vpop.f32.mrb[11].mxu1 }
 0x7f4   : > { %v5083_v58 = vpop.f32.mrb[34].mxu0 }
 0x7f5   : > { %v5085_v11 = vpop.f32.mrb[35].mxu0  ;;  %v5084_v10 = vadd.f32 %v12305_v27, %v5083_v58 }
 0x7fc   : > { %v12294_v45 = vpop.f32.mrb[12].mxu1 }
 0x7fd   : > { %v5140_v46 = vpop.f32.mrb[13].mxu1 }
 0x7fe   : > { %v5124_v46 = vadd.f32 %v12305_v27, %v12288_v49  ;;  %v5134_v49 = vadd.f32 %v12305_v27, %v12292_v34 }
 0x800   : > { %v5088_v15 = vpop.f32.mrb[36].mxu0 }
 0x801   : > { %v5090_v14 = vpop.f32.mrb[37].mxu0  ;;  %v5089_v16 = vadd.f32 %v12305_v27, %v5088_v15  ;;  %v13661_v15 = vld [vmem:[#allocation9_spill] sm:$0xff] }
 0x802   : > { %v5119_v14 = vadd.f32 %v12305_v27, %v12286_v4  ;;  %v5129_v4 = vadd.f32 %v12305_v27, %v12290_v40  ;;  %v5139_v40 = vadd.f32 %v12305_v27, %v12294_v45 }
 0x808   : > { %v12296_v9 = vpop.f32.mrb[14].mxu1 }
 0x809   : > { %v5145_v26 = vpop.f32.mrb[15].mxu1  ;;  %v5144_v34 = vadd.f32 %v12305_v27, %v12296_v9 }
 0x80a   : > { %v13662_v26 = vld [vmem:[#allocation10_spill] sm:$0xff] }
 0x80c   : > { %v5093_v56 = vpop.f32.mrb[38].mxu0 }
 0x80d   : > { %v5095_v44 = vpop.f32.mrb[39].mxu0  ;;  %v5094_v21 = vadd.f32 %v12305_v27, %v5093_v56 }
 0x814   : > { %v12298_v25 = vpop.f32.mrb[16].mxu1 }
 0x815   : > { %v5150_v57 = vpop.f32.mrb[17].mxu1  ;;  %v5149_v45 = vadd.f32 %v12305_v27, %v12298_v25 }
 0x818   : > { %v5098_v6 = vpop.f32.mrb[40].mxu0 }
 0x819   : > { %v5100_v29 = vpop.f32.mrb[41].mxu0  ;;  %v5099_v38 = vadd.f32 %v12305_v27, %v5098_v6 }
 0x820   : > { %v12300_v47 = vpop.f32.mrb[18].mxu1 }
 0x821   : > { %v5155_v33 = vpop.f32.mrb[19].mxu1  ;;  %v5154_v9 = vadd.f32 %v12305_v27, %v12300_v47 }
 0x822   : > { %v13663_v33 = vld [vmem:[#allocation11_spill] sm:$0xff] }
 0x824   : > { %v5103_v13 = vpop.f32.mrb[42].mxu0 }
 0x825   : > { %v5105_v41 = vpop.f32.mrb[43].mxu0  ;;  %v5104_v36 = vadd.f32 %v12305_v27, %v5103_v13 }
 0x826   : > { %v13664_v41 = vld [vmem:[#allocation12_spill] sm:$0xff] }
 0x828   : > { %v5851_v50 = vpop.f32.mrb[44].mxu0 }
 0x829   : > { %v5309_v55 = vadd.f32 %v5851_v50, %v5084_v10  ;;  %v12310_v20 = vpop.f32.mrb[20].mxu1  ;;  %v5303_v17 = vpop.f32.mrb[45].mxu0 }
 0x82a   : > { %v5304_v48 = vadd.f32 %v5303_v17, %v5079_v22  ;;  %v5160_v32 = vpop.f32.mrb[21].mxu1  ;;  %v5159_v25 = vadd.f32 %v12305_v27, %v12310_v20 }
 0x82b   : > { %v5495_v52 = vadd.f32 %v5309_v55, %v13655_v28 }
 0x82c   : > { %v5494_v1 = vadd.f32 %v5304_v48, %v13656_v60  ;;  %v5854_v61 = vpop.f32.mrb[46].mxu0 }
 0x82d   : > { %5527 = vst.msk [vmem:[%s12315_s7 + $0x8] sm:$0xff] %vm1384_vm2, %v5495_v52  ;;  %v5319_v39 = vadd.f32 %v5854_v61, %v5094_v21  ;;  %v5313_v31 = vpop.f32.mrb[47].mxu0  ;;  %v13665_v21 = vld [vmem:[#allocation13_spill] sm:$0xff]  ;;  %v13666_v52 = vld [vmem:[#allocation14_spill] sm:$0xff] }
 0x82e   : > { %5526 = vst.msk [vmem:[%s12315_s7] sm:$0xff] %vm1384_vm2, %v5494_v1  ;;  %v5314_v35 = vadd.f32 %v5313_v31, %v5089_v16 }
 0x82f   : > { %v5497_v42 = vadd.f32 %v5319_v39, %v13657_v43 }
 0x830   : > { %v5496_v62 = vadd.f32 %v5314_v35, %v13658_v12  ;;  %v12329_v53 = vpop.f32.mrb[22].mxu1  ;;  %v5857_v19 = vpop.f32.mrb[48].mxu0 }
 0x831   : > { %5529 = vst.msk [vmem:[%s12315_s7 + $0x18] sm:$0xff] %vm1384_vm2, %v5497_v42  ;;  %v5329_v54 = vadd.f32 %v5857_v19, %v5104_v36  ;;  %v5165_v37 = vpop.f32.mrb[23].mxu1  ;;  %v5323_v3 = vpop.f32.mrb[49].mxu0  ;;  %v13667_v36 = vld [vmem:[#allocation15_spill] sm:$0xff]  ;;  %v13668_v42 = vld [vmem:[#allocation16_spill] sm:$0xff]  ;;  %v5164_v47 = vadd.f32 %v12305_v27, %v12329_v53 }
 0x832   : > { %5528 = vst.msk [vmem:[%s12315_s7 + $0x10] sm:$0xff] %vm1384_vm2, %v5496_v62  ;;  %v5324_v59 = vadd.f32 %v5323_v3, %v5099_v38  ;;  %v13669_v37 = vld [vmem:[#allocation17_spill] sm:$0xff] }
 0x833   : > { %v5499_v51 = vadd.f32 %v5329_v54, %v13659_v23 }
 0x834   : > { %v5498_v24 = vadd.f32 %v5324_v59, %v13660_v8  ;;  %v5860_v7 = vpop.f32.mrb[50].mxu0  ;;  %v13670_v59 = vld [vmem:[#allocation18_spill] sm:$0xff] }
 0x835   : > { %5531 = vst.msk [vmem:[%s12315_s7 + $0x28] sm:$0xff] %vm1384_vm2, %v5499_v51  ;;  %v5339_v18 = vadd.f32 %v5860_v7, %v5114_v30  ;;  %v12343_v2 = vpop.f32.mrb[24].mxu1  ;;  %v5333_v58 = vpop.f32.mrb[51].mxu0 }
 0x836   : > { %5530 = vst.msk [vmem:[%s12315_s7 + $0x20] sm:$0xff] %vm1384_vm2, %v5498_v24  ;;  %v5334_v11 = vadd.f32 %v5333_v58, %v5109_v0  ;;  %v5170_v5 = vpop.f32.mrb[25].mxu1  ;;  %v5169_v20 = vadd.f32 %v12305_v27, %v12343_v2 }
 0x837   : > { %v5501_v63 = vadd.f32 %v5339_v18, %v13661_v15  ;;  %v13671_v18 = vld [vmem:[#allocation19_spill] sm:$0xff] }
 0x838   : > { %v5500_v56 = vadd.f32 %v5334_v11, %v13662_v26  ;;  %v5863_v44 = vpop.f32.mrb[52].mxu0  ;;  %v13672_v11 = vld [vmem:[#allocation20_spill] sm:$0xff] }
 0x839   : > { %5533 = vst.msk [vmem:[%s12315_s7 + $0x38] sm:$0xff] %vm1384_vm2, %v5501_v63  ;;  %v5349_v57 = vadd.f32 %v5863_v44, %v5124_v46  ;;  %v5343_v6 = vpop.f32.mrb[53].mxu0 }
 0x83a   : > { %5532 = vst.msk [vmem:[%s12315_s7 + $0x30] sm:$0xff] %vm1384_vm2, %v5500_v56  ;;  %v5344_v29 = vadd.f32 %v5343_v6, %v5119_v14 }
 0x83b   : > { %v5503_v13 = vadd.f32 %v5349_v57, %v13663_v33  ;;  %v13673_v57 = vld [vmem:[#allocation21_spill] sm:$0xff] }
 0x83c   : > { %v5502_v10 = vadd.f32 %v5344_v29, %v13664_v41  ;;  %v5173_v22 = vpop.f32.mrb[26].mxu1  ;;  %v5866_v50 = vpop.f32.mrb[54].mxu0  ;;  %v13674_v29 = vld [vmem:[#allocation22_spill] sm:$0xff] }
 0x83d   : > { %5535 = vst.msk [vmem:[%s12315_s7 + $0x48] sm:$0xff] %vm1384_vm2, %v5503_v13  ;;  %v5359_v55 = vadd.f32 %v5866_v50, %v5134_v49  ;;  %v5175_v17 = vpop.f32.mrb[27].mxu1  ;;  %v5353_v48 = vpop.f32.mrb[55].mxu0  ;;  %v5174_v53 = vadd.f32 %v12305_v27, %v5173_v22 }
 0x83e   : > { %5534 = vst.msk [vmem:[%s12315_s7 + $0x40] sm:$0xff] %vm1384_vm2, %v5502_v10  ;;  %v5354_v32 = vadd.f32 %v5353_v48, %v5129_v4  ;;  %v13675_v10 = vld [vmem:[#allocation23_spill] sm:$0xff] }
 0x83f   : > { %v5505_v28 = vadd.f32 %v5359_v55, %v13665_v21  ;;  %v13676_v55 = vld [vmem:[#allocation24_spill] sm:$0xff] }
 0x840   : > { %v5504_v16 = vadd.f32 %v5354_v32, %v13666_v52  ;;  %v5869_v60 = vpop.f32.mrb[56].mxu0 }
 0x841   : > { %5537 = vst.msk [vmem:[%s12315_s7 + $0x58] sm:$0xff] %vm1384_vm2, %v5505_v28  ;;  %v5369_v1 = vadd.f32 %v5869_v60, %v5144_v34  ;;  %v5178_v61 = vpop.f32.mrb[28].mxu1  ;;  %v5363_v39 = vpop.f32.mrb[57].mxu0 }
 0x842   : > { %5536 = vst.msk [vmem:[%s12315_s7 + $0x50] sm:$0xff] %vm1384_vm2, %v5504_v16  ;;  %v5364_v31 = vadd.f32 %v5363_v39, %v5139_v40  ;;  %v5180_v35 = vpop.f32.mrb[29].mxu1  ;;  %v5179_v2 = vadd.f32 %v12305_v27, %v5178_v61  ;;  %v13677_v16 = vld [vmem:[#allocation26_spill] sm:$0xff]  ;;  %v13678_v61 = vld [vmem:[#allocation25_spill] sm:$0xff] }
 0x843   : > { %v5507_v43 = vadd.f32 %v5369_v1, %v13667_v36 }
 0x844   : > { %v5506_v38 = vadd.f32 %v5364_v31, %v13668_v42  ;;  %v5872_v12 = vpop.f32.mrb[58].mxu0 }
 0x845   : > { %5539 = vst.msk [vmem:[%s12315_s7 + $0x68] sm:$0xff] %vm1384_vm2, %v5507_v43  ;;  %v5379_v62 = vadd.f32 %v5872_v12, %v5154_v9  ;;  %v5373_v19 = vpop.f32.mrb[59].mxu0 }
 0x846   : > { %5538 = vst.msk [vmem:[%s12315_s7 + $0x60] sm:$0xff] %vm1384_vm2, %v5506_v38  ;;  %v5374_v54 = vadd.f32 %v5373_v19, %v5149_v45  ;;  %v13679_v38 = vld [vmem:[#allocation28_spill] sm:$0xff] }
 0x847   : > { %v5509_v3 = vadd.f32 %v5379_v62, %v13669_v37 }
 0x848   : > { %v5508_v30 = vadd.f32 %v5374_v54, %v13670_v59  ;;  %v5183_v23 = vpop.f32.mrb[30].mxu1  ;;  %v5875_v51 = vpop.f32.mrb[60].mxu0  ;;  %v13680_v59 = vld [vmem:[#allocation27_spill] sm:$0xff] }
 0x849   : > { %5541 = vst.msk [vmem:[%s12315_s7 + $0x78] sm:$0xff] %vm1384_vm2, %v5509_v3  ;;  %v5389_v0 = vadd.f32 %v5875_v51, %v5164_v47  ;;  %v5185_v8 = vpop.f32.mrb[31].mxu1  ;;  %v5383_v24 = vpop.f32.mrb[61].mxu0  ;;  %v5184_v44 = vadd.f32 %v12305_v27, %v5183_v23 }
 0x84a   : > { %5540 = vst.msk [vmem:[%s12315_s7 + $0x70] sm:$0xff] %vm1384_vm2, %v5508_v30  ;;  %v5384_v7 = vadd.f32 %v5383_v24, %v5159_v25 }
 0x84b   : > { %v5511_v58 = vadd.f32 %v5389_v0, %v13671_v18 }
 0x84c   : > { %v5510_v5 = vadd.f32 %v5384_v7, %v13672_v11  ;;  %v5878_v46 = vpop.f32.mrb[62].mxu0  ;;  %v13681_v7 = vld [vmem:[#allocation30_spill] sm:$0xff] }
 0x84d   : > { %5543 = vst.msk [vmem:[%s12315_s7 + $0x88] sm:$0xff] %vm1384_vm2, %v5511_v58  ;;  %v5399_v15 = vadd.f32 %v5878_v46, %v5174_v53  ;;  %v5188_v63 = vpop.f32.mrb[32].mxu1  ;;  %v5393_v14 = vpop.f32.mrb[63].mxu0 }
 0x84e   : > { %5542 = vst.msk [vmem:[%s12315_s7 + $0x80] sm:$0xff] %vm1384_vm2, %v5510_v5  ;;  %v5394_v26 = vadd.f32 %v5393_v14, %v5169_v20  ;;  %v5190_v56 = vpop.f32.mrb[33].mxu1  ;;  %v5189_v50 = vadd.f32 %v12305_v27, %v5188_v63  ;;  %v13682_v5 = vld [vmem:[#allocation29_spill] sm:$0xff] }
 0x84f   : > { %v5513_v6 = vadd.f32 %v5399_v15, %v13673_v57  ;;  %v13683_v56 = vld [vmem:[#allocation32_spill] sm:$0xff] }
 0x850   : > { %v5512_v49 = vadd.f32 %v5394_v26, %v13674_v29  ;;  %v5881_v33 = vpop.f32.mrb[64].mxu0 }
 0x851   : > { %5545 = vst.msk [vmem:[%s12315_s7 + $0x98] sm:$0xff] %vm1384_vm2, %v5513_v6  ;;  %v5409_v13 = vadd.f32 %v5881_v33, %v5184_v44  ;;  %v5403_v4 = vpop.f32.mrb[65].mxu0 }
 0x852   : > { %5544 = vst.msk [vmem:[%s12315_s7 + $0x90] sm:$0xff] %vm1384_vm2, %v5512_v49  ;;  %v5404_v41 = vadd.f32 %v5403_v4, %v5179_v2  ;;  %v13684_v49 = vld [vmem:[#allocation31_spill] sm:$0xff] }
 0x853   : > { %v5515_v22 = vadd.f32 %v5409_v13, %v13675_v10 }
 0x854   : > { %v5514_v17 = vadd.f32 %v5404_v41, %v13676_v55  ;;  %v5193_v48 = vpop.f32.mrb[34].mxu1  ;;  %v5884_v32 = vpop.f32.mrb[66].mxu0 }
 0x855   : > { %5547 = vst.msk [vmem:[%s12315_s7 + $0xa8] sm:$0xff] %vm1384_vm2, %v5515_v22  ;;  %v5194_v34 = vadd.f32 %v12305_v27, %v5193_v48  ;;  %v5195_v21 = vpop.f32.mrb[35].mxu1  ;;  %v5413_v28 = vpop.f32.mrb[67].mxu0  ;;  %v13685_v22 = vld [vmem:[#allocation118_spill] sm:$0xff] }
 0x856   : > { %5546 = vst.msk [vmem:[%s12315_s7 + $0xa0] sm:$0xff] %vm1384_vm2, %v5514_v17  ;;  %v5414_v40 = vadd.f32 %v5413_v28, %v5189_v50 }
 0x857   : > { %v5419_v52 = vadd.f32 %v5884_v32, %v5194_v34  ;;  %v13686_v34 = vld [vmem:[#allocation116_spill] sm:$0xff] }
 0x858   : > { %v5516_v60 = vadd.f32 %v5414_v40, %v13677_v16  ;;  %v5887_v1 = vpop.f32.mrb[68].mxu0 }
 0x859   : > { %v5517_v39 = vadd.f32 %v5419_v52, %v13678_v61  ;;  %v5198_v31 = vpop.f32.mrb[36].mxu1  ;;  %v5423_v35 = vpop.f32.mrb[69].mxu0 }
 0x85a   : > { %5548 = vst.msk [vmem:[%s12315_s7 + $0xb0] sm:$0xff] %vm1384_vm2, %v5516_v60  ;;  %v5199_v9 = vadd.f32 %v12305_v27, %v5198_v31  ;;  %v5200_v36 = vpop.f32.mrb[37].mxu1 }
 0x85b   : > { %5549 = vst.msk [vmem:[%s12315_s7 + $0xb8] sm:$0xff] %vm1384_vm2, %v5517_v39 }
 0x85c   : > { %v5424_v43 = vadd.f32 %v5423_v35, %v5199_v9  ;;  %v5890_v45 = vpop.f32.mrb[70].mxu0 }
 0x85d   : > { %v5433_v42 = vpop.f32.mrb[71].mxu0 }
 0x85e   : > { %v5518_v12 = vadd.f32 %v5424_v43, %v13679_v38 }
 0x860   : > { %5550 = vst.msk [vmem:[%s12315_s7 + $0xc0] sm:$0xff] %vm1384_vm2, %v5518_v12  ;;  %v5203_v62 = vpop.f32.mrb[38].mxu1  ;;  %v5893_v19 = vpop.f32.mrb[72].mxu0 }
 0x861   : > { %v5204_v54 = vadd.f32 %v12305_v27, %v5203_v62  ;;  %v5205_v47 = vpop.f32.mrb[39].mxu1  ;;  %v5443_v37 = vpop.f32.mrb[73].mxu0 }
 0x863   : > { %v5429_v3 = vadd.f32 %v5887_v1, %v5204_v54 }
 0x864   : > { %v5896_v25 = vpop.f32.mrb[74].mxu0 }
 0x865   : > { %v5519_v30 = vadd.f32 %v5429_v3, %v13680_v59  ;;  %v5208_v23 = vpop.f32.mrb[40].mxu1  ;;  %v5453_v51 = vpop.f32.mrb[75].mxu0 }
 0x866   : > { %v5209_v0 = vadd.f32 %v12305_v27, %v5208_v23  ;;  %v5210_v8 = vpop.f32.mrb[41].mxu1 }
 0x867   : > { %5551 = vst.msk [vmem:[%s12315_s7 + $0xc8] sm:$0xff] %vm1384_vm2, %v5519_v30 }
 0x868   : > { %v5434_v24 = vadd.f32 %v5433_v42, %v5209_v0 }
 0x86a   : > { %v5520_v53 = vadd.f32 %v5434_v24, %v13681_v7 }
 0x86c   : > { %5552 = vst.msk [vmem:[%s12315_s7 + $0xd0] sm:$0xff] %vm1384_vm2, %v5520_v53  ;;  %v5213_v18 = vpop.f32.mrb[42].mxu1 }
 0x86d   : > { %v5214_v58 = vadd.f32 %v12305_v27, %v5213_v18  ;;  %v5215_v20 = vpop.f32.mrb[43].mxu1 }
 0x86f   : > { %v5439_v11 = vadd.f32 %v5890_v45, %v5214_v58 }
 0x871   : > { %v5521_v46 = vadd.f32 %v5439_v11, %v13682_v5  ;;  %v5218_v15 = vpop.f32.mrb[44].mxu1 }
 0x872   : > { %v5219_v63 = vadd.f32 %v12305_v27, %v5218_v15  ;;  %v5220_v14 = vpop.f32.mrb[45].mxu1 }
 0x873   : > { %5553 = vst.msk [vmem:[%s12315_s7 + $0xd8] sm:$0xff] %vm1384_vm2, %v5521_v46 }
 0x874   : > { %v5444_v26 = vadd.f32 %v5443_v37, %v5219_v63 }
 0x876   : > { %v5522_v44 = vadd.f32 %v5444_v26, %v13683_v56 }
 0x878   : > { %5554 = vst.msk [vmem:[%s12315_s7 + $0xe0] sm:$0xff] %vm1384_vm2, %v5522_v44  ;;  %v5223_v57 = vpop.f32.mrb[46].mxu1 }
 0x879   : > { %v5224_v6 = vadd.f32 %v12305_v27, %v5223_v57  ;;  %v5225_v2 = vpop.f32.mrb[47].mxu1 }
 0x87b   : > { %v5449_v29 = vadd.f32 %v5893_v19, %v5224_v6 }
 0x87d   : > { %v5523_v33 = vadd.f32 %v5449_v29, %v13684_v49  ;;  %v5228_v13 = vpop.f32.mrb[48].mxu1 }
 0x87e   : > { %v5229_v4 = vadd.f32 %v12305_v27, %v5228_v13  ;;  %v5230_v41 = vpop.f32.mrb[49].mxu1 }
 0x87f   : > { %5555 = vst.msk [vmem:[%s12315_s7 + $0xe8] sm:$0xff] %vm1384_vm2, %v5523_v33 }
 0x880   : > { %v5454_v10 = vadd.f32 %v5453_v51, %v5229_v4 }
 0x882   : > { %v5524_v50 = vadd.f32 %v5454_v10, %v13685_v22 }
 0x884   : > { %5556 = vst.msk [vmem:[%s12315_s7 + $0xf0] sm:$0xff] %vm1384_vm2, %v5524_v50  ;;  %v5233_v55 = vpop.f32.mrb[50].mxu1 }
 0x885   : > { %v5234_v17 = vadd.f32 %v12305_v27, %v5233_v55  ;;  %v5235_v48 = vpop.f32.mrb[51].mxu1 }
 0x887   : > { %v5459_v32 = vadd.f32 %v5896_v25, %v5234_v17 }
 0x889   : > { %v5525_v21 = vadd.f32 %v5459_v32, %v13686_v34 }
 0x88b   : > { %5557 = vst.msk [vmem:[%s12315_s7 + $0xf8] sm:$0xff] %vm1384_vm2, %v5525_v21 }
 0x88c PF: > { %s16_s21 = sadd.s32 1, %s6598_s21  }
 0x88d   : > { %p13_p4 = scmp.ge.s32.totalorder %s16_s21, 4  }
 0x88f   :  { %15 = sbr.rel (!%p13_p4) target bundleno = 1 (0x1), region = 78 }

</bundles_post_ra>
